<compile_context>
chip_gen: v5e
topology: v5e:2x2
jax: 0.10.0
libtpu: 0.0.40
codegen_flags: <defaults>
</compile_context>

<pallas_src>
import math
from functools import partial

import jax
import jax.numpy as jnp
from jax.experimental import pallas as pl
from jax.experimental.pallas import tpu as pltpu

F32 = jnp.float32
LEAKY_SLOPE = 0.01   # nn.LeakyReLU / VNLeakyReLU default
VN_EPS = 1e-6
LN_EPS = 1e-5


# ----------------------------- in-kernel helpers ---------------------------- #

def _leaky_relu(x, slope=LEAKY_SLOPE):
    return jnp.where(x >= 0.0, x, slope * x)


def _sigmoid(x):
    # clip avoids exp overflow; reciprocal lands on the EUP slot
    z = jnp.exp(-jnp.clip(x, -30.0, 30.0))
    return pl.reciprocal(1.0 + z, approx=True)


def _vn_dot(vec3, w):
    """Channel-dim linear on a component-major (3, M, Fin) vector feature.
    The 3 spatial components are stacked along sublanes -> ONE MXU matmul."""
    three, m, fin = vec3.shape
    out = jnp.dot(vec3.reshape(three * m, fin), w, preferred_element_type=F32)
    return out.reshape(three, m, -1)


def _gv_linear(wv1, wv2, ws, wg, bg, sca, vec3):
    """GVLinear: (M,in_s) scalar + (3,M,in_v) vector -> (M,out_s), (3,M,out_v).
    ws is the fused [ws_s; ws_n] scalar-path weight (scalar rows first)."""
    inter = _vn_dot(vec3, wv1)                                   # (3, M, dh)
    norm = jnp.sqrt(jnp.sum(inter * inter, axis=0))              # (M, dh)
    out_sca = jnp.dot(jnp.concatenate([sca, norm], axis=-1), ws,
                      preferred_element_type=F32)                # (M, out_s)
    out_vec = _vn_dot(inter, wv2)                                # (3, M, out_v)
    gate = _sigmoid(jnp.dot(out_sca, wg, preferred_element_type=F32) + bg)
    return out_sca, out_vec * gate[None]


def _vn_leaky_relu(w_dir, vec3, slope=LEAKY_SLOPE, eps=VN_EPS):
    d = _vn_dot(vec3, w_dir)                                     # (3, M, F)
    dotprod = jnp.sum(vec3 * d, axis=0)                          # (M, F)
    d_sq = jnp.sum(d * d, axis=0)                                # (M, F)
    mask = (dotprod >= 0.0).astype(F32)[None]
    coef = (dotprod * pl.reciprocal(d_sq + eps, approx=True))[None]
    base = mask * vec3 + (1.0 - mask) * (vec3 - coef * d)
    return slope * vec3 + (1.0 - slope) * base


# ------------------------------- fused kernel ------------------------------- #

def _block_kernel(x_sca_ref, x_vec_ref, ev_ref, ann_ref, col_ref, row_ref, *rest,
                  meta, n_slabs, hs, hv, cutoff, num_gaussians):
    slabs = rest[:n_slabs]
    out_ref = rest[n_slabs]
    node_slab = rest[n_slabs + 1]          # (Np, Hs+3Hv) gather source (scratch)
    aggr = rest[n_slabs + 2]               # (Np, Hs+3Hv) scatter accumulator

    def getp(name):
        pos, ro, nr = meta[name]
        return slabs[pos][ro:ro + nr, :]

    def gvlin(tag, sca, vec3):
        return _gv_linear(getp(tag + '_wv1'), getp(tag + '_wv2'), getp(tag + '_ws'),
                          getp(tag + '_wg'), getp(tag + '_bg'), sca, vec3)

    step = pl.program_id(0)
    n_nodes = x_sca_ref.shape[0]
    te = ev_ref.shape[0]

    # -- step 0: node-side GVLinear once (gather source) + zero the accumulator --
    @pl.when(step == 0)
    def _():
        n_sca, n_vec = gvlin('node', x_sca_ref[...], x_vec_ref[...])
        node_slab[...] = jnp.concatenate([n_sca, n_vec[0], n_vec[1], n_vec[2]],
                                         axis=-1)
        aggr[...] = jnp.zeros(aggr.shape, F32)

    # ---------------- per-edge-tile featurization (in-kernel) ---------------- #
    ev = ev_ref[...]                                             # (TE, 3)
    dist = jnp.sqrt(jnp.sum(ev * ev, axis=-1, keepdims=True))    # (TE, 1)
    inv_d = 1.0 / (dist + 1e-7)

    gstep = cutoff / max(num_gaussians - 1, 1)
    coeff = -0.5 / (gstep * gstep)
    offs = jax.lax.broadcasted_iota(jnp.int32, (1, num_gaussians), 1).astype(F32) * gstep
    diff = dist - offs
    edge_sca = jnp.exp(coeff * diff * diff)                      # (TE, C)

    w_exp = getp('expand_w')                                     # (1, C)
    edge_vec = jnp.concatenate(
        [(ev[:, i:i + 1] * inv_d * w_exp)[None] for i in range(3)], axis=0)  # (3,TE,C)

    # ------ gather / scatter one-hots: built once per tile, reused for slabs ---- #
    onehot_col = (jax.lax.broadcasted_iota(jnp.int32, (te, n_nodes), 1)
                  == col_ref[...]).astype(F32)                   # (TE, Np)
    onehot_row_t = (jax.lax.broadcasted_iota(jnp.int32, (n_nodes, te), 0)
                    == row_ref[...]).astype(F32)                 # (Np, TE)

    # fused gather of [sca | vec_x | vec_y | vec_z]   -> (TE, Hs+3Hv)
    gathered = jnp.dot(onehot_col, node_slab[...], preferred_element_type=F32)
    n_sca_e = gathered[:, :hs]
    n_vec_e = jnp.concatenate(
        [gathered[None, :, hs + i * hv: hs + (i + 1) * hv] for i in range(3)], axis=0)

    # ------------------------------ MessageModule --------------------------- #
    e_sca, e_vec = gvlin('edgegv', edge_sca, edge_vec)
    e_vec = _vn_leaky_relu(getp('edge_wdir'), e_vec)
    e_sca = _leaky_relu(e_sca)

    # fused sca_linear + e2n_linear (both consume e_sca)
    se = jnp.dot(e_sca, getp('se_w'), preferred_element_type=F32) + getp('se_b')
    y_sca = n_sca_e * se[:, :hs]
    e2n = se[:, hs:]                                             # (TE, Hv)
    n2e = jnp.dot(n_sca_e, getp('n2e_w'), preferred_element_type=F32) + getp('n2e_b')
    evn = _vn_dot(e_vec, getp('evn_w'))                          # (3, TE, Hv)
    y_vec = e2n[None] * n_vec_e + n2e[None] * evn

    msg_sca, msg_vec = gvlin('msgout', y_sca, y_vec)

    ann = ann_ref[...]           # (TE, 1); zero on padded edges => masks them out
    msg_sca = msg_sca * ann
    msg_vec = msg_vec * ann[None]

    # fused scatter-add into the node-resident accumulator
    msg_slab = jnp.concatenate([msg_sca, msg_vec[0], msg_vec[1], msg_vec[2]], axis=-1)
    aggr[...] += jnp.dot(onehot_row_t, msg_slab, preferred_element_type=F32)

    # ---- last step: centroid + LayerNorms + activations + out_transform ----- #
    @pl.when(step == pl.num_programs(0) - 1)
    def _():
        c_sca, c_vec = gvlin('cent', x_sca_ref[...], x_vec_ref[...])
        a = aggr[...]
        o_sca = c_sca + a[:, :hs]
        o_vec = c_vec + jnp.concatenate(
            [a[None, :, hs + i * hv: hs + (i + 1) * hv] for i in range(3)], axis=0)

        # LayerNorm over scalar channels
        mu = jnp.mean(o_sca, axis=-1, keepdims=True)
        var = jnp.mean((o_sca - mu) ** 2, axis=-1, keepdims=True)
        o_sca = ((o_sca - mu) * jax.lax.rsqrt(var + LN_EPS)
                 * getp('ln_sca_w') + getp('ln_sca_b'))

        # LayerNorm over each node's (Hv, 3) vector block
        inv_cnt = 1.0 / (3.0 * hv)
        vmu = jnp.sum(jnp.sum(o_vec, axis=-1, keepdims=True),
                      axis=0, keepdims=True) * inv_cnt           # (1, Np, 1)
        dv = o_vec - vmu
        vvar = jnp.sum(jnp.sum(dv * dv, axis=-1, keepdims=True),
                       axis=0, keepdims=True) * inv_cnt
        vinv = jax.lax.rsqrt(vvar + LN_EPS)
        o_vec = dv * vinv * getp('ln_vec_w')[:, None, :] + getp('ln_vec_b')[:, None, :]

        a_sca = _leaky_relu(o_sca)
        a_vec = _vn_leaky_relu(getp('vnact_wdir'), o_vec)
        f_sca, f_vec = gvlin('outt', a_sca, a_vec)

        # one lane-dense output slab: [sca | vec_x | vec_y | vec_z]
        out_ref[...] = jnp.concatenate([f_sca, f_vec[0], f_vec[1], f_vec[2]], axis=-1)


# ----------------------------- parameter packing ----------------------------- #

def _pack_params(params):
    """Group every 2-D parameter by lane width into a few row-stacked slabs
    (segments padded to 8-row boundaries).  Cuts ~30 tiny DMA descriptors and
    their padded VMEM tiles down to len(slabs) inputs."""
    P = params
    M = P['message']
    entries = []

    def add(name, a):
        a = jnp.asarray(a, F32)
        if a.ndim == 1:
            a = a[None, :]
        entries.append((name, a))

    def add_gv(tag, gp):
        add(tag + '_wv1', gp['wv1'])
        add(tag + '_wv2', gp['wv2'])
        # fused scalar-path weight; scalar rows first (kernel concats [sca, norm])
        add(tag + '_ws', jnp.concatenate([gp['ws_s'], gp['ws_n']], axis=0))
        add(tag + '_wg', gp['wg'])
        add(tag + '_bg', gp['bg'])

    add_gv('node', M['node_gvlinear'])
    add_gv('edgegv', M['edge_gvp']['gv'])
    add_gv('msgout', M['out_gvlinear'])
    add_gv('cent', P['centroid_lin'])
    add_gv('outt', P['out_transform'])
    add('edge_wdir', M['edge_gvp']['w_dir'])
    add('vnact_wdir', P['vn_act']['w_dir'])
    # sca_linear + e2n_linear fused (shared LHS e_sca)
    add('se_w', jnp.concatenate([M['sca_linear']['w'], M['e2n_linear']['w']], axis=1))
    add('se_b', jnp.concatenate([M['sca_linear']['b'], M['e2n_linear']['b']], axis=1))
    add('n2e_w', M['n2e_linear']['w'])
    add('n2e_b', M['n2e_linear']['b'])
    add('evn_w', M['edge_vnlinear']['w'])
    add('expand_w', P['edge_expansion']['w'])
    add('ln_sca_w', P['ln_sca']['w'])
    add('ln_sca_b', P['ln_sca']['b'])
    add('ln_vec_w', P['ln_vec']['w'].T)      # stored (Hv,3) -> component-major (3,Hv)
    add('ln_vec_b', P['ln_vec']['b'].T)

    groups = {}
    for name, a in entries:
        groups.setdefault(a.shape[1], []).append((name, a))

    slabs, meta = [], {}
    for pos, ncols in enumerate(sorted(groups)):
        parts, roff = [], 0
        for name, a in groups[ncols]:
            r = a.shape[0]
            meta[name] = (pos, roff, r)
            rpad = (-r) % 8
            if rpad:
                a = jnp.pad(a, ((0, rpad), (0, 0)))
            parts.append(a)
            roff += r + rpad
        slabs.append(jnp.concatenate(parts, axis=0))
    return tuple(slabs), meta


# --------------------------------- wrapper ----------------------------------- #

def attention_interaction_block_vn(x, edge_index, edge_vector, params, *,
                                   cutoff, num_gaussians, edge_tile=128):
    x_sca, x_vec = x
    x_sca = jnp.asarray(x_sca, F32)
    x_vec = jnp.asarray(x_vec, F32)
    edge_vector = jnp.asarray(edge_vector, F32)
    N, HS = x_sca.shape
    HV = x_vec.shape[1]
    E = edge_vector.shape[0]
    row = edge_index[0].astype(jnp.int32)
    col = edge_index[1].astype(jnp.int32)

    TE = int(edge_tile)
    if TE % 128 != 0:
        raise ValueError("edge_tile must be a multiple of 128")
    E_pad = max(pl.cdiv(E, TE), 1) * TE
    ep = E_pad - E
    N_pad = pl.cdiv(N, 8) * 8
    npd = N_pad - N

    # tiny XLA glue: cosine-cutoff annealing; its zero-padding masks padded edges.
    # TODO(synk): fold cos into the kernel once a Mosaic cos lowering is guaranteed.
    dist = jnp.sqrt(jnp.sum(edge_vector * edge_vector, axis=-1))
    ann = 0.5 * (jnp.cos(dist * (math.pi / float(cutoff))) + 1.0)
    ann = ann * (dist <= cutoff).astype(F32)

    ev_p = jnp.pad(edge_vector, ((0, ep), (0, 0)))
    ann_p = jnp.pad(ann, (0, ep))[:, None]                 # (E_pad, 1)
    col_p = jnp.pad(col, (0, ep))[:, None]                 # (E_pad, 1)  gather idx
    row_p = jnp.pad(row, (0, ep))[None, :]                 # (1, E_pad)  scatter idx
    x_sca_p = jnp.pad(x_sca, ((0, npd), (0, 0)))
    x_vec_cm = jnp.pad(jnp.transpose(x_vec, (2, 0, 1)), ((0, 0), (0, npd), (0, 0)))

    slabs, meta = _pack_params(params)
    n_slabs = len(slabs)
    SW = HS + 3 * HV
    grid = (E_pad // TE,)

    kernel = partial(_block_kernel, meta=meta, n_slabs=n_slabs, hs=HS, hv=HV,
                     cutoff=float(cutoff), num_gaussians=int(num_gaussians))

    def _full(shape):
        nd = len(shape)
        return pl.BlockSpec(shape, lambda e: (0,) * nd)

    out = pl.pallas_call(
        kernel,
        out_shape=jax.ShapeDtypeStruct((N_pad, SW), F32),
        grid=grid,
        in_specs=[_full((N_pad, HS)),
                  _full((3, N_pad, HV)),
                  pl.BlockSpec((TE, 3), lambda e: (e, 0)),
                  pl.BlockSpec((TE, 1), lambda e: (e, 0)),
                  pl.BlockSpec((TE, 1), lambda e: (e, 0)),
                  pl.BlockSpec((1, TE), lambda e: (0, e))]
                 + [_full(s.shape) for s in slabs],
        out_specs=_full((N_pad, SW)),
        scratch_shapes=[pltpu.VMEM((N_pad, SW), F32),
                        pltpu.VMEM((N_pad, SW), F32)],
        compiler_params=pltpu.CompilerParams(
            dimension_semantics=("arbitrary",),
            vmem_limit_bytes=32 * 1024 * 1024),
    )(x_sca_p, x_vec_cm, ev_p, ann_p, col_p, row_p, *slabs)

    out_sca = out[:N, :HS]
    out_vec = out[:N, HS:].reshape(N, 3, HV).transpose(0, 2, 1)   # (N, HV, 3)
    return out_sca, out_vec


# ------------------------------ parameter init ------------------------------- #

def _uniform(key, shape, bound):
    return jax.random.uniform(key, shape, F32, -bound, bound)


def _linear_init(key, fan_in, fan_out, bias=True):
    kw, kb = jax.random.split(key)
    bound = 1.0 / math.sqrt(fan_in)
    p = {'w': _uniform(kw, (fan_in, fan_out), bound)}
    if bias:
        p['b'] = _uniform(kb, (1, fan_out), bound)
    return p


def _gvlinear_init(key, in_s, in_v, out_s, out_v):
    dh = max(in_v, out_v)
    k = jax.random.split(key, 6)
    bs = 1.0 / math.sqrt(in_s + dh)
    bg = 1.0 / math.sqrt(out_s)
    return {
        'wv1': _uniform(k[0], (in_v, dh), 1.0 / math.sqrt(in_v)),   # VNLinear(in_v, dh)
        'wv2': _uniform(k[1], (dh, out_v), 1.0 / math.sqrt(dh)),    # VNLinear(dh, out_v)
        'ws_n': _uniform(k[2], (dh, out_s), bs),                    # lin_scalar (norm rows)
        'ws_s': _uniform(k[3], (in_s, out_s), bs),                  # lin_scalar (scalar rows)
        'wg': _uniform(k[4], (out_s, out_v), bg),                   # scalar_to_vector_gates
        'bg': _uniform(k[5], (1, out_v), bg),
    }


def init_params(key, hs, hv, c):
    ks = jax.random.split(key, 12)
    message = {
        'node_gvlinear': _gvlinear_init(ks[0], hs, hv, hs, hv),
        'edge_gvp': {
            'gv': _gvlinear_init(ks[1], c, c, c, c),
            'w_dir': _uniform(ks[2], (c, c), 1.0 / math.sqrt(c)),   # VNLeakyReLU dir
        },
        'sca_linear': _linear_init(ks[3], c, hs),
        'e2n_linear': _linear_init(ks[4], c, hv),
        'n2e_linear': _linear_init(ks[5], hs, hv),
        'edge_vnlinear': {'w': _uniform(ks[6], (c, hv), 1.0 / math.sqrt(c))},
        'out_gvlinear': _gvlinear_init(ks[7], hs, hv, hs, hv),
    }
    return {
        'edge_expansion': {'w': _uniform(ks[8], (1, c), 1.0)},      # Linear(1, c, bias=False)
        'message': message,
        'centroid_lin': _gvlinear_init(ks[9], hs, hv, hs, hv),
        'out_transform': _gvlinear_init(ks[10], hs, hv, hs, hv),
        'vn_act': {'w_dir': _uniform(ks[11], (hv, hv), 1.0 / math.sqrt(hv))},
        'ln_sca': {'w': jnp.ones((1, hs), F32), 'b': jnp.zeros((1, hs), F32)},
        'ln_vec': {'w': jnp.ones((hv, 3), F32), 'b': jnp.zeros((hv, 3), F32)},
    }


# ---------------------------- pure-JAX reference ----------------------------- #

def _gv_linear_ref(p, sca, vec):
    inter = jnp.einsum('nvc,vw->nwc', vec, p['wv1'])
    norm = jnp.sqrt(jnp.sum(inter * inter, axis=-1))
    out_sca = norm @ p['ws_n'] + sca @ p['ws_s']
    out_vec = jnp.einsum('nwc,wo->noc', inter, p['wv2'])
    gate = jax.nn.sigmoid(out_sca @ p['wg'] + p['bg'])
    return out_sca, gate[:, :, None] * out_vec


def _vn_leaky_ref(w, vec, slope=LEAKY_SLOPE, eps=VN_EPS):
    d = jnp.einsum('nvc,vw->nwc', vec, w)
    dot = jnp.sum(vec * d, axis=-1, keepdims=True)
    dsq = jnp.sum(d * d, axis=-1, keepdims=True)
    mask = (dot >= 0.0).astype(F32)
    return slope * vec + (1.0 - slope) * (
        mask * vec + (1.0 - mask) * (vec - (dot / (dsq + eps)) * d))


def reference_forward(x_sca, x_vec, edge_index, edge_vector, P, *, cutoff, num_gaussians):
    row, col = edge_index[0], edge_index[1]

    dist = jnp.sqrt(jnp.sum(edge_vector ** 2, axis=-1))
    offset = jnp.linspace(0.0, cutoff, num_gaussians, dtype=F32)
    coeff = -0.5 / (offset[1] - offset[0]) ** 2
    edge_sca = jnp.exp(coeff * (dist[:, None] - offset[None, :]) ** 2)
    unit = edge_vector / (dist[:, None] + 1e-7)
    edge_vec = unit[:, None, :] * P['edge_expansion']['w'][0][None, :, None]   # (E, C, 3)

    Pm = P['message']
    n_sca, n_vec = _gv_linear_ref(Pm['node_gvlinear'], x_sca, x_vec)
    n_sca_e, n_vec_e = n_sca[col], n_vec[col]
    e_sca, e_vec = _gv_linear_ref(Pm['edge_gvp']['gv'], edge_sca, edge_vec)
    e_vec = _vn_leaky_ref(Pm['edge_gvp']['w_dir'], e_vec)
    e_sca = _leaky_relu(e_sca)

    y_sca = n_sca_e * (e_sca @ Pm['sca_linear']['w'] + Pm['sca_linear']['b'])
    e2n = e_sca @ Pm['e2n_linear']['w'] + Pm['e2n_linear']['b']
    n2e = n_sca_e @ Pm['n2e_linear']['w'] + Pm['n2e_linear']['b']
    evn = jnp.einsum('evc,vw->ewc', e_vec, Pm['edge_vnlinear']['w'])
    y_vec = e2n[:, :, None] * n_vec_e + n2e[:, :, None] * evn
    m_sca, m_vec = _gv_linear_ref(Pm['out_gvlinear'], y_sca, y_vec)

    ann = 0.5 * (jnp.cos(dist * jnp.pi / cutoff) + 1.0)
    ann = ann * (dist <= cutoff)
    m_sca = m_sca * ann[:, None]
    m_vec = m_vec * ann[:, None, None]

    aggr_sca = jnp.zeros_like(n_sca).at[row].add(m_sca)
    aggr_vec = jnp.zeros_like(n_vec).at[row].add(m_vec)

    c_sca, c_vec = _gv_linear_ref(P['centroid_lin'], x_sca, x_vec)
    o_sca = c_sca + aggr_sca
    o_vec = c_vec + aggr_vec

    mu = o_sca.mean(-1, keepdims=True)
    var = ((o_sca - mu) ** 2).mean(-1, keepdims=True)
    o_sca = (o_sca - mu) / jnp.sqrt(var + LN_EPS) * P['ln_sca']['w'][0] + P['ln_sca']['b'][0]

    vmu = o_vec.mean(axis=(1, 2), keepdims=True)
    vvar = ((o_vec - vmu) ** 2).mean(axis=(1, 2), keepdims=True)
    o_vec = ((o_vec - vmu) / jnp.sqrt(vvar + LN_EPS)
             * P['ln_vec']['w'][None] + P['ln_vec']['b'][None])

    a_sca = _leaky_relu(o_sca)
    a_vec = _vn_leaky_ref(P['vn_act']['w_dir'], o_vec)
    return _gv_linear_ref(P['out_transform'], a_sca, a_vec)


# ----------------------------------- main ------------------------------------ #

if __name__ == "__main__":
    N, E = 16, 200                   # 200 edges -> 2 edge tiles (exercises accumulation + masking)
    HS, HV, C = 128, 32, 32          # hidden_channels=(HS, HV), edge_channels=C
    cutoff = 10.0

    key = jax.random.PRNGKey(0)
    k1, k2, k3, k4, k5, kp = jax.random.split(key, 6)
    x_sca = jax.random.normal(k1, (N, HS), F32)
    x_vec = jax.random.normal(k2, (N, HV, 3), F32)
    row = jax.random.randint(k3, (E,), 0, N, dtype=jnp.int32)
    col = jax.random.randint(k4, (E,), 0, N, dtype=jnp.int32)
    edge_index = jnp.stack([row, col], axis=0)
    pos = jax.random.uniform(k5, (N, 3), F32, 0.0, 0.6 * cutoff)
    edge_vector = pos[row] - pos[col]

    params = init_params(kp, HS, HV, C)

    out_sca, out_vec = attention_interaction_block_vn(
        (x_sca, x_vec), edge_index, edge_vector, params,
        cutoff=cutoff, num_gaussians=C, edge_tile=128)
    out_sca = jax.block_until_ready(out_sca)
    out_vec = jax.block_until_ready(out_vec)

    ref_sca, ref_vec = reference_forward(
        x_sca, x_vec, edge_index, edge_vector, params,
        cutoff=cutoff, num_gaussians=C)

    assert out_sca.shape == (N, HS) and out_vec.shape == (N, HV, 3)
    assert bool(jnp.all(jnp.isfinite(out_sca))) and bool(jnp.all(jnp.isfinite(out_vec)))
    err_s = float(jnp.max(jnp.abs(out_sca - ref_sca)))
    err_v = float(jnp.max(jnp.abs(out_vec - ref_vec)))
    assert bool(jnp.allclose(out_sca, ref_sca, rtol=1e-2, atol=1e-2)), err_s
    assert bool(jnp.allclose(out_vec, ref_vec, rtol=1e-2, atol=1e-2)), err_v
    print("KERNEL_OK")
</pallas_src>

<mosaic_0001>
module attributes {stable_mosaic.version = 11 : i64} {
  func.func @_block_kernel(%arg0: i32, %arg1: memref<16x128xf32, #tpu.memory_space<vmem>>, %arg2: memref<3x16x32xf32, #tpu.memory_space<vmem>>, %arg3: memref<128x3xf32, #tpu.memory_space<vmem>>, %arg4: memref<128x1xf32, #tpu.memory_space<vmem>>, %arg5: memref<128x1xi32, #tpu.memory_space<vmem>>, %arg6: memref<1x128xi32, #tpu.memory_space<vmem>>, %arg7: memref<1224x32xf32, #tpu.memory_space<vmem>>, %arg8: memref<656x128xf32, #tpu.memory_space<vmem>>, %arg9: memref<40x160xf32, #tpu.memory_space<vmem>>, %arg10: memref<16x224xf32, #tpu.memory_space<vmem>>, %arg11: memref<16x224xf32, #tpu.memory_space<vmem>>, %arg12: memref<16x224xf32, #tpu.memory_space<vmem>>) attributes {dimension_semantics = [#tpu.dimension_semantics<arbitrary>], iteration_bounds = array<i64: 2>, scalar_prefetch = 0 : i64, scratch_operands = 2 : i64, tpu.core_type = #tpu.core_type<tc>, window_params = [{pipeline_mode = #tpu.pipeline_mode<synchronous>, transform_indices = @transform_0, window_bounds = array<i64: 16, 128>}, {pipeline_mode = #tpu.pipeline_mode<synchronous>, transform_indices = @transform_1, window_bounds = array<i64: 3, 16, 32>}, {transform_indices = @transform_2, window_bounds = array<i64: 128, 3>}, {transform_indices = @transform_3, window_bounds = array<i64: 128, 1>}, {transform_indices = @transform_4, window_bounds = array<i64: 128, 1>}, {transform_indices = @transform_5, window_bounds = array<i64: 1, 128>}, {pipeline_mode = #tpu.pipeline_mode<synchronous>, transform_indices = @transform_6, window_bounds = array<i64: 1224, 32>}, {pipeline_mode = #tpu.pipeline_mode<synchronous>, transform_indices = @transform_7, window_bounds = array<i64: 656, 128>}, {pipeline_mode = #tpu.pipeline_mode<synchronous>, transform_indices = @transform_8, window_bounds = array<i64: 40, 160>}, {pipeline_mode = #tpu.pipeline_mode<synchronous>, transform_indices = @transform_9, window_bounds = array<i64: 16, 224>}]} {
    %c0_i32 = arith.constant 0 : i32
    %0 = arith.cmpi eq, %arg0, %c0_i32 : i32
    %1 = arith.extui %0 : i1 to i32
    %c0_i32_0 = arith.constant 0 : i32
    %2 = arith.cmpi ne, %1, %c0_i32_0 : i32
    scf.if %2 {
      %c0_70 = arith.constant 0 : index
      %c0_71 = arith.constant 0 : index
      %211 = vector.load %arg1[%c0_70, %c0_71] : memref<16x128xf32, #tpu.memory_space<vmem>>, vector<16x128xf32>
      %c0_72 = arith.constant 0 : index
      %c0_73 = arith.constant 0 : index
      %c0_74 = arith.constant 0 : index
      %212 = vector.load %arg2[%c0_72, %c0_73, %c0_74] : memref<3x16x32xf32, #tpu.memory_space<vmem>>, vector<3x16x32xf32>
      %c0_75 = arith.constant 0 : index
      %c0_76 = arith.constant 0 : index
      %213 = vector.load %arg7[%c0_75, %c0_76] : memref<1224x32xf32, #tpu.memory_space<vmem>>, vector<32x32xf32>
      %c32_77 = arith.constant 32 : index
      %c0_78 = arith.constant 0 : index
      %214 = vector.load %arg7[%c32_77, %c0_78] : memref<1224x32xf32, #tpu.memory_space<vmem>>, vector<32x32xf32>
      %c0_79 = arith.constant 0 : index
      %c0_80 = arith.constant 0 : index
      %215 = vector.load %arg8[%c0_79, %c0_80] : memref<656x128xf32, #tpu.memory_space<vmem>>, vector<160x128xf32>
      %c64 = arith.constant 64 : index
      %c0_81 = arith.constant 0 : index
      %216 = vector.load %arg7[%c64, %c0_81] : memref<1224x32xf32, #tpu.memory_space<vmem>>, vector<128x32xf32>
      %c192 = arith.constant 192 : index
      %c0_82 = arith.constant 0 : index
      %217 = vector.load %arg7[%c192, %c0_82] : memref<1224x32xf32, #tpu.memory_space<vmem>>, vector<1x32xf32>
      %218 = vector.shape_cast %212 : vector<3x16x32xf32> to vector<48x32xf32>
      %cst_83 = arith.constant dense<0.000000e+00> : vector<48x32xf32>
      %219 = tpu.matmul %218, %213, %cst_83 {dimension_numbers = #tpu.dot_dimension_numbers<[1], [0], [0], [1], [0, 0, 1, 1], [], []>} : vector<48x32xf32>, vector<32x32xf32>, vector<48x32xf32> -> vector<48x32xf32>
      %220 = vector.shape_cast %219 : vector<48x32xf32> to vector<3x16x32xf32>
      %221 = arith.mulf %220, %220 : vector<3x16x32xf32>
      %cst_84 = arith.constant dense<0.000000e+00> : vector<16x32xf32>
      %222 = vector.multi_reduction <add>, %221, %cst_84 [0] : vector<3x16x32xf32> to vector<16x32xf32>
      %223 = math.sqrt %222 : vector<16x32xf32>
      %224 = tpu.concatenate %211, %223 in 1 : vector<16x128xf32>, vector<16x32xf32> -> vector<16x160xf32>
      %cst_85 = arith.constant dense<0.000000e+00> : vector<16x128xf32>
      %225 = tpu.matmul %224, %215, %cst_85 {dimension_numbers = #tpu.dot_dimension_numbers<[1], [0], [0], [1], [0, 0, 1, 1], [], []>} : vector<16x160xf32>, vector<160x128xf32>, vector<16x128xf32> -> vector<16x128xf32>
      %226 = vector.shape_cast %220 : vector<3x16x32xf32> to vector<48x32xf32>
      %cst_86 = arith.constant dense<0.000000e+00> : vector<48x32xf32>
      %227 = tpu.matmul %226, %214, %cst_86 {dimension_numbers = #tpu.dot_dimension_numbers<[1], [0], [0], [1], [0, 0, 1, 1], [], []>} : vector<48x32xf32>, vector<32x32xf32>, vector<48x32xf32> -> vector<48x32xf32>
      %228 = vector.shape_cast %227 : vector<48x32xf32> to vector<3x16x32xf32>
      %cst_87 = arith.constant dense<0.000000e+00> : vector<16x32xf32>
      %229 = tpu.matmul %225, %216, %cst_87 {dimension_numbers = #tpu.dot_dimension_numbers<[1], [0], [0], [1], [0, 0, 1, 1], [], []>} : vector<16x128xf32>, vector<128x32xf32>, vector<16x32xf32> -> vector<16x32xf32>
      %230 = vector.broadcast %217 : vector<1x32xf32> to vector<16x32xf32>
      %231 = arith.addf %229, %230 : vector<16x32xf32>
      %cst_88 = arith.constant -3.000000e+01 : f32
      %cst_89 = arith.constant 3.000000e+01 : f32
      %232 = vector.broadcast %cst_88 : f32 to vector<16x32xf32>
      %233 = arith.maximumf %232, %231 : vector<16x32xf32>
      %234 = vector.broadcast %cst_89 : f32 to vector<16x32xf32>
      %235 = arith.minimumf %234, %233 : vector<16x32xf32>
      %cst_90 = arith.constant 0.000000e+00 : f32
      %236 = vector.broadcast %cst_90 : f32 to vector<16x32xf32>
      %237 = arith.subf %236, %235 : vector<16x32xf32>
      %238 = math.exp %237 : vector<16x32xf32>
      %cst_91 = arith.constant 1.000000e+00 : f32
      %239 = vector.broadcast %cst_91 : f32 to vector<16x32xf32>
      %240 = arith.addf %239, %238 : vector<16x32xf32>
      %241 = tpu.reciprocal %240 {approx = true} : vector<16x32xf32> -> vector<16x32xf32>
      %242 = vector.shape_cast %241 : vector<16x32xf32> to vector<1x16x32xf32>
      %243 = vector.broadcast %242 : vector<1x16x32xf32> to vector<3x16x32xf32>
      %244 = arith.mulf %228, %243 : vector<3x16x32xf32>
      %245 = vector.extract_strided_slice %244 {offsets = [0, 0, 0], sizes = [1, 16, 32], strides = [1, 1, 1]} : vector<3x16x32xf32> to vector<1x16x32xf32>
      %246 = vector.shape_cast %245 : vector<1x16x32xf32> to vector<16x32xf32>
      %247 = vector.extract_strided_slice %244 {offsets = [1, 0, 0], sizes = [1, 16, 32], strides = [1, 1, 1]} : vector<3x16x32xf32> to vector<1x16x32xf32>
      %248 = vector.shape_cast %247 : vector<1x16x32xf32> to vector<16x32xf32>
      %249 = vector.extract_strided_slice %244 {offsets = [2, 0, 0], sizes = [1, 16, 32], strides = [1, 1, 1]} : vector<3x16x32xf32> to vector<1x16x32xf32>
      %250 = vector.shape_cast %249 : vector<1x16x32xf32> to vector<16x32xf32>
      %251 = tpu.concatenate %225, %246, %248, %250 in 1 : vector<16x128xf32>, vector<16x32xf32>, vector<16x32xf32>, vector<16x32xf32> -> vector<16x224xf32>
      %c0_92 = arith.constant 0 : index
      %c0_93 = arith.constant 0 : index
      %252 = vector.load %arg11[%c0_92, %c0_93] : memref<16x224xf32, #tpu.memory_space<vmem>>, vector<16x224xf32>
      tpu.vector_store %arg11[%c0_92, %c0_93], %251 {strides = array<i32>} : memref<16x224xf32, #tpu.memory_space<vmem>>, vector<16x224xf32>,
      %cst_94 = arith.constant 0.000000e+00 : f32
      %253 = vector.broadcast %cst_94 : f32 to vector<16x224xf32>
      %c0_95 = arith.constant 0 : index
      %c0_96 = arith.constant 0 : index
      %254 = vector.load %arg12[%c0_95, %c0_96] : memref<16x224xf32, #tpu.memory_space<vmem>>, vector<16x224xf32>
      tpu.vector_store %arg12[%c0_95, %c0_96], %253 {strides = array<i32>} : memref<16x224xf32, #tpu.memory_space<vmem>>, vector<16x224xf32>,
    } else {
    }
    %c0 = arith.constant 0 : index
    %c0_1 = arith.constant 0 : index
    %3 = vector.load %arg3[%c0, %c0_1] : memref<128x3xf32, #tpu.memory_space<vmem>>, vector<128x3xf32>
    %4 = arith.mulf %3, %3 : vector<128x3xf32>
    %cst = arith.constant dense<0.000000e+00> : vector<128xf32>
    %5 = vector.multi_reduction <add>, %4, %cst [1] : vector<128x3xf32> to vector<128xf32>
    %6 = vector.shape_cast %5 : vector<128xf32> to vector<128x1xf32>
    %7 = math.sqrt %6 : vector<128x1xf32>
    %cst_2 = arith.constant 1.000000e-07 : f32
    %8 = vector.broadcast %cst_2 : f32 to vector<128x1xf32>
    %9 = arith.addf %7, %8 : vector<128x1xf32>
    %cst_3 = arith.constant 1.000000e+00 : f32
    %10 = vector.broadcast %cst_3 : f32 to vector<128x1xf32>
    %11 = arith.divf %10, %9 : vector<128x1xf32>
    %12 = tpu.iota {dimensions = array<i32: 1>} : vector<1x32xi32>
    %13 = arith.sitofp %12 : vector<1x32xi32> to vector<1x32xf32>
    %cst_4 = arith.constant 0.322580636 : f32
    %14 = vector.broadcast %cst_4 : f32 to vector<1x32xf32>
    %15 = arith.mulf %13, %14 : vector<1x32xf32>
    %16 = vector.broadcast %7 : vector<128x1xf32> to vector<128x32xf32>
    %17 = vector.broadcast %15 : vector<1x32xf32> to vector<128x32xf32>
    %18 = arith.subf %16, %17 : vector<128x32xf32>
    %cst_5 = arith.constant -4.805000e+00 : f32
    %19 = vector.broadcast %cst_5 : f32 to vector<128x32xf32>
    %20 = arith.mulf %19, %18 : vector<128x32xf32>
    %21 = arith.mulf %20, %18 : vector<128x32xf32>
    %22 = math.exp %21 : vector<128x32xf32>
    %c1200 = arith.constant 1200 : index
    %c0_6 = arith.constant 0 : index
    %23 = vector.load %arg7[%c1200, %c0_6] : memref<1224x32xf32, #tpu.memory_space<vmem>>, vector<1x32xf32>
    %24 = vector.extract_strided_slice %3 {offsets = [0, 0], sizes = [128, 1], strides = [1, 1]} : vector<128x3xf32> to vector<128x1xf32>
    %25 = arith.mulf %24, %11 : vector<128x1xf32>
    %26 = vector.broadcast %25 : vector<128x1xf32> to vector<128x32xf32>
    %27 = vector.broadcast %23 : vector<1x32xf32> to vector<128x32xf32>
    %28 = arith.mulf %26, %27 : vector<128x32xf32>
    %29 = vector.shape_cast %28 : vector<128x32xf32> to vector<1x128x32xf32>
    %30 = vector.extract_strided_slice %3 {offsets = [0, 1], sizes = [128, 1], strides = [1, 1]} : vector<128x3xf32> to vector<128x1xf32>
    %31 = arith.mulf %30, %11 : vector<128x1xf32>
    %32 = vector.broadcast %31 : vector<128x1xf32> to vector<128x32xf32>
    %33 = vector.broadcast %23 : vector<1x32xf32> to vector<128x32xf32>
    %34 = arith.mulf %32, %33 : vector<128x32xf32>
    %35 = vector.shape_cast %34 : vector<128x32xf32> to vector<1x128x32xf32>
    %36 = vector.extract_strided_slice %3 {offsets = [0, 2], sizes = [128, 1], strides = [1, 1]} : vector<128x3xf32> to vector<128x1xf32>
    %37 = arith.mulf %36, %11 : vector<128x1xf32>
    %38 = vector.broadcast %37 : vector<128x1xf32> to vector<128x32xf32>
    %39 = vector.broadcast %23 : vector<1x32xf32> to vector<128x32xf32>
    %40 = arith.mulf %38, %39 : vector<128x32xf32>
    %41 = vector.shape_cast %40 : vector<128x32xf32> to vector<1x128x32xf32>
    %42 = tpu.concatenate %29, %35, %41 in 0 : vector<1x128x32xf32>, vector<1x128x32xf32>, vector<1x128x32xf32> -> vector<3x128x32xf32>
    %43 = tpu.iota {dimensions = array<i32: 1>} : vector<128x16xi32>
    %c0_7 = arith.constant 0 : index
    %c0_8 = arith.constant 0 : index
    %44 = vector.load %arg5[%c0_7, %c0_8] : memref<128x1xi32, #tpu.memory_space<vmem>>, vector<128x1xi32>
    %45 = vector.broadcast %44 : vector<128x1xi32> to vector<128x16xi32>
    %46 = arith.cmpi eq, %43, %45 : vector<128x16xi32>
    %47 = arith.extui %46 : vector<128x16xi1> to vector<128x16xi32>
    %48 = arith.sitofp %47 : vector<128x16xi32> to vector<128x16xf32>
    %49 = tpu.iota {dimensions = array<i32: 0>} : vector<16x128xi32>
    %c0_9 = arith.constant 0 : index
    %c0_10 = arith.constant 0 : index
    %50 = vector.load %arg6[%c0_9, %c0_10] : memref<1x128xi32, #tpu.memory_space<vmem>>, vector<1x128xi32>
    %51 = vector.broadcast %50 : vector<1x128xi32> to vector<16x128xi32>
    %52 = arith.cmpi eq, %49, %51 : vector<16x128xi32>
    %53 = arith.extui %52 : vector<16x128xi1> to vector<16x128xi32>
    %54 = arith.sitofp %53 : vector<16x128xi32> to vector<16x128xf32>
    %c0_11 = arith.constant 0 : index
    %c0_12 = arith.constant 0 : index
    %55 = vector.load %arg11[%c0_11, %c0_12] : memref<16x224xf32, #tpu.memory_space<vmem>>, vector<16x224xf32>
    %cst_13 = arith.constant dense<0.000000e+00> : vector<128x224xf32>
    %56 = tpu.matmul %48, %55, %cst_13 {dimension_numbers = #tpu.dot_dimension_numbers<[1], [0], [0], [1], [0, 0, 1, 1], [], []>} : vector<128x16xf32>, vector<16x224xf32>, vector<128x224xf32> -> vector<128x224xf32>
    %57 = vector.extract_strided_slice %56 {offsets = [0, 0], sizes = [128, 128], strides = [1, 1]} : vector<128x224xf32> to vector<128x128xf32>
    %58 = vector.extract_strided_slice %56 {offsets = [0, 128], sizes = [128, 32], strides = [1, 1]} : vector<128x224xf32> to vector<128x32xf32>
    %59 = vector.shape_cast %58 : vector<128x32xf32> to vector<1x128x32xf32>
    %60 = vector.extract_strided_slice %56 {offsets = [0, 160], sizes = [128, 32], strides = [1, 1]} : vector<128x224xf32> to vector<128x32xf32>
    %61 = vector.shape_cast %60 : vector<128x32xf32> to vector<1x128x32xf32>
    %62 = vector.extract_strided_slice %56 {offsets = [0, 192], sizes = [128, 32], strides = [1, 1]} : vector<128x224xf32> to vector<128x32xf32>
    %63 = vector.shape_cast %62 : vector<128x32xf32> to vector<1x128x32xf32>
    %64 = tpu.concatenate %59, %61, %63 in 0 : vector<1x128x32xf32>, vector<1x128x32xf32>, vector<1x128x32xf32> -> vector<3x128x32xf32>
    %c200 = arith.constant 200 : index
    %c0_14 = arith.constant 0 : index
    %65 = vector.load %arg7[%c200, %c0_14] : memref<1224x32xf32, #tpu.memory_space<vmem>>, vector<32x32xf32>
    %c232 = arith.constant 232 : index
    %c0_15 = arith.constant 0 : index
    %66 = vector.load %arg7[%c232, %c0_15] : memref<1224x32xf32, #tpu.memory_space<vmem>>, vector<32x32xf32>
    %c264 = arith.constant 264 : index
    %c0_16 = arith.constant 0 : index
    %67 = vector.load %arg7[%c264, %c0_16] : memref<1224x32xf32, #tpu.memory_space<vmem>>, vector<64x32xf32>
    %c328 = arith.constant 328 : index
    %c0_17 = arith.constant 0 : index
    %68 = vector.load %arg7[%c328, %c0_17] : memref<1224x32xf32, #tpu.memory_space<vmem>>, vector<32x32xf32>
    %c360 = arith.constant 360 : index
    %c0_18 = arith.constant 0 : index
    %69 = vector.load %arg7[%c360, %c0_18] : memref<1224x32xf32, #tpu.memory_space<vmem>>, vector<1x32xf32>
    %70 = vector.shape_cast %42 : vector<3x128x32xf32> to vector<384x32xf32>
    %cst_19 = arith.constant dense<0.000000e+00> : vector<384x32xf32>
    %71 = tpu.matmul %70, %65, %cst_19 {dimension_numbers = #tpu.dot_dimension_numbers<[1], [0], [0], [1], [0, 0, 1, 1], [], []>} : vector<384x32xf32>, vector<32x32xf32>, vector<384x32xf32> -> vector<384x32xf32>
    %72 = vector.shape_cast %71 : vector<384x32xf32> to vector<3x128x32xf32>
    %73 = arith.mulf %72, %72 : vector<3x128x32xf32>
    %cst_20 = arith.constant dense<0.000000e+00> : vector<128x32xf32>
    %74 = vector.multi_reduction <add>, %73, %cst_20 [0] : vector<3x128x32xf32> to vector<128x32xf32>
    %75 = math.sqrt %74 : vector<128x32xf32>
    %76 = tpu.concatenate %22, %75 in 1 : vector<128x32xf32>, vector<128x32xf32> -> vector<128x64xf32>
    %cst_21 = arith.constant dense<0.000000e+00> : vector<128x32xf32>
    %77 = tpu.matmul %76, %67, %cst_21 {dimension_numbers = #tpu.dot_dimension_numbers<[1], [0], [0], [1], [0, 0, 1, 1], [], []>} : vector<128x64xf32>, vector<64x32xf32>, vector<128x32xf32> -> vector<128x32xf32>
    %78 = vector.shape_cast %72 : vector<3x128x32xf32> to vector<384x32xf32>
    %cst_22 = arith.constant dense<0.000000e+00> : vector<384x32xf32>
    %79 = tpu.matmul %78, %66, %cst_22 {dimension_numbers = #tpu.dot_dimension_numbers<[1], [0], [0], [1], [0, 0, 1, 1], [], []>} : vector<384x32xf32>, vector<32x32xf32>, vector<384x32xf32> -> vector<384x32xf32>
    %80 = vector.shape_cast %79 : vector<384x32xf32> to vector<3x128x32xf32>
    %cst_23 = arith.constant dense<0.000000e+00> : vector<128x32xf32>
    %81 = tpu.matmul %77, %68, %cst_23 {dimension_numbers = #tpu.dot_dimension_numbers<[1], [0], [0], [1], [0, 0, 1, 1], [], []>} : vector<128x32xf32>, vector<32x32xf32>, vector<128x32xf32> -> vector<128x32xf32>
    %82 = vector.broadcast %69 : vector<1x32xf32> to vector<128x32xf32>
    %83 = arith.addf %81, %82 : vector<128x32xf32>
    %cst_24 = arith.constant -3.000000e+01 : f32
    %cst_25 = arith.constant 3.000000e+01 : f32
    %84 = vector.broadcast %cst_24 : f32 to vector<128x32xf32>
    %85 = arith.maximumf %84, %83 : vector<128x32xf32>
    %86 = vector.broadcast %cst_25 : f32 to vector<128x32xf32>
    %87 = arith.minimumf %86, %85 : vector<128x32xf32>
    %cst_26 = arith.constant 0.000000e+00 : f32
    %88 = vector.broadcast %cst_26 : f32 to vector<128x32xf32>
    %89 = arith.subf %88, %87 : vector<128x32xf32>
    %90 = math.exp %89 : vector<128x32xf32>
    %cst_27 = arith.constant 1.000000e+00 : f32
    %91 = vector.broadcast %cst_27 : f32 to vector<128x32xf32>
    %92 = arith.addf %91, %90 : vector<128x32xf32>
    %93 = tpu.reciprocal %92 {approx = true} : vector<128x32xf32> -> vector<128x32xf32>
    %94 = vector.shape_cast %93 : vector<128x32xf32> to vector<1x128x32xf32>
    %95 = vector.broadcast %94 : vector<1x128x32xf32> to vector<3x128x32xf32>
    %96 = arith.mulf %80, %95 : vector<3x128x32xf32>
    %c968 = arith.constant 968 : index
    %c0_28 = arith.constant 0 : index
    %97 = vector.load %arg7[%c968, %c0_28] : memref<1224x32xf32, #tpu.memory_space<vmem>>, vector<32x32xf32>
    %98 = vector.shape_cast %96 : vector<3x128x32xf32> to vector<384x32xf32>
    %cst_29 = arith.constant dense<0.000000e+00> : vector<384x32xf32>
    %99 = tpu.matmul %98, %97, %cst_29 {dimension_numbers = #tpu.dot_dimension_numbers<[1], [0], [0], [1], [0, 0, 1, 1], [], []>} : vector<384x32xf32>, vector<32x32xf32>, vector<384x32xf32> -> vector<384x32xf32>
    %100 = vector.shape_cast %99 : vector<384x32xf32> to vector<3x128x32xf32>
    %101 = arith.mulf %96, %100 : vector<3x128x32xf32>
    %cst_30 = arith.constant dense<0.000000e+00> : vector<128x32xf32>
    %102 = vector.multi_reduction <add>, %101, %cst_30 [0] : vector<3x128x32xf32> to vector<128x32xf32>
    %103 = arith.mulf %100, %100 : vector<3x128x32xf32>
    %cst_31 = arith.constant dense<0.000000e+00> : vector<128x32xf32>
    %104 = vector.multi_reduction <add>, %103, %cst_31 [0] : vector<3x128x32xf32> to vector<128x32xf32>
    %cst_32 = arith.constant 0.000000e+00 : f32
    %105 = vector.broadcast %cst_32 : f32 to vector<128x32xf32>
    %106 = arith.cmpf oge, %102, %105 : vector<128x32xf32>
    %107 = arith.extui %106 : vector<128x32xi1> to vector<128x32xi32>
    %108 = arith.sitofp %107 : vector<128x32xi32> to vector<128x32xf32>
    %109 = vector.shape_cast %108 : vector<128x32xf32> to vector<1x128x32xf32>
    %cst_33 = arith.constant 9.99999997E-7 : f32
    %110 = vector.broadcast %cst_33 : f32 to vector<128x32xf32>
    %111 = arith.addf %104, %110 : vector<128x32xf32>
    %112 = tpu.reciprocal %111 {approx = true} : vector<128x32xf32> -> vector<128x32xf32>
    %113 = arith.mulf %102, %112 : vector<128x32xf32>
    %114 = vector.shape_cast %113 : vector<128x32xf32> to vector<1x128x32xf32>
    %115 = vector.broadcast %109 : vector<1x128x32xf32> to vector<3x128x32xf32>
    %116 = arith.mulf %115, %96 : vector<3x128x32xf32>
    %cst_34 = arith.constant 1.000000e+00 : f32
    %117 = vector.broadcast %cst_34 : f32 to vector<1x128x32xf32>
    %118 = arith.subf %117, %109 : vector<1x128x32xf32>
    %119 = vector.broadcast %114 : vector<1x128x32xf32> to vector<3x128x32xf32>
    %120 = arith.mulf %119, %100 : vector<3x128x32xf32>
    %121 = arith.subf %96, %120 : vector<3x128x32xf32>
    %122 = vector.broadcast %118 : vector<1x128x32xf32> to vector<3x128x32xf32>
    %123 = arith.mulf %122, %121 : vector<3x128x32xf32>
    %124 = arith.addf %116, %123 : vector<3x128x32xf32>
    %cst_35 = arith.constant 0.00999999977 : f32
    %125 = vector.broadcast %cst_35 : f32 to vector<3x128x32xf32>
    %126 = arith.mulf %125, %96 : vector<3x128x32xf32>
    %cst_36 = arith.constant 9.900000e-01 : f32
    %127 = vector.broadcast %cst_36 : f32 to vector<3x128x32xf32>
    %128 = arith.mulf %127, %124 : vector<3x128x32xf32>
    %129 = arith.addf %126, %128 : vector<3x128x32xf32>
    %cst_37 = arith.constant 0.000000e+00 : f32
    %130 = vector.broadcast %cst_37 : f32 to vector<128x32xf32>
    %131 = arith.cmpf oge, %77, %130 : vector<128x32xf32>
    %cst_38 = arith.constant 0.00999999977 : f32
    %132 = vector.broadcast %cst_38 : f32 to vector<128x32xf32>
    %133 = arith.mulf %132, %77 : vector<128x32xf32>
    %134 = arith.select %131, %77, %133 : vector<128x32xi1>, vector<128x32xf32>
    %c0_39 = arith.constant 0 : index
    %c0_40 = arith.constant 0 : index
    %135 = vector.load %arg9[%c0_39, %c0_40] : memref<40x160xf32, #tpu.memory_space<vmem>>, vector<32x160xf32>
    %cst_41 = arith.constant dense<0.000000e+00> : vector<128x160xf32>
    %136 = tpu.matmul %134, %135, %cst_41 {dimension_numbers = #tpu.dot_dimension_numbers<[1], [0], [0], [1], [0, 0, 1, 1], [], []>} : vector<128x32xf32>, vector<32x160xf32>, vector<128x160xf32> -> vector<128x160xf32>
    %c32 = arith.constant 32 : index
    %c0_42 = arith.constant 0 : index
    %137 = vector.load %arg9[%c32, %c0_42] : memref<40x160xf32, #tpu.memory_space<vmem>>, vector<1x160xf32>
    %138 = vector.broadcast %137 : vector<1x160xf32> to vector<128x160xf32>
    %139 = arith.addf %136, %138 : vector<128x160xf32>
    %140 = vector.extract_strided_slice %139 {offsets = [0, 0], sizes = [128, 128], strides = [1, 1]} : vector<128x160xf32> to vector<128x128xf32>
    %141 = arith.mulf %57, %140 : vector<128x128xf32>
    %142 = vector.extract_strided_slice %139 {offsets = [0, 128], sizes = [128, 32], strides = [1, 1]} : vector<128x160xf32> to vector<128x32xf32>
    %c1032 = arith.constant 1032 : index
    %c0_43 = arith.constant 0 : index
    %143 = vector.load %arg7[%c1032, %c0_43] : memref<1224x32xf32, #tpu.memory_space<vmem>>, vector<128x32xf32>
    %cst_44 = arith.constant dense<0.000000e+00> : vector<128x32xf32>
    %144 = tpu.matmul %57, %143, %cst_44 {dimension_numbers = #tpu.dot_dimension_numbers<[1], [0], [0], [1], [0, 0, 1, 1], [], []>} : vector<128x128xf32>, vector<128x32xf32>, vector<128x32xf32> -> vector<128x32xf32>
    %c1160 = arith.constant 1160 : index
    %c0_45 = arith.constant 0 : index
    %145 = vector.load %arg7[%c1160, %c0_45] : memref<1224x32xf32, #tpu.memory_space<vmem>>, vector<1x32xf32>
    %146 = vector.broadcast %145 : vector<1x32xf32> to vector<128x32xf32>
    %147 = arith.addf %144, %146 : vector<128x32xf32>
    %c1168 = arith.constant 1168 : index
    %c0_46 = arith.constant 0 : index
    %148 = vector.load %arg7[%c1168, %c0_46] : memref<1224x32xf32, #tpu.memory_space<vmem>>, vector<32x32xf32>
    %149 = vector.shape_cast %129 : vector<3x128x32xf32> to vector<384x32xf32>
    %cst_47 = arith.constant dense<0.000000e+00> : vector<384x32xf32>
    %150 = tpu.matmul %149, %148, %cst_47 {dimension_numbers = #tpu.dot_dimension_numbers<[1], [0], [0], [1], [0, 0, 1, 1], [], []>} : vector<384x32xf32>, vector<32x32xf32>, vector<384x32xf32> -> vector<384x32xf32>
    %151 = vector.shape_cast %150 : vector<384x32xf32> to vector<3x128x32xf32>
    %152 = vector.shape_cast %142 : vector<128x32xf32> to vector<1x128x32xf32>
    %153 = vector.broadcast %152 : vector<1x128x32xf32> to vector<3x128x32xf32>
    %154 = arith.mulf %153, %64 : vector<3x128x32xf32>
    %155 = vector.shape_cast %147 : vector<128x32xf32> to vector<1x128x32xf32>
    %156 = vector.broadcast %155 : vector<1x128x32xf32> to vector<3x128x32xf32>
    %157 = arith.mulf %156, %151 : vector<3x128x32xf32>
    %158 = arith.addf %154, %157 : vector<3x128x32xf32>
    %c368 = arith.constant 368 : index
    %c0_48 = arith.constant 0 : index
    %159 = vector.load %arg7[%c368, %c0_48] : memref<1224x32xf32, #tpu.memory_space<vmem>>, vector<32x32xf32>
    %c400 = arith.constant 400 : index
    %c0_49 = arith.constant 0 : index
    %160 = vector.load %arg7[%c400, %c0_49] : memref<1224x32xf32, #tpu.memory_space<vmem>>, vector<32x32xf32>
    %c160 = arith.constant 160 : index
    %c0_50 = arith.constant 0 : index
    %161 = vector.load %arg8[%c160, %c0_50] : memref<656x128xf32, #tpu.memory_space<vmem>>, vector<160x128xf32>
    %c432 = arith.constant 432 : index
    %c0_51 = arith.constant 0 : index
    %162 = vector.load %arg7[%c432, %c0_51] : memref<1224x32xf32, #tpu.memory_space<vmem>>, vector<128x32xf32>
    %c560 = arith.constant 560 : index
    %c0_52 = arith.constant 0 : index
    %163 = vector.load %arg7[%c560, %c0_52] : memref<1224x32xf32, #tpu.memory_space<vmem>>, vector<1x32xf32>
    %164 = vector.shape_cast %158 : vector<3x128x32xf32> to vector<384x32xf32>
    %cst_53 = arith.constant dense<0.000000e+00> : vector<384x32xf32>
    %165 = tpu.matmul %164, %159, %cst_53 {dimension_numbers = #tpu.dot_dimension_numbers<[1], [0], [0], [1], [0, 0, 1, 1], [], []>} : vector<384x32xf32>, vector<32x32xf32>, vector<384x32xf32> -> vector<384x32xf32>
    %166 = vector.shape_cast %165 : vector<384x32xf32> to vector<3x128x32xf32>
    %167 = arith.mulf %166, %166 : vector<3x128x32xf32>
    %cst_54 = arith.constant dense<0.000000e+00> : vector<128x32xf32>
    %168 = vector.multi_reduction <add>, %167, %cst_54 [0] : vector<3x128x32xf32> to vector<128x32xf32>
    %169 = math.sqrt %168 : vector<128x32xf32>
    %170 = tpu.concatenate %141, %169 in 1 : vector<128x128xf32>, vector<128x32xf32> -> vector<128x160xf32>
    %cst_55 = arith.constant dense<0.000000e+00> : vector<128x128xf32>
    %171 = tpu.matmul %170, %161, %cst_55 {dimension_numbers = #tpu.dot_dimension_numbers<[1], [0], [0], [1], [0, 0, 1, 1], [], []>} : vector<128x160xf32>, vector<160x128xf32>, vector<128x128xf32> -> vector<128x128xf32>
    %172 = vector.shape_cast %166 : vector<3x128x32xf32> to vector<384x32xf32>
    %cst_56 = arith.constant dense<0.000000e+00> : vector<384x32xf32>
    %173 = tpu.matmul %172, %160, %cst_56 {dimension_numbers = #tpu.dot_dimension_numbers<[1], [0], [0], [1], [0, 0, 1, 1], [], []>} : vector<384x32xf32>, vector<32x32xf32>, vector<384x32xf32> -> vector<384x32xf32>
    %174 = vector.shape_cast %173 : vector<384x32xf32> to vector<3x128x32xf32>
    %cst_57 = arith.constant dense<0.000000e+00> : vector<128x32xf32>
    %175 = tpu.matmul %171, %162, %cst_57 {dimension_numbers = #tpu.dot_dimension_numbers<[1], [0], [0], [1], [0, 0, 1, 1], [], []>} : vector<128x128xf32>, vector<128x32xf32>, vector<128x32xf32> -> vector<128x32xf32>
    %176 = vector.broadcast %163 : vector<1x32xf32> to vector<128x32xf32>
    %177 = arith.addf %175, %176 : vector<128x32xf32>
    %cst_58 = arith.constant -3.000000e+01 : f32
    %cst_59 = arith.constant 3.000000e+01 : f32
    %178 = vector.broadcast %cst_58 : f32 to vector<128x32xf32>
    %179 = arith.maximumf %178, %177 : vector<128x32xf32>
    %180 = vector.broadcast %cst_59 : f32 to vector<128x32xf32>
    %181 = arith.minimumf %180, %179 : vector<128x32xf32>
    %cst_60 = arith.constant 0.000000e+00 : f32
    %182 = vector.broadcast %cst_60 : f32 to vector<128x32xf32>
    %183 = arith.subf %182, %181 : vector<128x32xf32>
    %184 = math.exp %183 : vector<128x32xf32>
    %cst_61 = arith.constant 1.000000e+00 : f32
    %185 = vector.broadcast %cst_61 : f32 to vector<128x32xf32>
    %186 = arith.addf %185, %184 : vector<128x32xf32>
    %187 = tpu.reciprocal %186 {approx = true} : vector<128x32xf32> -> vector<128x32xf32>
    %188 = vector.shape_cast %187 : vector<128x32xf32> to vector<1x128x32xf32>
    %189 = vector.broadcast %188 : vector<1x128x32xf32> to vector<3x128x32xf32>
    %190 = arith.mulf %174, %189 : vector<3x128x32xf32>
    %c0_62 = arith.constant 0 : index
    %c0_63 = arith.constant 0 : index
    %191 = vector.load %arg4[%c0_62, %c0_63] : memref<128x1xf32, #tpu.memory_space<vmem>>, vector<128x1xf32>
    %192 = vector.broadcast %191 : vector<128x1xf32> to vector<128x128xf32>
    %193 = arith.mulf %171, %192 : vector<128x128xf32>
    %194 = vector.shape_cast %191 : vector<128x1xf32> to vector<1x128x1xf32>
    %195 = vector.broadcast %194 : vector<1x128x1xf32> to vector<3x128x32xf32>
    %196 = arith.mulf %190, %195 : vector<3x128x32xf32>
    %197 = vector.extract_strided_slice %196 {offsets = [0, 0, 0], sizes = [1, 128, 32], strides = [1, 1, 1]} : vector<3x128x32xf32> to vector<1x128x32xf32>
    %198 = vector.shape_cast %197 : vector<1x128x32xf32> to vector<128x32xf32>
    %199 = vector.extract_strided_slice %196 {offsets = [1, 0, 0], sizes = [1, 128, 32], strides = [1, 1, 1]} : vector<3x128x32xf32> to vector<1x128x32xf32>
    %200 = vector.shape_cast %199 : vector<1x128x32xf32> to vector<128x32xf32>
    %201 = vector.extract_strided_slice %196 {offsets = [2, 0, 0], sizes = [1, 128, 32], strides = [1, 1, 1]} : vector<3x128x32xf32> to vector<1x128x32xf32>
    %202 = vector.shape_cast %201 : vector<1x128x32xf32> to vector<128x32xf32>
    %203 = tpu.concatenate %193, %198, %200, %202 in 1 : vector<128x128xf32>, vector<128x32xf32>, vector<128x32xf32>, vector<128x32xf32> -> vector<128x224xf32>
    %c0_64 = arith.constant 0 : index
    %c0_65 = arith.constant 0 : index
    %204 = vector.load %arg12[%c0_64, %c0_65] : memref<16x224xf32, #tpu.memory_space<vmem>>, vector<16x224xf32>
    %cst_66 = arith.constant dense<0.000000e+00> : vector<16x224xf32>
    %205 = tpu.matmul %54, %203, %cst_66 {dimension_numbers = #tpu.dot_dimension_numbers<[1], [0], [0], [1], [0, 0, 1, 1], [], []>} : vector<16x128xf32>, vector<128x224xf32>, vector<16x224xf32> -> vector<16x224xf32>
    %206 = arith.addf %204, %205 : vector<16x224xf32>
    %c0_67 = arith.constant 0 : index
    %c0_68 = arith.constant 0 : index
    %207 = vector.load %arg12[%c0_67, %c0_68] : memref<16x224xf32, #tpu.memory_space<vmem>>, vector<16x224xf32>
    tpu.vector_store %arg12[%c0_67, %c0_68], %206 {strides = array<i32>} : memref<16x224xf32, #tpu.memory_space<vmem>>, vector<16x224xf32>,
    %c1_i32 = arith.constant 1 : i32
    %208 = arith.cmpi eq, %arg0, %c1_i32 : i32
    %209 = arith.extui %208 : i1 to i32
    %c0_i32_69 = arith.constant 0 : i32
    %210 = arith.cmpi ne, %209, %c0_i32_69 : i32
    scf.if %210 {
      %c0_70 = arith.constant 0 : index
      %c0_71 = arith.constant 0 : index
      %211 = vector.load %arg1[%c0_70, %c0_71] : memref<16x128xf32, #tpu.memory_space<vmem>>, vector<16x128xf32>
      %c0_72 = arith.constant 0 : index
      %c0_73 = arith.constant 0 : index
      %c0_74 = arith.constant 0 : index
      %212 = vector.load %arg2[%c0_72, %c0_73, %c0_74] : memref<3x16x32xf32, #tpu.memory_space<vmem>>, vector<3x16x32xf32>
      %c568 = arith.constant 568 : index
      %c0_75 = arith.constant 0 : index
      %213 = vector.load %arg7[%c568, %c0_75] : memref<1224x32xf32, #tpu.memory_space<vmem>>, vector<32x32xf32>
      %c600 = arith.constant 600 : index
      %c0_76 = arith.constant 0 : index
      %214 = vector.load %arg7[%c600, %c0_76] : memref<1224x32xf32, #tpu.memory_space<vmem>>, vector<32x32xf32>
      %c320 = arith.constant 320 : index
      %c0_77 = arith.constant 0 : index
      %215 = vector.load %arg8[%c320, %c0_77] : memref<656x128xf32, #tpu.memory_space<vmem>>, vector<160x128xf32>
      %c632 = arith.constant 632 : index
      %c0_78 = arith.constant 0 : index
      %216 = vector.load %arg7[%c632, %c0_78] : memref<1224x32xf32, #tpu.memory_space<vmem>>, vector<128x32xf32>
      %c760 = arith.constant 760 : index
      %c0_79 = arith.constant 0 : index
      %217 = vector.load %arg7[%c760, %c0_79] : memref<1224x32xf32, #tpu.memory_space<vmem>>, vector<1x32xf32>
      %218 = vector.shape_cast %212 : vector<3x16x32xf32> to vector<48x32xf32>
      %cst_80 = arith.constant dense<0.000000e+00> : vector<48x32xf32>
      %219 = tpu.matmul %218, %213, %cst_80 {dimension_numbers = #tpu.dot_dimension_numbers<[1], [0], [0], [1], [0, 0, 1, 1], [], []>} : vector<48x32xf32>, vector<32x32xf32>, vector<48x32xf32> -> vector<48x32xf32>
      %220 = vector.shape_cast %219 : vector<48x32xf32> to vector<3x16x32xf32>
      %221 = arith.mulf %220, %220 : vector<3x16x32xf32>
      %cst_81 = arith.constant dense<0.000000e+00> : vector<16x32xf32>
      %222 = vector.multi_reduction <add>, %221, %cst_81 [0] : vector<3x16x32xf32> to vector<16x32xf32>
      %223 = math.sqrt %222 : vector<16x32xf32>
      %224 = tpu.concatenate %211, %223 in 1 : vector<16x128xf32>, vector<16x32xf32> -> vector<16x160xf32>
      %cst_82 = arith.constant dense<0.000000e+00> : vector<16x128xf32>
      %225 = tpu.matmul %224, %215, %cst_82 {dimension_numbers = #tpu.dot_dimension_numbers<[1], [0], [0], [1], [0, 0, 1, 1], [], []>} : vector<16x160xf32>, vector<160x128xf32>, vector<16x128xf32> -> vector<16x128xf32>
      %226 = vector.shape_cast %220 : vector<3x16x32xf32> to vector<48x32xf32>
      %cst_83 = arith.constant dense<0.000000e+00> : vector<48x32xf32>
      %227 = tpu.matmul %226, %214, %cst_83 {dimension_numbers = #tpu.dot_dimension_numbers<[1], [0], [0], [1], [0, 0, 1, 1], [], []>} : vector<48x32xf32>, vector<32x32xf32>, vector<48x32xf32> -> vector<48x32xf32>
      %228 = vector.shape_cast %227 : vector<48x32xf32> to vector<3x16x32xf32>
      %cst_84 = arith.constant dense<0.000000e+00> : vector<16x32xf32>
      %229 = tpu.matmul %225, %216, %cst_84 {dimension_numbers = #tpu.dot_dimension_numbers<[1], [0], [0], [1], [0, 0, 1, 1], [], []>} : vector<16x128xf32>, vector<128x32xf32>, vector<16x32xf32> -> vector<16x32xf32>
      %230 = vector.broadcast %217 : vector<1x32xf32> to vector<16x32xf32>
      %231 = arith.addf %229, %230 : vector<16x32xf32>
      %cst_85 = arith.constant -3.000000e+01 : f32
      %cst_86 = arith.constant 3.000000e+01 : f32
      %232 = vector.broadcast %cst_85 : f32 to vector<16x32xf32>
      %233 = arith.maximumf %232, %231 : vector<16x32xf32>
      %234 = vector.broadcast %cst_86 : f32 to vector<16x32xf32>
      %235 = arith.minimumf %234, %233 : vector<16x32xf32>
      %cst_87 = arith.constant 0.000000e+00 : f32
      %236 = vector.broadcast %cst_87 : f32 to vector<16x32xf32>
      %237 = arith.subf %236, %235 : vector<16x32xf32>
      %238 = math.exp %237 : vector<16x32xf32>
      %cst_88 = arith.constant 1.000000e+00 : f32
      %239 = vector.broadcast %cst_88 : f32 to vector<16x32xf32>
      %240 = arith.addf %239, %238 : vector<16x32xf32>
      %241 = tpu.reciprocal %240 {approx = true} : vector<16x32xf32> -> vector<16x32xf32>
      %242 = vector.shape_cast %241 : vector<16x32xf32> to vector<1x16x32xf32>
      %243 = vector.broadcast %242 : vector<1x16x32xf32> to vector<3x16x32xf32>
      %244 = arith.mulf %228, %243 : vector<3x16x32xf32>
      %c0_89 = arith.constant 0 : index
      %c0_90 = arith.constant 0 : index
      %245 = vector.load %arg12[%c0_89, %c0_90] : memref<16x224xf32, #tpu.memory_space<vmem>>, vector<16x224xf32>
      %246 = vector.extract_strided_slice %245 {offsets = [0, 0], sizes = [16, 128], strides = [1, 1]} : vector<16x224xf32> to vector<16x128xf32>
      %247 = arith.addf %225, %246 : vector<16x128xf32>
      %248 = vector.extract_strided_slice %245 {offsets = [0, 128], sizes = [16, 32], strides = [1, 1]} : vector<16x224xf32> to vector<16x32xf32>
      %249 = vector.shape_cast %248 : vector<16x32xf32> to vector<1x16x32xf32>
      %250 = vector.extract_strided_slice %245 {offsets = [0, 160], sizes = [16, 32], strides = [1, 1]} : vector<16x224xf32> to vector<16x32xf32>
      %251 = vector.shape_cast %250 : vector<16x32xf32> to vector<1x16x32xf32>
      %252 = vector.extract_strided_slice %245 {offsets = [0, 192], sizes = [16, 32], strides = [1, 1]} : vector<16x224xf32> to vector<16x32xf32>
      %253 = vector.shape_cast %252 : vector<16x32xf32> to vector<1x16x32xf32>
      %254 = tpu.concatenate %249, %251, %253 in 0 : vector<1x16x32xf32>, vector<1x16x32xf32>, vector<1x16x32xf32> -> vector<3x16x32xf32>
      %255 = arith.addf %244, %254 : vector<3x16x32xf32>
      %cst_91 = arith.constant dense<0.000000e+00> : vector<16xf32>
      %256 = vector.multi_reduction <add>, %247, %cst_91 [1] : vector<16x128xf32> to vector<16xf32>
      %257 = vector.shape_cast %256 : vector<16xf32> to vector<16x1xf32>
      %cst_92 = arith.constant 1.280000e+02 : f32
      %258 = vector.broadcast %cst_92 : f32 to vector<16x1xf32>
      %259 = arith.divf %257, %258 : vector<16x1xf32>
      %260 = vector.broadcast %259 : vector<16x1xf32> to vector<16x128xf32>
      %261 = arith.subf %247, %260 : vector<16x128xf32>
      %262 = arith.mulf %261, %261 : vector<16x128xf32>
      %cst_93 = arith.constant dense<0.000000e+00> : vector<16xf32>
      %263 = vector.multi_reduction <add>, %262, %cst_93 [1] : vector<16x128xf32> to vector<16xf32>
      %264 = vector.shape_cast %263 : vector<16xf32> to vector<16x1xf32>
      %cst_94 = arith.constant 1.280000e+02 : f32
      %265 = vector.broadcast %cst_94 : f32 to vector<16x1xf32>
      %266 = arith.divf %264, %265 : vector<16x1xf32>
      %267 = vector.broadcast %259 : vector<16x1xf32> to vector<16x128xf32>
      %268 = arith.subf %247, %267 : vector<16x128xf32>
      %cst_95 = arith.constant 9.99999974E-6 : f32
      %269 = vector.broadcast %cst_95 : f32 to vector<16x1xf32>
      %270 = arith.addf %266, %269 : vector<16x1xf32>
      %271 = math.rsqrt %270 : vector<16x1xf32>
      %272 = vector.broadcast %271 : vector<16x1xf32> to vector<16x128xf32>
      %273 = arith.mulf %268, %272 : vector<16x128xf32>
      %c640 = arith.constant 640 : index
      %c0_96 = arith.constant 0 : index
      %274 = vector.load %arg8[%c640, %c0_96] : memref<656x128xf32, #tpu.memory_space<vmem>>, vector<1x128xf32>
      %275 = vector.broadcast %274 : vector<1x128xf32> to vector<16x128xf32>
      %276 = arith.mulf %273, %275 : vector<16x128xf32>
      %c648 = arith.constant 648 : index
      %c0_97 = arith.constant 0 : index
      %277 = vector.load %arg8[%c648, %c0_97] : memref<656x128xf32, #tpu.memory_space<vmem>>, vector<1x128xf32>
      %278 = vector.broadcast %277 : vector<1x128xf32> to vector<16x128xf32>
      %279 = arith.addf %276, %278 : vector<16x128xf32>
      %cst_98 = arith.constant dense<0.000000e+00> : vector<3x16xf32>
      %280 = vector.multi_reduction <add>, %255, %cst_98 [2] : vector<3x16x32xf32> to vector<3x16xf32>
      %281 = vector.shape_cast %280 : vector<3x16xf32> to vector<3x16x1xf32>
      %cst_99 = arith.constant dense<0.000000e+00> : vector<16x1xf32>
      %282 = vector.multi_reduction <add>, %281, %cst_99 [0] : vector<3x16x1xf32> to vector<16x1xf32>
      %283 = vector.shape_cast %282 : vector<16x1xf32> to vector<1x16x1xf32>
      %cst_100 = arith.constant 0.010416667 : f32
      %284 = vector.broadcast %cst_100 : f32 to vector<1x16x1xf32>
      %285 = arith.mulf %283, %284 : vector<1x16x1xf32>
      %286 = vector.broadcast %285 : vector<1x16x1xf32> to vector<3x16x32xf32>
      %287 = arith.subf %255, %286 : vector<3x16x32xf32>
      %288 = arith.mulf %287, %287 : vector<3x16x32xf32>
      %cst_101 = arith.constant dense<0.000000e+00> : vector<3x16xf32>
      %289 = vector.multi_reduction <add>, %288, %cst_101 [2] : vector<3x16x32xf32> to vector<3x16xf32>
      %290 = vector.shape_cast %289 : vector<3x16xf32> to vector<3x16x1xf32>
      %cst_102 = arith.constant dense<0.000000e+00> : vector<16x1xf32>
      %291 = vector.multi_reduction <add>, %290, %cst_102 [0] : vector<3x16x1xf32> to vector<16x1xf32>
      %292 = vector.shape_cast %291 : vector<16x1xf32> to vector<1x16x1xf32>
      %cst_103 = arith.constant 0.010416667 : f32
      %293 = vector.broadcast %cst_103 : f32 to vector<1x16x1xf32>
      %294 = arith.mulf %292, %293 : vector<1x16x1xf32>
      %cst_104 = arith.constant 9.99999974E-6 : f32
      %295 = vector.broadcast %cst_104 : f32 to vector<1x16x1xf32>
      %296 = arith.addf %294, %295 : vector<1x16x1xf32>
      %297 = math.rsqrt %296 : vector<1x16x1xf32>
      %298 = vector.broadcast %297 : vector<1x16x1xf32> to vector<3x16x32xf32>
      %299 = arith.mulf %287, %298 : vector<3x16x32xf32>
      %c1208 = arith.constant 1208 : index
      %c0_105 = arith.constant 0 : index
      %300 = vector.load %arg7[%c1208, %c0_105] : memref<1224x32xf32, #tpu.memory_space<vmem>>, vector<3x32xf32>
      %301 = vector.shape_cast %300 : vector<3x32xf32> to vector<3x1x32xf32>
      %302 = vector.broadcast %301 : vector<3x1x32xf32> to vector<3x16x32xf32>
      %303 = arith.mulf %299, %302 : vector<3x16x32xf32>
      %c1216 = arith.constant 1216 : index
      %c0_106 = arith.constant 0 : index
      %304 = vector.load %arg7[%c1216, %c0_106] : memref<1224x32xf32, #tpu.memory_space<vmem>>, vector<3x32xf32>
      %305 = vector.shape_cast %304 : vector<3x32xf32> to vector<3x1x32xf32>
      %306 = vector.broadcast %305 : vector<3x1x32xf32> to vector<3x16x32xf32>
      %307 = arith.addf %303, %306 : vector<3x16x32xf32>
      %cst_107 = arith.constant 0.000000e+00 : f32
      %308 = vector.broadcast %cst_107 : f32 to vector<16x128xf32>
      %309 = arith.cmpf oge, %279, %308 : vector<16x128xf32>
      %cst_108 = arith.constant 0.00999999977 : f32
      %310 = vector.broadcast %cst_108 : f32 to vector<16x128xf32>
      %311 = arith.mulf %310, %279 : vector<16x128xf32>
      %312 = arith.select %309, %279, %311 : vector<16x128xi1>, vector<16x128xf32>
      %c1000 = arith.constant 1000 : index
      %c0_109 = arith.constant 0 : index
      %313 = vector.load %arg7[%c1000, %c0_109] : memref<1224x32xf32, #tpu.memory_space<vmem>>, vector<32x32xf32>
      %314 = vector.shape_cast %307 : vector<3x16x32xf32> to vector<48x32xf32>
      %cst_110 = arith.constant dense<0.000000e+00> : vector<48x32xf32>
      %315 = tpu.matmul %314, %313, %cst_110 {dimension_numbers = #tpu.dot_dimension_numbers<[1], [0], [0], [1], [0, 0, 1, 1], [], []>} : vector<48x32xf32>, vector<32x32xf32>, vector<48x32xf32> -> vector<48x32xf32>
      %316 = vector.shape_cast %315 : vector<48x32xf32> to vector<3x16x32xf32>
      %317 = arith.mulf %307, %316 : vector<3x16x32xf32>
      %cst_111 = arith.constant dense<0.000000e+00> : vector<16x32xf32>
      %318 = vector.multi_reduction <add>, %317, %cst_111 [0] : vector<3x16x32xf32> to vector<16x32xf32>
      %319 = arith.mulf %316, %316 : vector<3x16x32xf32>
      %cst_112 = arith.constant dense<0.000000e+00> : vector<16x32xf32>
      %320 = vector.multi_reduction <add>, %319, %cst_112 [0] : vector<3x16x32xf32> to vector<16x32xf32>
      %cst_113 = arith.constant 0.000000e+00 : f32
      %321 = vector.broadcast %cst_113 : f32 to vector<16x32xf32>
      %322 = arith.cmpf oge, %318, %321 : vector<16x32xf32>
      %323 = arith.extui %322 : vector<16x32xi1> to vector<16x32xi32>
      %324 = arith.sitofp %323 : vector<16x32xi32> to vector<16x32xf32>
      %325 = vector.shape_cast %324 : vector<16x32xf32> to vector<1x16x32xf32>
      %cst_114 = arith.constant 9.99999997E-7 : f32
      %326 = vector.broadcast %cst_114 : f32 to vector<16x32xf32>
      %327 = arith.addf %320, %326 : vector<16x32xf32>
      %328 = tpu.reciprocal %327 {approx = true} : vector<16x32xf32> -> vector<16x32xf32>
      %329 = arith.mulf %318, %328 : vector<16x32xf32>
      %330 = vector.shape_cast %329 : vector<16x32xf32> to vector<1x16x32xf32>
      %331 = vector.broadcast %325 : vector<1x16x32xf32> to vector<3x16x32xf32>
      %332 = arith.mulf %331, %307 : vector<3x16x32xf32>
      %cst_115 = arith.constant 1.000000e+00 : f32
      %333 = vector.broadcast %cst_115 : f32 to vector<1x16x32xf32>
      %334 = arith.subf %333, %325 : vector<1x16x32xf32>
      %335 = vector.broadcast %330 : vector<1x16x32xf32> to vector<3x16x32xf32>
      %336 = arith.mulf %335, %316 : vector<3x16x32xf32>
      %337 = arith.subf %307, %336 : vector<3x16x32xf32>
      %338 = vector.broadcast %334 : vector<1x16x32xf32> to vector<3x16x32xf32>
      %339 = arith.mulf %338, %337 : vector<3x16x32xf32>
      %340 = arith.addf %332, %339 : vector<3x16x32xf32>
      %cst_116 = arith.constant 0.00999999977 : f32
      %341 = vector.broadcast %cst_116 : f32 to vector<3x16x32xf32>
      %342 = arith.mulf %341, %307 : vector<3x16x32xf32>
      %cst_117 = arith.constant 9.900000e-01 : f32
      %343 = vector.broadcast %cst_117 : f32 to vector<3x16x32xf32>
      %344 = arith.mulf %343, %340 : vector<3x16x32xf32>
      %345 = arith.addf %342, %344 : vector<3x16x32xf32>
      %c768 = arith.constant 768 : index
      %c0_118 = arith.constant 0 : index
      %346 = vector.load %arg7[%c768, %c0_118] : memref<1224x32xf32, #tpu.memory_space<vmem>>, vector<32x32xf32>
      %c800 = arith.constant 800 : index
      %c0_119 = arith.constant 0 : index
      %347 = vector.load %arg7[%c800, %c0_119] : memref<1224x32xf32, #tpu.memory_space<vmem>>, vector<32x32xf32>
      %c480 = arith.constant 480 : index
      %c0_120 = arith.constant 0 : index
      %348 = vector.load %arg8[%c480, %c0_120] : memref<656x128xf32, #tpu.memory_space<vmem>>, vector<160x128xf32>
      %c832 = arith.constant 832 : index
      %c0_121 = arith.constant 0 : index
      %349 = vector.load %arg7[%c832, %c0_121] : memref<1224x32xf32, #tpu.memory_space<vmem>>, vector<128x32xf32>
      %c960 = arith.constant 960 : index
      %c0_122 = arith.constant 0 : index
      %350 = vector.load %arg7[%c960, %c0_122] : memref<1224x32xf32, #tpu.memory_space<vmem>>, vector<1x32xf32>
      %351 = vector.shape_cast %345 : vector<3x16x32xf32> to vector<48x32xf32>
      %cst_123 = arith.constant dense<0.000000e+00> : vector<48x32xf32>
      %352 = tpu.matmul %351, %346, %cst_123 {dimension_numbers = #tpu.dot_dimension_numbers<[1], [0], [0], [1], [0, 0, 1, 1], [], []>} : vector<48x32xf32>, vector<32x32xf32>, vector<48x32xf32> -> vector<48x32xf32>
      %353 = vector.shape_cast %352 : vector<48x32xf32> to vector<3x16x32xf32>
      %354 = arith.mulf %353, %353 : vector<3x16x32xf32>
      %cst_124 = arith.constant dense<0.000000e+00> : vector<16x32xf32>
      %355 = vector.multi_reduction <add>, %354, %cst_124 [0] : vector<3x16x32xf32> to vector<16x32xf32>
      %356 = math.sqrt %355 : vector<16x32xf32>
      %357 = tpu.concatenate %312, %356 in 1 : vector<16x128xf32>, vector<16x32xf32> -> vector<16x160xf32>
      %cst_125 = arith.constant dense<0.000000e+00> : vector<16x128xf32>
      %358 = tpu.matmul %357, %348, %cst_125 {dimension_numbers = #tpu.dot_dimension_numbers<[1], [0], [0], [1], [0, 0, 1, 1], [], []>} : vector<16x160xf32>, vector<160x128xf32>, vector<16x128xf32> -> vector<16x128xf32>
      %359 = vector.shape_cast %353 : vector<3x16x32xf32> to vector<48x32xf32>
      %cst_126 = arith.constant dense<0.000000e+00> : vector<48x32xf32>
      %360 = tpu.matmul %359, %347, %cst_126 {dimension_numbers = #tpu.dot_dimension_numbers<[1], [0], [0], [1], [0, 0, 1, 1], [], []>} : vector<48x32xf32>, vector<32x32xf32>, vector<48x32xf32> -> vector<48x32xf32>
      %361 = vector.shape_cast %360 : vector<48x32xf32> to vector<3x16x32xf32>
      %cst_127 = arith.constant dense<0.000000e+00> : vector<16x32xf32>
      %362 = tpu.matmul %358, %349, %cst_127 {dimension_numbers = #tpu.dot_dimension_numbers<[1], [0], [0], [1], [0, 0, 1, 1], [], []>} : vector<16x128xf32>, vector<128x32xf32>, vector<16x32xf32> -> vector<16x32xf32>
      %363 = vector.broadcast %350 : vector<1x32xf32> to vector<16x32xf32>
      %364 = arith.addf %362, %363 : vector<16x32xf32>
      %cst_128 = arith.constant -3.000000e+01 : f32
      %cst_129 = arith.constant 3.000000e+01 : f32
      %365 = vector.broadcast %cst_128 : f32 to vector<16x32xf32>
      %366 = arith.maximumf %365, %364 : vector<16x32xf32>
      %367 = vector.broadcast %cst_129 : f32 to vector<16x32xf32>
      %368 = arith.minimumf %367, %366 : vector<16x32xf32>
      %cst_130 = arith.constant 0.000000e+00 : f32
      %369 = vector.broadcast %cst_130 : f32 to vector<16x32xf32>
      %370 = arith.subf %369, %368 : vector<16x32xf32>
      %371 = math.exp %370 : vector<16x32xf32>
      %cst_131 = arith.constant 1.000000e+00 : f32
      %372 = vector.broadcast %cst_131 : f32 to vector<16x32xf32>
      %373 = arith.addf %372, %371 : vector<16x32xf32>
      %374 = tpu.reciprocal %373 {approx = true} : vector<16x32xf32> -> vector<16x32xf32>
      %375 = vector.shape_cast %374 : vector<16x32xf32> to vector<1x16x32xf32>
      %376 = vector.broadcast %375 : vector<1x16x32xf32> to vector<3x16x32xf32>
      %377 = arith.mulf %361, %376 : vector<3x16x32xf32>
      %378 = vector.extract_strided_slice %377 {offsets = [0, 0, 0], sizes = [1, 16, 32], strides = [1, 1, 1]} : vector<3x16x32xf32> to vector<1x16x32xf32>
      %379 = vector.shape_cast %378 : vector<1x16x32xf32> to vector<16x32xf32>
      %380 = vector.extract_strided_slice %377 {offsets = [1, 0, 0], sizes = [1, 16, 32], strides = [1, 1, 1]} : vector<3x16x32xf32> to vector<1x16x32xf32>
      %381 = vector.shape_cast %380 : vector<1x16x32xf32> to vector<16x32xf32>
      %382 = vector.extract_strided_slice %377 {offsets = [2, 0, 0], sizes = [1, 16, 32], strides = [1, 1, 1]} : vector<3x16x32xf32> to vector<1x16x32xf32>
      %383 = vector.shape_cast %382 : vector<1x16x32xf32> to vector<16x32xf32>
      %384 = tpu.concatenate %358, %379, %381, %383 in 1 : vector<16x128xf32>, vector<16x32xf32>, vector<16x32xf32>, vector<16x32xf32> -> vector<16x224xf32>
      %c0_132 = arith.constant 0 : index
      %c0_133 = arith.constant 0 : index
      %385 = vector.load %arg10[%c0_132, %c0_133] : memref<16x224xf32, #tpu.memory_space<vmem>>, vector<16x224xf32>
      tpu.vector_store %arg10[%c0_132, %c0_133], %384 {strides = array<i32>} : memref<16x224xf32, #tpu.memory_space<vmem>>, vector<16x224xf32>,
    } else {
    }
    return
  }
  func.func @transform_0(%arg0: i32) -> (i32, i32) {
    %c0_i32 = arith.constant 0 : i32
    %c0_i32_0 = arith.constant 0 : i32
    %c0_i32_1 = arith.constant 0 : i32
    return %c0_i32, %c0_i32_0 : i32, i32
  }
  func.func @transform_1(%arg0: i32) -> (i32, i32, i32) {
    %c0_i32 = arith.constant 0 : i32
    %c0_i32_0 = arith.constant 0 : i32
    %c0_i32_1 = arith.constant 0 : i32
    %c0_i32_2 = arith.constant 0 : i32
    return %c0_i32, %c0_i32_0, %c0_i32_1 : i32, i32, i32
  }
  func.func @transform_2(%arg0: i32) -> (i32, i32) {
    %c0_i32 = arith.constant 0 : i32
    %c0_i32_0 = arith.constant 0 : i32
    return %arg0, %c0_i32 : i32, i32
  }
  func.func @transform_3(%arg0: i32) -> (i32, i32) {
    %c0_i32 = arith.constant 0 : i32
    %c0_i32_0 = arith.constant 0 : i32
    return %arg0, %c0_i32 : i32, i32
  }
  func.func @transform_4(%arg0: i32) -> (i32, i32) {
    %c0_i32 = arith.constant 0 : i32
    %c0_i32_0 = arith.constant 0 : i32
    return %arg0, %c0_i32 : i32, i32
  }
  func.func @transform_5(%arg0: i32) -> (i32, i32) {
    %c0_i32 = arith.constant 0 : i32
    %c0_i32_0 = arith.constant 0 : i32
    return %c0_i32, %arg0 : i32, i32
  }
  func.func @transform_6(%arg0: i32) -> (i32, i32) {
    %c0_i32 = arith.constant 0 : i32
    %c0_i32_0 = arith.constant 0 : i32
    %c0_i32_1 = arith.constant 0 : i32
    return %c0_i32, %c0_i32_0 : i32, i32
  }
  func.func @transform_7(%arg0: i32) -> (i32, i32) {
    %c0_i32 = arith.constant 0 : i32
    %c0_i32_0 = arith.constant 0 : i32
    %c0_i32_1 = arith.constant 0 : i32
    return %c0_i32, %c0_i32_0 : i32, i32
  }
  func.func @transform_8(%arg0: i32) -> (i32, i32) {
    %c0_i32 = arith.constant 0 : i32
    %c0_i32_0 = arith.constant 0 : i32
    %c0_i32_1 = arith.constant 0 : i32
    return %c0_i32, %c0_i32_0 : i32, i32
  }
  func.func @transform_9(%arg0: i32) -> (i32, i32) {
    %c0_i32 = arith.constant 0 : i32
    %c0_i32_0 = arith.constant 0 : i32
    %c0_i32_1 = arith.constant 0 : i32
    return %c0_i32, %c0_i32_0 : i32, i32
  }
}

</mosaic_0001>

<bundles_post_ra>
// kernel: tpu_custom_call.1
= control target key start
LH: loop header
LB: loop body
LE: loop exit
PB: predicated region body
PF: predicated region fallthrough
CT: control target
= control target key end

     0   :  { %14 = vsyncpa [#allocation5], 0  ;;  %s9280_s30 = smov 0   ;;  %s14866_s0 = inlined_call_operand.vmem [shape: f32[16,128], index: 0, kind: input, shape index: {}]   ;;  %s14867_s1 = inlined_call_operand.vmem [shape: f32[3,16,32], index: 1, kind: input, shape index: {}]   ;;  %s14868_s2 = inlined_call_operand.vmem [shape: f32[256,3], index: 2, kind: input, shape index: {}]   ;;  %s14869_s3 = inlined_call_operand.vmem [shape: f32[256,1], index: 3, kind: input, shape index: {}]   ;;  %s14870_s4 = inlined_call_operand.vmem [shape: s32[256,1], index: 4, kind: input, shape index: {}]   ;;  %s14871_s5 = inlined_call_operand.vmem [shape: s32[1,256], index: 5, kind: input, shape index: {}]   ;;  %s14872_s6 = inlined_call_operand.vmem [shape: f32[1224,32], index: 6, kind: input, shape index: {}]   ;;  %s14873_s7 = inlined_call_operand.vmem [shape: f32[656,128], index: 7, kind: input, shape index: {}]   ;;  %s14874_s8 = inlined_call_operand.vmem [shape: f32[40,160], index: 8, kind: input, shape index: {}]   ;;  %s14875_s9 = inlined_call_operand.hbm [shape: f32[16,224], index: 9, kind: output, shape index: {}]  }
   0x1 LB: > { %s9286_s10 = sadd.s32 4294967295, %s9209_s30   ;;  %p8100_p0 = scmp.ge.s32.totalorder %s9209_s30, 1  ;;  %s9209_s30 = sphi %s9280_s30, %s20_s30  }
   0x2   : > { %p314_p1 = scmp.lt.s32.totalorder %s9209_s30, 3 }
   0x4   : > { %p315_p2 = pnand %p8100_p0, %p314_p1 }
   0x6   : > { %318 = sbr.rel (%p315_p2) target bundleno = 5063 (0x13c7), region = 56 }
   0xb   : > { %s8101_s11 = sshll.u32 %s9286_s10, 4  ;;  %p376_p3 = scmp.lt.s32.totalorder %s9286_s10, 1 }
   0xc   : > { %p359_p4 = scmp.lt.s32.totalorder %s8101_s11, 31  ;;  %p8107_p5 = scmp.ne.s32.totalorder %s9286_s10, 0 }
   0xd   : > { %s9293_s12 = scalar_select %p376_p3, %s9286_s10, 1 }
   0xe   : > { %s15568_s11 = smov (!%p359_p4, %s8101_s11), 31  ;;  %382 = sbr.rel (%p8107_p5) target bundleno = 629 (0x275), region = 60 }
   0xf   : > { %s378_s15 = scalar_lea.vmem %s14871_s5, %s9293_s12  ;;  %s8102_s16 = sshll.u32 %s15568_s11, 3 }
  0x10   : > { %s9302_s19 = scalar_lea.vmem %s14868_s2, %s8102_s16  ;;  %s9307_s22 = scalar_lea.vmem %s14869_s3, %s8102_s16 }
  0x11   : > { %s9312_s25 = scalar_lea.vmem %s14870_s4, %s8102_s16  ;;  %s9211_s17 = smov (!%p8107_p5), 64  }
  0x12   : > { %s9212_s18 = smov (!%p8107_p5), 32  }
  0x13   : > { %v394_v0 = vld [vmem:[%s14872_s6 + $0x18] sm:$0xff]  ;;  %v393_v1 = vld [vmem:[%s14872_s6 + $0x10] sm:$0xff]  ;;  %v392_v2 = vld [vmem:[%s14872_s6 + $0x8] sm:$0xff]  ;;  %vm436_vm0 = vcmask 261120   ;;  %vm701_vm5 = vcmask 785408   ;;  %vm697_vm6 = vcmask 523264  }
  0x14   : > { %467 = vmatpush.msra.mxu0 %v394_v0  ;;  %v391_v3 = vld [vmem:[%s14872_s6] sm:$0xff]  ;;  %v386_v5 = vld [vmem:[%s14867_s1 + $0x8] sm:$0xff]  ;;  %v398_v6 = vld [vmem:[%s14872_s6 + $0x38] sm:$0xff] }
  0x15   : > { %v385_v4 = vld [vmem:[%s14867_s1] sm:$0xff]  ;;  %v397_v7 = vld [vmem:[%s14872_s6 + $0x30] sm:$0xff]  ;;  %612 = vmatpush.msra.mxu3 %v398_v6  ;;  %v396_v8 = vld [vmem:[%s14872_s6 + $0x28] sm:$0xff] }
  0x16   : > { %468 = vmatpush.msra.mxu0 %v393_v1  ;;  %v387_v9 = vld [vmem:[%s14867_s1 + $0x10] sm:$0xff]  ;;  %v388_v10 = vld [vmem:[%s14867_s1 + $0x18] sm:$0xff]  ;;  %v389_v11 = vld [vmem:[%s14867_s1 + $0x20] sm:$0xff] }
  0x17   : > { %613 = vmatpush.msra.mxu3 %v397_v7  ;;  %v390_v12 = vld [vmem:[%s14867_s1 + $0x28] sm:$0xff]  ;;  %v395_v13 = vld [vmem:[%s14872_s6 + $0x20] sm:$0xff]  ;;  %v414_v15 = vld [vmem:[%s14873_s7 + $0x78] sm:$0xff] }
  0x18   : > { %469 = vmatpush.msra.mxu0 %v392_v2  ;;  %536 = vmatpush.msra.mxu1 %v414_v15  ;;  %v413_v16 = vld [vmem:[%s14873_s7 + $0x70] sm:$0xff]  ;;  %v412_v17 = vld [vmem:[%s14873_s7 + $0x68] sm:$0xff]  ;;  %v411_v18 = vld [vmem:[%s14873_s7 + $0x60] sm:$0xff] }
  0x19   : > { %614 = vmatpush.msra.mxu3 %v396_v8  ;;  %v410_v20 = vld [vmem:[%s14873_s7 + $0x58] sm:$0xff]  ;;  %v409_v21 = vld [vmem:[%s14873_s7 + $0x50] sm:$0xff]  ;;  %v408_v22 = vld [vmem:[%s14873_s7 + $0x48] sm:$0xff] }
  0x1a   : > { %470 = vmatpush.msra.mxu0 %v391_v3  ;;  %537 = vmatpush.msra.mxu1 %v413_v16  ;;  %v407_v23 = vld [vmem:[%s14873_s7 + $0x40] sm:$0xff]  ;;  %v418_v24 = vld [vmem:[%s14873_s7 + $0x98] sm:$0xff]  ;;  %v417_v25 = vld [vmem:[%s14873_s7 + $0x90] sm:$0xff] }
  0x1b   : > { %8108 = vmatmul.msk.f32.vlgmr.msra.gmra.mxu0 %vm436_vm0, %v385_v4  ;;  %615 = vmatpush.msra.mxu3 %v395_v13  ;;  %v406_v26 = vld [vmem:[%s14873_s7 + $0x38] sm:$0xff]  ;;  %v416_v27 = vld [vmem:[%s14873_s7 + $0x88] sm:$0xff]  ;;  %v405_v29 = vld [vmem:[%s14873_s7 + $0x30] sm:$0xff] }
  0x1c   : > { %538 = vmatpush.msra.mxu1 %v412_v17  ;;  %571 = vmatpush.msra.mxu2 %v418_v24  ;;  %v415_v30 = vld [vmem:[%s14873_s7 + $0x80] sm:$0xff]  ;;  %v404_v31 = vld [vmem:[%s14873_s7 + $0x28] sm:$0xff]  ;;  %v402_v33 = vld [vmem:[%s14873_s7 + $0x18] sm:$0xff] }
  0x1d   : > { %v403_v32 = vld [vmem:[%s14873_s7 + $0x20] sm:$0xff]  ;;  %v401_v36 = vld [vmem:[%s14873_s7 + $0x10] sm:$0xff]  ;;  %v400_v37 = vld [vmem:[%s14873_s7 + $0x8] sm:$0xff] }
  0x1e   : > { %539 = vmatpush.msra.mxu1 %v411_v18  ;;  %572 = vmatpush.msra.mxu2 %v417_v25  ;;  %v399_v39 = vld [vmem:[%s14873_s7] sm:$0xff]  ;;  %v384_v50 = vld [vmem:[%s14866_s0 + $0x8] sm:$0xff]  ;;  %v433_v15 = vld [vmem:[%s14872_s6 + $0xb0] sm:$0xff] }
  0x1f   : > { %v383_v40 = vld [vmem:[%s14866_s0] sm:$0xff]  ;;  %v432_v16 = vld [vmem:[%s14872_s6 + $0xa8] sm:$0xff]  ;;  %v430_v18 = vld [vmem:[%s14872_s6 + $0x98] sm:$0xff] }
  0x20   : > { %540 = vmatpush.msra.mxu1 %v410_v20  ;;  %573 = vmatpush.msra.mxu2 %v416_v27  ;;  %v431_v17 = vld [vmem:[%s14872_s6 + $0xa0] sm:$0xff]  ;;  %v428_v20 = vld [vmem:[%s14872_s6 + $0x88] sm:$0xff]  ;;  %v421_v27 = vld [vmem:[%s14872_s6 + $0x50] sm:$0xff] }
  0x21   : > { %v424_v24 = vld [vmem:[%s14872_s6 + $0x68] sm:$0xff]  ;;  %v423_v25 = vld [vmem:[%s14872_s6 + $0x60] sm:$0xff] }
  0x22   : > { %541 = vmatpush.msra.mxu1 %v409_v21  ;;  %574 = vmatpush.msra.mxu2 %v415_v30  ;;  %v427_v21 = vld [vmem:[%s14872_s6 + $0x80] sm:$0xff] }
  0x23   : > { %8109 = vmatmul.msk.f32.gmra.mxu0 %vm436_vm0, %v386_v5 }
  0x24   : > { %542 = vmatpush.msra.mxu1 %v408_v22  ;;  %v426_v22 = vld [vmem:[%s14872_s6 + $0x78] sm:$0xff] }
  0x26   : > { %543 = vmatpush.msra.mxu1 %v407_v23  ;;  %v425_v23 = vld [vmem:[%s14872_s6 + $0x70] sm:$0xff] }
  0x28   : > { %544 = vmatpush.msra.mxu1 %v406_v26  ;;  %v422_v26 = vld [vmem:[%s14872_s6 + $0x58] sm:$0xff] }
  0x2a   : > { %545 = vmatpush.msra.mxu1 %v405_v29  ;;  %v419_v29 = vld [vmem:[%s14872_s6 + $0x40] sm:$0xff] }
  0x2b   : > { %8110 = vmatmul.msk.f32.gmra.mxu0 %vm436_vm0, %v387_v9 }
  0x2c   : > { %546 = vmatpush.msra.mxu1 %v404_v31 }
  0x2e   : > { %547 = vmatpush.msra.mxu1 %v403_v32 }
  0x30   : > { %548 = vmatpush.msra.mxu1 %v402_v33 }
  0x32   : > { %549 = vmatpush.msra.mxu1 %v401_v36 }
  0x33   : > { %8111 = vmatmul.msk.f32.gmra.mxu0 %vm436_vm0, %v388_v10 }
  0x34   : > { %550 = vmatpush.msra.mxu1 %v400_v37 }
  0x36   : > { %551 = vmatpush.msra.mxu1 %v399_v39 }
  0x37   : > { %552 = vmatmul.f32.vlgmr.msra.gmra.mxu1 %v383_v40 }
  0x3b   : > { %8112 = vmatmul.msk.f32.gmra.mxu0 %vm436_vm0, %v389_v11 }
  0x3f   : > { %555 = vmatmul.f32.gmra.mxu1 %v384_v50 }
  0x43   : > { %8113 = vmatmul.msk.f32.gmra.mxu0 %vm436_vm0, %v390_v12 }
  0x98   : > { %v472_v14 = vpop.f32.mrf.mxu0 }
  0x99   : > { %8116 = vmatmul.msk.f32.vlgmr.msra.gmra.mxu3 %vm436_vm0, %v472_v14  ;;  %v490_v38 = vmul.f32 %v472_v14, %v472_v14  ;;  %v434_v14 = vld [vmem:[%s14872_s6 + $0xb8] sm:$0xff] }
  0x9a   : > { %636 = vmatpush.msrb.mxu2 %v434_v14 }
  0x9b   : > { %v496_v43 = vsel %vm436_vm0, %v490_v38, 0.0  ;;  %v8681_v38 = vld [vmem:[%s14872_s6 + $0xc0] ss:$0 sm:$0xff] }
  0x9c   : > { %637 = vmatpush.msrb.mxu2 %v433_v15 }
  0x9e   : > { %638 = vmatpush.msrb.mxu2 %v432_v16 }
  0xa0   : > { %v475_v19 = vpop.f32.mrf.mxu0  ;;  %639 = vmatpush.msrb.mxu2 %v431_v17 }
  0xa1   : > { %8117 = vmatmul.msk.f32.gmra.mxu3 %vm436_vm0, %v475_v19  ;;  %v491_v49 = vmul.f32 %v475_v19, %v475_v19  ;;  %v429_v19 = vld [vmem:[%s14872_s6 + $0x90] sm:$0xff] }
  0xa2   : > { %640 = vmatpush.msrb.mxu2 %v430_v18 }
  0xa3   : > { %v501_v53 = vsel %vm436_vm0, %v491_v49, 0.0 }
  0xa4   : > { %641 = vmatpush.msrb.mxu2 %v429_v19 }
  0xa6   : > { %642 = vmatpush.msrb.mxu2 %v428_v20 }
  0xa8   : > { %v478_v28 = vpop.f32.mrf.mxu0  ;;  %643 = vmatpush.msrb.mxu2 %v427_v21 }
  0xa9   : > { %8118 = vmatmul.msk.f32.gmra.mxu3 %vm436_vm0, %v478_v28  ;;  %v492_v35 = vmul.f32 %v478_v28, %v478_v28  ;;  %v420_v28 = vld [vmem:[%s14872_s6 + $0x48] sm:$0xff] }
  0xaa   : > { %644 = vmatpush.msrb.mxu2 %v426_v22 }
  0xab   : > { %v497_v41 = vsel %vm436_vm0, %v492_v35, 0.0 }
  0xac   : > { %v498_v45 = vadd.f32 %v497_v41, %v496_v43  ;;  %645 = vmatpush.msrb.mxu2 %v425_v23 }
  0xae   : > { %646 = vmatpush.msrb.mxu2 %v424_v24 }
  0xb0   : > { %v481_v34 = vpop.f32.mrf.mxu0  ;;  %647 = vmatpush.msrb.mxu2 %v423_v25 }
  0xb1   : > { %8119 = vmatmul.msk.f32.gmra.mxu3 %vm436_vm0, %v481_v34  ;;  %v493_v46 = vmul.f32 %v481_v34, %v481_v34 }
  0xb2   : > { %648 = vmatpush.msrb.mxu2 %v422_v26 }
  0xb3   : > { %v502_v51 = vsel %vm436_vm0, %v493_v46, 0.0 }
  0xb4   : > { %v503_v55 = vadd.f32 %v502_v51, %v501_v53  ;;  %649 = vmatpush.msrb.mxu2 %v421_v27  ;;  %v553_v30 = vpop.f32.mrf.mxu1 }
  0xb6   : > { %650 = vmatpush.msrb.mxu2 %v420_v28 }
  0xb8   : > { %v484_v42 = vpop.f32.mrf.mxu0  ;;  %651 = vmatpush.msrb.mxu2 %v419_v29 }
  0xb9   : > { %v494_v44 = vmul.f32 %v484_v42, %v484_v42  ;;  %8120 = vmatmul.msk.f32.gmra.mxu3 %vm436_vm0, %v484_v42 }
  0xbb   : > { %v499_v47 = vsel %vm436_vm0, %v494_v44, 0.0 }
  0xbc   : > { %v500_v48 = vadd.f32 %v499_v47, %v498_v45  ;;  %v556_v33 = vpop.f32.mrf.mxu1 }
  0xbe   : > { %8682 = vrsqrt.f32 %v500_v48  ;;  %vm513_vm1 = vcmp.eq.f32.partialorder %v500_v48, inf  ;;  %v516_v4 = vand.u32 2147483648, %v500_v48  ;;  %vm515_vm2 = vcmp.eq.f32.partialorder %v500_v48, 0.0 }
  0xc0   : > { %v487_v52 = vpop.f32.mrf.mxu0 }
  0xc1   : > { %v495_v54 = vmul.f32 %v487_v52, %v487_v52  ;;  %8121 = vmatmul.msk.f32.gmra.mxu3 %vm436_vm0, %v487_v52 }
  0xc3   : > { %v504_v56 = vsel %vm436_vm0, %v495_v54, 0.0 }
  0xc4   : > { %v8683_v57 = vpop.eup %8682  ;;  %v505_v58 = vadd.f32 %v504_v56, %v503_v55 }
  0xc5   : > { %v507_v59 = vmul.f32 %v8683_v57, %v500_v48 }
  0xc6   : > { %8684 = vrsqrt.f32 %v505_v58  ;;  %vm525_vm3 = vcmp.eq.f32.partialorder %v505_v58, inf  ;;  %v528_v11 = vand.u32 2147483648, %v505_v58  ;;  %vm527_vm4 = vcmp.eq.f32.partialorder %v505_v58, 0.0 }
  0xc7   : > { %v508_v60 = vmul.f32 %v8683_v57, %v507_v59 }
  0xc9   : > { %v509_v61 = vmul.f32 0.5, %v508_v60 }
  0xcb   : > { %v510_v62 = vsub.f32 1.5, %v509_v61 }
  0xcc   : > { %v8685_v63 = vpop.eup %8684 }
  0xcd   : > { %v511_v0 = vmul.f32 %v8683_v57, %v510_v62  ;;  %v519_v1 = vmul.f32 %v8685_v63, %v505_v58 }
  0xcf   : > { %v512_v2 = vmul.f32 %v511_v0, %v500_v48  ;;  %v520_v3 = vmul.f32 %v8685_v63, %v519_v1 }
  0xd1   : > { %v514_v5 = vsel %vm513_vm1, %v500_v48, %v512_v2  ;;  %v521_v6 = vmul.f32 0.5, %v520_v3 }
  0xd2   : > { %v517_v7 = vsel %vm515_vm2, %v516_v4, %v514_v5 }
  0xd3   : > { %8114 = vmatmul.msk.f32.vlgmr.msra.gmra.mxu2 %vm436_vm0, %v517_v7  ;;  %v522_v8 = vsub.f32 1.5, %v521_v6 }
  0xd5   : > { %v523_v9 = vmul.f32 %v8685_v63, %v522_v8  ;;  %v9213_v63 = vmov 0.0  }
  0xd6   : > { %705 = vst [vmem:[#allocation3] sm:$0xff] %v9213_v63 }
  0xd7   : > { %v524_v10 = vmul.f32 %v523_v9, %v505_v58  ;;  %706 = vst.msk [vmem:[#allocation3 + $0x8] sm:$0xff] %vm701_vm5, %v9213_v63 }
  0xd8   : > { %707 = vst [vmem:[#allocation3 + $0x10] sm:$0xff] %v9213_v63 }
  0xd9   : > { %v526_v12 = vsel %vm525_vm3, %v505_v58, %v524_v10  ;;  %708 = vst.msk [vmem:[#allocation3 + $0x18] sm:$0xff] %vm701_vm5, %v9213_v63 }
  0xda   : > { %v529_v13 = vsel %vm527_vm4, %v528_v11, %v526_v12 }
  0xdb   : > { %8115 = vmatmul.msk.f32.gmra.mxu2 %vm436_vm0, %v529_v13 }
 0x11c   : > { %v617_v36 = vpop.f32.mrf.mxu3 }
 0x124   : > { %v620_v37 = vpop.f32.mrf.mxu3 }
 0x12c   : > { %v623_v41 = vpop.f32.mrf.mxu3 }
 0x134   : > { %v626_v48 = vpop.f32.mrf.mxu3 }
 0x13c   : > { %v629_v53 = vpop.f32.mrf.mxu3 }
 0x144   : > { %v632_v60 = vpop.f32.mrf.mxu3 }
 0x156   : > { %v576_v31 = vpop.f32.mrf.mxu2 }
 0x157   : > { %v577_v32 = vadd.f32 %v576_v31, %v553_v30 }
 0x159   : > { %700 = vst [vmem:[#allocation2] sm:$0xff] %v577_v32  ;;  %652 = vmatmul.f32.vlgmr.msrb.gmra.mxu2 %v577_v32 }
 0x15e   : > { %v579_v34 = vpop.f32.mrf.mxu2 }
 0x15f   : > { %v580_v35 = vadd.f32 %v579_v34, %v556_v33 }
 0x161   : > { %703 = vst [vmem:[#allocation2 + $0x10] sm:$0xff] %v580_v35  ;;  %655 = vmatmul.f32.gmra.mxu2 %v580_v35 }
 0x1dc   : > { %v653_v39 = vpop.f32.mrf.mxu2 }
 0x1dd   : > { %v654_v40 = vadd.f32 %v8681_v38, %v653_v39 }
 0x1df   : > { %v8122_v42 = vclamps-f32 %v654_v40, 30.0 }
 0x1e1   : > { %v663_v43 = vsub.f32 0.0, %v8122_v42 }
 0x1e3   : > { %v665_v44 = vmul.f32 1.442695, %v663_v43 }
 0x1e4   : > { %v656_v45 = vpop.f32.mrf.mxu2 }
 0x1e5   : > { %8686 = vpow2.f32 %v665_v44  ;;  %v657_v46 = vadd.f32 %v8681_v38, %v656_v45 }
 0x1e7   : > { %v8123_v47 = vclamps-f32 %v657_v46, 30.0 }
 0x1e9   : > { %v664_v49 = vsub.f32 0.0, %v8123_v47 }
 0x1eb   : > { %v8687_v50 = vpop.eup %8686  ;;  %v667_v51 = vmul.f32 1.442695, %v664_v49 }
 0x1ec   : > { %v669_v52 = vadd.f32 1.0, %v8687_v50 }
 0x1ed   : > { %8688 = vpow2.f32 %v667_v51 }
 0x1ee   : > { %8690 = vrcp.f32 %v669_v52 }
 0x1f3   : > { %v8689_v54 = vpop.eup %8688 }
 0x1f4   : > { %v8691_v55 = vpop.eup %8690  ;;  %v670_v56 = vadd.f32 1.0, %v8689_v54 }
 0x1f5   : > { %v677_v57 = vmul.f32 %v8691_v55, %v629_v53  ;;  %v675_v58 = vmul.f32 %v8691_v55, %v623_v41  ;;  %v673_v0 = vmul.f32 %v8691_v55, %v617_v36 }
 0x1f6   : > { %8692 = vrcp.f32 %v670_v56 }
 0x1f7   : > { %689 = vrot.lane.b32.xlu1 %v677_v57, %s9211_s17  ;;  %681 = vrot.lane.b32.xlu0 %v675_v58, %s9212_s18 }
 0x1fc   : > { %v8693_v59 = vpop.eup %8692 }
 0x1fd   : > { %v678_v61 = vmul.f32 %v8693_v59, %v632_v60  ;;  %v676_v62 = vmul.f32 %v8693_v59, %v626_v48  ;;  %v674_v5 = vmul.f32 %v8693_v59, %v620_v37 }
 0x1ff   : > { %691 = vrot.lane.b32.xlu1 %v678_v61, %s9211_s17  ;;  %683 = vrot.lane.b32.xlu0 %v676_v62, %s9212_s18 }
 0x269   : > { %v690_v1 = vpop.permute.xlu1 %689  ;;  %v682_v2 = vpop.permute.xlu0 %681 }
 0x26a   : > { %v695_v3 = vsel %vm436_vm0, %v673_v0, %v682_v2 }
 0x26b   : > { %v698_v4 = vsel %vm697_vm6, %v695_v3, %v690_v1 }
 0x26c   : > { %702 = vst.msk [vmem:[#allocation2 + $0x8] sm:$0xff] %vm701_vm5, %v698_v4 }
 0x271   : > { %v692_v6 = vpop.permute.xlu1 %691  ;;  %v684_v7 = vpop.permute.xlu0 %683 }
 0x272   : > { %v696_v8 = vsel %vm436_vm0, %v674_v5, %v684_v7 }
 0x273   : > { %v699_v9 = vsel %vm697_vm6, %v696_v8, %v692_v6 }
 0x274   : > { %704 = vst.msk [vmem:[#allocation2 + $0x18] sm:$0xff] %vm701_vm5, %v699_v9 }
 0x275 PF: > { %v9501_v10 = vld [vmem:[%s9302_s19 + $0x18] sm:$0xff]  ;;  %vm741_vm7 = vcmask 23552   ;;  %v9504_v11 = vld [vmem:[%s9302_s19 + $0x8] sm:$0xff]  ;;  %v9514_v15 = vld [vmem:[%s9302_s19 + $0x20] sm:$0xff]  ;;  %v9214_v52 = vmov 0   ;;  %s9218_s14 = smov 32  }
 0x276   : > { %v728_v12 = vmul.f32 %v9501_v10, %v9501_v10  ;;  %v726_v13 = vmul.f32 %v9504_v11, %v9504_v11  ;;  %v9511_v14 = vld [vmem:[%s9302_s19 + $0x28] sm:$0xff]  ;;  %v9517_v16 = vld [vmem:[%s9302_s19 + $0x10] sm:$0xff]  ;;  %v729_v22 = vmul.f32 %v9514_v15, %v9514_v15  ;;  %v9537_v28 = vld [vmem:[%s9302_s19 + $0x38] sm:$0xff]  ;;  %8696 = vset.pattern.permute.xlu0 %v9214_v52  ;;  %8694 = vset.pattern.permute.xlu2 %v9214_v52  ;;  %s9219_s11 = smov 96   ;;  %s9220_s28 = smov 64  }
 0x277   : > { %v730_v17 = vmul.f32 %v9511_v14, %v9511_v14  ;;  %v9524_v20 = vld [vmem:[%s9302_s19 + $0x30] sm:$0xff]  ;;  %v727_v23 = vmul.f32 %v9517_v16, %v9517_v16  ;;  %v9540_v29 = vld [vmem:[%s9302_s19 + $0x40] sm:$0xff]  ;;  %v9543_v30 = vld [vmem:[%s9302_s19 + $0x48] sm:$0xff]  ;;  %v732_v31 = vmul.f32 %v9537_v28, %v9537_v28  ;;  %8695 = vset.pattern.permute.xlu1 %v9214_v52  ;;  %p8595_p6 = scmp.ne.s32.totalorder %s9286_s10, 1 }
 0x278   : > { %v751_v18 = vsel %vm741_vm7, %v728_v12, 0.0  ;;  %v745_v19 = vsel %vm741_vm7, %v726_v13, 0.0  ;;  %v731_v24 = vmul.f32 %v9524_v20, %v9524_v20  ;;  %v754_v25 = vsel %vm741_vm7, %v729_v22, 0.0  ;;  %v9554_v36 = vld [vmem:[%s9302_s19 + $0x50] sm:$0xff]  ;;  %v9558_v38 = vld [vmem:[%s9302_s19 + $0x58] sm:$0xff]  ;;  %v9567_v43 = vld [vmem:[%s9302_s19 + $0x60] sm:$0xff] }
 0x279   : > { %752 = vadd.xlane.f32.xlu1 %v751_v18  ;;  %746 = vadd.xlane.f32.xlu0 %v745_v19  ;;  %v757_v21 = vsel %vm741_vm7, %v730_v17, 0.0  ;;  %v748_v26 = vsel %vm741_vm7, %v727_v23, 0.0  ;;  %v733_v32 = vmul.f32 %v9540_v29, %v9540_v29  ;;  %v734_v33 = vmul.f32 %v9543_v30, %v9543_v30  ;;  %v9573_v46 = vld [vmem:[%s9302_s19 + $0x68] sm:$0xff]  ;;  %s9223_s13 = smov (!%p8595_p6), 64   ;;  %s9226_s16 = smov (!%p8595_p6), 32  }
 0x27a   : > { %758 = vadd.xlane.f32.xlu2 %v757_v21  ;;  %v760_v27 = vsel %vm741_vm7, %v731_v24, 0.0  ;;  %v763_v34 = vsel %vm741_vm7, %v732_v31, 0.0  ;;  %v735_v39 = vmul.f32 %v9554_v36, %v9554_v36  ;;  %v736_v40 = vmul.f32 %v9558_v38, %v9558_v38 }
 0x27b   : > { %v766_v35 = vsel %vm741_vm7, %v733_v32, 0.0  ;;  %v769_v37 = vsel %vm741_vm7, %v734_v33, 0.0  ;;  %v737_v44 = vmul.f32 %v9567_v43, %v9567_v43  ;;  %v738_v47 = vmul.f32 %v9573_v46, %v9573_v46 }
 0x27c   : > { %v772_v41 = vsel %vm741_vm7, %v735_v39, 0.0  ;;  %v775_v42 = vsel %vm741_vm7, %v736_v40, 0.0 }
 0x27d   : > { %v778_v45 = vsel %vm741_vm7, %v737_v44, 0.0  ;;  %v781_v48 = vsel %vm741_vm7, %v738_v47, 0.0 }
 0x281   : > { %755 = vadd.xlane.f32.xlu1 %v754_v25  ;;  %749 = vadd.xlane.f32.xlu0 %v748_v26 }
 0x282   : > { %761 = vadd.xlane.f32.xlu2 %v760_v27 }
 0x289   : > { %764 = vadd.xlane.f32.xlu0 %v763_v34  ;;  %767 = vadd.xlane.f32.xlu1 %v766_v35 }
 0x28a   : > { %770 = vadd.xlane.f32.xlu2 %v769_v37 }
 0x291   : > { %773 = vadd.xlane.f32.xlu0 %v772_v41  ;;  %776 = vadd.xlane.f32.xlu1 %v775_v42 }
 0x299   : > { %779 = vadd.xlane.f32.xlu0 %v778_v45 }
 0x2a1   : > { %782 = vadd.xlane.f32.xlu0 %v781_v48 }
 0x2ec   : > { %v753_v49 = vpop.xlane.xlu1 %752  ;;  %v747_v50 = vpop.xlane.xlu0 %746 }
 0x2ed   : > { %8807 = vrsqrt.f32 %v753_v49  ;;  %v9578_v51 = vpop.xlane.xlu2 %758  ;;  %vm833_vm8 = vcmp.eq.f32.partialorder %v753_v49, inf  ;;  %vm835_vm9 = vcmp.eq.f32.partialorder %v753_v49, 0.0  ;;  %v836_v13 = vand.u32 2147483648, %v753_v49 }
 0x2ee   : > { %8809 = vrsqrt.f32 %v747_v50  ;;  %vm809_vm10 = vcmp.eq.f32.partialorder %v747_v50, inf  ;;  %v812_v21 = vand.u32 2147483648, %v747_v50  ;;  %vm811_vm11 = vcmp.eq.f32.partialorder %v747_v50, 0.0 }
 0x2f3   : > { %v8808_v53 = vpop.eup %8807 }
 0x2f4   : > { %v8810_v54 = vpop.eup %8809  ;;  %v827_v55 = vmul.f32 %v8808_v53, %v753_v49  ;;  %v9583_v56 = vpop.xlane.xlu1 %755 }
 0x2f5   : > { %v9585_v57 = vpop.xlane.xlu0 %749  ;;  %v803_v58 = vmul.f32 %v8810_v54, %v747_v50  ;;  %8811 = vrsqrt.f32 %v9583_v56  ;;  %v9590_v63 = vpop.xlane.xlu2 %761  ;;  %vm845_vm12 = vcmp.eq.f32.partialorder %v9583_v56, inf  ;;  %vm847_vm13 = vcmp.eq.f32.partialorder %v9583_v56, 0.0 }
 0x2f6   : > { %v828_v59 = vmul.f32 %v8808_v53, %v827_v55  ;;  %8813 = vrsqrt.f32 %v9585_v57  ;;  %v848_v44 = vand.u32 2147483648, %v9583_v56  ;;  %vm821_vm14 = vcmp.eq.f32.partialorder %v9585_v57, inf }
 0x2f7   : > { %v804_v60 = vmul.f32 %v8810_v54, %v803_v58  ;;  %8815 = vrsqrt.f32 %v9578_v51  ;;  %v824_v48 = vand.u32 2147483648, %v9585_v57  ;;  %vm823_vm15 = vcmp.eq.f32.partialorder %v9585_v57, 0.0 }
 0x2f8   : > { %v829_v61 = vmul.f32 0.5, %v828_v59  ;;  %8817 = vrsqrt.f32 %v9590_v63 }
 0x2f9   : > { %v805_v62 = vmul.f32 0.5, %v804_v60 }
 0x2fa   : > { %v830_v0 = vsub.f32 1.5, %v829_v61 }
 0x2fb   : > { %v8812_v1 = vpop.eup %8811  ;;  %v806_v2 = vsub.f32 1.5, %v805_v62 }
 0x2fc   : > { %v8814_v3 = vpop.eup %8813  ;;  %v831_v4 = vmul.f32 %v8808_v53, %v830_v0  ;;  %v839_v5 = vmul.f32 %v8812_v1, %v9583_v56 }
 0x2fd   : > { %v9594_v6 = vpop.eup %8815  ;;  %v807_v7 = vmul.f32 %v8810_v54, %v806_v2  ;;  %v815_v8 = vmul.f32 %v8814_v3, %v9585_v57 }
 0x2fe   : > { %v832_v9 = vmul.f32 %v831_v4, %v753_v49  ;;  %v840_v12 = vmul.f32 %v8812_v1, %v839_v5  ;;  %v851_v23 = vmul.f32 %v9594_v6, %v9578_v51  ;;  %v9601_v27 = vpop.eup %8817 }
 0x2ff   : > { %v808_v17 = vmul.f32 %v807_v7, %v747_v50  ;;  %v816_v18 = vmul.f32 %v8814_v3, %v815_v8  ;;  %v863_v41 = vmul.f32 %v9601_v27, %v9590_v63 }
 0x300   : > { %v834_v19 = vsel %vm833_vm8, %v753_v49, %v832_v9  ;;  %v841_v22 = vmul.f32 0.5, %v840_v12  ;;  %v852_v39 = vmul.f32 %v9594_v6, %v851_v23 }
 0x301   : > { %v810_v24 = vsel %vm809_vm10, %v747_v50, %v808_v17  ;;  %v817_v25 = vmul.f32 0.5, %v816_v18  ;;  %v9599_v26 = vsel %vm835_vm9, %v836_v13, %v834_v19  ;;  %v9618_v50 = vpop.xlane.xlu0 %764  ;;  %v864_v54 = vmul.f32 %v9601_v27, %v863_v41 }
 0x302   : > { %15086 = vst [vmem:[#allocation7_spill] sm:$0xff] %v9599_v26  ;;  %v842_v31 = vsub.f32 1.5, %v841_v22  ;;  %v985_v32 = vadd.f32 1e-07, %v9599_v26  ;;  %v9604_v33 = vsel %vm811_vm11, %v812_v21, %v810_v24  ;;  %v853_v49 = vmul.f32 0.5, %v852_v39 }
 0x303   : > { %15087 = vst [vmem:[#allocation8_spill] sm:$0xff] %v9604_v33  ;;  %v818_v34 = vsub.f32 1.5, %v817_v25  ;;  %v983_v35 = vadd.f32 1e-07, %v9604_v33  ;;  %v865_v2 = vmul.f32 0.5, %v864_v54  ;;  %vm857_vm9 = vcmp.eq.f32.partialorder %v9578_v51, inf }
 0x304   : > { %v843_v37 = vmul.f32 %v8812_v1, %v842_v31  ;;  %8819 = vrcp.f32 %v985_v32  ;;  %v854_v0 = vsub.f32 1.5, %v853_v49  ;;  %v1054_v4 = vand.u32 2147483648, %v985_v32 }
 0x305   : > { %v819_v40 = vmul.f32 %v8814_v3, %v818_v34  ;;  %8821 = vrcp.f32 %v983_v35  ;;  %v1052_v3 = vand.u32 2147483647, %v985_v32  ;;  %v1022_v7 = vand.u32 2147483647, %v983_v35 }
 0x306   : > { %v844_v42 = vmul.f32 %v843_v37, %v9583_v56  ;;  %8823 = vrsqrt.f32 %v9618_v50  ;;  %v1024_v9 = vand.u32 2147483648, %v983_v35  ;;  %v855_v13 = vmul.f32 %v9594_v6, %v854_v0  ;;  %v9674_v0 = vpop.xlane.xlu2 %770 }
 0x307   : > { %v820_v45 = vmul.f32 %v819_v40, %v9585_v57  ;;  %vm1048_vm2 = vweird.f32 %v985_v32  ;;  %vm1018_vm3 = vweird.f32 %v983_v35  ;;  %v866_v21 = vsub.f32 1.5, %v865_v2 }
 0x308   : > { %v846_v47 = vsel %vm845_vm12, %v9583_v56, %v844_v42  ;;  %vm1053_vm5 = vcmp.eq.f32.partialorder %v1052_v3, 8.507059e+37  ;;  %v1055_v23 = vor.u32 1.1754944e-38, %v1054_v4  ;;  %vm1023_vm6 = vcmp.eq.f32.partialorder %v1022_v7, 8.507059e+37 }
 0x309   : > { %v822_v53 = vsel %vm821_vm14, %v9585_v57, %v820_v45  ;;  %v9623_v55 = vsel %vm847_vm13, %v848_v44, %v846_v47  ;;  %v9639_v18 = vpop.xlane.xlu0 %773  ;;  %v1025_v34 = vor.u32 1.1754944e-38, %v1024_v9  ;;  %v867_v44 = vmul.f32 %v9601_v27, %v866_v21 }
 0x30a   : > { %15088 = vst [vmem:[#allocation9_spill] sm:$0xff] %v9623_v55  ;;  %v8820_v58 = vpop.eup %8819  ;;  %v9625_v59 = vsel %vm823_vm15, %v824_v48, %v822_v53  ;;  %v9628_v56 = vadd.f32 1e-07, %v9623_v55  ;;  %v856_v49 = vmul.f32 %v855_v13, %v9578_v51  ;;  %vm859_vm10 = vcmp.eq.f32.partialorder %v9578_v51, 0.0 }
 0x30b   : > { %15089 = vst [vmem:[#allocation10_spill] sm:$0xff] %v9625_v59  ;;  %v8822_v60 = vpop.eup %8821  ;;  %v9632_v61 = vadd.f32 1e-07, %v9625_v59  ;;  %v1044_v62 = vmul.f32 %v8820_v58, %v985_v32  ;;  %vm1049_vm0 = vweird.f32 %v8820_v58  ;;  %v9647_v32 = vpop.xlane.xlu1 %767  ;;  %vm869_vm12 = vcmp.eq.f32.partialorder %v9590_v63, inf }
 0x30c   : > { %v1014_v1 = vmul.f32 %v8822_v60, %v983_v35  ;;  %8825 = vrcp.f32 %v9628_v56  ;;  %v9636_v12 = vpop.eup %8823  ;;  %vm1019_vm1 = vweird.f32 %v8822_v60  ;;  %vm1050_vm4 = vmor %vm1048_vm2, %vm1049_vm0  ;;  %vm871_vm13 = vcmp.eq.f32.partialorder %v9590_v63, 0.0 }
 0x30d   : > { %8827 = vrcp.f32 %v9632_v61  ;;  %v1045_v57 = vsub.f32 1.0, %v1044_v62  ;;  %vm1020_vm8 = vmor %vm1018_vm3, %vm1019_vm1  ;;  %v875_v37 = vmul.f32 %v9636_v12, %v9618_v50  ;;  %v1037_v53 = vand.u32 2147483647, %v9632_v61 }
 0x30e   : > { %v1015_v5 = vsub.f32 1.0, %v1014_v1  ;;  %8829 = vrsqrt.f32 %v9639_v18  ;;  %v868_v62 = vmul.f32 %v867_v44, %v9590_v63  ;;  %vm1033_vm14 = vweird.f32 %v9632_v61 }
 0x30f   : > { %v1046_v8 = vmul.f32 %v8820_v58, %v1045_v57  ;;  %8831 = vrsqrt.f32 %v9647_v32  ;;  %v876_v54 = vmul.f32 %v9636_v12, %v875_v37  ;;  %v872_v57 = vand.u32 2147483648, %v9590_v63 }
 0x310   : > { %v1016_v17 = vmul.f32 %v8822_v60, %v1015_v5  ;;  %v858_v3 = vsel %vm857_vm9, %v9578_v51, %v856_v49  ;;  %vm1038_vm0 = vcmp.eq.f32.partialorder %v1037_v53, 8.507059e+37  ;;  %vm1063_vm2 = vweird.f32 %v9628_v56 }
 0x311   : > { %v1047_v19 = vadd.f32 %v8820_v58, %v1046_v8  ;;  %v877_v5 = vmul.f32 0.5, %v876_v54  ;;  %vm895_vm9 = vcmp.eq.f32.partialorder %v9647_v32, 0.0 }
 0x312   : > { %v9641_v22 = vpop.eup %8825  ;;  %v1017_v24 = vadd.f32 %v8822_v60, %v1016_v17  ;;  %v1069_v17 = vand.u32 2147483648, %v9628_v56 }
 0x313   : > { %v8828_v25 = vpop.eup %8827  ;;  %v1051_v31 = vsel %vm1050_vm4, %v8820_v58, %v1047_v19  ;;  %v1059_v6 = vmul.f32 %v9641_v22, %v9628_v56  ;;  %v9668_v58 = vpop.xlane.xlu0 %779  ;;  %vm1064_vm1 = vweird.f32 %v9641_v22 }
 0x314   : > { %v1056_v35 = vsel %vm1053_vm5, %v1055_v23, %v1051_v31  ;;  %v1021_v39 = vsel %vm1020_vm8, %v8822_v60, %v1017_v24  ;;  %v1029_v40 = vmul.f32 %v8828_v25, %v9632_v61  ;;  %vm1034_vm11 = vweird.f32 %v8828_v25  ;;  %v9676_v1 = vpop.eup %8829  ;;  %vm9701_vm3 = vmor %vm1063_vm2, %vm1064_vm1 }
 0x315   : > { %v9652_v41 = vmul.f32 %v1056_v35, %v9501_v10  ;;  %v1026_v42 = vsel %vm1023_vm6, %v1025_v34, %v1021_v39  ;;  %v1060_v45 = vsub.f32 1.0, %v1059_v6  ;;  %v1039_v10 = vand.u32 2147483648, %v9632_v61  ;;  %vm1035_vm15 = vmor %vm1033_vm14, %vm1034_vm11  ;;  %v8832_v7 = vpop.eup %8831 }
 0x316   : > { %v9657_v47 = vmul.f32 %v1026_v42, %v9504_v11  ;;  %v1030_v48 = vsub.f32 1.0, %v1029_v40  ;;  %v860_v60 = vand.u32 2147483648, %v9578_v51  ;;  %8833 = vrsqrt.f32 %v9668_v58 }
 0x317   : > { %1356 = vperm.xlu0 %8696, %v9652_v41   ;;  %v1061_v11 = vmul.f32 %v9641_v22, %v1060_v45  ;;  %v1040_v4 = vor.u32 1.1754944e-38, %v1039_v10  ;;  %8835 = vrsqrt.f32 %v9674_v0  ;;  %v870_v61 = vsel %vm869_vm12, %v9590_v63, %v868_v62 }
 0x318   : > { %1346 = vperm.xlu2 %8694, %v9657_v47   ;;  %v1031_v27 = vmul.f32 %v8828_v25, %v1030_v48  ;;  %v911_v19 = vmul.f32 %v9676_v1, %v9639_v18  ;;  %v1067_v23 = vand.u32 2147483647, %v9628_v56  ;;  %v887_v24 = vmul.f32 %v8832_v7, %v9647_v32 }
 0x319   : > { %v1062_v9 = vadd.f32 %v9641_v22, %v1061_v11  ;;  %v878_v34 = vsub.f32 1.5, %v877_v5  ;;  %v9711_v37 = vsel %vm859_vm10, %v860_v60, %v858_v3  ;;  %v9715_v56 = vsel %vm871_vm13, %v872_v57, %v870_v61 }
 0x31a   : > { %v1032_v2 = vadd.f32 %v8828_v25, %v1031_v27  ;;  %v888_v6 = vmul.f32 %v8832_v7, %v887_v24  ;;  %15092 = vst [vmem:[#allocation11_spill] sm:$0xff] %v9711_v37  ;;  %v1070_v35 = vor.u32 1.1754944e-38, %v1069_v17  ;;  %v912_v39 = vmul.f32 %v9676_v1, %v911_v19 }
 0x31b   : > { %15093 = vst [vmem:[#allocation12_spill] sm:$0xff] %v9715_v56  ;;  %v987_v42 = vadd.f32 1e-07, %v9711_v37  ;;  %vm1068_vm4 = vcmp.eq.f32.partialorder %v1067_v23, 8.507059e+37  ;;  %v9724_v51 = vadd.f32 1e-07, %v9715_v56  ;;  %v879_v63 = vmul.f32 %v9636_v12, %v878_v34 }
 0x31c   : > { %v1036_v8 = vsel %vm1035_vm15, %v8828_v25, %v1032_v2  ;;  %v9699_v25 = vpop.eup %8833  ;;  %v913_v49 = vmul.f32 0.5, %v912_v39  ;;  %vm881_vm5 = vcmp.eq.f32.partialorder %v9618_v50, inf  ;;  %vm883_vm6 = vcmp.eq.f32.partialorder %v9618_v50, 0.0 }
 0x31d   : > { %v1041_v13 = vsel %vm1038_vm0, %v1040_v4, %v1036_v8  ;;  %v935_v40 = vmul.f32 %v9699_v25, %v9668_v58  ;;  %v9721_v44 = vpop.eup %8835  ;;  %8837 = vrcp.f32 %v987_v42  ;;  %vm893_vm8 = vcmp.eq.f32.partialorder %v9647_v32, inf }
 0x31e   : > { %v9694_v21 = vmul.f32 %v1041_v13, %v9517_v16  ;;  %v1066_v16 = vsel %vm9701_vm3, %v9641_v22, %v1062_v9  ;;  %v889_v22 = vmul.f32 0.5, %v888_v6  ;;  %v899_v10 = vmul.f32 %v9721_v44, %v9674_v0 }
 0x31f   : > { %v1071_v45 = vsel %vm1068_vm4, %v1070_v35, %v1066_v16  ;;  %v936_v53 = vmul.f32 %v9699_v25, %v935_v40  ;;  %8839 = vrcp.f32 %v9724_v51  ;;  %v880_v60 = vmul.f32 %v879_v63, %v9618_v50 }
 0x320   : > { %1351 = vperm.xlu1 %8695, %v9694_v21   ;;  %v890_v48 = vsub.f32 1.5, %v889_v22  ;;  %v9732_v54 = vmul.f32 %v1071_v45, %v9514_v15  ;;  %v914_v62 = vsub.f32 1.5, %v913_v49  ;;  %v900_v2 = vmul.f32 %v9721_v44, %v899_v10  ;;  %v9741_v15 = vpop.xlane.xlu1 %776 }
 0x321   : > { %v937_v57 = vmul.f32 0.5, %v936_v53  ;;  %v884_v3 = vand.u32 2147483648, %v9618_v50  ;;  %v896_v4 = vand.u32 2147483648, %v9647_v32  ;;  %vm1078_vm10 = vweird.f32 %v987_v42 }
 0x322   : > { %v891_v27 = vmul.f32 %v8832_v7, %v890_v48  ;;  %v1082_v8 = vand.u32 2147483647, %v987_v42  ;;  %v1084_v9 = vand.u32 2147483648, %v987_v42  ;;  %8841 = vrsqrt.f32 %v9741_v15 }
 0x323   : > { %v8838_v11 = vpop.eup %8837  ;;  %v882_v19 = vsel %vm881_vm5, %v9618_v50, %v880_v60  ;;  %v915_v23 = vmul.f32 %v9676_v1, %v914_v62  ;;  %v938_v24 = vsub.f32 1.5, %v937_v57  ;;  %v901_v31 = vmul.f32 0.5, %v900_v2 }
 0x324   : > { %v892_v12 = vmul.f32 %v891_v27, %v9647_v32  ;;  %v1074_v5 = vmul.f32 %v8838_v11, %v987_v42  ;;  %vm1079_vm11 = vweird.f32 %v8838_v11  ;;  %vm1093_vm12 = vweird.f32 %v9724_v51 }
 0x325   : > { %v8840_v7 = vpop.eup %8839  ;;  %vm9757_vm14 = vmor %vm1078_vm10, %vm1079_vm11  ;;  %v1085_v35 = vor.u32 1.1754944e-38, %v1084_v9  ;;  %v1099_v39 = vand.u32 2147483648, %v9724_v51  ;;  %vm1083_vm15 = vcmp.eq.f32.partialorder %v1082_v8, 8.507059e+37  ;;  %v1097_v45 = vand.u32 2147483647, %v9724_v51 }
 0x326   : > { %v894_v61 = vsel %vm893_vm8, %v9647_v32, %v892_v12  ;;  %v1075_v13 = vsub.f32 1.0, %v1074_v5  ;;  %v1089_v17 = vmul.f32 %v8840_v7, %v9724_v51  ;;  %vm1094_vm13 = vweird.f32 %v8840_v7 }
 0x327   : > { %v9764_v40 = vsel %vm895_vm9, %v896_v4, %v894_v61  ;;  %v9769_v42 = vsel %vm883_vm6, %v884_v3, %v882_v19  ;;  %v939_v48 = vmul.f32 %v9699_v25, %v938_v24  ;;  %v902_v49 = vsub.f32 1.5, %v901_v31  ;;  %vm9772_vm0 = vmor %vm1093_vm12, %vm1094_vm13 }
 0x328   : > { %1361 = vperm.xlu1 %8695, %v9732_v54   ;;  %v1076_v34 = vmul.f32 %v8838_v11, %v1075_v13  ;;  %v1090_v16 = vsub.f32 1.0, %v1089_v17  ;;  %15096 = vst [vmem:[#allocation13_spill] sm:$0xff] %v9764_v40  ;;  %v8842_v63 = vpop.eup %8841  ;;  %v990_v32 = vadd.f32 1e-07, %v9764_v40  ;;  %v916_v10 = vmul.f32 %v915_v23, %v9639_v18 }
 0x329   : > { %15097 = vst [vmem:[#allocation14_spill] sm:$0xff] %v9769_v42  ;;  %v923_v12 = vmul.f32 %v8842_v63, %v9741_v15  ;;  %vm917_vm1 = vcmp.eq.f32.partialorder %v9639_v18, inf  ;;  %v920_v50 = vand.u32 2147483648, %v9639_v18  ;;  %v1100_v60 = vor.u32 1.1754944e-38, %v1099_v39 }
 0x32a   : > { %v1077_v1 = vadd.f32 %v8838_v11, %v1076_v34  ;;  %v1091_v22 = vmul.f32 %v8840_v7, %v1090_v16  ;;  %vm1098_vm2 = vcmp.eq.f32.partialorder %v1097_v45, 8.507059e+37  ;;  %v940_v3 = vmul.f32 %v939_v48, %v9668_v58 }
 0x32b   : > { %v924_v2 = vmul.f32 %v8842_v63, %v923_v12  ;;  %v903_v4 = vmul.f32 %v9721_v44, %v902_v49  ;;  %8843 = vrcp.f32 %v990_v32  ;;  %v918_v5 = vsel %vm917_vm1, %v9639_v18, %v916_v10 }
 0x32c   : > { %v1081_v27 = vsel %vm9757_vm14, %v8838_v11, %v1077_v1  ;;  %v1092_v51 = vadd.f32 %v8840_v7, %v1091_v22  ;;  %v9789_v11 = vadd.f32 1e-07, %v9769_v42  ;;  %vm919_vm3 = vcmp.eq.f32.partialorder %v9639_v18, 0.0 }
 0x32d   : > { %v1086_v25 = vsel %vm1083_vm15, %v1085_v35, %v1081_v27  ;;  %vm941_vm4 = vcmp.eq.f32.partialorder %v9668_v58, inf  ;;  %vm943_vm5 = vcmp.eq.f32.partialorder %v9668_v58, 0.0  ;;  %v944_v9 = vand.u32 2147483648, %v9668_v58  ;;  %v9823_v35 = vld [vmem:[%s9302_s19] sm:$0xff] }
 0x32e   : > { %v9784_v62 = vmul.f32 %v1086_v25, %v9511_v14  ;;  %v1096_v57 = vsel %vm9772_vm0, %v8840_v7, %v1092_v51  ;;  %v925_v14 = vmul.f32 0.5, %v924_v2  ;;  %v9798_v7 = vld [vmem:[%s9302_s19 + $0x70] sm:$0xff]  ;;  %8845 = vrcp.f32 %v9789_v11  ;;  %v9850_v2 = vpop.xlane.xlu0 %782 }
 0x32f   : > { %v1101_v8 = vsel %vm1098_vm2, %v1100_v60, %v1096_v57  ;;  %v9803_v44 = vsel %vm919_vm3, %v920_v50, %v918_v5  ;;  %v942_v61 = vsel %vm941_vm4, %v9668_v58, %v940_v3  ;;  %v904_v18 = vmul.f32 %v903_v4, %v9674_v0  ;;  %v9848_v60 = vld [vmem:[%s9302_s19 + $0x78] sm:$0xff] }
 0x330   : > { %1366 = vperm.xlu0 %8696, %v9784_v62   ;;  %15100 = vst [vmem:[#allocation15_spill] sm:$0xff] %v9803_v44  ;;  %vm905_vm6 = vcmp.eq.f32.partialorder %v9674_v0, inf  ;;  %v739_v13 = vmul.f32 %v9798_v7, %v9798_v7  ;;  %v9811_v17 = vmul.f32 %v1101_v8, %v9524_v20  ;;  %v926_v19 = vsub.f32 1.5, %v925_v14 }
 0x331   : > { %v8844_v23 = vpop.eup %8843  ;;  %v9814_v24 = vadd.f32 1e-07, %v9803_v44  ;;  %v9816_v31 = vsel %vm943_vm5, %v944_v9, %v942_v61  ;;  %v908_v34 = vand.u32 2147483648, %v9674_v0  ;;  %v906_v16 = vsel %vm905_vm6, %v9674_v0, %v904_v18 }
 0x332   : > { %15101 = vst [vmem:[#allocation16_spill] sm:$0xff] %v9816_v31  ;;  %v1119_v58 = vmul.f32 %v8844_v23, %v990_v32  ;;  %vm907_vm8 = vcmp.eq.f32.partialorder %v9674_v0, 0.0  ;;  %v784_v6 = vsel %vm741_vm7, %v739_v13, 0.0  ;;  %v927_v20 = vmul.f32 %v8842_v63, %v926_v19  ;;  %v9875_v19 = vld [vmem:[%s14872_s6 + $0xe0] sm:$0xff] }
 0x333   : > { %v1129_v1 = vand.u32 2147483648, %v990_v32  ;;  %v9829_v45 = vadd.f32 1e-07, %v9816_v31  ;;  %vm1123_vm9 = vweird.f32 %v990_v32  ;;  %vm1124_vm10 = vweird.f32 %v8844_v23  ;;  %8640 = vmatpush.msra.mxu2 %v9875_v19  ;;  %8641 = vmatpush.msra.mxu3 %v9875_v19 }
 0x334   : > { %v1120_v39 = vsub.f32 1.0, %v1119_v58  ;;  %v9826_v22 = vpop.eup %8845  ;;  %v1127_v48 = vand.u32 2147483647, %v990_v32  ;;  %8847 = vrcp.f32 %v9814_v24  ;;  %v9832_v49 = vsel %vm907_vm8, %v908_v34, %v906_v16  ;;  %vm1125_vm11 = vmor %vm1123_vm9, %vm1124_vm10 }
 0x335   : > { %15102 = vst [vmem:[#allocation17_spill] sm:$0xff] %v9832_v49  ;;  %v725_v63 = vmul.f32 %v9823_v35, %v9823_v35  ;;  %v1130_v53 = vor.u32 1.1754944e-38, %v1129_v1  ;;  %v928_v10 = vmul.f32 %v927_v20, %v9741_v15  ;;  %v1104_v27 = vmul.f32 %v9826_v22, %v9789_v11 }
 0x336   : > { %v1121_v0 = vmul.f32 %v8844_v23, %v1120_v39  ;;  %vm1128_vm12 = vcmp.eq.f32.partialorder %v1127_v48, 8.507059e+37  ;;  %8849 = vrcp.f32 %v9829_v45  ;;  %vm929_vm13 = vcmp.eq.f32.partialorder %v9741_v15, inf  ;;  %v9896_v39 = vld [vmem:[%s14872_s6 + $0xd0] sm:$0xff] }
 0x337   : > { %v9842_v32 = vadd.f32 1e-07, %v9832_v49  ;;  %v742_v50 = vsel %vm741_vm7, %v725_v63, 0.0  ;;  %vm931_vm14 = vcmp.eq.f32.partialorder %v9741_v15, 0.0  ;;  %v932_v25 = vand.u32 2147483648, %v9741_v15 }
 0x338   : > { %1371 = vperm.xlu0 %8696, %v9811_v17   ;;  %v1122_v51 = vadd.f32 %v8844_v23, %v1121_v0  ;;  %v930_v4 = vsel %vm929_vm13, %v9741_v15, %v928_v10  ;;  %v1105_v5 = vsub.f32 1.0, %v1104_v27  ;;  %8851 = vrsqrt.f32 %v9850_v2 }
 0x339   : > { %8853 = vrcp.f32 %v9842_v32  ;;  %v740_v8 = vmul.f32 %v9848_v60, %v9848_v60  ;;  %v9866_v18 = vsel %vm931_vm14, %v932_v25, %v930_v4  ;;  %vm1108_vm15 = vweird.f32 %v9789_v11 }
 0x33a   : > { %v1126_v12 = vsel %vm1125_vm11, %v8844_v23, %v1122_v51  ;;  %v8848_v3 = vpop.eup %8847  ;;  %15103 = vst [vmem:[#allocation18_spill] sm:$0xff] %v9866_v18  ;;  %v9870_v13 = vadd.f32 1e-07, %v9866_v18  ;;  %v9880_v23 = vld [vmem:[%s14872_s6 + $0xd8] sm:$0xff]  ;;  %vm1109_vm0 = vweird.f32 %v9826_v22  ;;  %v1112_v0 = vand.u32 2147483647, %v9789_v11 }
 0x33b   : > { %v1131_v57 = vsel %vm1128_vm12, %v1130_v53, %v1126_v12  ;;  %v1149_v61 = vmul.f32 %v8848_v3, %v9814_v24  ;;  %v787_v15 = vsel %vm741_vm7, %v740_v8, 0.0  ;;  %v1114_v63 = vand.u32 2147483648, %v9789_v11  ;;  %8642 = vmatpush.msra.mxu2 %v9880_v23  ;;  %8643 = vmatpush.msra.mxu3 %v9880_v23  ;;  %vm9914_vm3 = vmor %vm1108_vm15, %vm1109_vm0  ;;  %v9925_v11 = vld [vmem:[%s14872_s6 + $0xc8] sm:$0xff] }
 0x33c   : > { %v9854_v14 = vmul.f32 %v1131_v57, %v9540_v29  ;;  %v9861_v9 = vpop.eup %8849  ;;  %v1106_v29 = vmul.f32 %v9826_v22, %v1105_v5  ;;  %8855 = vrcp.f32 %v9870_v13  ;;  %v1159_v53 = vand.u32 2147483648, %v9814_v24 }
 0x33d   : > { %v1150_v34 = vsub.f32 1.0, %v1149_v61  ;;  %v1179_v16 = vmul.f32 %v9861_v9, %v9829_v45  ;;  %vm1153_vm7 = vweird.f32 %v9814_v24  ;;  %vm1154_vm1 = vweird.f32 %v8848_v3  ;;  %8644 = vmatpush.msra.mxu2 %v9896_v39  ;;  %8645 = vmatpush.msra.mxu3 %v9896_v39 }
 0x33e   : > { %v8852_v58 = vpop.eup %8851  ;;  %v1107_v48 = vadd.f32 %v9826_v22, %v1106_v29  ;;  %vm1155_vm2 = vmor %vm1153_vm7, %vm1154_vm1  ;;  %v1160_v25 = vor.u32 1.1754944e-38, %v1159_v53  ;;  %vm9918_vm4 = vcmp.eq.f32.partialorder %v1112_v0, 8.507059e+37  ;;  %vm1168_vm6 = vweird.f32 %v9870_v13 }
 0x33f   : > { %v947_v20 = vmul.f32 %v8852_v58, %v9850_v2  ;;  %v1151_v1 = vmul.f32 %v8848_v3, %v1150_v34  ;;  %v1180_v51 = vsub.f32 1.0, %v1179_v16  ;;  %8646 = vmatpush.msra.mxu2 %v9925_v11  ;;  %8647 = vmatpush.msra.mxu3 %v9925_v11  ;;  %vm953_vm9 = vcmp.eq.f32.partialorder %v9850_v2, inf }
 0x340   : > { %1381 = vperm.xlu0 %8696, %v9854_v14   ;;  %v956_v53 = vand.u32 2147483648, %v9850_v2  ;;  %vm955_vm10 = vcmp.eq.f32.partialorder %v9850_v2, 0.0  ;;  %vm1183_vm11 = vweird.f32 %v9829_v45  ;;  %vm1184_vm12 = vweird.f32 %v9861_v9 }
 0x341   : > { %785 = vadd.xlane.f32.xlu2 %v784_v6  ;;  %v9888_v6 = vpop.eup %8853  ;;  %v948_v10 = vmul.f32 %v8852_v58, %v947_v20  ;;  %v1152_v27 = vadd.f32 %v8848_v3, %v1151_v1  ;;  %vm1138_vm15 = vweird.f32 %v9842_v32  ;;  %vm9972_vm7 = vmor %vm1183_vm11, %vm1184_vm12 }
 0x342   : > { %v1134_v12 = vmul.f32 %v9888_v6, %v9842_v32  ;;  %v8856_v8 = vpop.eup %8855  ;;  %vm1139_vm0 = vweird.f32 %v9888_v6 }
 0x343   : > { %v949_v4 = vmul.f32 0.5, %v948_v10  ;;  %v1156_v5 = vsel %vm1155_vm2, %v8848_v3, %v1152_v27  ;;  %v1164_v16 = vmul.f32 %v8856_v8, %v9870_v13  ;;  %v1111_v3 = vsel %vm9914_vm3, %v9826_v22, %v1107_v48  ;;  %vm1140_vm1 = vmor %vm1138_vm15, %vm1139_vm0 }
 0x344   : > { %v1135_v20 = vsub.f32 1.0, %v1134_v12  ;;  %vm1169_vm8 = vweird.f32 %v8856_v8  ;;  %v1172_v22 = vand.u32 2147483647, %v9870_v13 }
 0x345   : > { %v950_v29 = vsub.f32 1.5, %v949_v4  ;;  %vm9949_vm13 = vmor %vm1168_vm6, %vm1169_vm8  ;;  %v1187_v4 = vand.u32 2147483647, %v9829_v45 }
 0x346   : > { %vm1173_vm14 = vcmp.eq.f32.partialorder %v1172_v22, 8.507059e+37 }
 0x347   : > { %v951_v0 = vmul.f32 %v8852_v58, %v950_v29  ;;  %vm1188_vm2 = vcmp.eq.f32.partialorder %v1187_v4, 8.507059e+37 }
 0x349   : > { %743 = vadd.xlane.f32.xlu2 %v742_v50  ;;  %v1157_v50 = vand.u32 2147483647, %v9814_v24  ;;  %v1115_v24 = vor.u32 1.1754944e-38, %v1114_v63  ;;  %v1165_v63 = vsub.f32 1.0, %v1164_v16  ;;  %v952_v48 = vmul.f32 %v951_v0, %v9850_v2 }
 0x34b   : > { %vm1158_vm5 = vcmp.eq.f32.partialorder %v1157_v50, 8.507059e+37  ;;  %v1166_v10 = vmul.f32 %v8856_v8, %v1165_v63  ;;  %v1116_v58 = vsel %vm9918_vm4, %v1115_v24, %v1111_v3  ;;  %v954_v12 = vsel %vm953_vm9, %v9850_v2, %v952_v48 }
 0x34c   : > { %v1161_v34 = vsel %vm1158_vm5, %v1160_v25, %v1156_v5  ;;  %v9955_v25 = vsel %vm955_vm10, %v956_v53, %v954_v12  ;;  %v1189_v5 = vand.u32 2147483648, %v9829_v45  ;;  %v9966_v24 = vmul.f32 %v1116_v58, %v9537_v28 }
 0x34d   : > { %v9933_v1 = vmul.f32 %v1161_v34, %v9554_v36  ;;  %v1174_v36 = vand.u32 2147483648, %v9870_v13  ;;  %v1136_v13 = vmul.f32 %v9888_v6, %v1135_v20  ;;  %v1167_v50 = vadd.f32 %v8856_v8, %v1166_v10  ;;  %15110 = vst [vmem:[#allocation19_spill] sm:$0xff] %v9955_v25 }
 0x34e   : > { %v995_v61 = vadd.f32 1e-07, %v9955_v25  ;;  %v1144_v34 = vand.u32 2147483648, %v9842_v32  ;;  %v1190_v28 = vor.u32 1.1754944e-38, %v1189_v5  ;;  %vm2035_vm9 = vcmask 261120  }
 0x34f   : > { %1391 = vperm.xlu0 %8696, %v9933_v1   ;;  %v1171_v2 = vsel %vm9949_vm13, %v8856_v8, %v1167_v50  ;;  %v1137_v3 = vadd.f32 %v9888_v6, %v1136_v13 }
 0x350   : > { %8857 = vrcp.f32 %v995_v61  ;;  %v1145_v20 = vor.u32 1.1754944e-38, %v1144_v34  ;;  %vm1198_vm4 = vweird.f32 %v995_v61  ;;  %v1202_v10 = vand.u32 2147483647, %v995_v61 }
 0x351   : > { %v1141_v0 = vsel %vm1140_vm1, %v9888_v6, %v1137_v3  ;;  %v1204_v6 = vand.u32 2147483648, %v995_v61 }
 0x352   : > { %788 = vadd.xlane.f32.xlu1 %v787_v15  ;;  %v1181_v15 = vmul.f32 %v9861_v9, %v1180_v51  ;;  %v1175_v51 = vor.u32 1.1754944e-38, %v1174_v36  ;;  %vm1203_vm8 = vcmp.eq.f32.partialorder %v1202_v10, 8.507059e+37 }
 0x353   : > { %v1205_v27 = vor.u32 1.1754944e-38, %v1204_v6 }
 0x354   : > { %v1182_v57 = vadd.f32 %v9861_v9, %v1181_v15  ;;  %v1176_v16 = vsel %vm1173_vm14, %v1175_v51, %v1171_v2  ;;  %v1142_v15 = vand.u32 2147483647, %v9842_v32 }
 0x355   : > { %v9980_v8 = vmul.f32 %v1176_v16, %v9558_v38 }
 0x356   : > { %v1186_v45 = vsel %vm9972_vm7, %v9861_v9, %v1182_v57  ;;  %vm1143_vm3 = vcmp.eq.f32.partialorder %v1142_v15, 8.507059e+37  ;;  %v8858_v32 = vpop.eup %8857 }
 0x357   : > { %1396 = vperm.xlu0 %8696, %v9980_v8   ;;  %v1191_v63 = vsel %vm1188_vm2, %v1190_v28, %v1186_v45  ;;  %v1146_v53 = vsel %vm1143_vm3, %v1145_v20, %v1141_v0  ;;  %v1194_v22 = vmul.f32 %v8858_v32, %v995_v61  ;;  %vm1199_vm5 = vweird.f32 %v8858_v32 }
 0x358   : > { %v9989_v38 = vmul.f32 %v1191_v63, %v9567_v43  ;;  %v9992_v36 = vmul.f32 %v1146_v53, %v9543_v30  ;;  %vm1200_vm6 = vmor %vm1198_vm4, %vm1199_vm5  ;;  %v9999_v30 = vld [vmem:[%s14872_s6 + $0x4b0] ss:$0 sm:$0xff] }
 0x359   : > { %v1195_v9 = vsub.f32 1.0, %v1194_v22 }
 0x35b   : > { %v1196_v48 = vmul.f32 %v8858_v32, %v1195_v9 }
 0x35d   : > { %v1197_v58 = vadd.f32 %v8858_v32, %v1196_v48 }
 0x35f   : > { %v1201_v43 = vsel %vm1200_vm6, %v8858_v32, %v1197_v58  ;;  %v9215_v32 = vmov 1  }
 0x360   : > { %v1206_v51 = vsel %vm1203_vm8, %v1205_v27, %v1201_v43 }
 0x361   : > { %1376 = vperm.xlu2 %8694, %v9966_v24   ;;  %v10002_v12 = vmul.f32 %v1206_v51, %v9573_v46 }
 0x363   : > { %1406 = vperm.xlu0 %8696, %v10002_v12  }
 0x369   : > { %1401 = vperm.xlu2 %8694, %v9989_v38  }
 0x36b   : > { %1386 = vperm.xlu1 %8695, %v9992_v36   ;;  %8697 = vset.pattern.permute.xlu0 %v9215_v32 }
 0x372   : > { %v1347_v13 = vpop.permute.xlu2 %1346 }
 0x373   : > { %v1421_v50 = vmul.f32 %v9999_v30, %v1347_v13 }
 0x375   : > { %8175 = vmatmul.msk.f32.vlgmr.msra.gmra.mxu2 %vm2035_vm9, %v1421_v50 }
 0x389   : > { %v1357_v5 = vpop.permute.xlu0 %1356 }
 0x38a   : > { %v1423_v61 = vmul.f32 %v9999_v30, %v1357_v5 }
 0x392   : > { %v1352_v57 = vpop.permute.xlu1 %1351 }
 0x393   : > { %v1422_v4 = vmul.f32 %v9999_v30, %v1352_v57 }
 0x395   : > { %8176 = vmatmul.msk.f32.gmra.mxu2 %vm2035_vm9, %v1422_v4 }
 0x39a   : > { %v1362_v46 = vpop.permute.xlu1 %1361 }
 0x39b   : > { %v1424_v2 = vmul.f32 %v9999_v30, %v1362_v46 }
 0x39d   : > { %8177 = vmatmul.msk.f32.gmra.mxu2 %vm2035_vm9, %v1423_v61 }
 0x3a2   : > { %v1367_v29 = vpop.permute.xlu0 %1366 }
 0x3a3   : > { %v1425_v34 = vmul.f32 %v9999_v30, %v1367_v29 }
 0x3a5   : > { %8178 = vmatmul.msk.f32.gmra.mxu2 %vm2035_vm9, %v1424_v2 }
 0x3aa   : > { %v1372_v16 = vpop.permute.xlu0 %1371 }
 0x3ab   : > { %v1426_v3 = vmul.f32 %v9999_v30, %v1372_v16 }
 0x3ad   : > { %8179 = vmatmul.msk.f32.gmra.mxu2 %vm2035_vm9, %v1425_v34 }
 0x3b2   : > { %v1382_v57 = vpop.permute.xlu0 %1381 }
 0x3b3   : > { %v1428_v46 = vmul.f32 %v9999_v30, %v1382_v57 }
 0x3b4   : > { %v786_v15 = vpop.xlane.xlu2 %785 }
 0x3b5   : > { %8859 = vrsqrt.f32 %v786_v15  ;;  %8180 = vmatmul.msk.f32.gmra.mxu2 %vm2035_vm9, %v1426_v3  ;;  %vm965_vm10 = vcmp.eq.f32.partialorder %v786_v15, inf  ;;  %v968_v6 = vand.u32 2147483648, %v786_v15  ;;  %vm967_vm11 = vcmp.eq.f32.partialorder %v786_v15, 0.0 }
 0x3bb   : > { %v8860_v28 = vpop.eup %8859 }
 0x3bc   : > { %v959_v45 = vmul.f32 %v8860_v28, %v786_v15  ;;  %v744_v20 = vpop.xlane.xlu2 %743 }
 0x3bd   : > { %8861 = vrsqrt.f32 %v744_v20  ;;  %vm797_vm12 = vcmp.eq.f32.partialorder %v744_v20, inf  ;;  %v800_v34 = vand.u32 2147483648, %v744_v20  ;;  %vm799_vm13 = vcmp.eq.f32.partialorder %v744_v20, 0.0 }
 0x3be   : > { %v960_v0 = vmul.f32 %v8860_v28, %v959_v45 }
 0x3c0   : > { %v961_v63 = vmul.f32 0.5, %v960_v0 }
 0x3c2   : > { %v962_v53 = vsub.f32 1.5, %v961_v63 }
 0x3c3   : > { %v8862_v22 = vpop.eup %8861 }
 0x3c4   : > { %v963_v9 = vmul.f32 %v8860_v28, %v962_v53  ;;  %v791_v48 = vmul.f32 %v8862_v22, %v744_v20  ;;  %v1377_v10 = vpop.permute.xlu2 %1376 }
 0x3c5   : > { %v1427_v58 = vmul.f32 %v9999_v30, %v1377_v10  ;;  %v789_v27 = vpop.xlane.xlu1 %788 }
 0x3c6   : > { %v964_v43 = vmul.f32 %v963_v9, %v786_v15  ;;  %v792_v51 = vmul.f32 %v8862_v22, %v791_v48  ;;  %8863 = vrsqrt.f32 %v789_v27  ;;  %vm977_vm15 = vcmp.eq.f32.partialorder %v789_v27, inf }
 0x3c7   : > { %8181 = vmatmul.msk.f32.gmra.mxu2 %vm2035_vm9, %v1427_v58  ;;  %vm979_vm0 = vcmp.eq.f32.partialorder %v789_v27, 0.0 }
 0x3c8   : > { %v966_v13 = vsel %vm965_vm10, %v786_v15, %v964_v43  ;;  %v793_v50 = vmul.f32 0.5, %v792_v51 }
 0x3c9   : > { %v10020_v4 = vsel %vm967_vm11, %v968_v6, %v966_v13  ;;  %v980_v13 = vand.u32 2147483648, %v789_v27 }
 0x3ca   : > { %15113 = vst [vmem:[#allocation20_spill] sm:$0xff] %v10020_v4  ;;  %v794_v5 = vsub.f32 1.5, %v793_v50  ;;  %v996_v61 = vadd.f32 1e-07, %v10020_v4 }
 0x3cc   : > { %v8864_v2 = vpop.eup %8863  ;;  %v795_v29 = vmul.f32 %v8862_v22, %v794_v5  ;;  %8865 = vrcp.f32 %v996_v61  ;;  %v1219_v6 = vand.u32 2147483648, %v996_v61  ;;  %v1217_v51 = vand.u32 2147483647, %v996_v61 }
 0x3cd   : > { %v971_v16 = vmul.f32 %v8864_v2, %v789_v27  ;;  %vm1213_vm7 = vweird.f32 %v996_v61 }
 0x3ce   : > { %v796_v3 = vmul.f32 %v795_v29, %v744_v20  ;;  %vm1218_vm2 = vcmp.eq.f32.partialorder %v1217_v51, 8.507059e+37 }
 0x3cf   : > { %v972_v28 = vmul.f32 %v8864_v2, %v971_v16  ;;  %8182 = vmatmul.msk.f32.gmra.mxu2 %vm2035_vm9, %v1428_v46  ;;  %v1220_v46 = vor.u32 1.1754944e-38, %v1219_v6 }
 0x3d0   : > { %v798_v15 = vsel %vm797_vm12, %v744_v20, %v796_v3 }
 0x3d1   : > { %v973_v45 = vmul.f32 0.5, %v972_v28  ;;  %v10025_v0 = vsel %vm799_vm13, %v800_v34, %v798_v15  ;;  %vm1723_vm13 = vcmask 130048  }
 0x3d2   : > { %v8866_v63 = vpop.eup %8865  ;;  %v982_v53 = vadd.f32 1e-07, %v10025_v0 }
 0x3d3   : > { %v974_v9 = vsub.f32 1.5, %v973_v45  ;;  %v1209_v48 = vmul.f32 %v8866_v63, %v996_v61  ;;  %vm1214_vm14 = vweird.f32 %v8866_v63 }
 0x3d4   : > { %8867 = vrcp.f32 %v982_v53  ;;  %vm1215_vm1 = vmor %vm1213_vm7, %vm1214_vm14  ;;  %v1009_v61 = vand.u32 2147483648, %v982_v53  ;;  %vm1003_vm4 = vweird.f32 %v982_v53 }
 0x3d5   : > { %v975_v22 = vmul.f32 %v8864_v2, %v974_v9  ;;  %v1210_v10 = vsub.f32 1.0, %v1209_v48  ;;  %v1007_v9 = vand.u32 2147483647, %v982_v53 }
 0x3d7   : > { %v976_v58 = vmul.f32 %v975_v22, %v789_v27  ;;  %v1211_v43 = vmul.f32 %v8866_v63, %v1210_v10  ;;  %v1010_v22 = vor.u32 1.1754944e-38, %v1009_v61  ;;  %vm1008_vm6 = vcmp.eq.f32.partialorder %v1007_v9, 8.507059e+37 }
 0x3d9   : > { %v978_v50 = vsel %vm977_vm15, %v789_v27, %v976_v58  ;;  %v1212_v20 = vadd.f32 %v8866_v63, %v1211_v43  ;;  %v1596_v58 = vld [vmem:[%s9312_s25] sm:$0xff] }
 0x3da   : > { %v8868_v57 = vpop.eup %8867  ;;  %v10028_v5 = vsel %vm979_vm0, %v980_v13, %v978_v50 }
 0x3db   : > { %15114 = vst [vmem:[#allocation21_spill] sm:$0xff] %v10028_v5  ;;  %v997_v29 = vadd.f32 1e-07, %v10028_v5  ;;  %v1216_v2 = vsel %vm1215_vm1, %v8866_v63, %v1212_v20  ;;  %v999_v34 = vmul.f32 %v8868_v57, %v982_v53  ;;  %vm1004_vm3 = vweird.f32 %v8868_v57  ;;  %v1392_v63 = vpop.permute.xlu0 %1391 }
 0x3dc   : > { %v1221_v16 = vsel %vm1218_vm2, %v1220_v46, %v1216_v2  ;;  %vm1005_vm5 = vmor %vm1003_vm4, %vm1004_vm3  ;;  %v1430_v6 = vmul.f32 %v9999_v30, %v1392_v63  ;;  %v1603_v63 = vld [vmem:[%s9312_s25 + $0x38] sm:$0xff] }
 0x3dd   : > { %8869 = vrcp.f32 %v997_v29  ;;  %v1387_v3 = vpop.permute.xlu1 %1386  ;;  %v10032_v28 = vmul.f32 %v1221_v16, %v9798_v7  ;;  %v1000_v15 = vsub.f32 1.0, %v999_v34  ;;  %v1234_v53 = vand.u32 2147483648, %v997_v29  ;;  %v1597_v16 = vld [vmem:[%s9312_s25 + $0x8] sm:$0xff] }
 0x3de   : > { %v1429_v27 = vmul.f32 %v9999_v30, %v1387_v3  ;;  %vm1228_vm10 = vweird.f32 %v997_v29 }
 0x3df   : > { %1411 = vperm.xlu2 %8694, %v10032_v28   ;;  %v1001_v45 = vmul.f32 %v8868_v57, %v1000_v15  ;;  %v1235_v34 = vor.u32 1.1754944e-38, %v1234_v53  ;;  %v9216_v53 = vmov 2  }
 0x3e0   : > { %8183 = vmatmul.msk.f32.gmra.mxu2 %vm2035_vm9, %v1429_v27  ;;  %v1598_v27 = vld [vmem:[%s9312_s25 + $0x10] sm:$0xff] }
 0x3e1   : > { %v1002_v48 = vadd.f32 %v8868_v57, %v1001_v45 }
 0x3e3   : > { %v8870_v10 = vpop.eup %8869  ;;  %v1006_v7 = vsel %vm1005_vm5, %v8868_v57, %v1002_v48  ;;  %v1232_v57 = vand.u32 2147483647, %v997_v29  ;;  %v1397_v46 = vpop.permute.xlu0 %1396  ;;  %v1601_v48 = vld [vmem:[%s9312_s25 + $0x28] sm:$0xff] }
 0x3e4   : > { %v1011_v43 = vsel %vm1008_vm6, %v1010_v22, %v1006_v7  ;;  %v1224_v51 = vmul.f32 %v8870_v10, %v997_v29  ;;  %vm1229_vm8 = vweird.f32 %v8870_v10  ;;  %v1402_v29 = vpop.permute.xlu2 %1401  ;;  %v1599_v22 = vld [vmem:[%s9312_s25 + $0x18] sm:$0xff]  ;;  %v1600_v7 = vld [vmem:[%s9312_s25 + $0x20] sm:$0xff] }
 0x3e5   : > { %v10040_v13 = vmul.f32 %v1011_v43, %v9823_v35  ;;  %vm1230_vm11 = vmor %vm1228_vm10, %vm1229_vm8  ;;  %vm1233_vm12 = vcmp.eq.f32.partialorder %v1232_v57, 8.507059e+37  ;;  %v1431_v35 = vmul.f32 %v9999_v30, %v1397_v46  ;;  %v1432_v45 = vmul.f32 %v9999_v30, %v1402_v29  ;;  %v1722_v43 = vld [vmem:[#allocation2 + $0x18] sm:$0xff]  ;;  %v1604_v57 = vld [vmem:[%s9312_s25 + $0x40] sm:$0xff] }
 0x3e6   : > { %v1225_v50 = vsub.f32 1.0, %v1224_v51  ;;  %1851 = vmatpush.msra.mxu1 %v1722_v43  ;;  %v1719_v51 = vld [vmem:[#allocation2] sm:$0xff]  ;;  %v1607_v46 = vld [vmem:[%s9312_s25 + $0x58] sm:$0xff] }
 0x3e7   : > { %1613 = vperm.xlu2 %8694, %v1596_v58   ;;  %1437 = vperm.xlu0 %8697, %v10040_v13   ;;  %v1721_v58 = vld [vmem:[#allocation2 + $0x10] sm:$0xff] }
 0x3e8   : > { %8184 = vmatmul.msk.f32.gmra.mxu2 %vm2035_vm9, %v1430_v6  ;;  %v1226_v20 = vmul.f32 %v8870_v10, %v1225_v50  ;;  %v1608_v6 = vld [vmem:[%s9312_s25 + $0x60] sm:$0xff]  ;;  %1786 = vmatpush.msra.mxu0 %v1721_v58  ;;  %v1720_v50 = vld [vmem:[#allocation2 + $0x8] sm:$0xff] }
 0x3e9   : > { %1852 = vmatpush.msra.mxu1 %v1720_v50 }
 0x3ea   : > { %v1227_v2 = vadd.f32 %v8870_v10, %v1226_v20  ;;  %1787 = vmatpush.msra.mxu0 %v1719_v51  ;;  %v1606_v20 = vld [vmem:[%s9312_s25 + $0x50] sm:$0xff] }
 0x3eb   : > { %2192 = vmatpush.msrb.mxu1 %v9875_v19  ;;  %v1605_v19 = vld [vmem:[%s9312_s25 + $0x48] sm:$0xff] }
 0x3ec   : > { %v1231_v3 = vsel %vm1230_vm11, %v8870_v10, %v1227_v2  ;;  %v1602_v10 = vld [vmem:[%s9312_s25 + $0x30] sm:$0xff] }
 0x3ed   : > { %v1236_v15 = vsel %vm1233_vm12, %v1235_v34, %v1231_v3  ;;  %2193 = vmatpush.msrb.mxu1 %v9880_v23 }
 0x3ee   : > { %v10048_v61 = vmul.f32 %v1236_v15, %v9848_v60  ;;  %v1407_v60 = vpop.permute.xlu0 %1406 }
 0x3ef   : > { %1616 = vperm.xlu2 %8694, %v1597_v16   ;;  %8699 = vset.pattern.permute.xlu0 %v9214_v52  ;;  %v1433_v9 = vmul.f32 %v9999_v30, %v1407_v60  ;;  %v1609_v16 = vld [vmem:[%s9312_s25 + $0x68] sm:$0xff] }
 0x3f0   : > { %1416 = vperm.xlu1 %8695, %v10048_v61   ;;  %1619 = vperm.xlu0 %8699, %v1598_v27  }
 0x3f1   : > { %8185 = vmatmul.msk.f32.gmra.mxu2 %vm2035_vm9, %v1431_v35  ;;  %2194 = vmatpush.msrb.mxu1 %v9896_v39  ;;  %v14876_v39 = vlaneseq  ;;  %v1610_v35 = vld [vmem:[%s9312_s25 + $0x70] sm:$0xff] }
 0x3f3   : > { %2195 = vmatpush.msrb.mxu1 %v9925_v11  ;;  %v10106_v11 = vand.u32 127, %v14876_v39 }
 0x3f7   : > { %8701 = vset.pattern.permute.xlu2 %v9215_v32 }
 0x3f8   : > { %8698 = vset.pattern.permute.xlu1 %v9215_v32  ;;  %1449 = vperm.xlu2 %8701, %v9652_v41  }
 0x3f9   : > { %8702 = vset.pattern.permute.xlu0 %v9215_v32  ;;  %8186 = vmatmul.msk.f32.gmra.mxu2 %vm2035_vm9, %v1432_v45 }
 0x3fa   : > { %1441 = vperm.xlu1 %8698, %v9657_v47   ;;  %1457 = vperm.xlu0 %8702, %v9784_v62  }
 0x400   : > { %1453 = vperm.xlu2 %8701, %v9732_v54  }
 0x401   : > { %8187 = vmatmul.msk.f32.gmra.mxu2 %vm2035_vm9, %v1433_v9 }
 0x402   : > { %1445 = vperm.xlu1 %8698, %v9694_v21   ;;  %8705 = vset.pattern.permute.xlu0 %v9214_v52 }
 0x403   : > { %1634 = vperm.xlu0 %8705, %v1603_v63  }
 0x408   : > { %8703 = vset.pattern.permute.xlu2 %v9214_v52 }
 0x409   : > { %1628 = vperm.xlu2 %8703, %v1601_v48  }
 0x40a   : > { %8700 = vset.pattern.permute.xlu1 %v9214_v52 }
 0x40b   : > { %1622 = vperm.xlu1 %8700, %v1599_v22   ;;  %8708 = vset.pattern.permute.xlu0 %v9215_v32 }
 0x40c   : > { %1477 = vperm.xlu0 %8708, %v9933_v1  }
 0x411   : > { %1631 = vperm.xlu2 %8703, %v1602_v10  }
 0x413   : > { %1625 = vperm.xlu1 %8700, %v1600_v7  }
 0x414   : > { %8711 = vset.pattern.permute.xlu0 %v9214_v52 }
 0x415   : > { %1649 = vperm.xlu0 %8711, %v1608_v6  }
 0x419   : > { %8706 = vset.pattern.permute.xlu2 %v9215_v32 }
 0x41a   : > { %1469 = vperm.xlu2 %8706, %v9854_v14  }
 0x41b   : > { %8704 = vset.pattern.permute.xlu1 %v9215_v32 }
 0x41c   : > { %1461 = vperm.xlu1 %8704, %v9811_v17  }
 0x41d   : > { %8714 = vset.pattern.permute.xlu0 %v9215_v32 }
 0x41e   : > { %1497 = vperm.xlu0 %8714, %v10048_v61  }
 0x422   : > { %1473 = vperm.xlu2 %8706, %v9992_v36  }
 0x424   : > { %1465 = vperm.xlu1 %8704, %v9966_v24  }
 0x426   : > { %8717 = vset.pattern.permute.xlu0 %v9216_v53 }
 0x427   : > { %1525 = vperm.xlu0 %8717, %v9694_v21  }
 0x42a   : > { %8709 = vset.pattern.permute.xlu2 %v9214_v52 }
 0x42b   : > { %1643 = vperm.xlu2 %8709, %v1606_v20  }
 0x42c   : > { %8707 = vset.pattern.permute.xlu1 %v9214_v52 }
 0x42d   : > { %1637 = vperm.xlu1 %8707, %v1604_v57  }
 0x42f   : > { %1545 = vperm.xlu0 %8717, %v9966_v24   ;;  %v14877_v24 = vmov 0.0  }
 0x433   : > { %1646 = vperm.xlu2 %8709, %v1607_v46  }
 0x435   : > { %1640 = vperm.xlu1 %8707, %v1605_v19  }
 0x437   : > { %1557 = vperm.xlu0 %8717, %v9933_v1  }
 0x439   : > { %v1412_v21 = vpop.permute.xlu2 %1411 }
 0x43a   : > { %v1434_v23 = vmul.f32 %v9999_v30, %v1412_v21 }
 0x43b   : > { %8712 = vset.pattern.permute.xlu2 %v9215_v32 }
 0x43c   : > { %1489 = vperm.xlu2 %8712, %v10002_v12   ;;  %8188 = vmatmul.msk.f32.gmra.mxu2 %vm2035_vm9, %v1434_v23 }
 0x43d   : > { %8710 = vset.pattern.permute.xlu1 %v9215_v32  ;;  %v1611_v32 = vld [vmem:[%s9312_s25 + $0x78] sm:$0xff]  ;;  %s9222_s25 = smov (!%p8595_p6), 96  }
 0x43e   : > { %1481 = vperm.xlu1 %8710, %v9980_v8  }
 0x43f   : > { %1569 = vperm.xlu0 %8717, %v10002_v12  }
 0x441   : > { %v1614_v1 = vpop.permute.xlu2 %1613 }
 0x442   : > { %vm1660_vm14 = vcmp.eq.s32.totalorder %v10106_v11, %v1614_v1 }
 0x443   : > { %v8124_v2 = vsel %vm1660_vm14, 1.0, %v14877_v24 }
 0x444   : > { %1493 = vperm.xlu2 %8712, %v10032_v28   ;;  %8142 = vmatmul.msk.f32.vlgmr.msra.gmra.mxu0 %vm1723_vm13, %v8124_v2 }
 0x445   : > { %8158 = vmatmul.msk.f32.vlgmr.msra.gmra.mxu1 %vm1723_vm13, %v8124_v2 }
 0x446   : > { %1485 = vperm.xlu1 %8710, %v9989_v38  }
 0x447   : > { %8719 = vset.pattern.permute.xlu0 %v9214_v52 }
 0x449   : > { %v1617_v12 = vpop.permute.xlu2 %1616 }
 0x44a   : > { %vm1661_vm15 = vcmp.eq.s32.totalorder %v10106_v11, %v1617_v12 }
 0x44b   : > { %v8125_v34 = vsel %vm1661_vm15, 1.0, %v14877_v24 }
 0x44c   : > { %8715 = vset.pattern.permute.xlu2 %v9214_v52  ;;  %8143 = vmatmul.msk.f32.gmra.mxu0 %vm1723_vm13, %v8125_v34 }
 0x44d   : > { %8159 = vmatmul.msk.f32.gmra.mxu1 %vm1723_vm13, %v8125_v34  ;;  %1658 = vperm.xlu2 %8715, %v1611_v32  }
 0x44e   : > { %8713 = vset.pattern.permute.xlu1 %v9214_v52 }
 0x44f   : > { %1652 = vperm.xlu1 %8713, %v1609_v16  }
 0x452   : > { %v1450_v3 = vpop.permute.xlu2 %1449 }
 0x455   : > { %1341 = vperm.xlu2 %8715, %v10040_v13  }
 0x457   : > { %1655 = vperm.xlu1 %8713, %v1610_v35  }
 0x459   : > { %v1438_v15 = vpop.permute.xlu0 %1437 }
 0x45a   : > { %v1454_v27 = vpop.permute.xlu2 %1453 }
 0x45d   : > { %8718 = vset.pattern.permute.xlu2 %v9216_v53 }
 0x45e   : > { %1529 = vperm.xlu2 %8718, %v9652_v41   ;;  %v10134_v41 = vpop.f32.mrf.mxu2 }
 0x45f   : > { %8716 = vset.pattern.permute.xlu1 %v9216_v53 }
 0x460   : > { %1517 = vperm.xlu1 %8716, %v10040_v13   ;;  %v1500_v13 = vmul.f32 %v9999_v30, %v1438_v15 }
 0x462   : > { %v1417_v29 = vpop.permute.xlu1 %1416  ;;  %v1620_v45 = vpop.permute.xlu0 %1619 }
 0x463   : > { %v1435_v60 = vmul.f32 %v9999_v30, %v1417_v29  ;;  %vm1662_vm0 = vcmp.eq.s32.totalorder %v10106_v11, %v1620_v45  ;;  %v1629_v9 = vpop.permute.xlu2 %1628 }
 0x464   : > { %v8126_v63 = vsel %vm1662_vm0, 1.0, %v14877_v24  ;;  %vm1665_vm2 = vcmp.eq.s32.totalorder %v10106_v11, %v1629_v9 }
 0x465   : > { %8189 = vmatmul.msk.f32.gmra.mxu2 %vm2035_vm9, %v1435_v60  ;;  %8160 = vmatmul.msk.f32.gmra.mxu1 %vm1723_vm13, %v8126_v63  ;;  %v8129_v21 = vsel %vm1665_vm2, 1.0, %v14877_v24 }
 0x466   : > { %1537 = vperm.xlu2 %8718, %v9784_v62   ;;  %8144 = vmatmul.msk.f32.gmra.mxu0 %vm1723_vm13, %v8126_v63  ;;  %v10140_v7 = vpop.f32.mrf.mxu2 }
 0x468   : > { %1521 = vperm.xlu1 %8716, %v9657_v47  }
 0x46b   : > { %v1632_v48 = vpop.permute.xlu2 %1631 }
 0x46c   : > { %v1442_v22 = vpop.permute.xlu1 %1441  ;;  %v1458_v10 = vpop.permute.xlu0 %1457  ;;  %vm1666_vm3 = vcmp.eq.s32.totalorder %v10106_v11, %v1632_v48 }
 0x46d   : > { %8190 = vmatmul.msk.f32.gmra.mxu2 %vm2035_vm9, %v1500_v13  ;;  %v1501_v62 = vmul.f32 %v9999_v30, %v1442_v22  ;;  %v8130_v12 = vsel %vm1666_vm3, 1.0, %v14877_v24 }
 0x46e   : > { %1549 = vperm.xlu2 %8718, %v9854_v14   ;;  %v10149_v47 = vpop.f32.mrf.mxu2 }
 0x470   : > { %1533 = vperm.xlu1 %8716, %v9732_v54  }
 0x474   : > { %v1446_v6 = vpop.permute.xlu1 %1445  ;;  %v10144_v58 = vpop.permute.xlu2 %1469 }
 0x475   : > { %v1635_v43 = vpop.permute.xlu0 %1634  ;;  %8191 = vmatmul.msk.f32.gmra.mxu2 %vm2035_vm9, %v1501_v62  ;;  %v1502_v14 = vmul.f32 %v9999_v30, %v1446_v6  ;;  %v1508_v48 = vmul.f32 %v9999_v30, %v10144_v58 }
 0x476   : > { %1561 = vperm.xlu2 %8718, %v9980_v8   ;;  %v10164_v8 = vpop.f32.mrf.mxu2  ;;  %vm1667_vm4 = vcmp.eq.s32.totalorder %v10106_v11, %v1635_v43 }
 0x477   : > { %v8131_v15 = vsel %vm1667_vm4, 1.0, %v14877_v24 }
 0x478   : > { %1541 = vperm.xlu1 %8716, %v9811_v17   ;;  %v1503_v17 = vmul.f32 %v9999_v30, %v1450_v3 }
 0x47c   : > { %v10152_v50 = vpop.permute.xlu2 %1473 }
 0x47d   : > { %v1623_v51 = vpop.permute.xlu1 %1622  ;;  %8192 = vmatmul.msk.f32.gmra.mxu2 %vm2035_vm9, %v1502_v14  ;;  %v1509_v43 = vmul.f32 %v9999_v30, %v10152_v50 }
 0x47e   : > { %vm1663_vm7 = vcmp.eq.s32.totalorder %v10106_v11, %v1623_v51  ;;  %1573 = vperm.xlu2 %8718, %v10032_v28   ;;  %v10158_v53 = vpop.permute.xlu0 %1477  ;;  %v10177_v19 = vpop.f32.mrf.mxu2 }
 0x47f   : > { %v8127_v54 = vsel %vm1663_vm7, 1.0, %v14877_v24 }
 0x480   : > { %1553 = vperm.xlu1 %8716, %v9992_v36   ;;  %8161 = vmatmul.msk.f32.gmra.mxu1 %vm1723_vm13, %v8127_v54  ;;  %v1504_v36 = vmul.f32 %v9999_v30, %v1454_v27 }
 0x481   : > { %8145 = vmatmul.msk.f32.gmra.mxu0 %vm1723_vm13, %v8127_v54 }
 0x485   : > { %v1626_v20 = vpop.permute.xlu1 %1625  ;;  %8193 = vmatmul.msk.f32.gmra.mxu2 %vm2035_vm9, %v1503_v17  ;;  %v1644_v57 = vpop.permute.xlu2 %1643  ;;  %v1510_v17 = vmul.f32 %v9999_v30, %v10158_v53 }
 0x486   : > { %vm1664_vm1 = vcmp.eq.s32.totalorder %v10106_v11, %v1626_v20  ;;  %8720 = vset.pattern.permute.xlu2 %v9214_v52  ;;  %v10190_v32 = vpop.f32.mrf.mxu2  ;;  %vm1670_vm8 = vcmp.eq.s32.totalorder %v10106_v11, %v1644_v57  ;;  %v4767_v57 = vld [vmem:[%s14872_s6 + $0x480] sm:$0xff] }
 0x487   : > { %v8128_v28 = vsel %vm1664_vm1, 1.0, %v14877_v24  ;;  %v10170_v46 = vpop.permute.xlu0 %1649  ;;  %v8134_v58 = vsel %vm1670_vm8, 1.0, %v14877_v24  ;;  %4770 = vmatpush.msrb.mxu2 %v4767_v57  ;;  %v4752_v57 = vld [vmem:[%s14872_s6 + $0x408] sm:$0xff] }
 0x488   : > { %1565 = vperm.xlu1 %8716, %v9989_v38   ;;  %8162 = vmatmul.msk.f32.gmra.mxu1 %vm1723_vm13, %v8128_v28  ;;  %v1505_v38 = vmul.f32 %v9999_v30, %v1458_v10  ;;  %vm1672_vm11 = vcmp.eq.s32.totalorder %v10106_v11, %v10170_v46 }
 0x489   : > { %8146 = vmatmul.msk.f32.gmra.mxu0 %vm1723_vm13, %v8128_v28  ;;  %v4766_v28 = vld [vmem:[%s14872_s6 + $0x478] sm:$0xff] }
 0x48a   : > { %4771 = vmatpush.msrb.mxu2 %v4766_v28 }
 0x48d   : > { %8194 = vmatmul.msk.f32.gmra.mxu2 %vm2035_vm9, %v1504_v36  ;;  %v1647_v23 = vpop.permute.xlu2 %1646 }
 0x48e   : > { %v1462_v1 = vpop.permute.xlu1 %1461  ;;  %v10205_v45 = vpop.f32.mrf.mxu2  ;;  %vm1671_vm10 = vcmp.eq.s32.totalorder %v10106_v11, %v1647_v23  ;;  %v8136_v23 = vsel %vm1672_vm11, 1.0, %v14877_v24 }
 0x48f   : > { %v1506_v35 = vmul.f32 %v9999_v30, %v1462_v1  ;;  %v8135_v20 = vsel %vm1671_vm10, 1.0, %v14877_v24  ;;  %v4764_v1 = vld [vmem:[%s14872_s6 + $0x468] sm:$0xff] }
 0x490   : > { %1577 = vperm.xlu1 %8716, %v10048_v61   ;;  %v10182_v2 = vpop.permute.xlu0 %1497  ;;  %8163 = vmatmul.msk.f32.gmra.mxu1 %vm1723_vm13, %v8129_v21 }
 0x491   : > { %8147 = vmatmul.msk.f32.gmra.mxu0 %vm1723_vm13, %v8129_v21  ;;  %v4765_v21 = vld [vmem:[%s14872_s6 + $0x470] sm:$0xff] }
 0x492   : > { %4772 = vmatpush.msrb.mxu2 %v4765_v21 }
 0x494   : > { %4773 = vmatpush.msrb.mxu2 %v4764_v1 }
 0x495   : > { %8195 = vmatmul.msk.f32.gmra.mxu2 %vm2035_vm9, %v1505_v38  ;;  %v4763_v38 = vld [vmem:[%s14872_s6 + $0x460] sm:$0xff] }
 0x496   : > { %v10192_v34 = vpop.permute.xlu2 %1489  ;;  %v1466_v16 = vpop.permute.xlu1 %1465  ;;  %4774 = vmatpush.msrb.mxu2 %v4763_v38 }
 0x497   : > { %v10215_v13 = vpop.f32.mrf.mxu2 }
 0x498   : > { %8164 = vmatmul.msk.f32.gmra.mxu1 %vm1723_vm13, %v8130_v12  ;;  %8721 = vset.pattern.permute.xlu1 %v9214_v52  ;;  %v1507_v52 = vmul.f32 %v9999_v30, %v1466_v16  ;;  %v4762_v16 = vld [vmem:[%s14872_s6 + $0x458] sm:$0xff] }
 0x499   : > { %v1526_v61 = vpop.permute.xlu0 %1525  ;;  %8148 = vmatmul.msk.f32.gmra.mxu0 %vm1723_vm13, %v8130_v12  ;;  %4775 = vmatpush.msrb.mxu2 %v4762_v16 }
 0x49a   : > { %v1582_v3 = vmul.f32 %v9999_v30, %v1526_v61 }
 0x49c   : > { %8208 = vmatmul.msk.f32.vlgmr.msra.gmra.mxu3 %vm2035_vm9, %v1582_v3  ;;  %v4761_v3 = vld [vmem:[%s14872_s6 + $0x450] sm:$0xff] }
 0x49d   : > { %8196 = vmatmul.msk.f32.gmra.mxu2 %vm2035_vm9, %v1506_v35 }
 0x49e   : > { %v10203_v27 = vpop.permute.xlu2 %1493  ;;  %4776 = vmatpush.msrb.mxu2 %v4761_v3 }
 0x49f   : > { %v1638_v29 = vpop.permute.xlu1 %1637  ;;  %v10228_v6 = vpop.f32.mrf.mxu2 }
 0x4a0   : > { %8165 = vmatmul.msk.f32.gmra.mxu1 %vm1723_vm13, %v8131_v15  ;;  %vm1668_vm5 = vcmp.eq.s32.totalorder %v10106_v11, %v1638_v29  ;;  %v4759_v29 = vld [vmem:[%s14872_s6 + $0x440] sm:$0xff] }
 0x4a1   : > { %8149 = vmatmul.msk.f32.gmra.mxu0 %vm1723_vm13, %v8131_v15  ;;  %v8132_v60 = vsel %vm1668_vm5, 1.0, %v14877_v24  ;;  %v4760_v15 = vld [vmem:[%s14872_s6 + $0x448] sm:$0xff] }
 0x4a2   : > { %4777 = vmatpush.msrb.mxu2 %v4760_v15 }
 0x4a4   : > { %4778 = vmatpush.msrb.mxu2 %v4759_v29 }
 0x4a5   : > { %8197 = vmatmul.msk.f32.gmra.mxu2 %vm2035_vm9, %v1507_v52 }
 0x4a7   : > { %v1641_v9 = vpop.permute.xlu1 %1640  ;;  %v10213_v63 = vpop.permute.xlu2 %1658 }
 0x4a8   : > { %8166 = vmatmul.msk.f32.gmra.mxu1 %vm1723_vm13, %v8132_v60  ;;  %vm1669_vm6 = vcmp.eq.s32.totalorder %v10106_v11, %v1641_v9  ;;  %v10242_v50 = vpop.f32.mrf.mxu2  ;;  %vm1675_vm15 = vcmp.eq.s32.totalorder %v10106_v11, %v10213_v63 }
 0x4a9   : > { %8150 = vmatmul.msk.f32.gmra.mxu0 %vm1723_vm13, %v8132_v60  ;;  %v8133_v22 = vsel %vm1669_vm6, 1.0, %v14877_v24  ;;  %v4758_v60 = vld [vmem:[%s14872_s6 + $0x438] sm:$0xff] }
 0x4aa   : > { %4779 = vmatpush.msrb.mxu2 %v4758_v60 }
 0x4ad   : > { %8198 = vmatmul.msk.f32.gmra.mxu2 %vm2035_vm9, %v1508_v48  ;;  %v1513_v48 = vmul.f32 %v9999_v30, %v10192_v34  ;;  %v4754_v34 = vld [vmem:[%s14872_s6 + $0x418] sm:$0xff] }
 0x4af   : > { %v10224_v10 = vpop.permute.xlu2 %1341 }
 0x4b0   : > { %v1482_v62 = vpop.permute.xlu1 %1481  ;;  %8167 = vmatmul.msk.f32.gmra.mxu1 %vm1723_vm13, %v8133_v22  ;;  %v10268_v46 = vpop.f32.mrf.mxu2 }
 0x4b1   : > { %8151 = vmatmul.msk.f32.gmra.mxu0 %vm1723_vm13, %v8133_v22  ;;  %v1511_v36 = vmul.f32 %v9999_v30, %v1482_v62  ;;  %v4757_v22 = vld [vmem:[%s14872_s6 + $0x430] sm:$0xff] }
 0x4b2   : > { %4780 = vmatpush.msrb.mxu2 %v4757_v22 }
 0x4b5   : > { %8199 = vmatmul.msk.f32.gmra.mxu2 %vm2035_vm9, %v1509_v43  ;;  %v4756_v43 = vld [vmem:[%s14872_s6 + $0x428] sm:$0xff] }
 0x4b6   : > { %4781 = vmatpush.msrb.mxu2 %v4756_v43 }
 0x4b8   : > { %8168 = vmatmul.msk.f32.gmra.mxu1 %vm1723_vm13, %v8134_v58  ;;  %v1530_v14 = vpop.permute.xlu2 %1529  ;;  %v1486_v51 = vpop.permute.xlu1 %1485 }
 0x4b9   : > { %v1583_v54 = vmul.f32 %v9999_v30, %v1530_v14  ;;  %8152 = vmatmul.msk.f32.gmra.mxu0 %vm1723_vm13, %v8134_v58  ;;  %v1512_v61 = vmul.f32 %v9999_v30, %v1486_v51  ;;  %v10288_v52 = vpop.f32.mrf.mxu2  ;;  %v4755_v58 = vld [vmem:[%s14872_s6 + $0x420] sm:$0xff] }
 0x4ba   : > { %4782 = vmatpush.msrb.mxu2 %v4755_v58 }
 0x4bb   : > { %8209 = vmatmul.msk.f32.gmra.mxu3 %vm2035_vm9, %v1583_v54  ;;  %v1514_v54 = vmul.f32 %v9999_v30, %v10203_v27 }
 0x4bc   : > { %4783 = vmatpush.msrb.mxu2 %v4754_v34 }
 0x4bd   : > { %8200 = vmatmul.msk.f32.gmra.mxu2 %vm2035_vm9, %v1510_v17  ;;  %v4753_v17 = vld [vmem:[%s14872_s6 + $0x410] sm:$0xff] }
 0x4be   : > { %4784 = vmatpush.msrb.mxu2 %v4753_v17 }
 0x4c0   : > { %8169 = vmatmul.msk.f32.gmra.mxu1 %vm1723_vm13, %v8135_v20  ;;  %4785 = vmatpush.msrb.mxu2 %v4752_v57  ;;  %v1538_v1 = vpop.permute.xlu2 %1537 }
 0x4c1   : > { %v1653_v53 = vpop.permute.xlu1 %1652  ;;  %8153 = vmatmul.msk.f32.gmra.mxu0 %vm1723_vm13, %v8135_v20  ;;  %v10309_v14 = vpop.f32.mrf.mxu2  ;;  %v8139_v20 = vsel %vm1675_vm15, 1.0, %v14877_v24 }
 0x4c2   : > { %vm1673_vm12 = vcmp.eq.s32.totalorder %v10106_v11, %v1653_v53  ;;  %v10331_v28 = vpop.f32.mrf.mxu1  ;;  %v10334_v27 = vpop.f32.mrf.mxu0 }
 0x4c3   : > { %v8137_v35 = vsel %vm1673_vm12, 1.0, %v14877_v24  ;;  %15115 = vst [vmem:[#allocation22_spill] sm:$0xff] %v10331_v28 }
 0x4c4   : > { %15116 = vst [vmem:[#allocation23_spill] sm:$0xff] %v10334_v27 }
 0x4c5   : > { %8201 = vmatmul.msk.f32.gmra.mxu2 %vm2035_vm9, %v1511_v36  ;;  %v1515_v36 = vmul.f32 %v9999_v30, %v10182_v2 }
 0x4c8   : > { %8170 = vmatmul.msk.f32.gmra.mxu1 %vm1723_vm13, %v8136_v23  ;;  %v1550_v58 = vpop.permute.xlu2 %1549 }
 0x4c9   : > { %v1656_v12 = vpop.permute.xlu1 %1655  ;;  %8154 = vmatmul.msk.f32.gmra.mxu0 %vm1723_vm13, %v8136_v23  ;;  %v10328_v63 = vpop.f32.mrf.mxu2  ;;  %v1420_v23 = vmul.f32 %v9999_v30, %v10224_v10 }
 0x4ca   : > { %vm1674_vm14 = vcmp.eq.s32.totalorder %v10106_v11, %v1656_v12  ;;  %v1585_v12 = vmul.f32 %v9999_v30, %v1538_v1  ;;  %v10347_v16 = vpop.f32.mrf.mxu1 }
 0x4cb   : > { %v8138_v62 = vsel %vm1674_vm14, 1.0, %v14877_v24  ;;  %15117 = vst [vmem:[#allocation24_spill] sm:$0xff] %v10347_v16 }
 0x4cd   : > { %8202 = vmatmul.msk.f32.gmra.mxu2 %vm2035_vm9, %v1512_v61  ;;  %v10350_v61 = vpop.f32.mrf.mxu0 }
 0x4ce   : > { %15118 = vst [vmem:[#allocation25_spill] sm:$0xff] %v10350_v61 }
 0x4d0   : > { %8171 = vmatmul.msk.f32.gmra.mxu1 %vm1723_vm13, %v8137_v35 }
 0x4d1   : > { %8155 = vmatmul.msk.f32.gmra.mxu0 %vm1723_vm13, %v8137_v35 }
 0x4d2   : > { %v1518_v9 = vpop.permute.xlu1 %1517 }
 0x4d3   : > { %v1580_v2 = vmul.f32 %v9999_v30, %v1518_v9  ;;  %v1546_v9 = vpop.permute.xlu0 %1545 }
 0x4d4   : > { %v1587_v22 = vmul.f32 %v9999_v30, %v1546_v9 }
 0x4d5   : > { %8203 = vmatmul.msk.f32.gmra.mxu2 %vm2035_vm9, %v1513_v48 }
 0x4d8   : > { %8172 = vmatmul.msk.f32.gmra.mxu1 %vm1723_vm13, %v8138_v62 }
 0x4d9   : > { %8156 = vmatmul.msk.f32.gmra.mxu0 %vm1723_vm13, %v8138_v62 }
 0x4da   : > { %v1522_v51 = vpop.permute.xlu1 %1521 }
 0x4db   : > { %v1581_v10 = vmul.f32 %v9999_v30, %v1522_v51  ;;  %v1588_v51 = vmul.f32 %v9999_v30, %v1550_v58 }
 0x4dd   : > { %8204 = vmatmul.msk.f32.gmra.mxu2 %vm2035_vm9, %v1514_v54 }
 0x4e0   : > { %8173 = vmatmul.msk.f32.gmra.mxu1 %vm1723_vm13, %v8139_v20 }
 0x4e1   : > { %8157 = vmatmul.msk.f32.gmra.mxu0 %vm1723_vm13, %v8139_v20 }
 0x4e2   : > { %v1534_v53 = vpop.permute.xlu1 %1533  ;;  %v10358_v29 = vpop.f32.mrf.mxu1 }
 0x4e3   : > { %v1584_v21 = vmul.f32 %v9999_v30, %v1534_v53  ;;  %15119 = vst [vmem:[#allocation26_spill] sm:$0xff] %v10358_v29  ;;  %v10360_v60 = vpop.f32.mrf.mxu0 }
 0x4e4   : > { %15120 = vst [vmem:[#allocation27_spill] sm:$0xff] %v10360_v60 }
 0x4e5   : > { %8210 = vmatmul.msk.f32.gmra.mxu3 %vm2035_vm9, %v1584_v21  ;;  %8205 = vmatmul.msk.f32.gmra.mxu2 %vm2035_vm9, %v1515_v36  ;;  %v1558_v21 = vpop.permute.xlu0 %1557 }
 0x4e8   : > { %8174 = vmatmul.msk.f32.vlgmr.msrb.gmra.mxu1 %vm2035_vm9, %v1420_v23  ;;  %v10344_v38 = vpop.f32.mrf.mxu2 }
 0x4ea   : > { %v1542_v3 = vpop.permute.xlu1 %1541 }
 0x4eb   : > { %v1586_v15 = vmul.f32 %v9999_v30, %v1542_v3  ;;  %v1562_v3 = vpop.permute.xlu2 %1561 }
 0x4ec   : > { %v1591_v9 = vmul.f32 %v9999_v30, %v1562_v3 }
 0x4ed   : > { %8211 = vmatmul.msk.f32.gmra.mxu3 %vm2035_vm9, %v1585_v12  ;;  %8206 = vmatmul.msk.f32.gmra.mxu2 %vm2035_vm9, %v1580_v2  ;;  %v1590_v12 = vmul.f32 %v9999_v30, %v1558_v21 }
 0x4f0   : > { %v10354_v35 = vpop.f32.mrf.mxu2 }
 0x4f2   : > { %v1554_v17 = vpop.permute.xlu1 %1553 }
 0x4f3   : > { %v1589_v53 = vmul.f32 %v9999_v30, %v1554_v17 }
 0x4f5   : > { %8212 = vmatmul.msk.f32.gmra.mxu3 %vm2035_vm9, %v1586_v15  ;;  %8207 = vmatmul.msk.f32.gmra.mxu2 %vm2035_vm9, %v1581_v10 }
 0x4f8   : > { %v10364_v48 = vpop.f32.mrf.mxu2 }
 0x4f9   : > { %15121 = vst [vmem:[#allocation28_spill] sm:$0xff] %v10364_v48 }
 0x4fd   : > { %v10367_v62 = vpop.f32.mrf.mxu1  ;;  %8213 = vmatmul.msk.f32.gmra.mxu3 %vm2035_vm9, %v1587_v22  ;;  %4786 = vmatmul.f32.vlgmr.msrb.gmra.mxu2 %v10334_v27  ;;  %v2343_v22 = vmul.f32 %v10140_v7, %v10140_v7 }
 0x4fe   : > { %15122 = vst [vmem:[#allocation29_spill] sm:$0xff] %v10367_v62  ;;  %v10371_v43 = vpop.f32.mrf.mxu0 }
 0x4ff   : > { %15123 = vst [vmem:[#allocation30_spill] sm:$0xff] %v10371_v43  ;;  %v2399_v21 = vsel %vm2035_vm9, %v2343_v22, 0.0  ;;  %v1570_v22 = vpop.permute.xlu0 %1569 }
 0x500   : > { %v10373_v34 = vpop.f32.mrf.mxu2 }
 0x501   : > { %15124 = vst [vmem:[#allocation31_spill] sm:$0xff] %v10373_v34  ;;  %v2359_v15 = vmul.f32 %v10373_v34, %v10373_v34 }
 0x503   : > { %v2400_v17 = vsel %vm2035_vm9, %v2359_v15, 0.0 }
 0x504   : > { %v2401_v24 = vadd.f32 %v2400_v17, %v2399_v21  ;;  %v9127_v17 = vld [vmem:[%s14872_s6 + $0x4b0] ss:$0 sm:$0xff] }
 0x505   : > { %v10376_v54 = vpop.f32.mrf.mxu1  ;;  %8214 = vmatmul.msk.f32.gmra.mxu3 %vm2035_vm9, %v1588_v51  ;;  %4789 = vmatmul.f32.gmra.mxu2 %v10350_v61  ;;  %v1593_v21 = vmul.f32 %v9127_v17, %v1570_v22 }
 0x506   : > { %15125 = vst [vmem:[#allocation32_spill] sm:$0xff] %v10376_v54  ;;  %v10380_v20 = vpop.f32.mrf.mxu0 }
 0x507   : > { %15126 = vst [vmem:[#allocation33_spill] sm:$0xff] %v10380_v20 }
 0x508   : > { %v10382_v57 = vpop.f32.mrf.mxu2 }
 0x509   : > { %15127 = vst [vmem:[#allocation34_spill] sm:$0xff] %v10382_v57 }
 0x50d   : > { %v10385_v36 = vpop.f32.mrf.mxu1  ;;  %8215 = vmatmul.msk.f32.gmra.mxu3 %vm2035_vm9, %v1589_v53  ;;  %4792 = vmatmul.f32.gmra.mxu2 %v10360_v60 }
 0x50e   : > { %15128 = vst [vmem:[#allocation35_spill] sm:$0xff] %v10385_v36  ;;  %v10391_v1 = vpop.f32.mrf.mxu0 }
 0x50f   : > { %15130 = vst [vmem:[#allocation37_spill] sm:$0xff] %v10391_v1 }
 0x510   : > { %v10389_v23 = vpop.f32.mrf.mxu2 }
 0x511   : > { %15129 = vst [vmem:[#allocation36_spill] sm:$0xff] %v10389_v23  ;;  %v2361_v56 = vmul.f32 %v10389_v23, %v10389_v23 }
 0x515   : > { %v10394_v2 = vpop.f32.mrf.mxu1  ;;  %8216 = vmatmul.msk.f32.gmra.mxu3 %vm2035_vm9, %v1590_v12  ;;  %4795 = vmatmul.f32.gmra.mxu2 %v10371_v43  ;;  %v1566_v12 = vpop.permute.xlu1 %1565 }
 0x516   : > { %15131 = vst [vmem:[#allocation38_spill] sm:$0xff] %v10394_v2  ;;  %v10405_v58 = vpop.f32.mrf.mxu0  ;;  %v1592_v60 = vmul.f32 %v9999_v30, %v1566_v12 }
 0x517   : > { %15133 = vst [vmem:[#allocation40_spill] sm:$0xff] %v10405_v58 }
 0x518   : > { %v10398_v10 = vpop.f32.mrf.mxu2 }
 0x519   : > { %15132 = vst [vmem:[#allocation39_spill] sm:$0xff] %v10398_v10 }
 0x51d   : > { %v10407_v51 = vpop.f32.mrf.mxu1  ;;  %8217 = vmatmul.msk.f32.gmra.mxu3 %vm2035_vm9, %v1591_v9  ;;  %4798 = vmatmul.f32.gmra.mxu2 %v10380_v20 }
 0x51e   : > { %15134 = vst [vmem:[#allocation41_spill] sm:$0xff] %v10407_v51  ;;  %v10425_v15 = vpop.f32.mrf.mxu0 }
 0x51f   : > { %v10412_v53 = vpop.f32.mrf.mxu3  ;;  %15138 = vst [vmem:[#allocation45_spill] sm:$0xff] %v10425_v15 }
 0x520   : > { %15135 = vst [vmem:[#allocation42_spill] sm:$0xff] %v10412_v53  ;;  %v2375_v3 = vmul.f32 %v10412_v53, %v10412_v53  ;;  %v10417_v39 = vpop.f32.mrf.mxu2 }
 0x521   : > { %15136 = vst [vmem:[#allocation43_spill] sm:$0xff] %v10417_v39 }
 0x522   : > { %v2402_v43 = vsel %vm2035_vm9, %v2375_v3, 0.0 }
 0x523   : > { %v2403_v9 = vadd.f32 %v2402_v43, %v2401_v24  ;;  %v1574_v43 = vpop.permute.xlu2 %1573 }
 0x524   : > { %v1594_v5 = vmul.f32 %v9127_v17, %v1574_v43 }
 0x525   : > { %v10421_v61 = vpop.f32.mrf.mxu1  ;;  %8218 = vmatmul.msk.f32.gmra.mxu3 %vm2035_vm9, %v1592_v60  ;;  %4801 = vmatmul.f32.gmra.mxu2 %v10391_v1  ;;  %8871 = vrsqrt.f32 %v2403_v9  ;;  %vm2500_vm13 = vcmp.eq.f32.partialorder %v2403_v9, inf  ;;  %vm2502_vm0 = vcmp.eq.f32.partialorder %v2403_v9, 0.0 }
 0x526   : > { %15137 = vst [vmem:[#allocation44_spill] sm:$0xff] %v10421_v61  ;;  %v10436_v12 = vpop.f32.mrf.mxu0 }
 0x527   : > { %15141 = vst [vmem:[#allocation48_spill] sm:$0xff] %v10436_v12 }
 0x528   : > { %v10427_v20 = vpop.f32.mrf.mxu2 }
 0x529   : > { %15139 = vst [vmem:[#allocation46_spill] sm:$0xff] %v10427_v20 }
 0x52b   : > { %v8872_v27 = vpop.eup %8871 }
 0x52c   : > { %v2494_v30 = vmul.f32 %v8872_v27, %v2403_v9 }
 0x52d   : > { %v10432_v24 = vpop.f32.mrf.mxu1  ;;  %8219 = vmatmul.msk.f32.gmra.mxu3 %vm2035_vm9, %v1593_v21  ;;  %4804 = vmatmul.f32.gmra.mxu2 %v10405_v58  ;;  %v2503_v21 = vand.u32 2147483648, %v2403_v9  ;;  %v1578_v58 = vpop.permute.xlu1 %1577 }
 0x52e   : > { %15140 = vst [vmem:[#allocation47_spill] sm:$0xff] %v10432_v24  ;;  %v2495_v60 = vmul.f32 %v8872_v27, %v2494_v30  ;;  %v10446_v44 = vpop.f32.mrf.mxu0 }
 0x52f   : > { %15144 = vst [vmem:[#allocation51_spill] sm:$0xff] %v10446_v44 }
 0x530   : > { %v10438_v3 = vpop.f32.mrf.mxu2  ;;  %v2496_v1 = vmul.f32 0.5, %v2495_v60 }
 0x531   : > { %15142 = vst [vmem:[#allocation49_spill] sm:$0xff] %v10438_v3 }
 0x532   : > { %v2497_v53 = vsub.f32 1.5, %v2496_v1 }
 0x534   : > { %v2498_v4 = vmul.f32 %v8872_v27, %v2497_v53  ;;  %v1595_v27 = vmul.f32 %v9127_v17, %v1578_v58 }
 0x535   : > { %v10440_v25 = vpop.f32.mrf.mxu1  ;;  %8220 = vmatmul.msk.f32.gmra.mxu3 %vm2035_vm9, %v1594_v5  ;;  %4807 = vmatmul.f32.gmra.mxu2 %v10425_v15 }
 0x536   : > { %15143 = vst [vmem:[#allocation50_spill] sm:$0xff] %v10440_v25  ;;  %v2499_v22 = vmul.f32 %v2498_v4, %v2403_v9  ;;  %v2021_v4 = vld [vmem:[%s14872_s6 + $0x100] sm:$0xff]  ;;  %v10464_v58 = vpop.f32.mrf.mxu0 }
 0x537   : > { %3011 = vmatpush.msrb.mxu0 %v2021_v4  ;;  %15146 = vst [vmem:[#allocation53_spill] sm:$0xff] %v10464_v58 }
 0x538   : > { %v10444_v30 = vpop.f32.mrf.mxu2  ;;  %v2501_v31 = vsel %vm2500_vm13, %v2403_v9, %v2499_v22  ;;  %v2018_v9 = vld [vmem:[%s14872_s6 + $0xe8] sm:$0xff] }
 0x539   : > { %v2504_v18 = vsel %vm2502_vm0, %v2503_v21, %v2501_v31  ;;  %v2020_v31 = vld [vmem:[%s14872_s6 + $0xf8] sm:$0xff] }
 0x53a   : > { %2681 = vrot.lane.b32.xlu1 %v2504_v18, %s9218_s14  ;;  %3012 = vmatpush.msrb.mxu0 %v2020_v31  ;;  %v2019_v18 = vld [vmem:[%s14872_s6 + $0xf0] sm:$0xff] }
 0x53c   : > { %3013 = vmatpush.msrb.mxu0 %v2019_v18 }
 0x53d   : > { %v10449_v1 = vpop.f32.mrf.mxu1  ;;  %8221 = vmatmul.msk.f32.gmra.mxu3 %vm2035_vm9, %v1595_v27  ;;  %4810 = vmatmul.f32.gmra.mxu2 %v10436_v12 }
 0x53e   : > { %15145 = vst [vmem:[#allocation52_spill] sm:$0xff] %v10449_v1  ;;  %3014 = vmatpush.msrb.mxu0 %v2018_v9  ;;  %v10477_v43 = vpop.f32.mrf.mxu0  ;;  %v10491_v18 = vpop.f32.mrf.mxu3  ;;  %v2360_v9 = vmul.f32 %v10382_v57, %v10382_v57 }
 0x53f   : > { %15149 = vst [vmem:[#allocation56_spill] sm:$0xff] %v10477_v43 }
 0x540   : > { %v10456_v5 = vpop.f32.mrf.mxu2  ;;  %15153 = vst [vmem:[#allocation60_spill] sm:$0xff] %v10491_v18  ;;  %v2405_v15 = vsel %vm2035_vm9, %v2360_v9, 0.0  ;;  %v2346_v9 = vmul.f32 %v10177_v19, %v10177_v19 }
 0x545   : > { %v10466_v53 = vpop.f32.mrf.mxu1  ;;  %4813 = vmatmul.f32.gmra.mxu2 %v10446_v44  ;;  %v2344_v44 = vmul.f32 %v10149_v47, %v10149_v47 }
 0x546   : > { %15147 = vst [vmem:[#allocation54_spill] sm:$0xff] %v10466_v53  ;;  %v10484_v27 = vpop.f32.mrf.mxu0 }
 0x547   : > { %15151 = vst [vmem:[#allocation58_spill] sm:$0xff] %v10484_v27  ;;  %v2404_v49 = vsel %vm2035_vm9, %v2344_v44, 0.0  ;;  %v2345_v44 = vmul.f32 %v10164_v8, %v10164_v8 }
 0x548   : > { %v10472_v17 = vpop.f32.mrf.mxu2  ;;  %v2406_v42 = vadd.f32 %v2405_v15, %v2404_v49  ;;  %v2362_v49 = vmul.f32 %v10398_v10, %v10398_v10 }
 0x54a   : > { %v2415_v10 = vsel %vm2035_vm9, %v2362_v49, 0.0 }
 0x54d   : > { %v10474_v60 = vpop.f32.mrf.mxu1  ;;  %4816 = vmatmul.f32.gmra.mxu2 %v10464_v58 }
 0x54e   : > { %15148 = vst [vmem:[#allocation55_spill] sm:$0xff] %v10474_v60  ;;  %v10501_v12 = vpop.f32.mrf.mxu0 }
 0x54f   : > { %15154 = vst [vmem:[#allocation61_spill] sm:$0xff] %v10501_v12 }
 0x550   : > { %v10479_v22 = vpop.f32.mrf.mxu2 }
 0x555   : > { %v10481_v21 = vpop.f32.mrf.mxu1  ;;  %4819 = vmatmul.f32.gmra.mxu2 %v10477_v43  ;;  %v2376_v43 = vmul.f32 %v10491_v18, %v10491_v18 }
 0x556   : > { %15150 = vst [vmem:[#allocation57_spill] sm:$0xff] %v10481_v21  ;;  %v2414_v21 = vsel %vm2035_vm9, %v2346_v9, 0.0  ;;  %v2358_v9 = vmul.f32 %v10364_v48, %v10364_v48 }
 0x557   : > { %v2416_v49 = vadd.f32 %v2415_v10, %v2414_v21  ;;  %v2347_v10 = vmul.f32 %v10190_v32, %v10190_v32 }
 0x558   : > { %v10486_v4 = vpop.f32.mrf.mxu2 }
 0x55d   : > { %v10488_v31 = vpop.f32.mrf.mxu1  ;;  %4822 = vmatmul.f32.gmra.mxu2 %v10484_v27  ;;  %v2407_v27 = vsel %vm2035_vm9, %v2376_v43, 0.0 }
 0x55e   : > { %15152 = vst [vmem:[#allocation59_spill] sm:$0xff] %v10488_v31  ;;  %v10510_v37 = vadd.f32 %v2407_v27, %v2406_v42  ;;  %v2410_v42 = vsel %vm2035_vm9, %v2361_v56, 0.0  ;;  %v10525_v27 = vpop.f32.mrf.mxu0 }
 0x55f   : > { %15156 = vst [vmem:[#allocation63_spill] sm:$0xff] %v10525_v27 }
 0x560   : > { %v10495_v58 = vpop.f32.mrf.mxu2  ;;  %8873 = vrsqrt.f32 %v10510_v37  ;;  %vm2512_vm4 = vcmp.eq.f32.partialorder %v10510_v37, inf  ;;  %vm2514_vm8 = vcmp.eq.f32.partialorder %v10510_v37, 0.0 }
 0x565   : > { %v2197_v40 = vpop.f32.mrf.mxu1  ;;  %4825 = vmatmul.f32.gmra.mxu2 %v10501_v12  ;;  %v2357_v12 = vmul.f32 %v10354_v35, %v10354_v35 }
 0x566   : > { %8238 = vmatmul.msk.f32.vlgmr.msrb.gmra.mxu0 %vm2035_vm9, %v2197_v40  ;;  %v2341_v15 = vmul.f32 %v2197_v40, %v2197_v40 }
 0x568   : > { %v10512_v18 = vpop.f32.mrf.mxu3  ;;  %v10514_v55 = vpop.f32.mrf.mxu2  ;;  %v2389_v56 = vsel %vm2035_vm9, %v2341_v15, 0.0 }
 0x569   : > { %15155 = vst [vmem:[#allocation62_spill] sm:$0xff] %v10512_v18  ;;  %v2377_v43 = vmul.f32 %v10512_v18, %v10512_v18  ;;  %v2409_v18 = vsel %vm2035_vm9, %v2345_v44, 0.0 }
 0x56a   : > { %v2411_v40 = vadd.f32 %v2410_v42, %v2409_v18  ;;  %v2363_v42 = vmul.f32 %v10417_v39, %v10417_v39 }
 0x56b   : > { %v2412_v23 = vsel %vm2035_vm9, %v2377_v43, 0.0  ;;  %v10549_v43 = vpop.eup %8873 }
 0x56c   : > { %v10543_v1 = vadd.f32 %v2412_v23, %v2411_v40  ;;  %v2342_v40 = vmul.f32 %v10134_v41, %v10134_v41  ;;  %v2506_v21 = vmul.f32 %v10549_v43, %v10510_v37 }
 0x56d   : > { %4828 = vmatmul.f32.gmra.mxu2 %v10525_v27  ;;  %v2390_v27 = vsel %vm2035_vm9, %v2357_v12, 0.0 }
 0x56e   : > { %8239 = vmatmul.msk.f32.gmra.mxu0 %vm2035_vm9, %v10134_v41  ;;  %v2391_v15 = vadd.f32 %v2390_v27, %v2389_v56  ;;  %8875 = vrsqrt.f32 %v10543_v1  ;;  %v2395_v41 = vsel %vm2035_vm9, %v2358_v9, 0.0  ;;  %v2420_v27 = vsel %vm2035_vm9, %v2363_v42, 0.0 }
 0x56f   : > { %v2394_v56 = vsel %vm2035_vm9, %v2342_v40, 0.0  ;;  %v2507_v9 = vmul.f32 %v10549_v43, %v2506_v21  ;;  %v2364_v40 = vmul.f32 %v10427_v20, %v10427_v20  ;;  %vm2524_vm10 = vcmp.eq.f32.partialorder %v10543_v1, inf }
 0x570   : > { %v10538_v26 = vpop.f32.mrf.mxu3  ;;  %v10540_v57 = vpop.f32.mrf.mxu2  ;;  %vm2526_vm12 = vcmp.eq.f32.partialorder %v10543_v1, 0.0 }
 0x571   : > { %15157 = vst [vmem:[#allocation64_spill] sm:$0xff] %v10538_v26  ;;  %v2378_v44 = vmul.f32 %v10538_v26, %v10538_v26  ;;  %v2373_v18 = vmul.f32 %v10540_v57, %v10540_v57  ;;  %v10559_v26 = vpop.f32.mrf.mxu0 }
 0x572   : > { %15158 = vst [vmem:[#allocation65_spill] sm:$0xff] %v10540_v57 }
 0x573   : > { %v2417_v12 = vsel %vm2035_vm9, %v2378_v44, 0.0  ;;  %v2392_v23 = vsel %vm2035_vm9, %v2373_v18, 0.0  ;;  %15159 = vst [vmem:[#allocation66_spill] sm:$0xff] %v10559_v26 }
 0x574   : > { %v10561_v57 = vadd.f32 %v2417_v12, %v2416_v49  ;;  %v10563_v60 = vadd.f32 %v2392_v23, %v2391_v15  ;;  %v2419_v49 = vsel %vm2035_vm9, %v2347_v10, 0.0  ;;  %v2396_v12 = vadd.f32 %v2395_v41, %v2394_v56  ;;  %v10588_v23 = vpop.eup %8875 }
 0x575   : > { %4831 = vmatmul.f32.gmra.mxu2 %v10559_v26  ;;  %v2421_v42 = vadd.f32 %v2420_v27, %v2419_v49  ;;  %v2365_v41 = vmul.f32 %v10438_v3, %v10438_v3  ;;  %v2508_v56 = vmul.f32 0.5, %v2507_v9  ;;  %v2349_v49 = vmul.f32 %v10215_v13, %v10215_v13 }
 0x576   : > { %8240 = vmatmul.msk.f32.gmra.mxu0 %vm2035_vm9, %v10140_v7  ;;  %8877 = vrsqrt.f32 %v10561_v57  ;;  %vm2536_vm7 = vcmp.eq.f32.partialorder %v10561_v57, inf  ;;  %vm2538_vm1 = vcmp.eq.f32.partialorder %v10561_v57, 0.0  ;;  %vm2476_vm2 = vcmp.eq.f32.partialorder %v10563_v60, inf }
 0x577   : > { %8879 = vrsqrt.f32 %v10563_v60  ;;  %v2430_v3 = vsel %vm2035_vm9, %v2365_v41, 0.0  ;;  %v2509_v59 = vsub.f32 1.5, %v2508_v56  ;;  %v2366_v56 = vmul.f32 %v10444_v30, %v10444_v30 }
 0x578   : > { %v10578_v44 = vpop.f32.mrf.mxu3  ;;  %v10580_v18 = vpop.f32.mrf.mxu2  ;;  %vm2478_vm3 = vcmp.eq.f32.partialorder %v10563_v60, 0.0 }
 0x579   : > { %15160 = vst [vmem:[#allocation67_spill] sm:$0xff] %v10578_v44  ;;  %v2379_v15 = vmul.f32 %v10578_v44, %v10578_v44  ;;  %v2374_v7 = vmul.f32 %v10580_v18, %v10580_v18  ;;  %v2348_v44 = vmul.f32 %v10205_v45, %v10205_v45 }
 0x57a   : > { %15161 = vst [vmem:[#allocation68_spill] sm:$0xff] %v10580_v18 }
 0x57b   : > { %v2422_v26 = vsel %vm2035_vm9, %v2379_v15, 0.0  ;;  %v2397_v39 = vsel %vm2035_vm9, %v2374_v7, 0.0  ;;  %v2518_v7 = vmul.f32 %v10588_v23, %v10543_v1  ;;  %v2424_v9 = vsel %vm2035_vm9, %v2348_v44, 0.0 }
 0x57c   : > { %v8878_v10 = vpop.eup %8877  ;;  %v10596_v31 = vadd.f32 %v2422_v26, %v2421_v42  ;;  %v10598_v18 = vadd.f32 %v2397_v39, %v2396_v12  ;;  %v2425_v26 = vsel %vm2035_vm9, %v2364_v40, 0.0 }
 0x57d   : > { %v8880_v21 = vpop.eup %8879  ;;  %v2530_v27 = vmul.f32 %v8878_v10, %v10561_v57  ;;  %v2426_v34 = vadd.f32 %v2425_v26, %v2424_v9  ;;  %v2519_v53 = vmul.f32 %v10588_v23, %v2518_v7  ;;  %v2479_v7 = vand.u32 2147483648, %v10563_v60 }
 0x57e   : > { %8241 = vmatmul.msk.f32.gmra.mxu0 %vm2035_vm9, %v10149_v47  ;;  %v2470_v15 = vmul.f32 %v8880_v21, %v10563_v60  ;;  %8881 = vrsqrt.f32 %v10598_v18  ;;  %vm2488_vm5 = vcmp.eq.f32.partialorder %v10598_v18, inf  ;;  %vm2490_vm6 = vcmp.eq.f32.partialorder %v10598_v18, 0.0 }
 0x57f   : > { %v2531_v39 = vmul.f32 %v8878_v10, %v2530_v27  ;;  %8883 = vrsqrt.f32 %v10596_v31  ;;  %v2429_v27 = vsel %vm2035_vm9, %v2349_v49, 0.0  ;;  %vm2548_vm11 = vcmp.eq.f32.partialorder %v10596_v31, inf }
 0x580   : > { %v10614_v12 = vpop.f32.mrf.mxu3  ;;  %v2471_v42 = vmul.f32 %v8880_v21, %v2470_v15  ;;  %v2350_v15 = vmul.f32 %v10228_v6, %v10228_v6  ;;  %v2431_v33 = vadd.f32 %v2430_v3, %v2429_v27  ;;  %vm2550_vm14 = vcmp.eq.f32.partialorder %v10596_v31, 0.0 }
 0x581   : > { %15162 = vst [vmem:[#allocation69_spill] sm:$0xff] %v10614_v12  ;;  %v2380_v47 = vmul.f32 %v10614_v12, %v10614_v12  ;;  %v2532_v20 = vmul.f32 0.5, %v2531_v39  ;;  %v2510_v39 = vmul.f32 %v10549_v43, %v2509_v59  ;;  %v2539_v59 = vand.u32 2147483648, %v10561_v57 }
 0x582   : > { %v2472_v40 = vmul.f32 0.5, %v2471_v42 }
 0x583   : > { %v2427_v61 = vsel %vm2035_vm9, %v2380_v47, 0.0  ;;  %v2533_v25 = vsub.f32 1.5, %v2532_v20 }
 0x584   : > { %v8882_v44 = vpop.eup %8881  ;;  %v10624_v41 = vadd.f32 %v2427_v61, %v2426_v34  ;;  %v2473_v48 = vsub.f32 1.5, %v2472_v40 }
 0x585   : > { %v8884_v12 = vpop.eup %8883  ;;  %v2534_v26 = vmul.f32 %v8878_v10, %v2533_v25  ;;  %v2482_v49 = vmul.f32 %v8882_v44, %v10598_v18  ;;  %v2520_v25 = vmul.f32 0.5, %v2519_v53 }
 0x586   : > { %8242 = vmatmul.msk.f32.gmra.mxu0 %vm2035_vm9, %v10164_v8  ;;  %v2474_v20 = vmul.f32 %v8880_v21, %v2473_v48  ;;  %v2542_v3 = vmul.f32 %v8884_v12, %v10596_v31  ;;  %8885 = vrsqrt.f32 %v10624_v41  ;;  %vm2560_vm15 = vcmp.eq.f32.partialorder %v10624_v41, inf }
 0x587   : > { %v2535_v61 = vmul.f32 %v2534_v26, %v10561_v57  ;;  %v2483_v34 = vmul.f32 %v8882_v44, %v2482_v49  ;;  %v2521_v49 = vsub.f32 1.5, %v2520_v25  ;;  %v2515_v25 = vand.u32 2147483648, %v10510_v37 }
 0x588   : > { %v10637_v10 = vpop.f32.mrf.mxu3  ;;  %v2475_v43 = vmul.f32 %v2474_v20, %v10563_v60  ;;  %v2543_v8 = vmul.f32 %v8884_v12, %v2542_v3  ;;  %vm2562_vm0 = vcmp.eq.f32.partialorder %v10624_v41, 0.0 }
 0x589   : > { %v2381_v48 = vmul.f32 %v10637_v10, %v10637_v10  ;;  %v2537_v21 = vsel %vm2536_vm7, %v10561_v57, %v2535_v61  ;;  %v2484_v9 = vmul.f32 0.5, %v2483_v34  ;;  %v2511_v57 = vmul.f32 %v2510_v39, %v10510_v37 }
 0x58a   : > { %v2540_v42 = vsel %vm2538_vm1, %v2539_v59, %v2537_v21  ;;  %v2477_v53 = vsel %vm2476_vm2, %v10563_v60, %v2475_v43  ;;  %v2544_v47 = vmul.f32 0.5, %v2543_v8  ;;  %v2434_v60 = vsel %vm2035_vm9, %v2350_v15, 0.0 }
 0x58b   : > { %v2432_v40 = vsel %vm2035_vm9, %v2381_v48, 0.0  ;;  %2687 = vrot.lane.b32.xlu1 %v2540_v42, %s9218_s14  ;;  %v2480_v27 = vsel %vm2478_vm3, %v2479_v7, %v2477_v53  ;;  %v2485_v26 = vsub.f32 1.5, %v2484_v9  ;;  %v2435_v43 = vsel %vm2035_vm9, %v2366_v56, 0.0 }
 0x58c   : > { %v8886_v20 = vpop.eup %8885  ;;  %v10650_v3 = vadd.f32 %v2432_v40, %v2431_v33  ;;  %2677 = vrot.lane.b32.xlu0 %v2480_v27, %s9218_s14  ;;  %v2545_v61 = vsub.f32 1.5, %v2544_v47  ;;  %v2522_v39 = vmul.f32 %v10588_v23, %v2521_v49  ;;  %v2491_v15 = vand.u32 2147483648, %v10598_v18 }
 0x58d   : > { %v2486_v34 = vmul.f32 %v8882_v44, %v2485_v26  ;;  %v2554_v59 = vmul.f32 %v8886_v20, %v10624_v41  ;;  %v2513_v56 = vsel %vm2512_vm4, %v10510_v37, %v2511_v57  ;;  %v2436_v9 = vadd.f32 %v2435_v43, %v2434_v60 }
 0x58e   : > { %8243 = vmatmul.msk.f32.gmra.mxu0 %vm2035_vm9, %v10177_v19  ;;  %8887 = vrsqrt.f32 %v10650_v3  ;;  %v2546_v19 = vmul.f32 %v8884_v12, %v2545_v61  ;;  %v2367_v23 = vmul.f32 %v10456_v5, %v10456_v5  ;;  %v2516_v12 = vsel %vm2514_vm8, %v2515_v25, %v2513_v56 }
 0x58f   : > { %v2487_v33 = vmul.f32 %v2486_v34, %v10598_v18  ;;  %v2555_v44 = vmul.f32 %v8886_v20, %v2554_v59  ;;  %v2523_v47 = vmul.f32 %v2522_v39, %v10543_v1  ;;  %v2352_v43 = vmul.f32 %v10268_v46, %v10268_v46 }
 0x590   : > { %v10664_v8 = vpop.f32.mrf.mxu3  ;;  %v2547_v49 = vmul.f32 %v2546_v19, %v10596_v31  ;;  %v2440_v57 = vsel %vm2035_vm9, %v2367_v23, 0.0  ;;  %v2527_v25 = vand.u32 2147483648, %v10543_v1  ;;  %v2368_v56 = vmul.f32 %v10472_v17, %v10472_v17 }
 0x591   : > { %v2382_v48 = vmul.f32 %v10664_v8, %v10664_v8  ;;  %v2489_v21 = vsel %vm2488_vm5, %v10598_v18, %v2487_v33  ;;  %v2556_v7 = vmul.f32 0.5, %v2555_v44  ;;  %v2351_v18 = vmul.f32 %v10242_v50, %v10242_v50 }
 0x592   : > { %v2492_v42 = vsel %vm2490_vm6, %v2491_v15, %v2489_v21  ;;  %v2525_v61 = vsel %vm2524_vm10, %v10543_v1, %v2523_v47  ;;  %v2551_v44 = vand.u32 2147483648, %v10596_v31  ;;  %vm2572_vm13 = vcmp.eq.f32.partialorder %v10650_v3, inf }
 0x593   : > { %v2437_v53 = vsel %vm2035_vm9, %v2382_v48, 0.0  ;;  %2679 = vrot.lane.b32.xlu2 %v2492_v42, %s9218_s14  ;;  %v2557_v40 = vsub.f32 1.5, %v2556_v7  ;;  %v2439_v60 = vsel %vm2035_vm9, %v2351_v18, 0.0  ;;  %v2528_v19 = vsel %vm2526_vm12, %v2527_v25, %v2525_v61 }
 0x594   : > { %v8888_v27 = vpop.eup %8887  ;;  %v10681_v26 = vadd.f32 %v2437_v53, %v2436_v9  ;;  %2683 = vrot.lane.b32.xlu0 %v2516_v12, %s9218_s14  ;;  %v2444_v12 = vsel %vm2035_vm9, %v2352_v43, 0.0  ;;  %vm2574_vm7 = vcmp.eq.f32.partialorder %v10650_v3, 0.0  ;;  %v2369_v43 = vmul.f32 %v10479_v22, %v10479_v22 }
 0x595   : > { %v2566_v37 = vmul.f32 %v8888_v27, %v10650_v3  ;;  %v2558_v59 = vmul.f32 %v8886_v20, %v2557_v40  ;;  %v2441_v20 = vadd.f32 %v2440_v57, %v2439_v60 }
 0x596   : > { %8244 = vmatmul.msk.f32.gmra.mxu0 %vm2035_vm9, %v10190_v32  ;;  %8889 = vrsqrt.f32 %v10681_v26  ;;  %v2549_v32 = vsel %vm2548_vm11, %v10596_v31, %v2547_v49  ;;  %v2445_v31 = vsel %vm2035_vm9, %v2368_v56, 0.0  ;;  %vm2584_vm1 = vcmp.eq.f32.partialorder %v10681_v26, inf }
 0x597   : > { %v2567_v34 = vmul.f32 %v8888_v27, %v2566_v37  ;;  %v2552_v21 = vsel %vm2550_vm14, %v2551_v44, %v2549_v32  ;;  %v2559_v9 = vmul.f32 %v2558_v59, %v10624_v41  ;;  %vm2586_vm2 = vcmp.eq.f32.partialorder %v10681_v26, 0.0 }
 0x598   : > { %v10696_v33 = vpop.f32.mrf.mxu3 }
 0x599   : > { %v2383_v39 = vmul.f32 %v10696_v33, %v10696_v33  ;;  %v2568_v15 = vmul.f32 0.5, %v2567_v34  ;;  %v2561_v40 = vsel %vm2560_vm15, %v10624_v41, %v2559_v9  ;;  %v2446_v34 = vadd.f32 %v2445_v31, %v2444_v12 }
 0x59a   : > { %v2370_v12 = vmul.f32 %v10486_v4, %v10486_v4 }
 0x59b   : > { %v2442_v48 = vsel %vm2035_vm9, %v2383_v39, 0.0  ;;  %2685 = vrot.lane.b32.xlu2 %v2528_v19, %s9218_s14  ;;  %v2569_v7 = vsub.f32 1.5, %v2568_v15  ;;  %v2353_v39 = vmul.f32 %v10288_v52, %v10288_v52 }
 0x59c   : > { %v8890_v23 = vpop.eup %8889  ;;  %v10710_v1 = vadd.f32 %v2442_v48, %v2441_v20  ;;  %2689 = vrot.lane.b32.xlu0 %v2552_v21, %s9218_s14  ;;  %v2450_v20 = vsel %vm2035_vm9, %v2369_v43, 0.0 }
 0x59d   : > { %v2570_v42 = vmul.f32 %v8888_v27, %v2569_v7  ;;  %v2578_v53 = vmul.f32 %v8890_v23, %v10681_v26  ;;  %v2575_v27 = vand.u32 2147483648, %v10650_v3  ;;  %v2449_v48 = vsel %vm2035_vm9, %v2353_v39, 0.0 }
 0x59e   : > { %8245 = vmatmul.msk.f32.gmra.mxu0 %vm2035_vm9, %v10205_v45  ;;  %8891 = vrsqrt.f32 %v10710_v1  ;;  %v2563_v45 = vand.u32 2147483648, %v10624_v41  ;;  %v2587_v7 = vand.u32 2147483648, %v10681_v26  ;;  %vm2596_vm3 = vcmp.eq.f32.partialorder %v10710_v1, inf }
 0x59f   : > { %v2571_v47 = vmul.f32 %v2570_v42, %v10650_v3  ;;  %v2579_v18 = vmul.f32 %v8890_v23, %v2578_v53  ;;  %v2451_v42 = vadd.f32 %v2450_v20, %v2449_v48  ;;  %vm2598_vm4 = vcmp.eq.f32.partialorder %v10710_v1, 0.0 }
 0x5a0   : > { %v10722_v49 = vpop.f32.mrf.mxu3  ;;  %v2564_v60 = vsel %vm2562_vm0, %v2563_v45, %v2561_v40  ;;  %v2371_v39 = vmul.f32 %v10495_v58, %v10495_v58 }
 0x5a1   : > { %v2384_v37 = vmul.f32 %v10722_v49, %v10722_v49  ;;  %v2573_v57 = vsel %vm2572_vm13, %v10650_v3, %v2571_v47  ;;  %v2580_v61 = vmul.f32 0.5, %v2579_v18  ;;  %v2354_v18 = vmul.f32 %v10309_v14, %v10309_v14 }
 0x5a2   : > { %v2576_v59 = vsel %vm2574_vm7, %v2575_v27, %v2573_v57  ;;  %vm2741_vm7 = vcmask 523264  }
 0x5a3   : > { %v2447_v25 = vsel %vm2035_vm9, %v2384_v37, 0.0  ;;  %2693 = vrot.lane.b32.xlu1 %v2576_v59, %s9218_s14  ;;  %2691 = vrot.lane.b32.xlu2 %v2564_v60, %s9218_s14  ;;  %v2581_v41 = vsub.f32 1.5, %v2580_v61  ;;  %v2455_v37 = vsel %vm2035_vm9, %v2370_v12, 0.0  ;;  %v2599_v60 = vand.u32 2147483648, %v10710_v1 }
 0x5a4   : > { %v8892_v32 = vpop.eup %8891  ;;  %v10739_v44 = vadd.f32 %v2447_v25, %v2446_v34  ;;  %v2454_v34 = vsel %vm2035_vm9, %v2354_v18, 0.0  ;;  %v2372_v18 = vmul.f32 %v10514_v55, %v10514_v55 }
 0x5a5   : > { %v2582_v3 = vmul.f32 %v8890_v23, %v2581_v41  ;;  %v2590_v15 = vmul.f32 %v8892_v32, %v10710_v1  ;;  %v2456_v41 = vadd.f32 %v2455_v37, %v2454_v34 }
 0x5a6   : > { %8246 = vmatmul.msk.f32.gmra.mxu0 %vm2035_vm9, %v10215_v13  ;;  %8893 = vrsqrt.f32 %v10739_v44  ;;  %vm2608_vm5 = vcmp.eq.f32.partialorder %v10739_v44, inf  ;;  %vm2610_vm6 = vcmp.eq.f32.partialorder %v10739_v44, 0.0 }
 0x5a7   : > { %v2583_v56 = vmul.f32 %v2582_v3, %v10681_v26  ;;  %v2591_v19 = vmul.f32 %v8892_v32, %v2590_v15 }
 0x5a8   : > { %v10748_v21 = vpop.f32.mrf.mxu3 }
 0x5a9   : > { %v2385_v9 = vmul.f32 %v10748_v21, %v10748_v21  ;;  %v2585_v13 = vsel %vm2584_vm1, %v10681_v26, %v2583_v56  ;;  %v2592_v23 = vmul.f32 0.5, %v2591_v19  ;;  %v2355_v56 = vmul.f32 %v10328_v63, %v10328_v63 }
 0x5aa   : > { %v2588_v53 = vsel %vm2586_vm2, %v2587_v7, %v2585_v13 }
 0x5ab   : > { %v2452_v31 = vsel %vm2035_vm9, %v2385_v9, 0.0  ;;  %2695 = vrot.lane.b32.xlu0 %v2588_v53, %s9218_s14  ;;  %v2593_v47 = vsub.f32 1.5, %v2592_v23  ;;  %v2459_v23 = vsel %vm2035_vm9, %v2355_v56, 0.0  ;;  %v2611_v53 = vand.u32 2147483648, %v10739_v44 }
 0x5ac   : > { %v8894_v40 = vpop.eup %8893  ;;  %v10762_v27 = vadd.f32 %v2452_v31, %v2451_v42 }
 0x5ad   : > { %v2594_v45 = vmul.f32 %v8892_v32, %v2593_v47  ;;  %v2602_v26 = vmul.f32 %v8894_v40, %v10739_v44 }
 0x5ae   : > { %8247 = vmatmul.msk.f32.gmra.mxu0 %vm2035_vm9, %v10228_v6  ;;  %8895 = vrsqrt.f32 %v10762_v27  ;;  %vm2620_vm8 = vcmp.eq.f32.partialorder %v10762_v27, inf  ;;  %vm2622_vm10 = vcmp.eq.f32.partialorder %v10762_v27, 0.0 }
 0x5af   : > { %v2595_v57 = vmul.f32 %v2594_v45, %v10710_v1  ;;  %v2603_v61 = vmul.f32 %v8894_v40, %v2602_v26 }
 0x5b0   : > { %v10771_v59 = vpop.f32.mrf.mxu3 }
 0x5b1   : > { %v2386_v43 = vmul.f32 %v10771_v59, %v10771_v59  ;;  %v2597_v6 = vsel %vm2596_vm3, %v10710_v1, %v2595_v57  ;;  %v2604_v25 = vmul.f32 0.5, %v2603_v61  ;;  %v2460_v1 = vsel %vm2035_vm9, %v2371_v39, 0.0 }
 0x5b2   : > { %v2600_v32 = vsel %vm2598_vm4, %v2599_v60, %v2597_v6  ;;  %v2461_v47 = vadd.f32 %v2460_v1, %v2459_v23  ;;  %v2356_v57 = vmul.f32 %v10344_v38, %v10344_v38 }
 0x5b3   : > { %v2457_v3 = vsel %vm2035_vm9, %v2386_v43, 0.0  ;;  %2697 = vrot.lane.b32.xlu2 %v2600_v32, %s9218_s14  ;;  %v2605_v15 = vsub.f32 1.5, %v2604_v25  ;;  %v2623_v32 = vand.u32 2147483648, %v10762_v27 }
 0x5b4   : > { %v8896_v20 = vpop.eup %8895  ;;  %v2458_v19 = vadd.f32 %v2457_v3, %v2456_v41  ;;  %v2464_v25 = vsel %vm2035_vm9, %v2356_v57, 0.0 }
 0x5b5   : > { %v2606_v48 = vmul.f32 %v8894_v40, %v2605_v15  ;;  %v2614_v7 = vmul.f32 %v8896_v20, %v10762_v27 }
 0x5b6   : > { %8248 = vmatmul.msk.f32.gmra.mxu0 %vm2035_vm9, %v10242_v50  ;;  %8897 = vrsqrt.f32 %v2458_v19  ;;  %vm2632_vm11 = vcmp.eq.f32.partialorder %v2458_v19, inf  ;;  %vm2634_vm12 = vcmp.eq.f32.partialorder %v2458_v19, 0.0 }
 0x5b7   : > { %v2607_v9 = vmul.f32 %v2606_v48, %v10739_v44  ;;  %v2615_v13 = vmul.f32 %v8896_v20, %v2614_v7 }
 0x5b8   : > { %v10791_v42 = vpop.f32.mrf.mxu3 }
 0x5b9   : > { %v2387_v12 = vmul.f32 %v10791_v42, %v10791_v42  ;;  %v2609_v31 = vsel %vm2608_vm5, %v10739_v44, %v2607_v9  ;;  %v2616_v50 = vmul.f32 0.5, %v2615_v13  ;;  %v2465_v44 = vsel %vm2035_vm9, %v2372_v18, 0.0  ;;  %v2029_v18 = vld [vmem:[%s14872_s6 + $0x140] sm:$0xff] }
 0x5ba   : > { %v2612_v40 = vsel %vm2610_vm6, %v2611_v53, %v2609_v31  ;;  %v2466_v15 = vadd.f32 %v2465_v44, %v2464_v25  ;;  %2798 = vmatpush.msrb.mxu3 %v2029_v18  ;;  %v2025_v25 = vld [vmem:[%s14872_s6 + $0x120] sm:$0xff] }
 0x5bb   : > { %v2462_v45 = vsel %vm2035_vm9, %v2387_v12, 0.0  ;;  %2699 = vrot.lane.b32.xlu1 %v2612_v40, %s9218_s14  ;;  %v2617_v26 = vsub.f32 1.5, %v2616_v50  ;;  %v15170_v18 = vld [vmem:[#allocation59_spill] sm:$0xff] }
 0x5bc   : > { %v8898_v37 = vpop.eup %8897  ;;  %v2463_v61 = vadd.f32 %v2462_v45, %v2461_v47 }
 0x5bd   : > { %v2618_v34 = vmul.f32 %v8896_v20, %v2617_v26  ;;  %v2626_v60 = vmul.f32 %v8898_v37, %v2458_v19 }
 0x5be   : > { %8249 = vmatmul.msk.f32.gmra.mxu0 %vm2035_vm9, %v10268_v46  ;;  %8899 = vrsqrt.f32 %v2463_v61  ;;  %vm2644_vm14 = vcmp.eq.f32.partialorder %v2463_v61, inf  ;;  %vm2646_vm15 = vcmp.eq.f32.partialorder %v2463_v61, 0.0 }
 0x5bf   : > { %v2619_v43 = vmul.f32 %v2618_v34, %v10762_v27  ;;  %v2627_v6 = vmul.f32 %v8898_v37, %v2626_v60  ;;  %v2028_v60 = vld [vmem:[%s14872_s6 + $0x138] sm:$0xff] }
 0x5c0   : > { %v10810_v41 = vpop.f32.mrf.mxu3  ;;  %2799 = vmatpush.msrb.mxu3 %v2028_v60 }
 0x5c1   : > { %v2388_v39 = vmul.f32 %v10810_v41, %v10810_v41  ;;  %v2621_v3 = vsel %vm2620_vm8, %v10762_v27, %v2619_v43  ;;  %v2628_v46 = vmul.f32 0.5, %v2627_v6  ;;  %v2635_v27 = vand.u32 2147483648, %v2458_v19  ;;  %v2027_v43 = vld [vmem:[%s14872_s6 + $0x130] sm:$0xff] }
 0x5c2   : > { %v2624_v20 = vsel %vm2622_vm10, %v2623_v32, %v2621_v3  ;;  %2800 = vmatpush.msrb.mxu3 %v2027_v43 }
 0x5c3   : > { %v2467_v56 = vsel %vm2035_vm9, %v2388_v39, 0.0  ;;  %2701 = vrot.lane.b32.xlu0 %v2624_v20, %s9218_s14  ;;  %v2629_v48 = vsub.f32 1.5, %v2628_v46  ;;  %v2024_v46 = vld [vmem:[%s14872_s6 + $0x118] sm:$0xff]  ;;  %v2022_v20 = vld [vmem:[%s14872_s6 + $0x108] sm:$0xff] }
 0x5c4   : > { %v8900_v7 = vpop.eup %8899  ;;  %v2468_v1 = vadd.f32 %v2467_v56, %v2466_v15  ;;  %v2023_v15 = vld [vmem:[%s14872_s6 + $0x110] sm:$0xff]  ;;  %v1240_v56 = vcvt.s32.f32 %v10106_v11 }
 0x5c5   : > { %v2630_v9 = vmul.f32 %v8898_v37, %v2629_v48  ;;  %v2638_v13 = vmul.f32 %v8900_v7, %v2463_v61 }
 0x5c6   : > { %8250 = vmatmul.msk.f32.gmra.mxu0 %vm2035_vm9, %v10288_v52  ;;  %8901 = vrsqrt.f32 %v2468_v1  ;;  %vm2656_vm13 = vcmp.eq.f32.partialorder %v2468_v1, inf  ;;  %v2659_v39 = vand.u32 2147483648, %v2468_v1  ;;  %vm2658_vm0 = vcmp.eq.f32.partialorder %v2468_v1, 0.0 }
 0x5c7   : > { %v2631_v23 = vmul.f32 %v2630_v9, %v2458_v19  ;;  %v2639_v53 = vmul.f32 %v8900_v7, %v2638_v13  ;;  %v10868_v48 = vmul.f32 0.32258064, %v1240_v56  ;;  %v15164_v9 = vld [vmem:[#allocation8_spill] sm:$0xff]  ;;  %v15165_v13 = vld [vmem:[#allocation54_spill] sm:$0xff] }
 0x5c9   : > { %v2633_v12 = vsel %vm2632_vm11, %v2458_v19, %v2631_v23  ;;  %v2640_v31 = vmul.f32 0.5, %v2639_v53  ;;  %v2647_v19 = vand.u32 2147483648, %v2463_v61  ;;  %v15167_v23 = vld [vmem:[#allocation44_spill] sm:$0xff] }
 0x5ca   : > { %v2636_v50 = vsel %vm2634_vm12, %v2635_v27, %v2633_v12  ;;  %v15168_v12 = vld [vmem:[#allocation31_spill] sm:$0xff] }
 0x5cb   : > { %2703 = vrot.lane.b32.xlu2 %v2636_v50, %s9218_s14  ;;  %v2641_v47 = vsub.f32 1.5, %v2640_v31  ;;  %v15169_v31 = vld [vmem:[#allocation10_spill] sm:$0xff] }
 0x5cc   : > { %v8902_v40 = vpop.eup %8901  ;;  %v1244_v50 = vsub.f32 %v15169_v31, %v10868_v48 }
 0x5cd   : > { %v2642_v45 = vmul.f32 %v8900_v7, %v2641_v47  ;;  %v2650_v26 = vmul.f32 %v8902_v40, %v2468_v1  ;;  %v15163_v7 = vld [vmem:[#allocation28_spill] sm:$0xff] }
 0x5ce   : > { %8251 = vmatmul.msk.f32.gmra.mxu0 %vm2035_vm9, %v10309_v14 }
 0x5cf   : > { %v2643_v52 = vmul.f32 %v2642_v45, %v2463_v61  ;;  %v2651_v37 = vmul.f32 %v8902_v40, %v2650_v26  ;;  %v15171_v45 = vld [vmem:[#allocation55_spill] sm:$0xff]  ;;  %v15172_v26 = vld [vmem:[#allocation52_spill] sm:$0xff] }
 0x5d1   : > { %v2645_v57 = vsel %vm2644_vm14, %v2463_v61, %v2643_v52  ;;  %v2652_v34 = vmul.f32 0.5, %v2651_v37  ;;  %v2026_v61 = vld [vmem:[%s14872_s6 + $0x128] sm:$0xff]  ;;  %v1260_v37 = vmul.f32 -4.805, %v1244_v50 }
 0x5d2   : > { %v2648_v44 = vsel %vm2646_vm15, %v2647_v19, %v2645_v57  ;;  %2801 = vmatpush.msrb.mxu3 %v2026_v61  ;;  %v15173_v57 = vld [vmem:[#allocation34_spill] sm:$0xff] }
 0x5d3   : > { %1918 = vrot.lane.b32.xlu2 %v10331_v28, %s9219_s11  ;;  %2705 = vrot.lane.b32.xlu1 %v2648_v44, %s9218_s14  ;;  %v2653_v14 = vsub.f32 1.5, %v2652_v34  ;;  %v1276_v44 = vmul.f32 %v1260_v37, %v1244_v50 }
 0x5d4   : > { %2802 = vmatpush.msrb.mxu3 %v2025_v25  ;;  %v15175_v25 = vld [vmem:[#allocation57_spill] sm:$0xff] }
 0x5d5   : > { %v2654_v6 = vmul.f32 %v8902_v40, %v2653_v14  ;;  %v15174_v14 = vld [vmem:[#allocation7_spill] sm:$0xff] }
 0x5d6   : > { %8252 = vmatmul.msk.f32.gmra.mxu0 %vm2035_vm9, %v10328_v63  ;;  %2803 = vmatpush.msrb.mxu3 %v2024_v46  ;;  %v1245_v43 = vsub.f32 %v15174_v14, %v10868_v48  ;;  %v15176_v46 = vld [vmem:[#allocation36_spill] sm:$0xff] }
 0x5d7   : > { %v2655_v32 = vmul.f32 %v2654_v6, %v2468_v1 }
 0x5d8   : > { %2804 = vmatpush.msrb.mxu3 %v2023_v15 }
 0x5d9   : > { %v2657_v3 = vsel %vm2656_vm13, %v2468_v1, %v2655_v32  ;;  %v1294_v32 = vmul.f32 1.442695, %v1276_v44  ;;  %v15181_v44 = vld [vmem:[#allocation12_spill] sm:$0xff] }
 0x5da   : > { %v2660_v63 = vsel %vm2658_vm0, %v2659_v39, %v2657_v3  ;;  %2805 = vmatpush.msrb.mxu3 %v2022_v20  ;;  %v1261_v39 = vmul.f32 -4.805, %v1245_v43  ;;  %v15177_v20 = vld [vmem:[#allocation9_spill] sm:$0xff]  ;;  %v1248_v14 = vsub.f32 %v15181_v44, %v10868_v48 }
 0x5db   : > { %1924 = vrot.lane.b32.xlu2 %v10367_v62, %s9219_s11  ;;  %1920 = vrot.lane.b32.xlu1 %v10347_v16, %s9219_s11  ;;  %v1246_v56 = vsub.f32 %v15177_v20, %v10868_v48  ;;  %v15186_v44 = vld [vmem:[#allocation17_spill] sm:$0xff] }
 0x5dc   : > { %2707 = vrot.lane.b32.xlu0 %v2660_v63, %s9218_s14  ;;  %v1277_v15 = vmul.f32 %v1261_v39, %v1245_v43 }
 0x5de   : > { %8253 = vmatmul.msk.f32.gmra.mxu0 %vm2035_vm9, %v10344_v38  ;;  %v1242_v38 = vsub.f32 %v10025_v0, %v10868_v48  ;;  %v15166_v0 = vld [vmem:[#allocation50_spill] sm:$0xff] }
 0x5e0   : > { %v1258_v11 = vmul.f32 -4.805, %v1242_v38 }
 0x5e2   : > { %v1274_v1 = vmul.f32 %v1258_v11, %v1242_v38  ;;  %v2682_v38 = vpop.permute.xlu1 %2681 }
 0x5e3   : > { %1930 = vrot.lane.b32.xlu2 %v10394_v2, %s9219_s11  ;;  %1926 = vrot.lane.b32.xlu1 %v10376_v54, %s9219_s11  ;;  %v10894_v47 = vpop.f32.mrf.mxu0 }
 0x5e4   : > { %1922 = vrot.lane.b32.xlu0 %v10358_v29, %s9219_s11  ;;  %v1290_v53 = vmul.f32 1.442695, %v1274_v1  ;;  %v1262_v1 = vmul.f32 -4.805, %v1246_v56 }
 0x5e6   : > { %8254 = vmatmul.msk.f32.gmra.mxu0 %vm2035_vm9, %v10354_v35  ;;  %v1243_v35 = vsub.f32 %v15164_v9, %v10868_v48  ;;  %8903 = vpow2.f32 %v1290_v53 }
 0x5e8   : > { %v1259_v27 = vmul.f32 -4.805, %v1243_v35 }
 0x5ea   : > { %v1275_v40 = vmul.f32 %v1259_v27, %v1243_v35  ;;  %v15178_v35 = vld [vmem:[#allocation39_spill] sm:$0xff]  ;;  %v1278_v27 = vmul.f32 %v1262_v1, %v1246_v56 }
 0x5eb   : > { %1936 = vrot.lane.b32.xlu2 %v10432_v24, %s9219_s11  ;;  %1932 = vrot.lane.b32.xlu1 %v10407_v51, %s9219_s11  ;;  %v10908_v6 = vpop.f32.mrf.mxu0 }
 0x5ec   : > { %1928 = vrot.lane.b32.xlu0 %v10385_v36, %s9219_s11  ;;  %v1292_v52 = vmul.f32 1.442695, %v1275_v40  ;;  %v8904_v19 = vpop.eup %8903  ;;  %v1298_v40 = vmul.f32 1.442695, %v1278_v27 }
 0x5ed   : > { %v2680_v61 = vpop.permute.xlu2 %2679 }
 0x5ee   : > { %8255 = vmatmul.msk.f32.gmra.mxu0 %vm2035_vm9, %v15163_v7  ;;  %8905 = vpow2.f32 %v1292_v52  ;;  %v1296_v7 = vmul.f32 1.442695, %v1277_v15 }
 0x5ef   : > { %8907 = vpow2.f32 %v1294_v32  ;;  %v1264_v32 = vmul.f32 -4.805, %v1248_v14 }
 0x5f0   : > { %8909 = vpow2.f32 %v1296_v7 }
 0x5f1   : > { %8911 = vpow2.f32 %v1298_v40  ;;  %v1280_v56 = vmul.f32 %v1264_v32, %v1248_v14  ;;  %v1251_v14 = vsub.f32 %v15186_v44, %v10868_v48 }
 0x5f3   : > { %1942 = vrot.lane.b32.xlu2 %v15165_v13, %s9219_s11  ;;  %1938 = vrot.lane.b32.xlu1 %v15166_v0, %s9219_s11  ;;  %v10926_v11 = vpop.f32.mrf.mxu0  ;;  %v1302_v7 = vmul.f32 1.442695, %v1280_v56 }
 0x5f4   : > { %1934 = vrot.lane.b32.xlu0 %v15167_v23, %s9219_s11  ;;  %v8906_v3 = vpop.eup %8905 }
 0x5f5   : > { %v2726_v63 = vsel %vm2035_vm9, %v8906_v3, %v2680_v61  ;;  %v8908_v9 = vpop.eup %8907  ;;  %v2686_v43 = vpop.permute.xlu2 %2685  ;;  %v15182_v3 = vld [vmem:[#allocation46_spill] sm:$0xff] }
 0x5f6   : > { %8256 = vmatmul.msk.f32.gmra.mxu0 %vm2035_vm9, %v15168_v12  ;;  %v2727_v53 = vsel %vm2035_vm9, %v8908_v9, %v2682_v38  ;;  %v15179_v12 = vld [vmem:[#allocation11_spill] sm:$0xff]  ;;  %v8910_v37 = vpop.eup %8909 }
 0x5f7   : > { %v1247_v31 = vsub.f32 %v15179_v12, %v10868_v48  ;;  %v8912_v39 = vpop.eup %8911  ;;  %v15185_v12 = vld [vmem:[#allocation13_spill] sm:$0xff] }
 0x5f9   : > { %v1263_v52 = vmul.f32 -4.805, %v1247_v31 }
 0x5fb   : > { %1948 = vrot.lane.b32.xlu2 %v15170_v18, %s9219_s11  ;;  %1944 = vrot.lane.b32.xlu1 %v15171_v45, %s9219_s11 }
 0x5fc   : > { %1940 = vrot.lane.b32.xlu0 %v15172_v26, %s9219_s11 }
 0x5fd   : > { %v2688_v38 = vpop.permute.xlu1 %2687 }
 0x5fe   : > { %8257 = vmatmul.msk.f32.gmra.mxu0 %vm2035_vm9, %v15173_v57  ;;  %v2678_v34 = vpop.permute.xlu0 %2677  ;;  %v15180_v57 = vld [vmem:[#allocation43_spill] sm:$0xff] }
 0x5ff   : > { %v2725_v60 = vsel %vm2035_vm9, %v8904_v19, %v2678_v34  ;;  %v10942_v19 = vpop.f32.mrf.mxu0 }
 0x600   : > { %8222 = vmatmul.msk.f32.vlgmr.msrb.gmra.mxu3 %vm2741_vm7, %v2725_v60  ;;  %v1279_v60 = vmul.f32 %v1263_v52, %v1247_v31  ;;  %v1250_v31 = vsub.f32 %v15185_v12, %v10868_v48 }
 0x602   : > { %v1300_v61 = vmul.f32 1.442695, %v1279_v60 }
 0x603   : > { %1970 = vrot.lane.b32.xlu2 %v10358_v29, %s9220_s28  ;;  %1966 = vrot.lane.b32.xlu1 %v10331_v28, %s9220_s28 }
 0x604   : > { %1946 = vrot.lane.b32.xlu0 %v15175_v25, %s9219_s11  ;;  %8913 = vpow2.f32 %v1300_v61 }
 0x605   : > { %8915 = vpow2.f32 %v1302_v7 }
 0x606   : > { %8258 = vmatmul.msk.f32.gmra.mxu0 %vm2035_vm9, %v15176_v46  ;;  %v2684_v50 = vpop.permute.xlu0 %2683  ;;  %v2729_v46 = vsel %vm2035_vm9, %v8912_v39, %v2686_v43  ;;  %v2692_v43 = vpop.permute.xlu2 %2691  ;;  %v1267_v39 = vmul.f32 -4.805, %v1251_v14 }
 0x607   : > { %v2728_v34 = vsel %vm2035_vm9, %v8910_v37, %v2684_v50  ;;  %v10961_v20 = vpop.f32.mrf.mxu0  ;;  %v1266_v37 = vmul.f32 -4.805, %v1250_v31 }
 0x608   : > { %8223 = vmatmul.msk.f32.gmra.mxu3 %vm2741_vm7, %v2726_v63  ;;  %v15183_v63 = vld [vmem:[#allocation14_spill] sm:$0xff] }
 0x609   : > { %v1249_v15 = vsub.f32 %v15183_v63, %v10868_v48  ;;  %v1282_v60 = vmul.f32 %v1266_v37, %v1250_v31 }
 0x60a   : > { %v8914_v9 = vpop.eup %8913 }
 0x60b   : > { %1976 = vrot.lane.b32.xlu2 %v10385_v36, %s9220_s28  ;;  %1972 = vrot.lane.b32.xlu1 %v10367_v62, %s9220_s28  ;;  %v1265_v1 = vmul.f32 -4.805, %v1249_v15  ;;  %v1306_v32 = vmul.f32 1.442695, %v1282_v60 }
 0x60c   : > { %1968 = vrot.lane.b32.xlu0 %v10347_v16, %s9220_s28 }
 0x60d   : > { %v1281_v27 = vmul.f32 %v1265_v1, %v1249_v15  ;;  %v1283_v15 = vmul.f32 %v1267_v39, %v1251_v14  ;;  %v15190_v39 = vld [vmem:[#allocation19_spill] sm:$0xff] }
 0x60e   : > { %8259 = vmatmul.msk.f32.gmra.mxu0 %vm2035_vm9, %v15178_v35  ;;  %v15184_v35 = vld [vmem:[#allocation49_spill] sm:$0xff]  ;;  %v2690_v40 = vpop.permute.xlu0 %2689  ;;  %v2698_v44 = vpop.permute.xlu2 %2697 }
 0x60f   : > { %v10976_v50 = vpop.f32.mrf.mxu0  ;;  %v1304_v52 = vmul.f32 1.442695, %v1281_v27  ;;  %v1308_v7 = vmul.f32 1.442695, %v1283_v15 }
 0x610   : > { %8224 = vmatmul.msk.f32.gmra.mxu3 %vm2741_vm7, %v2727_v53  ;;  %v2730_v53 = vsel %vm2035_vm9, %v8914_v9, %v2688_v38 }
 0x611   : > { %8917 = vpow2.f32 %v1304_v52 }
 0x612   : > { %8919 = vpow2.f32 %v1306_v32 }
 0x613   : > { %1982 = vrot.lane.b32.xlu2 %v15167_v23, %s9220_s28  ;;  %1978 = vrot.lane.b32.xlu1 %v10394_v2, %s9220_s28  ;;  %8921 = vpow2.f32 %v1308_v7 }
 0x614   : > { %1974 = vrot.lane.b32.xlu0 %v10376_v54, %s9220_s28 }
 0x615   : > { %v2694_v38 = vpop.permute.xlu1 %2693 }
 0x616   : > { %8260 = vmatmul.msk.f32.gmra.mxu0 %vm2035_vm9, %v15180_v57  ;;  %v8916_v57 = vpop.eup %8915 }
 0x617   : > { %v10988_v61 = vpop.f32.mrf.mxu0 }
 0x618   : > { %8225 = vmatmul.msk.f32.gmra.mxu3 %vm2741_vm7, %v2728_v34  ;;  %v2731_v34 = vsel %vm2035_vm9, %v8916_v57, %v2690_v40 }
 0x61b   : > { %1988 = vrot.lane.b32.xlu2 %v15172_v26, %s9220_s28  ;;  %1984 = vrot.lane.b32.xlu1 %v10432_v24, %s9220_s28 }
 0x61c   : > { %1980 = vrot.lane.b32.xlu0 %v10407_v51, %s9220_s28 }
 0x61d   : > { %v2696_v31 = vpop.permute.xlu0 %2695 }
 0x61e   : > { %8261 = vmatmul.msk.f32.gmra.mxu0 %vm2035_vm9, %v15182_v3  ;;  %v8918_v3 = vpop.eup %8917 }
 0x61f   : > { %v8920_v1 = vpop.eup %8919  ;;  %v10996_v9 = vpop.f32.mrf.mxu0 }
 0x620   : > { %8226 = vmatmul.msk.f32.gmra.mxu3 %vm2741_vm7, %v2729_v46  ;;  %v15187_v46 = vld [vmem:[#allocation15_spill] sm:$0xff]  ;;  %v8922_v52 = vpop.eup %8921 }
 0x621   : > { %v1252_v63 = vsub.f32 %v15187_v46, %v10868_v48  ;;  %v2734_v37 = vsel %vm2035_vm9, %v8922_v52, %v2696_v31  ;;  %v2031_v52 = vld [vmem:[%s14872_s6 + $0x150] sm:$0xff] }
 0x623   : > { %1994 = vrot.lane.b32.xlu2 %v15175_v25, %s9220_s28  ;;  %1990 = vrot.lane.b32.xlu1 %v15165_v13, %s9220_s28  ;;  %v1268_v56 = vmul.f32 -4.805, %v1252_v63 }
 0x624   : > { %1986 = vrot.lane.b32.xlu0 %v15166_v0, %s9220_s28 }
 0x626   : > { %8262 = vmatmul.msk.f32.gmra.mxu0 %vm2035_vm9, %v15184_v35  ;;  %v1284_v35 = vmul.f32 %v1268_v56, %v1252_v63 }
 0x628   : > { %8227 = vmatmul.msk.f32.gmra.mxu3 %vm2741_vm7, %v2730_v53  ;;  %v15188_v53 = vld [vmem:[#allocation18_spill] sm:$0xff]  ;;  %v1310_v12 = vmul.f32 1.442695, %v1284_v35  ;;  %v2033_v35 = vld [vmem:[%s14872_s6 + $0x160] sm:$0xff] }
 0x629   : > { %v1253_v27 = vsub.f32 %v15188_v53, %v10868_v48  ;;  %3221 = vmatpush.msra.mxu1 %v2033_v35 }
 0x62a   : > { %8923 = vpow2.f32 %v1310_v12 }
 0x62b   : > { %1996 = vrot.lane.b32.xlu1 %v15170_v18, %s9220_s28  ;;  %v1269_v40 = vmul.f32 -4.805, %v1253_v27 }
 0x62c   : > { %1992 = vrot.lane.b32.xlu0 %v15171_v45, %s9220_s28 }
 0x62d   : > { %v1285_v60 = vmul.f32 %v1269_v40, %v1253_v27  ;;  %v2700_v15 = vpop.permute.xlu1 %2699  ;;  %v2032_v40 = vld [vmem:[%s14872_s6 + $0x158] sm:$0xff] }
 0x62e   : > { %8263 = vmatmul.msk.f32.gmra.mxu0 %vm2035_vm9, %v10444_v30  ;;  %v2732_v30 = vsel %vm2035_vm9, %v8918_v3, %v2692_v43  ;;  %v1255_v3 = vsub.f32 %v15190_v39, %v10868_v48  ;;  %3222 = vmatpush.msra.mxu1 %v2032_v40  ;;  %v15193_v39 = vld [vmem:[#allocation65_spill] sm:$0xff]  ;;  %v15197_v40 = vld [vmem:[#allocation62_spill] sm:$0xff] }
 0x62f   : > { %v1312_v14 = vmul.f32 1.442695, %v1285_v60 }
 0x630   : > { %8228 = vmatmul.msk.f32.gmra.mxu3 %vm2741_vm7, %v2731_v34  ;;  %v11009_v34 = vpop.f32.mrf.mxu0  ;;  %v8924_v32 = vpop.eup %8923  ;;  %v1271_v63 = vmul.f32 -4.805, %v1255_v3  ;;  %3223 = vmatpush.msra.mxu1 %v2031_v52 }
 0x631   : > { %8925 = vpow2.f32 %v1312_v14 }
 0x632   : > { %v1287_v7 = vmul.f32 %v1271_v63, %v1255_v3 }
 0x634   : > { %v1316_v53 = vmul.f32 1.442695, %v1287_v7 }
 0x635   : > { %v2702_v12 = vpop.permute.xlu0 %2701 }
 0x636   : > { %8264 = vmatmul.msk.f32.gmra.mxu0 %vm2035_vm9, %v10456_v5  ;;  %v2733_v5 = vsel %vm2035_vm9, %v8920_v1, %v2694_v38  ;;  %v15191_v1 = vld [vmem:[#allocation20_spill] sm:$0xff] }
 0x637   : > { %v8926_v38 = vpop.eup %8925 }
 0x638   : > { %8229 = vmatmul.msk.f32.gmra.mxu3 %vm2741_vm7, %v2732_v30  ;;  %v11018_v46 = vpop.f32.mrf.mxu0 }
 0x63e   : > { %8265 = vmatmul.msk.f32.gmra.mxu0 %vm2035_vm9, %v10472_v17  ;;  %v15189_v17 = vld [vmem:[#allocation16_spill] sm:$0xff] }
 0x63f   : > { %v1254_v57 = vsub.f32 %v15189_v17, %v10868_v48  ;;  %v15192_v17 = vld [vmem:[#allocation21_spill] sm:$0xff] }
 0x640   : > { %8230 = vmatmul.msk.f32.gmra.mxu3 %vm2741_vm7, %v2733_v5  ;;  %v1256_v5 = vsub.f32 %v15191_v1, %v10868_v48  ;;  %v11029_v27 = vpop.f32.mrf.mxu0 }
 0x641   : > { %v1270_v43 = vmul.f32 -4.805, %v1254_v57 }
 0x642   : > { %v1272_v31 = vmul.f32 -4.805, %v1256_v5 }
 0x643   : > { %v1286_v30 = vmul.f32 %v1270_v43, %v1254_v57  ;;  %v1257_v57 = vsub.f32 %v15192_v17, %v10868_v48  ;;  %v2030_v43 = vld [vmem:[%s14872_s6 + $0x148] sm:$0xff] }
 0x644   : > { %v1288_v60 = vmul.f32 %v1272_v31, %v1256_v5  ;;  %3224 = vmatpush.msra.mxu1 %v2030_v43  ;;  %v15195_v5 = vld [vmem:[#allocation42_spill] sm:$0xff]  ;;  %v15198_v17 = vld [vmem:[#allocation64_spill] sm:$0xff] }
 0x645   : > { %v1314_v56 = vmul.f32 1.442695, %v1286_v30  ;;  %v1273_v14 = vmul.f32 -4.805, %v1257_v57  ;;  %v2706_v30 = vpop.permute.xlu1 %2705 }
 0x646   : > { %8266 = vmatmul.msk.f32.gmra.mxu0 %vm2035_vm9, %v10479_v22  ;;  %v2735_v22 = vsel %vm2035_vm9, %v8924_v32, %v2698_v44  ;;  %v1318_v44 = vmul.f32 1.442695, %v1288_v60  ;;  %v15199_v60 = vld [vmem:[#allocation67_spill] sm:$0xff] }
 0x647   : > { %8927 = vpow2.f32 %v1314_v56  ;;  %v1289_v3 = vmul.f32 %v1273_v14, %v1257_v57  ;;  %v15194_v56 = vld [vmem:[#allocation68_spill] sm:$0xff]  ;;  %v15200_v14 = vld [vmem:[#allocation69_spill] sm:$0xff] }
 0x648   : > { %8231 = vmatmul.msk.f32.gmra.mxu3 %vm2741_vm7, %v2734_v37  ;;  %8929 = vpow2.f32 %v1316_v53 }
 0x649   : > { %8931 = vpow2.f32 %v1318_v44  ;;  %v1320_v63 = vmul.f32 1.442695, %v1289_v3 }
 0x64b   : > { %8933 = vpow2.f32 %v1320_v63 }
 0x64e   : > { %8267 = vmatmul.msk.f32.gmra.mxu0 %vm2035_vm9, %v10486_v4  ;;  %v2736_v4 = vsel %vm2035_vm9, %v8926_v38, %v2700_v15  ;;  %v2708_v7 = vpop.permute.xlu0 %2707 }
 0x650   : > { %8232 = vmatmul.msk.f32.gmra.mxu3 %vm2741_vm7, %v2735_v22  ;;  %v11046_v22 = vpop.f32.mrf.mxu0 }
 0x656   : > { %8268 = vmatmul.msk.f32.gmra.mxu0 %vm2035_vm9, %v10495_v58  ;;  %v8928_v58 = vpop.eup %8927 }
 0x657   : > { %v2737_v37 = vsel %vm2035_vm9, %v8928_v58, %v2702_v12  ;;  %v8930_v32 = vpop.eup %8929  ;;  %v15196_v12 = vld [vmem:[#allocation60_spill] sm:$0xff] }
 0x658   : > { %8233 = vmatmul.msk.f32.gmra.mxu3 %vm2741_vm7, %v2736_v4  ;;  %v8932_v15 = vpop.eup %8931  ;;  %v11055_v4 = vpop.f32.mrf.mxu0 }
 0x659   : > { %v2739_v38 = vsel %vm2035_vm9, %v8932_v15, %v2706_v30  ;;  %v8934_v1 = vpop.eup %8933 }
 0x65a   : > { %v2740_v35 = vsel %vm2035_vm9, %v8934_v1, %v2708_v7  ;;  %v4547_v7 = vld [vmem:[%s14874_s8 + $0x20] sm:$0xff] }
 0x65e   : > { %8269 = vmatmul.msk.f32.gmra.mxu0 %vm2035_vm9, %v10514_v55  ;;  %v2704_v55 = vpop.permute.xlu2 %2703 }
 0x65f   : > { %v2738_v48 = vsel %vm2035_vm9, %v8930_v32, %v2704_v55 }
 0x660   : > { %8234 = vmatmul.msk.f32.gmra.mxu3 %vm2741_vm7, %v2737_v37  ;;  %v11062_v53 = vpop.f32.mrf.mxu0 }
 0x666   : > { %8270 = vmatmul.msk.f32.gmra.mxu0 %vm2035_vm9, %v15193_v39 }
 0x668   : > { %8235 = vmatmul.msk.f32.gmra.mxu3 %vm2741_vm7, %v2738_v48  ;;  %v11068_v58 = vpop.f32.mrf.mxu0 }
 0x66e   : > { %8271 = vmatmul.msk.f32.gmra.mxu0 %vm2035_vm9, %v15194_v56 }
 0x670   : > { %8236 = vmatmul.msk.f32.gmra.mxu3 %vm2741_vm7, %v2739_v38  ;;  %v11078_v37 = vpop.f32.mrf.mxu0 }
 0x676   : > { %8272 = vmatmul.msk.f32.gmra.mxu0 %vm2035_vm9, %v15195_v5 }
 0x678   : > { %8237 = vmatmul.msk.f32.gmra.mxu3 %vm2741_vm7, %v2740_v35  ;;  %v11088_v55 = vpop.f32.mrf.mxu0 }
 0x67e   : > { %8273 = vmatmul.msk.f32.gmra.mxu0 %vm2035_vm9, %v15196_v12  ;;  %v4545_v12 = vld [vmem:[%s14874_s8 + $0x10] sm:$0xff] }
 0x680   : > { %v11096_v43 = vpop.f32.mrf.mxu0 }
 0x683   : > { %v11066_v31 = vpop.f32.mrf.mxu3 }
 0x684   : > { %8286 = vmatmul.msk.f32.vlgmr.msra.gmra.mxu1 %vm2035_vm9, %v11066_v31  ;;  %vm4495_vm1 = vcmp.ge.f32.partialorder %v11066_v31, 0.0 }
 0x686   : > { %8274 = vmatmul.msk.f32.gmra.mxu0 %vm2035_vm9, %v15197_v40 }
 0x688   : > { %v11106_v48 = vpop.f32.mrf.mxu0 }
 0x68b   : > { %v11074_v52 = vpop.f32.mrf.mxu3 }
 0x68c   : > { %8287 = vmatmul.msk.f32.gmra.mxu1 %vm2035_vm9, %v11074_v52  ;;  %v4512_v18 = vmul.f32 0.01, %v11074_v52  ;;  %vm4496_vm2 = vcmp.ge.f32.partialorder %v11074_v52, 0.0 }
 0x68e   : > { %8275 = vmatmul.msk.f32.gmra.mxu0 %vm2035_vm9, %v15198_v17  ;;  %v11192_v17 = vld [vmem:[%s14872_s6 + $0x168] ss:$0 sm:$0xff] }
 0x690   : > { %v11116_v30 = vpop.f32.mrf.mxu0 }
 0x693   : > { %v11082_v57 = vpop.f32.mrf.mxu3 }
 0x694   : > { %8288 = vmatmul.msk.f32.gmra.mxu1 %vm2035_vm9, %v11082_v57  ;;  %vm4497_vm3 = vcmp.ge.f32.partialorder %v11082_v57, 0.0 }
 0x696   : > { %8276 = vmatmul.msk.f32.gmra.mxu0 %vm2035_vm9, %v15199_v60  ;;  %v4511_v60 = vmul.f32 0.01, %v11066_v31 }
 0x698   : > { %v11126_v63 = vpop.f32.mrf.mxu0 }
 0x69b   : > { %v11090_v44 = vpop.f32.mrf.mxu3 }
 0x69c   : > { %8289 = vmatmul.msk.f32.gmra.mxu1 %vm2035_vm9, %v11090_v44  ;;  %vm4498_vm4 = vcmp.ge.f32.partialorder %v11090_v44, 0.0 }
 0x69e   : > { %8277 = vmatmul.msk.f32.gmra.mxu0 %vm2035_vm9, %v15200_v14 }
 0x6a0   : > { %v11134_v15 = vpop.f32.mrf.mxu0 }
 0x6a3   : > { %v11098_v32 = vpop.f32.mrf.mxu3 }
 0x6a4   : > { %8290 = vmatmul.msk.f32.gmra.mxu1 %vm2035_vm9, %v11098_v32  ;;  %vm4499_vm5 = vcmp.ge.f32.partialorder %v11098_v32, 0.0 }
 0x6a6   : > { %8278 = vmatmul.msk.f32.gmra.mxu0 %vm2035_vm9, %v10637_v10 }
 0x6a8   : > { %v11144_v56 = vpop.f32.mrf.mxu0 }
 0x6ab   : > { %v11104_v39 = vpop.f32.mrf.mxu3 }
 0x6ac   : > { %8291 = vmatmul.msk.f32.gmra.mxu1 %vm2035_vm9, %v11104_v39  ;;  %vm4500_vm6 = vcmp.ge.f32.partialorder %v11104_v39, 0.0 }
 0x6ae   : > { %8279 = vmatmul.msk.f32.gmra.mxu0 %vm2035_vm9, %v10664_v8 }
 0x6b0   : > { %v11163_v1 = vpop.f32.mrf.mxu0 }
 0x6b3   : > { %v11112_v3 = vpop.f32.mrf.mxu3 }
 0x6b4   : > { %8292 = vmatmul.msk.f32.gmra.mxu1 %vm2035_vm9, %v11112_v3  ;;  %vm4501_vm8 = vcmp.ge.f32.partialorder %v11112_v3, 0.0 }
 0x6b6   : > { %8280 = vmatmul.msk.f32.gmra.mxu0 %vm2035_vm9, %v10696_v33 }
 0x6bb   : > { %v11120_v10 = vpop.f32.mrf.mxu3 }
 0x6bc   : > { %8293 = vmatmul.msk.f32.gmra.mxu1 %vm2035_vm9, %v11120_v10  ;;  %vm4502_vm10 = vcmp.ge.f32.partialorder %v11120_v10, 0.0 }
 0x6be   : > { %8281 = vmatmul.msk.f32.gmra.mxu0 %vm2035_vm9, %v10722_v49 }
 0x6c3   : > { %v11128_v8 = vpop.f32.mrf.mxu3 }
 0x6c4   : > { %8294 = vmatmul.msk.f32.gmra.mxu1 %vm2035_vm9, %v11128_v8  ;;  %vm4503_vm11 = vcmp.ge.f32.partialorder %v11128_v8, 0.0 }
 0x6c6   : > { %8282 = vmatmul.msk.f32.gmra.mxu0 %vm2035_vm9, %v10748_v21  ;;  %v3437_v21 = vld [vmem:[%s14872_s6 + $0x3e0] sm:$0xff] }
 0x6c7   : > { %3594 = vmatpush.msra.mxu3 %v3437_v21 }
 0x6cb   : > { %v11136_v33 = vpop.f32.mrf.mxu3 }
 0x6cc   : > { %8295 = vmatmul.msk.f32.gmra.mxu1 %vm2035_vm9, %v11136_v33  ;;  %vm4504_vm12 = vcmp.ge.f32.partialorder %v11136_v33, 0.0 }
 0x6ce   : > { %8283 = vmatmul.msk.f32.gmra.mxu0 %vm2035_vm9, %v10771_v59  ;;  %v4549_v59 = vld [vmem:[%s14874_s8 + $0x30] sm:$0xff] }
 0x6cf   : > { %4618 = vmatpush.msrb.mxu1 %v4549_v59  ;;  %v11198_v59 = vsel %vm4495_vm1, %v11066_v31, %v4511_v60  ;;  %v11209_v60 = vsel %vm4496_vm2, %v11074_v52, %v4512_v18 }
 0x6d1   : > { %4619 = vmatpush.msrb.mxu1 %v4547_v7  ;;  %v3436_v7 = vld [vmem:[%s14872_s6 + $0x3d8] sm:$0xff] }
 0x6d2   : > { %3595 = vmatpush.msra.mxu3 %v3436_v7 }
 0x6d3   : > { %v11142_v49 = vpop.f32.mrf.mxu3  ;;  %4620 = vmatpush.msrb.mxu1 %v4545_v12 }
 0x6d4   : > { %8296 = vmatmul.msk.f32.gmra.mxu1 %vm2035_vm9, %v11142_v49  ;;  %vm4505_vm14 = vcmp.ge.f32.partialorder %v11142_v49, 0.0 }
 0x6d6   : > { %8284 = vmatmul.msk.f32.gmra.mxu0 %vm2035_vm9, %v10791_v42 }
 0x6db   : > { %v11153_v38 = vpop.f32.mrf.mxu3 }
 0x6dc   : > { %8297 = vmatmul.msk.f32.gmra.mxu1 %vm2035_vm9, %v11153_v38  ;;  %vm4506_vm15 = vcmp.ge.f32.partialorder %v11153_v38, 0.0 }
 0x6de   : > { %8285 = vmatmul.msk.f32.gmra.mxu0 %vm2035_vm9, %v10810_v41  ;;  %v4543_v41 = vld [vmem:[%s14874_s8] sm:$0xff] }
 0x6df   : > { %4621 = vmatpush.msrb.mxu1 %v4543_v41 }
 0x6e3   : > { %v11167_v42 = vpop.f32.mrf.mxu3 }
 0x6e4   : > { %8298 = vmatmul.msk.f32.gmra.mxu1 %vm2035_vm9, %v11167_v42  ;;  %vm4507_vm13 = vcmp.ge.f32.partialorder %v11167_v42, 0.0 }
 0x6eb   : > { %v11171_v5 = vpop.f32.mrf.mxu3 }
 0x6ec   : > { %8299 = vmatmul.msk.f32.gmra.mxu1 %vm2035_vm9, %v11171_v5  ;;  %vm4508_vm0 = vcmp.ge.f32.partialorder %v11171_v5, 0.0 }
 0x6f3   : > { %v11175_v35 = vpop.f32.mrf.mxu3 }
 0x6f4   : > { %8300 = vmatmul.msk.f32.gmra.mxu1 %vm2035_vm9, %v11175_v35  ;;  %vm4509_vm1 = vcmp.ge.f32.partialorder %v11175_v35, 0.0 }
 0x6fb   : > { %v11185_v40 = vpop.f32.mrf.mxu3 }
 0x6fc   : > { %8301 = vmatmul.msk.f32.gmra.mxu1 %vm2035_vm9, %v11185_v40  ;;  %vm4510_vm2 = vcmp.ge.f32.partialorder %v11185_v40, 0.0 }
 0x701   : > { %v3226_v14 = vpop.f32.mrf.mxu1 }
 0x702   : > { %v3227_v21 = vadd.f32 %v11192_v17, %v3226_v14  ;;  %v3435_v14 = vld [vmem:[%s14872_s6 + $0x3d0] sm:$0xff] }
 0x703   : > { %3596 = vmatpush.msra.mxu3 %v3435_v14 }
 0x704   : > { %v8302_v12 = vclamps-f32 %v3227_v21, 30.0  ;;  %8383 = vmatmul.msk.f32.vlgmr.msrb.gmra.mxu1 %vm2035_vm9, %v11198_v59  ;;  %v3434_v21 = vld [vmem:[%s14872_s6 + $0x3c8] sm:$0xff] }
 0x705   : > { %3597 = vmatpush.msra.mxu3 %v3434_v21  ;;  %v4514_v21 = vmul.f32 0.01, %v11090_v44 }
 0x706   : > { %v3306_v41 = vsub.f32 0.0, %v8302_v12 }
 0x708   : > { %v3322_v25 = vmul.f32 1.442695, %v3306_v41 }
 0x709   : > { %v3229_v45 = vpop.f32.mrf.mxu1 }
 0x70a   : > { %8935 = vpow2.f32 %v3322_v25  ;;  %v3230_v31 = vadd.f32 %v11192_v17, %v3229_v45  ;;  %v4513_v45 = vmul.f32 0.01, %v11082_v57 }
 0x70c   : > { %v8303_v7 = vclamps-f32 %v3230_v31, 30.0  ;;  %8384 = vmatmul.msk.f32.gmra.mxu1 %vm2035_vm9, %v11209_v60  ;;  %v11223_v31 = vsel %vm4497_vm3, %v11082_v57, %v4513_v45 }
 0x70e   : > { %v3307_v12 = vsub.f32 0.0, %v8303_v7 }
 0x710   : > { %v8936_v25 = vpop.eup %8935  ;;  %v3324_v18 = vmul.f32 1.442695, %v3307_v12 }
 0x711   : > { %v3354_v52 = vadd.f32 1.0, %v8936_v25  ;;  %v3232_v41 = vpop.f32.mrf.mxu1 }
 0x712   : > { %8937 = vpow2.f32 %v3324_v18  ;;  %v3233_v13 = vadd.f32 %v11192_v17, %v3232_v41  ;;  %v4515_v41 = vmul.f32 0.01, %v11098_v32 }
 0x713   : > { %8939 = vrcp.f32 %v3354_v52 }
 0x714   : > { %v8304_v26 = vclamps-f32 %v3233_v13, 30.0  ;;  %8385 = vmatmul.msk.f32.gmra.mxu1 %vm2035_vm9, %v11223_v31 }
 0x716   : > { %v3308_v14 = vsub.f32 0.0, %v8304_v26  ;;  %v11237_v26 = vsel %vm4498_vm4, %v11090_v44, %v4514_v21 }
 0x718   : > { %v8938_v7 = vpop.eup %8937  ;;  %v3326_v12 = vmul.f32 1.442695, %v3308_v14 }
 0x719   : > { %v11229_v25 = vpop.eup %8939  ;;  %v3355_v18 = vadd.f32 1.0, %v8938_v7  ;;  %v3235_v0 = vpop.f32.mrf.mxu1 }
 0x71a   : > { %8941 = vpow2.f32 %v3326_v12  ;;  %v3236_v52 = vadd.f32 %v11192_v17, %v3235_v0  ;;  %v11234_v13 = vmul.f32 %v11229_v25, %v10894_v47 }
 0x71b   : > { %8943 = vrcp.f32 %v3355_v18  ;;  %v11253_v18 = vsel %vm4499_vm5, %v11098_v32, %v4515_v41 }
 0x71c   : > { %v8305_v57 = vclamps-f32 %v3236_v52, 30.0  ;;  %8318 = vmatmul.msk.f32.vlgmr.msra.gmra.mxu3 %vm2035_vm9, %v11234_v13  ;;  %8386 = vmatmul.msk.f32.gmra.mxu1 %vm2035_vm9, %v11237_v26 }
 0x71e   : > { %v3309_v45 = vsub.f32 0.0, %v8305_v57 }
 0x720   : > { %v8942_v14 = vpop.eup %8941  ;;  %v3328_v0 = vmul.f32 1.442695, %v3309_v45  ;;  %v4516_v45 = vmul.f32 0.01, %v11104_v39 }
 0x721   : > { %v11245_v47 = vpop.eup %8943  ;;  %v3356_v7 = vadd.f32 1.0, %v8942_v14  ;;  %v3238_v12 = vpop.f32.mrf.mxu1 }
 0x722   : > { %8945 = vpow2.f32 %v3328_v0  ;;  %v3239_v44 = vadd.f32 %v11192_v17, %v3238_v12  ;;  %v11250_v21 = vmul.f32 %v11245_v47, %v10908_v6 }
 0x723   : > { %8947 = vrcp.f32 %v3356_v7 }
 0x724   : > { %v8306_v52 = vclamps-f32 %v3239_v44, 30.0  ;;  %8319 = vmatmul.msk.f32.gmra.mxu3 %vm2035_vm9, %v11250_v21  ;;  %8387 = vmatmul.msk.f32.gmra.mxu1 %vm2035_vm9, %v11253_v18  ;;  %v11269_v44 = vsel %vm4500_vm6, %v11104_v39, %v4516_v45 }
 0x726   : > { %v3310_v57 = vsub.f32 0.0, %v8306_v52 }
 0x728   : > { %v8946_v14 = vpop.eup %8945  ;;  %v3330_v0 = vmul.f32 1.442695, %v3310_v57 }
 0x729   : > { %v11261_v6 = vpop.eup %8947  ;;  %v3357_v7 = vadd.f32 1.0, %v8946_v14  ;;  %v3241_v12 = vpop.f32.mrf.mxu1  ;;  %v4517_v14 = vmul.f32 0.01, %v11112_v3 }
 0x72a   : > { %8949 = vpow2.f32 %v3330_v0  ;;  %v3242_v32 = vadd.f32 %v11192_v17, %v3241_v12  ;;  %v11266_v41 = vmul.f32 %v11261_v6, %v10926_v11 }
 0x72b   : > { %8951 = vrcp.f32 %v3357_v7 }
 0x72c   : > { %15201 = vst [vmem:[#allocation28_spill] sm:$0xff] %v11266_v41  ;;  %v8307_v52 = vclamps-f32 %v3242_v32, 30.0  ;;  %8320 = vmatmul.msk.f32.gmra.mxu3 %vm2035_vm9, %v11266_v41  ;;  %8388 = vmatmul.msk.f32.gmra.mxu1 %vm2035_vm9, %v11269_v44  ;;  %v11285_v32 = vsel %vm4501_vm8, %v11112_v3, %v4517_v14 }
 0x72e   : > { %v3311_v57 = vsub.f32 0.0, %v8307_v52 }
 0x730   : > { %v8950_v0 = vpop.eup %8949  ;;  %v3332_v12 = vmul.f32 1.442695, %v3311_v57 }
 0x731   : > { %v11277_v11 = vpop.eup %8951  ;;  %v3358_v7 = vadd.f32 1.0, %v8950_v0  ;;  %v3244_v24 = vpop.f32.mrf.mxu1  ;;  %v4518_v0 = vmul.f32 0.01, %v11120_v10 }
 0x732   : > { %8953 = vpow2.f32 %v3332_v12  ;;  %v3245_v39 = vadd.f32 %v11192_v17, %v3244_v24  ;;  %v11282_v45 = vmul.f32 %v11277_v11, %v10942_v19 }
 0x733   : > { %8955 = vrcp.f32 %v3358_v7 }
 0x734   : > { %15202 = vst [vmem:[#allocation8_spill] sm:$0xff] %v11282_v45  ;;  %v8308_v52 = vclamps-f32 %v3245_v39, 30.0  ;;  %8321 = vmatmul.msk.f32.gmra.mxu3 %vm2035_vm9, %v11282_v45  ;;  %8389 = vmatmul.msk.f32.gmra.mxu1 %vm2035_vm9, %v11285_v32  ;;  %v11301_v39 = vsel %vm4502_vm10, %v11120_v10, %v4518_v0 }
 0x736   : > { %v3312_v57 = vsub.f32 0.0, %v8308_v52 }
 0x738   : > { %v8954_v12 = vpop.eup %8953  ;;  %v3334_v24 = vmul.f32 1.442695, %v3312_v57 }
 0x739   : > { %v11293_v19 = vpop.eup %8955  ;;  %v3359_v7 = vadd.f32 1.0, %v8954_v12  ;;  %v3247_v23 = vpop.f32.mrf.mxu1  ;;  %v4519_v12 = vmul.f32 0.01, %v11128_v8 }
 0x73a   : > { %8957 = vpow2.f32 %v3334_v24  ;;  %v3248_v3 = vadd.f32 %v11192_v17, %v3247_v23  ;;  %v11298_v14 = vmul.f32 %v11293_v19, %v10961_v20 }
 0x73b   : > { %8959 = vrcp.f32 %v3359_v7 }
 0x73c   : > { %15203 = vst [vmem:[#allocation31_spill] sm:$0xff] %v11298_v14  ;;  %v8309_v52 = vclamps-f32 %v3248_v3, 30.0  ;;  %8322 = vmatmul.msk.f32.gmra.mxu3 %vm2035_vm9, %v11298_v14  ;;  %8390 = vmatmul.msk.f32.gmra.mxu1 %vm2035_vm9, %v11301_v39  ;;  %v11317_v3 = vsel %vm4503_vm11, %v11128_v8, %v4519_v12 }
 0x73e   : > { %v3313_v57 = vsub.f32 0.0, %v8309_v52 }
 0x740   : > { %v8958_v24 = vpop.eup %8957  ;;  %v3336_v23 = vmul.f32 1.442695, %v3313_v57 }
 0x741   : > { %v11309_v20 = vpop.eup %8959  ;;  %v3360_v7 = vadd.f32 1.0, %v8958_v24  ;;  %v3250_v51 = vpop.f32.mrf.mxu1  ;;  %v4520_v24 = vmul.f32 0.01, %v11136_v33 }
 0x742   : > { %8961 = vpow2.f32 %v3336_v23  ;;  %v3251_v10 = vadd.f32 %v11192_v17, %v3250_v51  ;;  %v11314_v0 = vmul.f32 %v11309_v20, %v10976_v50 }
 0x743   : > { %8963 = vrcp.f32 %v3360_v7 }
 0x744   : > { %15204 = vst [vmem:[#allocation10_spill] sm:$0xff] %v11314_v0  ;;  %v8310_v52 = vclamps-f32 %v3251_v10, 30.0  ;;  %8323 = vmatmul.msk.f32.gmra.mxu3 %vm2035_vm9, %v11314_v0  ;;  %8391 = vmatmul.msk.f32.gmra.mxu1 %vm2035_vm9, %v11317_v3  ;;  %v11333_v10 = vsel %vm4504_vm12, %v11136_v33, %v4520_v24 }
 0x746   : > { %v3314_v57 = vsub.f32 0.0, %v8310_v52 }
 0x748   : > { %v8962_v23 = vpop.eup %8961  ;;  %v3338_v51 = vmul.f32 1.442695, %v3314_v57 }
 0x749   : > { %v11325_v50 = vpop.eup %8963  ;;  %v3361_v7 = vadd.f32 1.0, %v8962_v23  ;;  %v3253_v2 = vpop.f32.mrf.mxu1  ;;  %v4521_v23 = vmul.f32 0.01, %v11142_v49 }
 0x74a   : > { %8965 = vpow2.f32 %v3338_v51  ;;  %v3254_v8 = vadd.f32 %v11192_v17, %v3253_v2  ;;  %v11330_v12 = vmul.f32 %v11325_v50, %v10988_v61 }
 0x74b   : > { %8967 = vrcp.f32 %v3361_v7 }
 0x74c   : > { %15205 = vst [vmem:[#allocation34_spill] sm:$0xff] %v11330_v12  ;;  %v8311_v52 = vclamps-f32 %v3254_v8, 30.0  ;;  %8324 = vmatmul.msk.f32.gmra.mxu3 %vm2035_vm9, %v11330_v12  ;;  %8392 = vmatmul.msk.f32.gmra.mxu1 %vm2035_vm9, %v11333_v10  ;;  %v11349_v8 = vsel %vm4505_vm14, %v11142_v49, %v4521_v23 }
 0x74e   : > { %v3315_v57 = vsub.f32 0.0, %v8311_v52  ;;  %v5311_v52 = vld [vmem:[%s14873_s7 + $0x118] sm:$0xff] }
 0x74f   : > { %6006 = vmatpush.msra.mxu2 %v5311_v52 }
 0x750   : > { %v8966_v51 = vpop.eup %8965  ;;  %v3340_v2 = vmul.f32 1.442695, %v3315_v57 }
 0x751   : > { %v11341_v61 = vpop.eup %8967  ;;  %v3362_v7 = vadd.f32 1.0, %v8966_v51  ;;  %v3256_v36 = vpop.f32.mrf.mxu1 }
 0x752   : > { %8969 = vpow2.f32 %v3340_v2  ;;  %v3257_v33 = vadd.f32 %v11192_v17, %v3256_v36  ;;  %v11346_v24 = vmul.f32 %v11341_v61, %v10996_v9  ;;  %v4522_v9 = vmul.f32 0.01, %v11153_v38 }
 0x753   : > { %8971 = vrcp.f32 %v3362_v7 }
 0x754   : > { %15206 = vst [vmem:[#allocation7_spill] sm:$0xff] %v11346_v24  ;;  %v8312_v57 = vclamps-f32 %v3257_v33, 30.0  ;;  %8325 = vmatmul.msk.f32.gmra.mxu3 %vm2035_vm9, %v11346_v24  ;;  %8393 = vmatmul.msk.f32.gmra.mxu1 %vm2035_vm9, %v11349_v8  ;;  %v11368_v52 = vsel %vm4506_vm15, %v11153_v38, %v4522_v9  ;;  %v5308_v38 = vld [vmem:[%s14873_s7 + $0x100] sm:$0xff]  ;;  %v4523_v9 = vmul.f32 0.01, %v11167_v42 }
 0x756   : > { %v3316_v36 = vsub.f32 0.0, %v8312_v57  ;;  %v5310_v57 = vld [vmem:[%s14873_s7 + $0x110] sm:$0xff] }
 0x757   : > { %6007 = vmatpush.msra.mxu2 %v5310_v57 }
 0x758   : > { %v8970_v51 = vpop.eup %8969  ;;  %v3342_v2 = vmul.f32 1.442695, %v3316_v36 }
 0x759   : > { %v11360_v49 = vpop.eup %8971  ;;  %v3363_v23 = vadd.f32 1.0, %v8970_v51  ;;  %v3259_v7 = vpop.f32.mrf.mxu1 }
 0x75a   : > { %8973 = vpow2.f32 %v3342_v2  ;;  %v3260_v33 = vadd.f32 %v11192_v17, %v3259_v7  ;;  %v11365_v54 = vmul.f32 %v11360_v49, %v11009_v34  ;;  %v5309_v34 = vld [vmem:[%s14873_s7 + $0x108] sm:$0xff]  ;;  %v5307_v7 = vld [vmem:[%s14873_s7 + $0xf8] sm:$0xff] }
 0x75b   : > { %8975 = vrcp.f32 %v3363_v23  ;;  %6008 = vmatpush.msra.mxu2 %v5309_v34  ;;  %v11396_v34 = vsel %vm4507_vm13, %v11167_v42, %v4523_v9  ;;  %v5304_v42 = vld [vmem:[%s14873_s7 + $0xe0] sm:$0xff] }
 0x75c   : > { %15207 = vst [vmem:[#allocation36_spill] sm:$0xff] %v11365_v54  ;;  %v8313_v36 = vclamps-f32 %v3260_v33, 30.0  ;;  %8326 = vmatmul.msk.f32.gmra.mxu3 %vm2035_vm9, %v11365_v54  ;;  %8394 = vmatmul.msk.f32.gmra.mxu1 %vm2035_vm9, %v11368_v52 }
 0x75d   : > { %6009 = vmatpush.msra.mxu2 %v5308_v38  ;;  %v4524_v38 = vmul.f32 0.01, %v11171_v5 }
 0x75e   : > { %v3317_v51 = vsub.f32 0.0, %v8313_v36 }
 0x75f   : > { %6010 = vmatpush.msra.mxu2 %v5307_v7 }
 0x760   : > { %v8974_v2 = vpop.eup %8973  ;;  %v3344_v23 = vmul.f32 1.442695, %v3317_v51  ;;  %v5306_v51 = vld [vmem:[%s14873_s7 + $0xf0] sm:$0xff] }
 0x761   : > { %v11388_v33 = vpop.eup %8975  ;;  %v3364_v62 = vadd.f32 1.0, %v8974_v2  ;;  %v3262_v57 = vpop.f32.mrf.mxu1  ;;  %6011 = vmatpush.msra.mxu2 %v5306_v51 }
 0x762   : > { %8977 = vpow2.f32 %v3344_v23  ;;  %v3263_v36 = vadd.f32 %v11192_v17, %v3262_v57  ;;  %v11393_v29 = vmul.f32 %v11388_v33, %v11018_v46  ;;  %v5305_v46 = vld [vmem:[%s14873_s7 + $0xe8] sm:$0xff]  ;;  %v5303_v23 = vld [vmem:[%s14873_s7 + $0xd8] sm:$0xff] }
 0x763   : > { %8979 = vrcp.f32 %v3364_v62  ;;  %6012 = vmatpush.msra.mxu2 %v5305_v46  ;;  %v11424_v46 = vsel %vm4508_vm0, %v11171_v5, %v4524_v38  ;;  %v4548_v5 = vld [vmem:[%s14874_s8 + $0x28] sm:$0xff] }
 0x764   : > { %15208 = vst [vmem:[#allocation9_spill] sm:$0xff] %v11393_v29  ;;  %v8314_v16 = vclamps-f32 %v3263_v36, 30.0  ;;  %8327 = vmatmul.msk.f32.gmra.mxu3 %vm2035_vm9, %v11393_v29  ;;  %8395 = vmatmul.msk.f32.gmra.mxu1 %vm2035_vm9, %v11396_v34 }
 0x765   : > { %6013 = vmatpush.msra.mxu2 %v5304_v42  ;;  %v4550_v42 = vld [vmem:[%s14874_s8 + $0x38] sm:$0xff] }
 0x766   : > { %v3318_v62 = vsub.f32 0.0, %v8314_v16  ;;  %4683 = vmatpush.msra.mxu1 %v4550_v42  ;;  %v4544_v42 = vld [vmem:[%s14874_s8 + $0x8] sm:$0xff] }
 0x767   : > { %6014 = vmatpush.msra.mxu2 %v5303_v23  ;;  %v4546_v23 = vld [vmem:[%s14874_s8 + $0x18] sm:$0xff] }
 0x768   : > { %v8978_v9 = vpop.eup %8977  ;;  %v3346_v2 = vmul.f32 1.442695, %v3318_v62  ;;  %v5302_v62 = vld [vmem:[%s14873_s7 + $0xd0] sm:$0xff]  ;;  %4684 = vmatpush.msra.mxu1 %v4548_v5 }
 0x769   : > { %v11416_v7 = vpop.eup %8979  ;;  %v3365_v57 = vadd.f32 1.0, %v8978_v9  ;;  %v3265_v36 = vpop.f32.mrf.mxu1  ;;  %6015 = vmatpush.msra.mxu2 %v5302_v62  ;;  %v5299_v62 = vld [vmem:[%s14873_s7 + $0xb8] sm:$0xff] }
 0x76a   : > { %8981 = vpow2.f32 %v3346_v2  ;;  %v3266_v16 = vadd.f32 %v11192_v17, %v3265_v36  ;;  %v11421_v51 = vmul.f32 %v11416_v7, %v11029_v27  ;;  %v5301_v27 = vld [vmem:[%s14873_s7 + $0xc8] sm:$0xff]  ;;  %v5300_v2 = vld [vmem:[%s14873_s7 + $0xc0] sm:$0xff]  ;;  %4685 = vmatpush.msra.mxu1 %v4546_v23 }
 0x76b   : > { %8983 = vrcp.f32 %v3365_v57  ;;  %v4525_v57 = vmul.f32 0.01, %v11175_v35  ;;  %6016 = vmatpush.msra.mxu2 %v5301_v27 }
 0x76c   : > { %15209 = vst [vmem:[#allocation39_spill] sm:$0xff] %v11421_v51  ;;  %v8315_v9 = vclamps-f32 %v3266_v16, 30.0  ;;  %8328 = vmatmul.msk.f32.gmra.mxu3 %vm2035_vm9, %v11421_v51  ;;  %8396 = vmatmul.msk.f32.gmra.mxu1 %vm2035_vm9, %v11424_v46 }
 0x76d   : > { %6017 = vmatpush.msra.mxu2 %v5300_v2  ;;  %v11467_v29 = vsel %vm4509_vm1, %v11175_v35, %v4525_v57  ;;  %4686 = vmatpush.msra.mxu1 %v4544_v42  ;;  %v4526_v35 = vmul.f32 0.01, %v11185_v40 }
 0x76e   : > { %v3319_v38 = vsub.f32 0.0, %v8315_v9 }
 0x76f   : > { %6018 = vmatpush.msra.mxu2 %v5299_v62 }
 0x770   : > { %v8982_v36 = vpop.eup %8981  ;;  %v3348_v16 = vmul.f32 1.442695, %v3319_v38  ;;  %v5298_v38 = vld [vmem:[%s14873_s7 + $0xb0] sm:$0xff] }
 0x771   : > { %v11456_v9 = vpop.eup %8983  ;;  %v3366_v28 = vadd.f32 1.0, %v8982_v36  ;;  %v3268_v51 = vpop.f32.mrf.mxu1  ;;  %6019 = vmatpush.msra.mxu2 %v5298_v38  ;;  %v11489_v38 = vsel %vm4510_vm2, %v11185_v40, %v4526_v35 }
 0x772   : > { %8985 = vpow2.f32 %v3348_v16  ;;  %v3269_v27 = vadd.f32 %v11192_v17, %v3268_v51  ;;  %v11461_v5 = vmul.f32 %v11456_v9, %v11046_v22  ;;  %v5297_v22 = vld [vmem:[%s14873_s7 + $0xa8] sm:$0xff] }
 0x773   : > { %8987 = vrcp.f32 %v3366_v28  ;;  %v5296_v28 = vld [vmem:[%s14873_s7 + $0xa0] sm:$0xff]  ;;  %6020 = vmatpush.msra.mxu2 %v5297_v22 }
 0x774   : > { %15210 = vst [vmem:[#allocation11_spill] sm:$0xff] %v11461_v5  ;;  %v8316_v36 = vclamps-f32 %v3269_v27, 30.0  ;;  %8329 = vmatmul.msk.f32.gmra.mxu3 %vm2035_vm9, %v11461_v5  ;;  %8397 = vmatmul.msk.f32.gmra.mxu1 %vm2035_vm9, %v11467_v29 }
 0x775   : > { %6021 = vmatpush.msra.mxu2 %v5296_v28 }
 0x776   : > { %v3320_v51 = vsub.f32 0.0, %v8316_v36  ;;  %v8382_v36 = vld [vmem:[%s14874_s8 + $0x40] ss:$8 sm:$0x3] }
 0x778   : > { %v8986_v2 = vpop.eup %8985  ;;  %v3350_v23 = vmul.f32 1.442695, %v3320_v51  ;;  %v11501_v51 = vperm.slane %v8382_v36, 0 }
 0x779   : > { %v11481_v57 = vpop.eup %8987  ;;  %v3367_v16 = vadd.f32 1.0, %v8986_v2  ;;  %v3271_v62 = vpop.f32.mrf.mxu1 }
 0x77a   : > { %8989 = vpow2.f32 %v3350_v23  ;;  %v3272_v42 = vadd.f32 %v11192_v17, %v3271_v62  ;;  %v11486_v27 = vmul.f32 %v11481_v57, %v11055_v4  ;;  %v4838_v4 = vld [vmem:[%s14872_s6 + $0x4a8] sm:$0xff] }
 0x77b   : > { %8991 = vrcp.f32 %v3367_v16  ;;  %4995 = vmatpush.msra.mxu0 %v4838_v4 }
 0x77c   : > { %15211 = vst [vmem:[#allocation43_spill] sm:$0xff] %v11486_v27  ;;  %v8317_v22 = vclamps-f32 %v3272_v42, 30.0  ;;  %8330 = vmatmul.msk.f32.gmra.mxu3 %vm2035_vm9, %v11486_v27  ;;  %8398 = vmatmul.msk.f32.gmra.mxu1 %vm2035_vm9, %v11489_v38  ;;  %v15213_v42 = vld [vmem:[#allocation23_spill] sm:$0xff] }
 0x77e   : > { %v3321_v17 = vsub.f32 0.0, %v8317_v22 }
 0x780   : > { %v8990_v40 = vpop.eup %8989  ;;  %v3352_v28 = vmul.f32 1.442695, %v3321_v17 }
 0x781   : > { %v11503_v35 = vpop.eup %8991  ;;  %v3368_v2 = vadd.f32 1.0, %v8990_v40  ;;  %v4623_v23 = vpop.f32.mrf.mxu1 }
 0x782   : > { %8993 = vpow2.f32 %v3352_v28  ;;  %v4624_v16 = vadd.f32 %v4623_v23, %v11501_v51  ;;  %v11508_v62 = vmul.f32 %v11503_v35, %v11062_v53  ;;  %v15215_v28 = vld [vmem:[#allocation25_spill] sm:$0xff] }
 0x783   : > { %8995 = vrcp.f32 %v3368_v2 }
 0x784   : > { %15212 = vst [vmem:[#allocation12_spill] sm:$0xff] %v11508_v62  ;;  %v4736_v27 = vmul.f32 %v4624_v16, %v15213_v42  ;;  %8331 = vmatmul.msk.f32.gmra.mxu3 %vm2035_vm9, %v11508_v62  ;;  %8399 = vmatmul.msk.f32.vlgmr.msra.gmra.mxu1 %vm2035_vm9, %v11198_v59 }
 0x786   : > { %6022 = vmatmul.f32.vlgmr.msra.gmra.mxu2 %v4736_v27 }
 0x788   : > { %v8994_v36 = vpop.eup %8993 }
 0x789   : > { %v11515_v22 = vpop.eup %8995  ;;  %v3369_v4 = vadd.f32 1.0, %v8994_v36  ;;  %v4626_v17 = vpop.f32.mrf.mxu1 }
 0x78a   : > { %v4627_v40 = vadd.f32 %v4626_v17, %v11501_v51  ;;  %v11520_v53 = vmul.f32 %v11515_v22, %v11068_v58  ;;  %v15217_v58 = vld [vmem:[#allocation27_spill] sm:$0xff]  ;;  %v15218_v17 = vld [vmem:[#allocation30_spill] sm:$0xff] }
 0x78b   : > { %8997 = vrcp.f32 %v3369_v4  ;;  %v11542_v4 = vmul.f32 %v11229_v25, %v11088_v55  ;;  %v15220_v55 = vld [vmem:[#allocation33_spill] sm:$0xff] }
 0x78c   : > { %15214 = vst [vmem:[#allocation46_spill] sm:$0xff] %v11520_v53  ;;  %v4737_v2 = vmul.f32 %v4627_v40, %v15215_v28  ;;  %8332 = vmatmul.msk.f32.gmra.mxu3 %vm2035_vm9, %v11520_v53  ;;  %8400 = vmatmul.msk.f32.gmra.mxu1 %vm2035_vm9, %v11209_v60 }
 0x78e   : > { %6025 = vmatmul.f32.gmra.mxu2 %v4737_v2  ;;  %v11554_v2 = vmul.f32 %v11245_v47, %v11096_v43  ;;  %v3088_v43 = vpop.f32.mrf.mxu0 }
 0x790   : > { %15219 = vst [vmem:[#allocation49_spill] sm:$0xff] %v11554_v2 }
 0x791   : > { %v11527_v59 = vpop.eup %8997  ;;  %v4629_v27 = vpop.f32.mrf.mxu1 }
 0x792   : > { %v4630_v23 = vadd.f32 %v4629_v27, %v11501_v51  ;;  %v11532_v16 = vmul.f32 %v11527_v59, %v11078_v37 }
 0x794   : > { %15216 = vst [vmem:[#allocation14_spill] sm:$0xff] %v11532_v16  ;;  %v4738_v42 = vmul.f32 %v4630_v23, %v15217_v58  ;;  %8333 = vmatmul.msk.f32.gmra.mxu3 %vm2035_vm9, %v11532_v16  ;;  %8401 = vmatmul.msk.f32.gmra.mxu1 %vm2035_vm9, %v11223_v31 }
 0x796   : > { %6028 = vmatmul.f32.gmra.mxu2 %v4738_v42  ;;  %v11566_v42 = vmul.f32 %v11261_v6, %v11106_v48  ;;  %v15225_v48 = vld [vmem:[#allocation40_spill] sm:$0xff] }
 0x798   : > { %15221 = vst [vmem:[#allocation13_spill] sm:$0xff] %v11566_v42 }
 0x799   : > { %v4632_v60 = vpop.f32.mrf.mxu1 }
 0x79a   : > { %v4633_v36 = vadd.f32 %v4632_v60, %v11501_v51  ;;  %v15222_v60 = vld [vmem:[#allocation37_spill] sm:$0xff] }
 0x79c   : > { %v4739_v40 = vmul.f32 %v4633_v36, %v15218_v17  ;;  %8334 = vmatmul.msk.f32.gmra.mxu3 %vm2035_vm9, %v11542_v4  ;;  %8402 = vmatmul.msk.f32.gmra.mxu1 %vm2035_vm9, %v11237_v26 }
 0x79e   : > { %6031 = vmatmul.f32.gmra.mxu2 %v4739_v40 }
 0x79f   : > { %v11549_v37 = vpop.f32.mrf.mxu3 }
 0x7a1   : > { %v4635_v31 = vpop.f32.mrf.mxu1 }
 0x7a2   : > { %v4636_v28 = vadd.f32 %v4635_v31, %v11501_v51  ;;  %v11578_v31 = vmul.f32 %v11277_v11, %v11116_v30  ;;  %v11592_v30 = vmul.f32 %v11293_v19, %v11126_v63  ;;  %v11606_v63 = vmul.f32 %v11309_v20, %v11134_v15 }
 0x7a4   : > { %v4740_v27 = vmul.f32 %v4636_v28, %v15220_v55  ;;  %8335 = vmatmul.msk.f32.gmra.mxu3 %vm2035_vm9, %v11554_v2  ;;  %8403 = vmatmul.msk.f32.gmra.mxu1 %vm2035_vm9, %v11253_v18  ;;  %15224 = vst [vmem:[#allocation15_spill] sm:$0xff] %v11578_v31  ;;  %v3091_v55 = vpop.f32.mrf.mxu0 }
 0x7a5   : > { %15228 = vst [vmem:[#allocation19_spill] sm:$0xff] %v11592_v30 }
 0x7a6   : > { %6034 = vmatmul.f32.gmra.mxu2 %v4740_v27  ;;  %v11587_v27 = vpop.f32.mrf.mxu2  ;;  %15232 = vst [vmem:[#allocation65_spill] sm:$0xff] %v11606_v63 }
 0x7a7   : > { %v11561_v26 = vpop.f32.mrf.mxu3  ;;  %15227 = vst [vmem:[#allocation16_spill] sm:$0xff] %v11587_v27 }
 0x7a9   : > { %v4638_v23 = vpop.f32.mrf.mxu1 }
 0x7aa   : > { %v4639_v58 = vadd.f32 %v4638_v23, %v11501_v51 }
 0x7ac   : > { %v4741_v36 = vmul.f32 %v4639_v58, %v15222_v60  ;;  %8336 = vmatmul.msk.f32.gmra.mxu3 %vm2035_vm9, %v11566_v42  ;;  %8404 = vmatmul.msk.f32.gmra.mxu1 %vm2035_vm9, %v11269_v44  ;;  %v15229_v60 = vld [vmem:[#allocation45_spill] sm:$0xff] }
 0x7ae   : > { %6037 = vmatmul.f32.gmra.mxu2 %v4741_v36 }
 0x7af   : > { %v11573_v18 = vpop.f32.mrf.mxu3 }
 0x7b0   : > { %15223 = vst [vmem:[#allocation17_spill] sm:$0xff] %v11573_v18 }
 0x7b1   : > { %v4641_v17 = vpop.f32.mrf.mxu1 }
 0x7b2   : > { %v4642_v40 = vadd.f32 %v4641_v17, %v11501_v51 }
 0x7b4   : > { %v4742_v28 = vmul.f32 %v4642_v40, %v15225_v48  ;;  %8337 = vmatmul.msk.f32.gmra.mxu3 %vm2035_vm9, %v11578_v31  ;;  %8405 = vmatmul.msk.f32.gmra.mxu1 %vm2035_vm9, %v11285_v32  ;;  %v3094_v32 = vpop.f32.mrf.mxu0  ;;  %v11601_v48 = vpop.f32.mrf.mxu2 }
 0x7b5   : > { %15231 = vst [vmem:[#allocation21_spill] sm:$0xff] %v11601_v48 }
 0x7b6   : > { %6040 = vmatmul.f32.gmra.mxu2 %v4742_v28 }
 0x7b7   : > { %v11585_v44 = vpop.f32.mrf.mxu3 }
 0x7b8   : > { %15226 = vst [vmem:[#allocation18_spill] sm:$0xff] %v11585_v44 }
 0x7b9   : > { %v4644_v23 = vpop.f32.mrf.mxu1 }
 0x7ba   : > { %v4645_v58 = vadd.f32 %v4644_v23, %v11501_v51  ;;  %v15233_v23 = vld [vmem:[#allocation48_spill] sm:$0xff] }
 0x7bc   : > { %v4743_v36 = vmul.f32 %v4645_v58, %v15229_v60  ;;  %8338 = vmatmul.msk.f32.gmra.mxu3 %vm2035_vm9, %v11592_v30  ;;  %8406 = vmatmul.msk.f32.gmra.mxu1 %vm2035_vm9, %v11301_v39  ;;  %v3097_v60 = vpop.f32.mrf.mxu0  ;;  %v11620_v15 = vpop.f32.mrf.mxu2 }
 0x7bd   : > { %15236 = vst [vmem:[#allocation60_spill] sm:$0xff] %v11620_v15  ;;  %v15240_v15 = vld [vmem:[#allocation53_spill] sm:$0xff] }
 0x7be   : > { %6043 = vmatmul.f32.gmra.mxu2 %v4743_v36 }
 0x7bf   : > { %v11599_v17 = vpop.f32.mrf.mxu3 }
 0x7c0   : > { %15230 = vst [vmem:[#allocation20_spill] sm:$0xff] %v11599_v17 }
 0x7c1   : > { %v4647_v40 = vpop.f32.mrf.mxu1 }
 0x7c2   : > { %v4648_v28 = vadd.f32 %v4647_v40, %v11501_v51  ;;  %v11618_v40 = vmul.f32 %v11325_v50, %v11144_v56  ;;  %v11632_v56 = vmul.f32 %v11341_v61, %v11163_v1  ;;  %v11645_v1 = vmul.f32 %v11360_v49, %v3088_v43 }
 0x7c4   : > { %v4744_v58 = vmul.f32 %v4648_v28, %v15233_v23  ;;  %8339 = vmatmul.msk.f32.gmra.mxu3 %vm2035_vm9, %v11606_v63  ;;  %8407 = vmatmul.msk.f32.gmra.mxu1 %vm2035_vm9, %v11317_v3  ;;  %15235 = vst [vmem:[#allocation42_spill] sm:$0xff] %v11618_v40  ;;  %v15237_v28 = vld [vmem:[#allocation51_spill] sm:$0xff]  ;;  %v3100_v27 = vpop.f32.mrf.mxu0 }
 0x7c5   : > { %15239 = vst [vmem:[#allocation64_spill] sm:$0xff] %v11632_v56 }
 0x7c6   : > { %6046 = vmatmul.f32.gmra.mxu2 %v4744_v58  ;;  %15243 = vst [vmem:[#allocation23_spill] sm:$0xff] %v11645_v1 }
 0x7c7   : > { %v11613_v39 = vpop.f32.mrf.mxu3 }
 0x7c8   : > { %15234 = vst [vmem:[#allocation68_spill] sm:$0xff] %v11613_v39 }
 0x7c9   : > { %v4650_v36 = vpop.f32.mrf.mxu1 }
 0x7ca   : > { %v4651_v48 = vadd.f32 %v4650_v36, %v11501_v51 }
 0x7cc   : > { %v4745_v23 = vmul.f32 %v4651_v48, %v15237_v28  ;;  %8340 = vmatmul.msk.f32.gmra.mxu3 %vm2035_vm9, %v11618_v40  ;;  %8408 = vmatmul.msk.f32.gmra.mxu1 %vm2035_vm9, %v11333_v10  ;;  %v11639_v10 = vpop.f32.mrf.mxu2 }
 0x7cd   : > { %15241 = vst [vmem:[#allocation67_spill] sm:$0xff] %v11639_v10 }
 0x7ce   : > { %6049 = vmatmul.f32.gmra.mxu2 %v4745_v23 }
 0x7cf   : > { %v11627_v3 = vpop.f32.mrf.mxu3 }
 0x7d0   : > { %15238 = vst [vmem:[#allocation62_spill] sm:$0xff] %v11627_v3 }
 0x7d1   : > { %v4653_v58 = vpop.f32.mrf.mxu1 }
 0x7d2   : > { %v4654_v36 = vadd.f32 %v4653_v58, %v11501_v51  ;;  %v15244_v58 = vld [vmem:[#allocation56_spill] sm:$0xff] }
 0x7d4   : > { %v4746_v63 = vmul.f32 %v4654_v36, %v15240_v15  ;;  %8341 = vmatmul.msk.f32.gmra.mxu3 %vm2035_vm9, %v11632_v56  ;;  %8409 = vmatmul.msk.f32.gmra.mxu1 %vm2035_vm9, %v11349_v8  ;;  %v4837_v8 = vld [vmem:[%s14872_s6 + $0x4a0] sm:$0xff]  ;;  %v11657_v36 = vpop.f32.mrf.mxu2 }
 0x7d5   : > { %4996 = vmatpush.msra.mxu0 %v4837_v8  ;;  %15246 = vst [vmem:[#allocation27_spill] sm:$0xff] %v11657_v36 }
 0x7d6   : > { %6052 = vmatmul.f32.gmra.mxu2 %v4746_v63  ;;  %v3103_v63 = vpop.f32.mrf.mxu0 }
 0x7d7   : > { %v11641_v48 = vpop.f32.mrf.mxu3 }
 0x7d8   : > { %15242 = vst [vmem:[#allocation69_spill] sm:$0xff] %v11641_v48 }
 0x7d9   : > { %v4656_v28 = vpop.f32.mrf.mxu1 }
 0x7da   : > { %v4657_v23 = vadd.f32 %v4656_v28, %v11501_v51 }
 0x7dc   : > { %v4747_v40 = vmul.f32 %v4657_v23, %v15244_v58  ;;  %8342 = vmatmul.msk.f32.gmra.mxu3 %vm2035_vm9, %v11645_v1  ;;  %8410 = vmatmul.msk.f32.gmra.mxu1 %vm2035_vm9, %v11368_v52  ;;  %v11661_v23 = vmul.f32 %v11388_v33, %v3091_v55  ;;  %v15248_v58 = vld [vmem:[#allocation58_spill] sm:$0xff]  ;;  %v11670_v36 = vpop.f32.mrf.mxu2  ;;  %v11674_v55 = vmul.f32 %v11416_v7, %v3094_v32  ;;  %v15252_v1 = vld [vmem:[#allocation61_spill] sm:$0xff] }
 0x7dd   : > { %15250 = vst [vmem:[#allocation37_spill] sm:$0xff] %v11670_v36 }
 0x7de   : > { %6055 = vmatmul.f32.gmra.mxu2 %v4747_v40  ;;  %15247 = vst [vmem:[#allocation30_spill] sm:$0xff] %v11661_v23  ;;  %v3106_v52 = vpop.f32.mrf.mxu0 }
 0x7df   : > { %v11655_v15 = vpop.f32.mrf.mxu3  ;;  %15251 = vst [vmem:[#allocation40_spill] sm:$0xff] %v11674_v55 }
 0x7e0   : > { %15245 = vst [vmem:[#allocation25_spill] sm:$0xff] %v11655_v15 }
 0x7e1   : > { %v4659_v43 = vpop.f32.mrf.mxu1 }
 0x7e2   : > { %v4660_v28 = vadd.f32 %v4659_v43, %v11501_v51 }
 0x7e4   : > { %v4748_v10 = vmul.f32 %v4660_v28, %v15248_v58  ;;  %8343 = vmatmul.msk.f32.gmra.mxu3 %vm2035_vm9, %v11661_v23  ;;  %8411 = vmatmul.msk.f32.gmra.mxu1 %vm2035_vm9, %v11396_v34  ;;  %v11687_v32 = vpop.f32.mrf.mxu2  ;;  %v15256_v23 = vld [vmem:[#allocation63_spill] sm:$0xff] }
 0x7e5   : > { %15255 = vst [vmem:[#allocation51_spill] sm:$0xff] %v11687_v32 }
 0x7e6   : > { %6058 = vmatmul.f32.gmra.mxu2 %v4748_v10  ;;  %v3109_v10 = vpop.f32.mrf.mxu0 }
 0x7e7   : > { %v11668_v40 = vpop.f32.mrf.mxu3 }
 0x7e8   : > { %15249 = vst [vmem:[#allocation33_spill] sm:$0xff] %v11668_v40 }
 0x7e9   : > { %v4662_v8 = vpop.f32.mrf.mxu1 }
 0x7ea   : > { %v4663_v43 = vadd.f32 %v4662_v8, %v11501_v51  ;;  %v11685_v8 = vmul.f32 %v11456_v9, %v3097_v60 }
 0x7ec   : > { %v4749_v28 = vmul.f32 %v4663_v43, %v15252_v1  ;;  %8344 = vmatmul.msk.f32.gmra.mxu3 %vm2035_vm9, %v11674_v55  ;;  %8412 = vmatmul.msk.f32.gmra.mxu1 %vm2035_vm9, %v11424_v46  ;;  %15254 = vst [vmem:[#allocation48_spill] sm:$0xff] %v11685_v8  ;;  %v15259_v55 = vld [vmem:[#allocation66_spill] sm:$0xff] }
 0x7ee   : > { %6061 = vmatmul.f32.gmra.mxu2 %v4749_v28  ;;  %v3112_v60 = vpop.f32.mrf.mxu0 }
 0x7ef   : > { %v11681_v34 = vpop.f32.mrf.mxu3 }
 0x7f0   : > { %15253 = vst [vmem:[#allocation45_spill] sm:$0xff] %v11681_v34 }
 0x7f1   : > { %v4665_v58 = vpop.f32.mrf.mxu1 }
 0x7f2   : > { %v4666_v36 = vadd.f32 %v4665_v58, %v11501_v51  ;;  %v11698_v58 = vmul.f32 %v11481_v57, %v3100_v27 }
 0x7f4   : > { %v4750_v1 = vmul.f32 %v4666_v36, %v15256_v23  ;;  %8345 = vmatmul.msk.f32.gmra.mxu3 %vm2035_vm9, %v11685_v8  ;;  %8413 = vmatmul.msk.f32.gmra.mxu1 %vm2035_vm9, %v11467_v29  ;;  %15258 = vst [vmem:[#allocation56_spill] sm:$0xff] %v11698_v58  ;;  %v11705_v36 = vpop.f32.mrf.mxu2  ;;  %v11710_v23 = vmul.f32 %v11503_v35, %v3103_v63 }
 0x7f5   : > { %15260 = vst [vmem:[#allocation58_spill] sm:$0xff] %v11705_v36 }
 0x7f6   : > { %6064 = vmatmul.f32.gmra.mxu2 %v4750_v1  ;;  %15262 = vst [vmem:[#allocation63_spill] sm:$0xff] %v11710_v23 }
 0x7f7   : > { %v11694_v46 = vpop.f32.mrf.mxu3 }
 0x7f8   : > { %15257 = vst [vmem:[#allocation53_spill] sm:$0xff] %v11694_v46 }
 0x7f9   : > { %v4668_v43 = vpop.f32.mrf.mxu1 }
 0x7fa   : > { %v4669_v28 = vadd.f32 %v4668_v43, %v11501_v51  ;;  %v3115_v51 = vpop.f32.mrf.mxu0 }
 0x7fb   : > { %v11738_v36 = vmul.f32 %v11245_v47, %v3115_v51 }
 0x7fc   : > { %v4751_v32 = vmul.f32 %v4669_v28, %v15259_v55  ;;  %8346 = vmatmul.msk.f32.gmra.mxu3 %vm2035_vm9, %v11698_v58  ;;  %8414 = vmatmul.msk.f32.gmra.mxu1 %vm2035_vm9, %v11489_v38  ;;  %v11717_v55 = vmul.f32 %v11515_v22, %v3106_v52  ;;  %v11731_v28 = vmul.f32 %v11229_v25, %v3112_v60 }
 0x7fd   : > { %15269 = vst [vmem:[#allocation75_spill] sm:$0xff] %v11738_v36 }
 0x7fe   : > { %6067 = vmatmul.f32.gmra.mxu2 %v4751_v32  ;;  %15264 = vst [vmem:[#allocation70_spill] sm:$0xff] %v11717_v55  ;;  %v11724_v32 = vmul.f32 %v11527_v59, %v3109_v10 }
 0x7ff   : > { %v11707_v29 = vpop.f32.mrf.mxu3  ;;  %15268 = vst [vmem:[#allocation74_spill] sm:$0xff] %v11731_v28 }
 0x800   : > { %15261 = vst [vmem:[#allocation61_spill] sm:$0xff] %v11707_v29 }
 0x801   : > { %15266 = vst [vmem:[#allocation72_spill] sm:$0xff] %v11724_v32 }
 0x802   : > { %v3118_v38 = vpop.f32.mrf.mxu0 }
 0x804   : > { %8347 = vmatmul.msk.f32.gmra.mxu3 %vm2035_vm9, %v11710_v23 }
 0x807   : > { %v11714_v27 = vpop.f32.mrf.mxu3 }
 0x808   : > { %15263 = vst [vmem:[#allocation66_spill] sm:$0xff] %v11714_v27 }
 0x80a   : > { %v3121_v43 = vpop.f32.mrf.mxu0 }
 0x80b   : > { %v11752_v23 = vmul.f32 %v11277_v11, %v3121_v43 }
 0x80c   : > { %8348 = vmatmul.msk.f32.gmra.mxu3 %vm2035_vm9, %v11717_v55 }
 0x80d   : > { %15271 = vst [vmem:[#allocation77_spill] sm:$0xff] %v11752_v23 }
 0x80f   : > { %v11721_v1 = vpop.f32.mrf.mxu3 }
 0x810   : > { %15265 = vst [vmem:[#allocation71_spill] sm:$0xff] %v11721_v1 }
 0x812   : > { %v3124_v55 = vpop.f32.mrf.mxu0 }
 0x813   : > { %v11759_v58 = vmul.f32 %v11293_v19, %v3124_v55 }
 0x814   : > { %8349 = vmatmul.msk.f32.gmra.mxu3 %vm2035_vm9, %v11724_v32  ;;  %v11745_v32 = vmul.f32 %v11261_v6, %v3118_v38  ;;  %v4836_v6 = vld [vmem:[%s14872_s6 + $0x498] sm:$0xff] }
 0x815   : > { %15272 = vst [vmem:[#allocation78_spill] sm:$0xff] %v11759_v58  ;;  %4997 = vmatpush.msra.mxu0 %v4836_v6 }
 0x816   : > { %15270 = vst [vmem:[#allocation76_spill] sm:$0xff] %v11745_v32 }
 0x817   : > { %v11728_v63 = vpop.f32.mrf.mxu3 }
 0x818   : > { %15267 = vst [vmem:[#allocation73_spill] sm:$0xff] %v11728_v63 }
 0x81a   : > { %v3127_v25 = vpop.f32.mrf.mxu0 }
 0x81b   : > { %v11769_v43 = vmul.f32 %v11309_v20, %v3127_v25 }
 0x81c   : > { %8350 = vmatmul.msk.f32.gmra.mxu3 %vm2035_vm9, %v11731_v28 }
 0x81d   : > { %15273 = vst [vmem:[#allocation79_spill] sm:$0xff] %v11769_v43 }
 0x81f   : > { %v11735_v52 = vpop.f32.mrf.mxu3 }
 0x822   : > { %v3130_v47 = vpop.f32.mrf.mxu0 }
 0x823   : > { %v11776_v19 = vmul.f32 %v11325_v50, %v3130_v47 }
 0x824   : > { %8351 = vmatmul.msk.f32.gmra.mxu3 %vm2035_vm9, %v11738_v36 }
 0x825   : > { %15274 = vst [vmem:[#allocation80_spill] sm:$0xff] %v11776_v19 }
 0x827   : > { %v11742_v10 = vpop.f32.mrf.mxu3 }
 0x82a   : > { %v3133_v11 = vpop.f32.mrf.mxu0 }
 0x82b   : > { %v11783_v6 = vmul.f32 %v11341_v61, %v3133_v11 }
 0x82c   : > { %8352 = vmatmul.msk.f32.gmra.mxu3 %vm2035_vm9, %v11745_v32 }
 0x82d   : > { %15275 = vst [vmem:[#allocation81_spill] sm:$0xff] %v11783_v6 }
 0x82f   : > { %v11749_v60 = vpop.f32.mrf.mxu3 }
 0x832   : > { %v3136_v55 = vpop.f32.mrf.mxu0 }
 0x834   : > { %8353 = vmatmul.msk.f32.gmra.mxu3 %vm2035_vm9, %v11752_v23 }
 0x837   : > { %v11756_v51 = vpop.f32.mrf.mxu3 }
 0x83a   : > { %v3139_v20 = vpop.f32.mrf.mxu0 }
 0x83c   : > { %8354 = vmatmul.msk.f32.gmra.mxu3 %vm2035_vm9, %v11759_v58 }
 0x83f   : > { %v11766_v38 = vpop.f32.mrf.mxu3 }
 0x842   : > { %v3142_v50 = vpop.f32.mrf.mxu0 }
 0x844   : > { %8355 = vmatmul.msk.f32.gmra.mxu3 %vm2035_vm9, %v11769_v43  ;;  %v11790_v43 = vmul.f32 %v11360_v49, %v3136_v55 }
 0x846   : > { %15277 = vst [vmem:[#allocation83_spill] sm:$0xff] %v11790_v43 }
 0x847   : > { %v11773_v8 = vpop.f32.mrf.mxu3 }
 0x84a   : > { %v3145_v11 = vpop.f32.mrf.mxu0 }
 0x84b   : > { %v11811_v55 = vmul.f32 %v11456_v9, %v3145_v11 }
 0x84c   : > { %8356 = vmatmul.msk.f32.gmra.mxu3 %vm2035_vm9, %v11776_v19  ;;  %v11797_v19 = vmul.f32 %v11388_v33, %v3139_v20 }
 0x84d   : > { %15282 = vst [vmem:[#allocation88_spill] sm:$0xff] %v11811_v55 }
 0x84e   : > { %15278 = vst [vmem:[#allocation84_spill] sm:$0xff] %v11797_v19 }
 0x84f   : > { %v11780_v58 = vpop.f32.mrf.mxu3 }
 0x854   : > { %8357 = vmatmul.msk.f32.gmra.mxu3 %vm2035_vm9, %v11783_v6  ;;  %v11804_v6 = vmul.f32 %v11416_v7, %v3142_v50 }
 0x856   : > { %15280 = vst [vmem:[#allocation86_spill] sm:$0xff] %v11804_v6 }
 0x857   : > { %v11787_v25 = vpop.f32.mrf.mxu3 }
 0x858   : > { %15276 = vst [vmem:[#allocation82_spill] sm:$0xff] %v11787_v25 }
 0x85c   : > { %8358 = vmatmul.msk.f32.gmra.mxu3 %vm2035_vm9, %v11790_v43  ;;  %v3148_v43 = vpop.f32.mrf.mxu0 }
 0x85d   : > { %v11818_v20 = vmul.f32 %v11481_v57, %v3148_v43  ;;  %v11839_v43 = vmul.f32 0.01, %v11234_v13 }
 0x85f   : > { %v11794_v47 = vpop.f32.mrf.mxu3  ;;  %15284 = vst [vmem:[#allocation90_spill] sm:$0xff] %v11818_v20 }
 0x864   : > { %8359 = vmatmul.msk.f32.gmra.mxu3 %vm2035_vm9, %v11797_v19  ;;  %v3151_v7 = vpop.f32.mrf.mxu0  ;;  %v3744_v19 = vmul.f32 %v11561_v26, %v11250_v21 }
 0x867   : > { %v11801_v61 = vpop.f32.mrf.mxu3 }
 0x868   : > { %15279 = vst [vmem:[#allocation85_spill] sm:$0xff] %v11801_v61  ;;  %v11905_v61 = vsel %vm2035_vm9, %v3744_v19, 0.0  ;;  %v3749_v19 = vmul.f32 %v11627_v3, %v11330_v12 }
 0x86c   : > { %8360 = vmatmul.msk.f32.gmra.mxu3 %vm2035_vm9, %v11804_v6  ;;  %v11825_v6 = vmul.f32 %v11503_v35, %v3151_v7  ;;  %v3154_v9 = vpop.f32.mrf.mxu0  ;;  %v11842_v35 = vmul.f32 0.01, %v11250_v21  ;;  %v11845_v7 = vmul.f32 0.01, %v11266_v41 }
 0x86e   : > { %15286 = vst [vmem:[#allocation92_spill] sm:$0xff] %v11825_v6 }
 0x86f   : > { %v11808_v49 = vpop.f32.mrf.mxu3  ;;  %15290 = vst [vmem:[#allocation96_spill] sm:$0xff] %v11842_v35 }
 0x870   : > { %15281 = vst [vmem:[#allocation87_spill] sm:$0xff] %v11808_v49  ;;  %v3746_v49 = vmul.f32 %v11585_v44, %v11282_v45 }
 0x871   : > { %15291 = vst [vmem:[#allocation97_spill] sm:$0xff] %v11845_v7  ;;  %v15299_v7 = vld [vmem:[#allocation9_spill] sm:$0xff] }
 0x872   : > { %v11881_v35 = vmul.f32 0.01, %v15299_v7 }
 0x874   : > { %8361 = vmatmul.msk.f32.gmra.mxu3 %vm2035_vm9, %v11811_v55  ;;  %v11832_v55 = vmul.f32 %v11515_v22, %v3154_v9  ;;  %v11851_v22 = vmul.f32 0.01, %v11298_v14  ;;  %v3157_v9 = vpop.f32.mrf.mxu0  ;;  %15300 = vst [vmem:[#allocation105_spill] sm:$0xff] %v11881_v35 }
 0x876   : > { %15288 = vst [vmem:[#allocation94_spill] sm:$0xff] %v11832_v55 }
 0x877   : > { %v11815_v33 = vpop.f32.mrf.mxu3  ;;  %15293 = vst [vmem:[#allocation99_spill] sm:$0xff] %v11851_v22  ;;  %v3745_v22 = vmul.f32 %v11573_v18, %v11266_v41  ;;  %v11891_v41 = vmul.f32 0.01, %v11461_v5 }
 0x878   : > { %15283 = vst [vmem:[#allocation89_spill] sm:$0xff] %v11815_v33  ;;  %v11870_v33 = vmul.f32 %v11527_v59, %v3157_v9  ;;  %v15301_v59 = vld [vmem:[#allocation39_spill] sm:$0xff] }
 0x879   : > { %v11888_v9 = vmul.f32 0.01, %v15301_v59  ;;  %15303 = vst [vmem:[#allocation107_spill] sm:$0xff] %v11891_v41  ;;  %v11911_v41 = vsel %vm2035_vm9, %v3745_v22, 0.0  ;;  %v11927_v22 = vsel %vm2035_vm9, %v3746_v49, 0.0  ;;  %v3879_v49 = vmul.f32 %v11655_v15, %v11655_v15 }
 0x87a   : > { %15296 = vst [vmem:[#allocation102_spill] sm:$0xff] %v11870_v33 }
 0x87b   : > { %15302 = vst [vmem:[#allocation106_spill] sm:$0xff] %v11888_v9 }
 0x87c   : > { %8362 = vmatmul.msk.f32.gmra.mxu3 %vm2035_vm9, %v11818_v20  ;;  %v3871_v20 = vmul.f32 %v11549_v37, %v11549_v37 }
 0x87e   : > { %v3919_v35 = vsel %vm2035_vm9, %v3871_v20, 0.0 }
 0x87f   : > { %v11822_v50 = vpop.f32.mrf.mxu3 }
 0x880   : > { %15285 = vst [vmem:[#allocation91_spill] sm:$0xff] %v11822_v50  ;;  %v3872_v50 = vmul.f32 %v11561_v26, %v11561_v26 }
 0x882   : > { %v11908_v9 = vsel %vm2035_vm9, %v3872_v50, 0.0 }
 0x884   : > { %8363 = vmatmul.msk.f32.gmra.mxu3 %vm2035_vm9, %v11825_v6  ;;  %v11848_v6 = vmul.f32 0.01, %v11282_v45  ;;  %v3874_v45 = vmul.f32 %v11585_v44, %v11585_v44 }
 0x886   : > { %15292 = vst [vmem:[#allocation98_spill] sm:$0xff] %v11848_v6  ;;  %v3873_v6 = vmul.f32 %v11573_v18, %v11573_v18  ;;  %v15304_v18 = vld [vmem:[#allocation43_spill] sm:$0xff]  ;;  %v11936_v44 = vsel %vm2035_vm9, %v3874_v45, 0.0  ;;  %v3887_v45 = vmul.f32 %v11735_v52, %v11735_v52 }
 0x887   : > { %v11829_v11 = vpop.f32.mrf.mxu3 }
 0x888   : > { %15287 = vst [vmem:[#allocation93_spill] sm:$0xff] %v11829_v11  ;;  %v11861_v11 = vmul.f32 0.01, %v11330_v12  ;;  %v11916_v20 = vsel %vm2035_vm9, %v3873_v6, 0.0  ;;  %v3750_v6 = vmul.f32 %v11641_v48, %v11346_v24 }
 0x88a   : > { %15295 = vst [vmem:[#allocation101_spill] sm:$0xff] %v11861_v11  ;;  %v11878_v11 = vmul.f32 0.01, %v11365_v54 }
 0x88c   : > { %8364 = vmatmul.msk.f32.gmra.mxu3 %vm2035_vm9, %v11832_v55  ;;  %v3743_v55 = vmul.f32 %v11549_v37, %v11234_v13  ;;  %15298 = vst [vmem:[#allocation104_spill] sm:$0xff] %v11878_v11 }
 0x88e   : > { %v11897_v11 = vsel %vm2035_vm9, %v3743_v55, 0.0  ;;  %v3875_v55 = vmul.f32 %v11599_v17, %v11599_v17 }
 0x88f   : > { %v11836_v57 = vpop.f32.mrf.mxu3 }
 0x890   : > { %15289 = vst [vmem:[#allocation95_spill] sm:$0xff] %v11836_v57  ;;  %v11858_v57 = vmul.f32 0.01, %v11314_v0  ;;  %v11946_v12 = vsel %vm2035_vm9, %v3875_v55, 0.0  ;;  %v3753_v55 = vmul.f32 %v11681_v34, %v15301_v59  ;;  %v3754_v59 = vmul.f32 %v11694_v46, %v11461_v5 }
 0x891   : > { %v3755_v5 = vmul.f32 %v11707_v29, %v15304_v18 }
 0x892   : > { %15294 = vst [vmem:[#allocation100_spill] sm:$0xff] %v11858_v57  ;;  %v11875_v57 = vmul.f32 0.01, %v11346_v24  ;;  %v3752_v24 = vmul.f32 %v11668_v40, %v15299_v7 }
 0x894   : > { %15297 = vst [vmem:[#allocation103_spill] sm:$0xff] %v11875_v57  ;;  %8365 = vmatmul.msk.f32.gmra.mxu3 %vm2035_vm9, %v11870_v33  ;;  %v11894_v57 = vmul.f32 0.01, %v15304_v18  ;;  %v3747_v33 = vmul.f32 %v11599_v17, %v11298_v14  ;;  %v3876_v14 = vmul.f32 %v11613_v39, %v11613_v39  ;;  %v3877_v17 = vmul.f32 %v11627_v3, %v11627_v3 }
 0x896   : > { %15305 = vst [vmem:[#allocation108_spill] sm:$0xff] %v11894_v57  ;;  %v3748_v57 = vmul.f32 %v11613_v39, %v11314_v0  ;;  %v3878_v0 = vmul.f32 %v11641_v48, %v11641_v48  ;;  %v11939_v39 = vsel %vm2035_vm9, %v3747_v33, 0.0  ;;  %v3880_v48 = vmul.f32 %v11668_v40, %v11668_v40 }
 0x897   : > { %v11924_v50 = vpop.f32.mrf.mxu3  ;;  %v11966_v7 = vsel %vm2035_vm9, %v3877_v17, 0.0  ;;  %v11969_v40 = vsel %vm2035_vm9, %v3750_v6, 0.0  ;;  %v3882_v17 = vmul.f32 %v11694_v46, %v11694_v46  ;;  %v11987_v6 = vsel %vm2035_vm9, %v3752_v24, 0.0 }
 0x898   : > { %15306 = vst [vmem:[#allocation109_spill] sm:$0xff] %v11924_v50  ;;  %v3751_v50 = vmul.f32 %v11655_v15, %v11365_v54  ;;  %v11955_v33 = vsel %vm2035_vm9, %v3748_v57, 0.0  ;;  %v11958_v54 = vsel %vm2035_vm9, %v3876_v14, 0.0  ;;  %v11961_v15 = vsel %vm2035_vm9, %v3749_v19, 0.0 }
 0x899   : > { %v11972_v3 = vsel %vm2035_vm9, %v3878_v0, 0.0  ;;  %v3881_v57 = vmul.f32 %v11681_v34, %v11681_v34  ;;  %v11980_v19 = vsel %vm2035_vm9, %v3879_v49, 0.0  ;;  %15307 = vst [vmem:[#allocation110_spill] sm:$0xff] %v11987_v6  ;;  %v11990_v0 = vsel %vm2035_vm9, %v3880_v48, 0.0 }
 0x89a   : > { %v11977_v14 = vsel %vm2035_vm9, %v3751_v50, 0.0  ;;  %15308 = vst [vmem:[#allocation111_spill] sm:$0xff] %v11990_v0  ;;  %v3759_v34 = vmul.f32 %v11735_v52, %v11542_v4  ;;  %v3920_v50 = vsel %vm2035_vm9, %v3887_v45, 0.0  ;;  %v11996_v49 = vsel %vm2035_vm9, %v3753_v55, 0.0 }
 0x89b   : > { %15309 = vst [vmem:[#allocation112_spill] sm:$0xff] %v11996_v49  ;;  %v3883_v46 = vmul.f32 %v11707_v29, %v11707_v29  ;;  %v3756_v24 = vmul.f32 %v11714_v27, %v11508_v62  ;;  %v12007_v48 = vsel %vm2035_vm9, %v3881_v57, 0.0  ;;  %v3884_v45 = vmul.f32 %v11714_v27, %v11714_v27 }
 0x89c   : > { %15310 = vst [vmem:[#allocation113_spill] sm:$0xff] %v12007_v48  ;;  %v3757_v55 = vmul.f32 %v11721_v1, %v11520_v53  ;;  %v12016_v49 = vsel %vm2035_vm9, %v3754_v59, 0.0  ;;  %v12019_v29 = vsel %vm2035_vm9, %v3882_v17, 0.0  ;;  %v3921_v62 = vadd.f32 %v3920_v50, %v3919_v35 }
 0x89d   : > { %15311 = vst [vmem:[#allocation114_spill] sm:$0xff] %v12016_v49  ;;  %v3792_v48 = vsel %vm2035_vm9, %v3759_v34, 0.0  ;;  %v3760_v27 = vmul.f32 %v11742_v10, %v11554_v2  ;;  %v3888_v53 = vmul.f32 %v11742_v10, %v11742_v10  ;;  %v12030_v59 = vsel %vm2035_vm9, %v3755_v5, 0.0 }
 0x89e   : > { %15312 = vst [vmem:[#allocation115_spill] sm:$0xff] %v12019_v29  ;;  %v12033_v17 = vsel %vm2035_vm9, %v3883_v46, 0.0  ;;  %v12036_v35 = vsel %vm2035_vm9, %v3756_v24, 0.0  ;;  %v12039_v34 = vsel %vm2035_vm9, %v3884_v45, 0.0  ;;  %v12042_v29 = vsel %vm2035_vm9, %v3757_v55, 0.0 }
 0x89f   : > { %v12004_v6 = vpop.f32.mrf.mxu3  ;;  %15313 = vst [vmem:[#allocation116_spill] sm:$0xff] %v12030_v59  ;;  %v3885_v49 = vmul.f32 %v11721_v1, %v11721_v1  ;;  %v3758_v5 = vmul.f32 %v11728_v63, %v11532_v16  ;;  %v3793_v46 = vadd.f32 %v3792_v48, %v11897_v11  ;;  %v3925_v45 = vsel %vm2035_vm9, %v3888_v53, 0.0 }
 0x8a0   : > { %v3903_v18 = vmul.f32 %v12004_v6, %v12004_v6  ;;  %v3775_v57 = vmul.f32 %v12004_v6, %v11731_v28  ;;  %15314 = vst [vmem:[#allocation117_spill] sm:$0xff] %v12033_v17  ;;  %v3761_v55 = vmul.f32 %v11749_v60, %v11566_v42  ;;  %v3889_v1 = vmul.f32 %v11749_v60, %v11749_v60 }
 0x8a1   : > { %15315 = vst [vmem:[#allocation118_spill] sm:$0xff] %v12036_v35  ;;  %v3762_v16 = vmul.f32 %v11756_v51, %v11578_v31  ;;  %v3763_v11 = vmul.f32 %v11766_v38, %v11592_v30  ;;  %v3891_v53 = vmul.f32 %v11766_v38, %v11766_v38  ;;  %v3926_v35 = vadd.f32 %v3925_v45, %v11908_v9 }
 0x8a2   : > { %v3922_v0 = vsel %vm2035_vm9, %v3903_v18, 0.0  ;;  %15316 = vst [vmem:[#allocation119_spill] sm:$0xff] %v12039_v34  ;;  %v3886_v18 = vmul.f32 %v11728_v63, %v11728_v63  ;;  %v3794_v24 = vsel %vm2035_vm9, %v3775_v57, 0.0  ;;  %v3890_v63 = vmul.f32 %v11756_v51, %v11756_v51 }
 0x8a3   : > { %v3923_v50 = vadd.f32 %v3922_v0, %v3921_v62  ;;  %15317 = vst [vmem:[#allocation120_spill] sm:$0xff] %v12042_v29  ;;  %v3797_v0 = vsel %vm2035_vm9, %v3760_v27, 0.0  ;;  %v3795_v27 = vadd.f32 %v3794_v24, %v3793_v46  ;;  %v12073_v29 = vsel %vm2035_vm9, %v3885_v49, 0.0 }
 0x8a4   : > { %15318 = vst [vmem:[#allocation121_spill] sm:$0xff] %v12073_v29  ;;  %v12076_v34 = vsel %vm2035_vm9, %v3758_v5, 0.0  ;;  %v3798_v17 = vadd.f32 %v3797_v0, %v11905_v61  ;;  %v3802_v46 = vsel %vm2035_vm9, %v3761_v55, 0.0  ;;  %v3930_v24 = vsel %vm2035_vm9, %v3889_v1, 0.0 }
 0x8a5   : > { %v4047_v62 = vadd.f32 1e-06, %v3923_v50  ;;  %15319 = vst [vmem:[#allocation122_spill] sm:$0xff] %v12076_v34  ;;  %v3807_v30 = vsel %vm2035_vm9, %v3762_v16, 0.0  ;;  %v3935_v49 = vsel %vm2035_vm9, %v3890_v63, 0.0  ;;  %v3812_v5 = vsel %vm2035_vm9, %v3763_v11, 0.0 }
 0x8a6   : > { %vm3999_vm3 = vcmp.ge.f32.partialorder %v3795_v27, 0.0  ;;  %v3803_v1 = vadd.f32 %v3802_v46, %v11911_v41  ;;  %v3931_v45 = vadd.f32 %v3930_v24, %v11916_v20  ;;  %v3892_v16 = vmul.f32 %v11773_v8, %v11773_v8 }
 0x8a7   : > { %8999 = vrcp.f32 %v4047_v62  ;;  %v12064_v48 = vpop.f32.mrf.mxu3  ;;  %v12079_v62 = vsel %vm2035_vm9, %v3886_v18, 0.0  ;;  %v3940_v18 = vsel %vm2035_vm9, %v3891_v53, 0.0  ;;  %v3936_v55 = vadd.f32 %v3935_v49, %v11936_v44 }
 0x8a8   : > { %v3776_v57 = vmul.f32 %v12064_v48, %v11738_v36  ;;  %v3904_v50 = vmul.f32 %v12064_v48, %v12064_v48  ;;  %15320 = vst [vmem:[#allocation123_spill] sm:$0xff] %v12079_v62  ;;  %v15321_v62 = vld [vmem:[#allocation65_spill] sm:$0xff]  ;;  %v12105_v11 = vadd.f32 %v3812_v5, %v11939_v39  ;;  %v12110_v41 = vadd.f32 %v3940_v18, %v11946_v12 }
 0x8a9   : > { %v3764_v9 = vmul.f32 %v11773_v8, %v15321_v62  ;;  %v15322_v20 = vmov 0.0   ;;  %v3945_v12 = vsel %vm2035_vm9, %v3892_v16, 0.0  ;;  %v3894_v18 = vmul.f32 %v11787_v25, %v11787_v25 }
 0x8aa   : > { %v3927_v59 = vsel %vm2035_vm9, %v3904_v50, 0.0  ;;  %v3799_v61 = vsel %vm2035_vm9, %v3776_v57, 0.0  ;;  %v12152_v29 = vadd.f32 %v3945_v12, %v11958_v54 }
 0x8ab   : > { %v3928_v34 = vadd.f32 %v3927_v59, %v3926_v35  ;;  %v4835_v59 = vld [vmem:[%s14872_s6 + $0x490] sm:$0xff]  ;;  %v12101_v35 = vadd.f32 %v3807_v30, %v11927_v22  ;;  %v3800_v57 = vadd.f32 %v3799_v61, %v3798_v17  ;;  %v3817_v30 = vsel %vm2035_vm9, %v3764_v9, 0.0 }
 0x8ac   : > { %4998 = vmatpush.msra.mxu0 %v4835_v59  ;;  %v3893_v17 = vmul.f32 %v11780_v58, %v11780_v58  ;;  %v3955_v12 = vsel %vm2035_vm9, %v3894_v18, 0.0  ;;  %v15325_v18 = vld [vmem:[#allocation30_spill] sm:$0xff] }
 0x8ad   : > { %v9000_v0 = vpop.eup %8999  ;;  %v4048_v63 = vadd.f32 1e-06, %v3928_v34  ;;  %v12113_v34 = vsel %vm3999_vm3, 1.0, %v15322_v20  ;;  %vm4000_vm4 = vcmp.ge.f32.partialorder %v3800_v57, 0.0 }
 0x8ae   : > { %v12107_v53 = vmul.f32 %v9000_v0, %v3795_v27  ;;  %v15323_v27 = vld [vmem:[#allocation42_spill] sm:$0xff]  ;;  %v12134_v49 = vsub.f32 1.0, %v12113_v34  ;;  %v4095_v9 = vmul.f32 %v12113_v34, %v11234_v13 }
 0x8af   : > { %9001 = vrcp.f32 %v4048_v63  ;;  %v12115_v50 = vpop.f32.mrf.mxu3  ;;  %v3765_v46 = vmul.f32 %v11780_v58, %v15323_v27 }
 0x8b0   : > { %v4159_v44 = vmul.f32 %v12107_v53, %v11549_v37  ;;  %v4191_v39 = vmul.f32 %v12107_v53, %v12004_v6  ;;  %v3777_v22 = vmul.f32 %v12115_v50, %v11745_v32  ;;  %v3905_v24 = vmul.f32 %v12115_v50, %v12115_v50 }
 0x8b1   : > { %v3766_v37 = vmul.f32 %v11787_v25, %v11632_v56  ;;  %v15324_v56 = vld [vmem:[#allocation23_spill] sm:$0xff] }
 0x8b2   : > { %v4207_v6 = vsub.f32 %v11234_v13, %v4159_v44  ;;  %v4239_v5 = vsub.f32 %v11731_v28, %v4191_v39  ;;  %v3932_v61 = vsel %vm2035_vm9, %v3905_v24, 0.0  ;;  %v3804_v63 = vsel %vm2035_vm9, %v3777_v22, 0.0 }
 0x8b3   : > { %v3933_v59 = vadd.f32 %v3932_v61, %v3931_v45  ;;  %v12149_v39 = vadd.f32 %v3817_v30, %v11955_v33  ;;  %v3822_v13 = vsel %vm2035_vm9, %v3765_v46, 0.0  ;;  %v3767_v24 = vmul.f32 %v11794_v47, %v15324_v56 }
 0x8b4   : > { %v4255_v0 = vmul.f32 %v4207_v6, %v12134_v49  ;;  %v12145_v16 = vmul.f32 %v4239_v5, %v12134_v49  ;;  %v3950_v6 = vsel %vm2035_vm9, %v3893_v17, 0.0  ;;  %v3827_v22 = vsel %vm2035_vm9, %v3766_v37, 0.0 }
 0x8b5   : > { %v9002_v44 = vpop.eup %9001  ;;  %v4049_v27 = vadd.f32 1e-06, %v3933_v59  ;;  %v3895_v45 = vmul.f32 %v11794_v47, %v11794_v47  ;;  %v12163_v33 = vsel %vm4000_vm4, 1.0, %v15322_v20  ;;  %v3805_v54 = vadd.f32 %v3804_v63, %v3803_v1  ;;  %v15326_v63 = vld [vmem:[#allocation85_spill] sm:$0xff] }
 0x8b6   : > { %v4303_v25 = vadd.f32 %v4255_v0, %v4095_v9  ;;  %v4080_v5 = vmul.f32 %v9002_v44, %v3800_v57  ;;  %v3832_v61 = vsel %vm2035_vm9, %v3767_v24, 0.0  ;;  %v12176_v1 = vsub.f32 1.0, %v12163_v33 }
 0x8b7   : > { %v12165_v30 = vpop.f32.mrf.mxu3  ;;  %9003 = vrcp.f32 %v4049_v27  ;;  %v3768_v27 = vmul.f32 %v15326_v63, %v15325_v18  ;;  %vm4001_vm5 = vcmp.ge.f32.partialorder %v3805_v54, 0.0 }
 0x8b8   : > { %v4399_v46 = vmul.f32 0.99, %v4303_v25  ;;  %v4160_v17 = vmul.f32 %v4080_v5, %v11561_v26  ;;  %v4192_v9 = vmul.f32 %v4080_v5, %v12064_v48  ;;  %v3778_v37 = vmul.f32 %v12165_v30, %v11752_v23 }
 0x8b9   : > { %v3906_v57 = vmul.f32 %v12165_v30, %v12165_v30  ;;  %v3960_v48 = vsel %vm2035_vm9, %v3895_v45, 0.0  ;;  %v12196_v45 = vadd.f32 %v3950_v6, %v11966_v7  ;;  %v12217_v6 = vsel %vm4001_vm5, 1.0, %v15322_v20 }
 0x8ba   : > { %v4240_v0 = vsub.f32 %v11738_v36, %v4192_v9  ;;  %v4447_v25 = vadd.f32 %v4399_v46, %v11839_v43  ;;  %v4208_v26 = vsub.f32 %v11250_v21, %v4160_v17  ;;  %v4096_v9 = vmul.f32 %v12163_v33, %v11250_v21 }
 0x8bb   : > { %v3937_v59 = vsel %vm2035_vm9, %v3906_v57, 0.0  ;;  %v12193_v46 = vadd.f32 %v3822_v13, %v11961_v15  ;;  %v3896_v17 = vmul.f32 %v15326_v63, %v15326_v63  ;;  %v3809_v57 = vsel %vm2035_vm9, %v3778_v37, 0.0  ;;  %v15328_v37 = vld [vmem:[#allocation40_spill] sm:$0xff] }
 0x8bc   : > { %v12186_v44 = vmul.f32 %v4240_v0, %v12176_v1  ;;  %v3938_v24 = vadd.f32 %v3937_v59, %v3936_v55  ;;  %8415 = vmatmul.msk.f32.vlgmr.msra.gmra.mxu0 %vm2035_vm9, %v4447_v25  ;;  %v4256_v43 = vmul.f32 %v4208_v26, %v12176_v1  ;;  %v12202_v55 = vadd.f32 %v3827_v22, %v11969_v40 }
 0x8bd   : > { %v12205_v0 = vadd.f32 %v3955_v12, %v11972_v3  ;;  %v9004_v26 = vpop.eup %9003  ;;  %v12208_v15 = vadd.f32 %v3832_v61, %v11977_v14  ;;  %v12211_v7 = vadd.f32 %v3960_v48, %v11980_v19  ;;  %v4175_v13 = vmul.f32 %v12107_v53, %v11735_v52  ;;  %v15327_v19 = vld [vmem:[#allocation78_spill] sm:$0xff]  ;;  %v15329_v48 = vld [vmem:[#allocation87_spill] sm:$0xff] }
 0x8be   : > { %v4050_v21 = vadd.f32 1e-06, %v3938_v24  ;;  %v4304_v25 = vadd.f32 %v4256_v43, %v4096_v9  ;;  %v3837_v3 = vsel %vm2035_vm9, %v3768_v27, 0.0  ;;  %v4081_v22 = vmul.f32 %v9004_v26, %v3805_v54  ;;  %v15330_v54 = vld [vmem:[#allocation17_spill] sm:$0xff] }
 0x8bf   : > { %v12219_v40 = vpop.f32.mrf.mxu3  ;;  %v3810_v12 = vadd.f32 %v3809_v57, %v12101_v35  ;;  %v12224_v14 = vsel %vm2035_vm9, %v3896_v17, 0.0  ;;  %v3769_v59 = vmul.f32 %v15329_v48, %v15328_v37  ;;  %v12233_v24 = vsub.f32 1.0, %v12217_v6  ;;  %v15331_v17 = vld [vmem:[#allocation96_spill] sm:$0xff] }
 0x8c0   : > { %9005 = vrcp.f32 %v4050_v21  ;;  %v3779_v61 = vmul.f32 %v12219_v40, %v15327_v19  ;;  %v3907_v52 = vmul.f32 %v12219_v40, %v12219_v40  ;;  %v4400_v53 = vmul.f32 0.99, %v4304_v25  ;;  %v15332_v37 = vld [vmem:[#allocation28_spill] sm:$0xff] }
 0x8c1   : > { %v4161_v27 = vmul.f32 %v4081_v22, %v15330_v54  ;;  %v4193_v35 = vmul.f32 %v4081_v22, %v12115_v50  ;;  %v4176_v9 = vmul.f32 %v4080_v5, %v11742_v10  ;;  %v4223_v21 = vsub.f32 %v11542_v4, %v4175_v13 }
 0x8c2   : > { %v3942_v43 = vsel %vm2035_vm9, %v3907_v52, 0.0  ;;  %v4448_v57 = vadd.f32 %v4400_v53, %v15331_v17  ;;  %vm4002_vm6 = vcmp.ge.f32.partialorder %v3810_v12, 0.0  ;;  %v3814_v63 = vsel %vm2035_vm9, %v3779_v61, 0.0 }
 0x8c3   : > { %v4241_v25 = vsub.f32 %v11745_v32, %v4193_v35  ;;  %v3943_v26 = vadd.f32 %v3942_v43, %v12110_v41  ;;  %v4209_v18 = vsub.f32 %v15332_v37, %v4161_v27  ;;  %v4111_v10 = vmul.f32 %v12113_v34, %v11542_v4 }
 0x8c4   : > { %8416 = vmatmul.msk.f32.gmra.mxu0 %vm2035_vm9, %v4448_v57  ;;  %v4271_v50 = vmul.f32 %v4223_v21, %v12134_v49  ;;  %v4127_v5 = vmul.f32 %v12113_v34, %v11731_v28  ;;  %v4097_v41 = vmul.f32 %v12217_v6, %v15332_v37  ;;  %v12258_v54 = vsel %vm4002_vm6, 1.0, %v15322_v20  ;;  %v15335_v21 = vld [vmem:[#allocation18_spill] sm:$0xff] }
 0x8c5   : > { %v12252_v52 = vmul.f32 %v4241_v25, %v12233_v24  ;;  %v4051_v53 = vadd.f32 1e-06, %v3943_v26  ;;  %v4257_v61 = vmul.f32 %v4209_v18, %v12233_v24  ;;  %v3815_v43 = vadd.f32 %v3814_v63, %v12105_v11  ;;  %v15334_v18 = vld [vmem:[#allocation110_spill] sm:$0xff]  ;;  %v15336_v26 = vld [vmem:[#allocation79_spill] sm:$0xff] }
 0x8c6   : > { %v9006_v13 = vpop.eup %9005  ;;  %v12264_v49 = vadd.f32 %v4271_v50, %v4111_v10  ;;  %v12267_v34 = vadd.f32 %v12145_v16, %v4127_v5  ;;  %v12273_v57 = vadd.f32 %v3837_v3, %v15334_v18  ;;  %v3842_v10 = vsel %vm2035_vm9, %v3769_v59, 0.0 }
 0x8c7   : > { %v12260_v27 = vmul.f32 %v9006_v13, %v3810_v12  ;;  %v12262_v35 = vpop.f32.mrf.mxu3  ;;  %9007 = vrcp.f32 %v4051_v53  ;;  %v4305_v17 = vadd.f32 %v4257_v61, %v4097_v41  ;;  %v3897_v11 = vmul.f32 %v15329_v48, %v15329_v48  ;;  %v15337_v53 = vld [vmem:[#allocation8_spill] sm:$0xff]  ;;  %v15338_v41 = vld [vmem:[#allocation97_spill] sm:$0xff] }
 0x8c8   : > { %15333 = vst [vmem:[#allocation87_spill] sm:$0xff] %v12267_v34  ;;  %v3908_v37 = vmul.f32 %v12262_v35, %v12262_v35  ;;  %v3780_v16 = vmul.f32 %v12262_v35, %v15336_v26  ;;  %v12286_v3 = vsub.f32 1.0, %v12258_v54  ;;  %vm4003_vm8 = vcmp.ge.f32.partialorder %v3815_v43, 0.0 }
 0x8c9   : > { %v4162_v12 = vmul.f32 %v12260_v27, %v15335_v21  ;;  %v4194_v25 = vmul.f32 %v12260_v27, %v12165_v30  ;;  %v4401_v50 = vmul.f32 0.99, %v4305_v17  ;;  %v4098_v59 = vmul.f32 %v12258_v54, %v15337_v53 }
 0x8ca   : > { %v3947_v63 = vsel %vm2035_vm9, %v3908_v37, 0.0  ;;  %v4224_v18 = vsub.f32 %v11554_v2, %v4176_v9  ;;  %v3819_v17 = vsel %vm2035_vm9, %v3780_v16, 0.0  ;;  %v4128_v9 = vmul.f32 %v12163_v33, %v11738_v36 }
 0x8cb   : > { %v4242_v5 = vsub.f32 %v11752_v23, %v4194_v25  ;;  %v3948_v13 = vadd.f32 %v3947_v63, %v12152_v29  ;;  %v4210_v30 = vsub.f32 %v15337_v53, %v4162_v12  ;;  %v4449_v61 = vadd.f32 %v4401_v50, %v15338_v41 }
 0x8cc   : > { %v4177_v29 = vmul.f32 %v4081_v22, %v11749_v60  ;;  %v4112_v12 = vmul.f32 %v12163_v33, %v11554_v2  ;;  %v4272_v63 = vmul.f32 %v4224_v18, %v12176_v1  ;;  %v12308_v50 = vsel %vm4003_vm8, 1.0, %v15322_v20  ;;  %v15339_v22 = vld [vmem:[#allocation80_spill] sm:$0xff]  ;;  %v15340_v33 = vld [vmem:[#allocation111_spill] sm:$0xff] }
 0x8cd   : > { %v12296_v37 = vmul.f32 %v4242_v5, %v12286_v3  ;;  %v4052_v21 = vadd.f32 1e-06, %v3948_v13  ;;  %v4258_v25 = vmul.f32 %v4210_v30, %v12286_v3  ;;  %v9008_v28 = vpop.eup %9007  ;;  %8417 = vmatmul.msk.f32.gmra.mxu0 %vm2035_vm9, %v4449_v61  ;;  %v3820_v60 = vadd.f32 %v3819_v17, %v12149_v39  ;;  %v15342_v39 = vld [vmem:[#allocation112_spill] sm:$0xff] }
 0x8ce   : > { %v12310_v16 = vmul.f32 %v9008_v28, %v3815_v43  ;;  %v12319_v30 = vadd.f32 %v4272_v63, %v4112_v12  ;;  %v12323_v41 = vadd.f32 %v12224_v14, %v15340_v33  ;;  %v15341_v28 = vld [vmem:[#allocation20_spill] sm:$0xff]  ;;  %v12330_v18 = vadd.f32 %v3842_v10, %v15342_v39  ;;  %v15344_v33 = vld [vmem:[#allocation98_spill] sm:$0xff] }
 0x8cf   : > { %9009 = vrcp.f32 %v4052_v21  ;;  %v12312_v5 = vpop.f32.mrf.mxu3  ;;  %v4306_v13 = vadd.f32 %v4258_v25, %v4098_v59  ;;  %v3970_v17 = vsel %vm2035_vm9, %v3897_v11, 0.0  ;;  %v12335_v25 = vadd.f32 %v12186_v44, %v4128_v9  ;;  %v15346_v39 = vld [vmem:[#allocation48_spill] sm:$0xff]  ;;  %v15347_v44 = vld [vmem:[#allocation89_spill] sm:$0xff] }
 0x8d0   : > { %v3781_v53 = vmul.f32 %v12312_v5, %v15339_v22  ;;  %v3909_v1 = vmul.f32 %v12312_v5, %v12312_v5  ;;  %v4163_v43 = vmul.f32 %v12310_v16, %v15341_v28  ;;  %v4195_v61 = vmul.f32 %v12310_v16, %v12219_v40 }
 0x8d1   : > { %v4402_v59 = vmul.f32 0.99, %v4306_v13  ;;  %15343 = vst [vmem:[#allocation17_spill] sm:$0xff] %v12335_v25  ;;  %v12338_v14 = vsub.f32 1.0, %v12308_v50  ;;  %vm4004_vm10 = vcmp.ge.f32.partialorder %v3820_v60, 0.0  ;;  %v15345_v13 = vld [vmem:[#allocation31_spill] sm:$0xff]  ;;  %v4225_v11 = vsub.f32 %v11566_v42, %v4177_v29 }
 0x8d2   : > { %v3952_v21 = vsel %vm2035_vm9, %v3909_v1, 0.0  ;;  %v4243_v12 = vsub.f32 %v15327_v19, %v4195_v61  ;;  %v3824_v10 = vsel %vm2035_vm9, %v3781_v53, 0.0  ;;  %v4211_v28 = vsub.f32 %v15345_v13, %v4163_v43  ;;  %v15351_v25 = vld [vmem:[#allocation10_spill] sm:$0xff] }
 0x8d3   : > { %v3953_v63 = vadd.f32 %v3952_v21, %v12196_v45  ;;  %v4450_v40 = vadd.f32 %v4402_v59, %v15344_v33  ;;  %v3770_v9 = vmul.f32 %v15347_v44, %v15346_v39  ;;  %v3898_v36 = vmul.f32 %v15347_v44, %v15347_v44 }
 0x8d4   : > { %v12351_v61 = vmul.f32 %v4243_v12, %v12338_v14  ;;  %v4259_v53 = vmul.f32 %v4211_v28, %v12338_v14  ;;  %v4113_v29 = vmul.f32 %v12217_v6, %v11566_v42  ;;  %v4273_v43 = vmul.f32 %v4225_v11, %v12233_v24 }
 0x8d5   : > { %v9010_v1 = vpop.eup %9009  ;;  %v4053_v45 = vadd.f32 1e-06, %v3953_v63  ;;  %8418 = vmatmul.msk.f32.gmra.mxu0 %vm2035_vm9, %v4450_v40  ;;  %v12361_v59 = vsel %vm4004_vm10, 1.0, %v15322_v20  ;;  %v3825_v33 = vadd.f32 %v3824_v10, %v12193_v46  ;;  %v15348_v63 = vld [vmem:[#allocation68_spill] sm:$0xff]  ;;  %v4129_v11 = vmul.f32 %v12217_v6, %v11745_v32 }
 0x8d6   : > { %v12353_v21 = vmul.f32 %v9010_v1, %v3820_v60  ;;  %v4099_v60 = vmul.f32 %v12308_v50, %v15345_v13  ;;  %v15349_v1 = vld [vmem:[#allocation81_spill] sm:$0xff]  ;;  %v4178_v46 = vmul.f32 %v12260_v27, %v11756_v51  ;;  %v12380_v13 = vadd.f32 %v4273_v43, %v4113_v29 }
 0x8d7   : > { %9011 = vrcp.f32 %v4053_v45  ;;  %v12364_v12 = vpop.f32.mrf.mxu3  ;;  %v12388_v42 = vadd.f32 %v12252_v52, %v4129_v11  ;;  %vm4005_vm11 = vcmp.ge.f32.partialorder %v3825_v33, 0.0  ;;  %v4100_v27 = vmul.f32 %v12361_v59, %v15351_v25 }
 0x8d8   : > { %v4164_v40 = vmul.f32 %v12353_v21, %v15348_v63  ;;  %v4196_v28 = vmul.f32 %v12353_v21, %v12262_v35  ;;  %v3782_v24 = vmul.f32 %v12364_v12, %v15349_v1  ;;  %v3910_v10 = vmul.f32 %v12364_v12, %v12364_v12  ;;  %15350 = vst [vmem:[#allocation96_spill] sm:$0xff] %v12380_v13 }
 0x8d9   : > { %v4307_v45 = vadd.f32 %v4259_v53, %v4099_v60  ;;  %v12383_v63 = vsub.f32 1.0, %v12361_v59  ;;  %15352 = vst [vmem:[#allocation28_spill] sm:$0xff] %v12388_v42  ;;  %v3847_v11 = vsel %vm2035_vm9, %v3770_v9, 0.0  ;;  %v4226_v32 = vsub.f32 %v11578_v31, %v4178_v46 }
 0x8da   : > { %v4244_v35 = vsub.f32 %v15336_v26, %v4196_v28  ;;  %v4212_v34 = vsub.f32 %v15351_v25, %v4164_v40  ;;  %v3957_v6 = vsel %vm2035_vm9, %v3910_v10, 0.0  ;;  %v3829_v29 = vsel %vm2035_vm9, %v3782_v24, 0.0  ;;  %v15353_v28 = vld [vmem:[#allocation113_spill] sm:$0xff]  ;;  %v15354_v10 = vld [vmem:[#allocation99_spill] sm:$0xff] }
 0x8db   : > { %v4403_v51 = vmul.f32 0.99, %v4307_v45  ;;  %v3958_v43 = vadd.f32 %v3957_v6, %v12205_v0  ;;  %v12400_v52 = vadd.f32 %v3970_v17, %v15353_v28  ;;  %v12406_v25 = vsel %vm2035_vm9, %v3898_v36, 0.0  ;;  %v15355_v6 = vld [vmem:[#allocation62_spill] sm:$0xff] }
 0x8dc   : > { %v12394_v53 = vmul.f32 %v4244_v35, %v12383_v63  ;;  %v4260_v60 = vmul.f32 %v4212_v34, %v12383_v63  ;;  %v12410_v0 = vsel %vm4005_vm11, 1.0, %v15322_v20  ;;  %v3830_v34 = vadd.f32 %v3829_v29, %v12202_v55 }
 0x8dd   : > { %v9012_v40 = vpop.eup %9011  ;;  %v4451_v45 = vadd.f32 %v4403_v51, %v15354_v10  ;;  %v4054_v42 = vadd.f32 1e-06, %v3958_v43  ;;  %v4114_v9 = vmul.f32 %v12258_v54, %v11578_v31  ;;  %v4274_v46 = vmul.f32 %v4226_v32, %v12286_v3  ;;  %v15363_v31 = vld [vmem:[#allocation19_spill] sm:$0xff] }
 0x8de   : > { %v4085_v35 = vmul.f32 %v9012_v40, %v3825_v33  ;;  %v4308_v24 = vadd.f32 %v4260_v60, %v4100_v27  ;;  %v4179_v36 = vmul.f32 %v12310_v16, %v11766_v38  ;;  %v15356_v27 = vld [vmem:[#allocation83_spill] sm:$0xff]  ;;  %v12430_v40 = vsub.f32 1.0, %v12410_v0  ;;  %v15358_v38 = vld [vmem:[#allocation34_spill] sm:$0xff] }
 0x8df   : > { %8419 = vmatmul.msk.f32.gmra.mxu0 %vm2035_vm9, %v4451_v45  ;;  %v12414_v17 = vpop.f32.mrf.mxu3  ;;  %9013 = vrcp.f32 %v4054_v42  ;;  %v12427_v60 = vadd.f32 %v4274_v46, %v4114_v9  ;;  %v4101_v3 = vmul.f32 %v12410_v0, %v15358_v38  ;;  %vm4006_vm12 = vcmp.ge.f32.partialorder %v3830_v34, 0.0 }
 0x8e0   : > { %v4165_v51 = vmul.f32 %v4085_v35, %v15355_v6  ;;  %v4197_v33 = vmul.f32 %v4085_v35, %v12312_v5  ;;  %v3783_v55 = vmul.f32 %v12414_v17, %v15356_v27  ;;  %v3911_v29 = vmul.f32 %v12414_v17, %v12414_v17  ;;  %v15359_v5 = vld [vmem:[#allocation100_spill] sm:$0xff]  ;;  %v15360_v6 = vld [vmem:[#allocation114_spill] sm:$0xff] }
 0x8e1   : > { %v4404_v43 = vmul.f32 0.99, %v4308_v24  ;;  %15357 = vst [vmem:[#allocation110_spill] sm:$0xff] %v12427_v60  ;;  %v4130_v10 = vmul.f32 %v12258_v54, %v11752_v23  ;;  %v15368_v23 = vld [vmem:[#allocation101_spill] sm:$0xff] }
 0x8e2   : > { %v4245_v32 = vsub.f32 %v15339_v22, %v4197_v33  ;;  %v4213_v16 = vsub.f32 %v15358_v38, %v4165_v51  ;;  %v3962_v42 = vsel %vm2035_vm9, %v3911_v29, 0.0  ;;  %v3834_v24 = vsel %vm2035_vm9, %v3783_v55, 0.0  ;;  %v15361_v51 = vld [vmem:[#allocation56_spill] sm:$0xff]  ;;  %v15362_v38 = vld [vmem:[#allocation91_spill] sm:$0xff] }
 0x8e3   : > { %v4452_v28 = vadd.f32 %v4404_v43, %v15359_v5  ;;  %v3963_v9 = vadd.f32 %v3962_v42, %v12211_v7  ;;  %v12447_v33 = vadd.f32 %v3847_v11, %v15360_v6  ;;  %v3771_v29 = vmul.f32 %v15362_v38, %v15361_v51  ;;  %v15365_v6 = vld [vmem:[#allocation84_spill] sm:$0xff] }
 0x8e4   : > { %v12441_v45 = vmul.f32 %v4245_v32, %v12430_v40  ;;  %v4261_v46 = vmul.f32 %v4213_v16, %v12430_v40  ;;  %v4227_v43 = vsub.f32 %v15363_v31, %v4179_v36  ;;  %v12453_v5 = vadd.f32 %v12296_v37, %v4130_v10 }
 0x8e5   : > { %v9014_v54 = vpop.eup %9013  ;;  %v3899_v32 = vmul.f32 %v15362_v38, %v15362_v38  ;;  %v4180_v7 = vmul.f32 %v12353_v21, %v11773_v8  ;;  %v4055_v55 = vadd.f32 1e-06, %v3963_v9  ;;  %v12461_v11 = vsel %vm4006_vm12, 1.0, %v15322_v20  ;;  %v15366_v9 = vld [vmem:[#allocation69_spill] sm:$0xff] }
 0x8e6   : > { %15364 = vst [vmem:[#allocation18_spill] sm:$0xff] %v12453_v5  ;;  %v4309_v16 = vadd.f32 %v4261_v46, %v4101_v3  ;;  %v12463_v42 = vmul.f32 %v9014_v54, %v3830_v34  ;;  %v3835_v36 = vadd.f32 %v3834_v24, %v12208_v15  ;;  %v4275_v10 = vmul.f32 %v4227_v43, %v12338_v14 }
 0x8e7   : > { %8420 = vmatmul.msk.f32.gmra.mxu0 %vm2035_vm9, %v4452_v28  ;;  %v12467_v37 = vpop.f32.mrf.mxu3  ;;  %9015 = vrcp.f32 %v4055_v55  ;;  %v4115_v3 = vmul.f32 %v12308_v50, %v15363_v31  ;;  %v3852_v34 = vsel %vm2035_vm9, %v3771_v29, 0.0  ;;  %v3980_v14 = vsel %vm2035_vm9, %v3899_v32, 0.0 }
 0x8e8   : > { %v3784_v8 = vmul.f32 %v12467_v37, %v15365_v6  ;;  %v3912_v21 = vmul.f32 %v12467_v37, %v12467_v37  ;;  %v4166_v15 = vmul.f32 %v12463_v42, %v15366_v9  ;;  %v4198_v28 = vmul.f32 %v12463_v42, %v12364_v12 }
 0x8e9   : > { %v4405_v24 = vmul.f32 0.99, %v4309_v16  ;;  %v12483_v46 = vsub.f32 1.0, %v12461_v11  ;;  %v12486_v54 = vadd.f32 %v4275_v10, %v4115_v3  ;;  %vm4007_vm14 = vcmp.ge.f32.partialorder %v3835_v36, 0.0  ;;  %v15369_v16 = vld [vmem:[#allocation7_spill] sm:$0xff] }
 0x8ea   : > { %v3967_v43 = vsel %vm2035_vm9, %v3912_v21, 0.0  ;;  %v4246_v55 = vsub.f32 %v15349_v1, %v4198_v28  ;;  %v4181_v5 = vmul.f32 %v4085_v35, %v11780_v58  ;;  %v3839_v12 = vsel %vm2035_vm9, %v3784_v8, 0.0 }
 0x8eb   : > { %15367 = vst [vmem:[#allocation8_spill] sm:$0xff] %v12486_v54  ;;  %v3968_v29 = vadd.f32 %v3967_v43, %v12323_v41  ;;  %v4453_v9 = vadd.f32 %v4405_v24, %v15368_v23  ;;  %v4214_v32 = vsub.f32 %v15369_v16, %v4166_v15  ;;  %v4228_v31 = vsub.f32 %v15321_v62, %v4180_v7  ;;  %v15371_v24 = vld [vmem:[#allocation86_spill] sm:$0xff]  ;;  %v15389_v54 = vld [vmem:[#allocation64_spill] sm:$0xff] }
 0x8ec   : > { %v12496_v60 = vmul.f32 %v4246_v55, %v12483_v46  ;;  %v4116_v21 = vmul.f32 %v12361_v59, %v15321_v62  ;;  %v4131_v41 = vmul.f32 %v12308_v50, %v15327_v19  ;;  %v12503_v23 = vsel %vm4007_vm14, 1.0, %v15322_v20 }
 0x8ed   : > { %v4056_v10 = vadd.f32 1e-06, %v3968_v29  ;;  %v9016_v3 = vpop.eup %9015  ;;  %v4102_v58 = vmul.f32 %v12461_v11, %v15369_v16  ;;  %v4262_v35 = vmul.f32 %v4214_v32, %v12483_v46  ;;  %v4276_v7 = vmul.f32 %v4228_v31, %v12383_v63  ;;  %v15373_v63 = vld [vmem:[#allocation115_spill] sm:$0xff]  ;;  %v15376_v32 = vld [vmem:[#allocation117_spill] sm:$0xff] }
 0x8ee   : > { %v12509_v8 = vmul.f32 %v9016_v3, %v3835_v36  ;;  %v3840_v15 = vadd.f32 %v3839_v12, %v12273_v57  ;;  %v12516_v50 = vadd.f32 %v12351_v61, %v4131_v41  ;;  %v3976_v57 = vadd.f32 %v12406_v25, %v15373_v63  ;;  %v15374_v36 = vld [vmem:[#allocation116_spill] sm:$0xff]  ;;  %v15377_v41 = vld [vmem:[#allocation63_spill] sm:$0xff]  ;;  %v15378_v3 = vld [vmem:[#allocation93_spill] sm:$0xff] }
 0x8ef   : > { %9017 = vrcp.f32 %v4056_v10  ;;  %8421 = vmatmul.msk.f32.gmra.mxu0 %vm2035_vm9, %v4453_v9  ;;  %v12513_v28 = vpop.f32.mrf.mxu3  ;;  %v4310_v29 = vadd.f32 %v4262_v35, %v4102_v58  ;;  %v12522_v31 = vadd.f32 %v4276_v7, %v4116_v21  ;;  %v12527_v12 = vadd.f32 %v3852_v34, %v15374_v36  ;;  %v15375_v9 = vld [vmem:[#allocation25_spill] sm:$0xff]  ;;  %v15379_v63 = vld [vmem:[#allocation36_spill] sm:$0xff] }
 0x8f0   : > { %15370 = vst [vmem:[#allocation97_spill] sm:$0xff] %v12516_v50  ;;  %v3785_v43 = vmul.f32 %v12513_v28, %v15371_v24  ;;  %v3913_v55 = vmul.f32 %v12513_v28, %v12513_v28  ;;  %v4167_v16 = vmul.f32 %v12509_v8, %v15375_v9  ;;  %v4199_v61 = vmul.f32 %v12509_v8, %v12414_v17 }
 0x8f1   : > { %15372 = vst [vmem:[#allocation111_spill] sm:$0xff] %v12522_v31  ;;  %v12534_v10 = vadd.f32 %v3980_v14, %v15376_v32  ;;  %v3772_v58 = vmul.f32 %v15378_v3, %v15377_v41  ;;  %v4406_v35 = vmul.f32 0.99, %v4310_v29  ;;  %v12540_v25 = vsub.f32 1.0, %v12503_v23  ;;  %v15380_v14 = vld [vmem:[#allocation103_spill] sm:$0xff]  ;;  %v15381_v32 = vld [vmem:[#allocation42_spill] sm:$0xff] }
 0x8f2   : > { %v3972_v21 = vsel %vm2035_vm9, %v3913_v55, 0.0  ;;  %v4247_v34 = vsub.f32 %v15356_v27, %v4199_v61  ;;  %v4215_v36 = vsub.f32 %v15379_v63, %v4167_v16  ;;  %vm4008_vm15 = vcmp.ge.f32.partialorder %v3840_v15, 0.0  ;;  %v15388_v31 = vld [vmem:[#allocation118_spill] sm:$0xff] }
 0x8f3   : > { %v3973_v7 = vadd.f32 %v3972_v21, %v12400_v52  ;;  %v3844_v17 = vsel %vm2035_vm9, %v3785_v43, 0.0  ;;  %v4454_v9 = vadd.f32 %v4406_v35, %v15380_v14  ;;  %v4229_v19 = vsub.f32 %v15381_v32, %v4181_v5 }
 0x8f4   : > { %v12549_v55 = vmul.f32 %v4247_v34, %v12540_v25  ;;  %v4103_v62 = vmul.f32 %v12503_v23, %v15379_v63  ;;  %v4263_v61 = vmul.f32 %v4215_v36, %v12540_v25  ;;  %v3900_v52 = vmul.f32 %v15378_v3, %v15378_v3  ;;  %v15383_v36 = vld [vmem:[#allocation33_spill] sm:$0xff] }
 0x8f5   : > { %v9018_v50 = vpop.eup %9017  ;;  %v4057_v29 = vadd.f32 1e-06, %v3973_v7  ;;  %v4117_v43 = vmul.f32 %v12410_v0, %v15381_v32  ;;  %v4277_v5 = vmul.f32 %v4229_v19, %v12430_v40  ;;  %v12562_v21 = vsel %vm4008_vm15, 1.0, %v15322_v20  ;;  %v15384_v40 = vld [vmem:[#allocation88_spill] sm:$0xff] }
 0x8f6   : > { %v12556_v16 = vmul.f32 %v9018_v50, %v3840_v15  ;;  %v3845_v35 = vadd.f32 %v3844_v17, %v12330_v18  ;;  %v4311_v7 = vadd.f32 %v4263_v61, %v4103_v62  ;;  %v3857_v63 = vsel %vm2035_vm9, %v3772_v58, 0.0  ;;  %v15382_v15 = vld [vmem:[#allocation82_spill] sm:$0xff]  ;;  %v15386_v61 = vld [vmem:[#allocation9_spill] sm:$0xff] }
 0x8f7   : > { %9019 = vrcp.f32 %v4057_v29  ;;  %8422 = vmatmul.msk.f32.gmra.mxu0 %vm2035_vm9, %v4454_v9  ;;  %v12566_v34 = vpop.f32.mrf.mxu3  ;;  %v4182_v50 = vmul.f32 %v12463_v42, %v15382_v15  ;;  %v12579_v29 = vadd.f32 %v4277_v5, %v4117_v43  ;;  %v12582_v62 = vsel %vm2035_vm9, %v3900_v52, 0.0 }
 0x8f8   : > { %v4168_v14 = vmul.f32 %v12556_v16, %v15383_v36  ;;  %v4200_v19 = vmul.f32 %v12556_v16, %v12467_v37  ;;  %v3786_v18 = vmul.f32 %v12566_v34, %v15384_v40  ;;  %v3914_v17 = vmul.f32 %v12566_v34, %v12566_v34  ;;  %v15387_v36 = vld [vmem:[#allocation104_spill] sm:$0xff] }
 0x8f9   : > { %v4407_v9 = vmul.f32 0.99, %v4311_v7  ;;  %15385 = vst [vmem:[#allocation20_spill] sm:$0xff] %v12579_v29  ;;  %v12585_v42 = vsub.f32 1.0, %v12562_v21  ;;  %vm4009_vm13 = vcmp.ge.f32.partialorder %v3845_v35, 0.0  ;;  %v4132_v7 = vmul.f32 %v12361_v59, %v15336_v26  ;;  %v15391_v59 = vld [vmem:[#allocation70_spill] sm:$0xff] }
 0x8fa   : > { %v4248_v58 = vsub.f32 %v15365_v6, %v4200_v19  ;;  %v4216_v15 = vsub.f32 %v15386_v61, %v4168_v14  ;;  %v3977_v37 = vsel %vm2035_vm9, %v3914_v17, 0.0  ;;  %v4104_v5 = vmul.f32 %v12562_v21, %v15386_v61 }
 0x8fb   : > { %v4455_v32 = vadd.f32 %v4407_v9, %v15387_v36  ;;  %v3978_v52 = vadd.f32 %v3977_v37, %v3976_v57  ;;  %v12600_v14 = vadd.f32 %v3857_v63, %v15388_v31  ;;  %v3849_v17 = vsel %vm2035_vm9, %v3786_v18, 0.0  ;;  %v15393_v18 = vld [vmem:[#allocation45_spill] sm:$0xff] }
 0x8fc   : > { %v12594_v43 = vmul.f32 %v4248_v58, %v12585_v42  ;;  %v4264_v29 = vmul.f32 %v4216_v15, %v12585_v42  ;;  %v4230_v9 = vsub.f32 %v15389_v54, %v4182_v50  ;;  %v12605_v36 = vadd.f32 %v12394_v53, %v4132_v7  ;;  %v15392_v58 = vld [vmem:[#allocation95_spill] sm:$0xff] }
 0x8fd   : > { %v9020_v19 = vpop.eup %9019  ;;  %v3773_v26 = vmul.f32 %v15392_v58, %v15391_v59  ;;  %v4058_v37 = vadd.f32 1e-06, %v3978_v52  ;;  %v4183_v15 = vmul.f32 %v12509_v8, %v11794_v47  ;;  %v12615_v31 = vsel %vm4009_vm13, 1.0, %v15322_v20  ;;  %v15394_v8 = vld [vmem:[#allocation90_spill] sm:$0xff] }
 0x8fe   : > { %15390 = vst [vmem:[#allocation112_spill] sm:$0xff] %v12605_v36  ;;  %v12609_v57 = vmul.f32 %v9020_v19, %v3845_v35  ;;  %v4312_v61 = vadd.f32 %v4264_v29, %v4104_v5  ;;  %v4118_v53 = vmul.f32 %v12461_v11, %v15389_v54  ;;  %v4278_v50 = vmul.f32 %v4230_v9, %v12483_v46  ;;  %v15396_v9 = vld [vmem:[#allocation39_spill] sm:$0xff] }
 0x8ff   : > { %8423 = vmatmul.msk.f32.gmra.mxu0 %vm2035_vm9, %v4455_v32  ;;  %v12618_v63 = vpop.f32.mrf.mxu3  ;;  %v3850_v47 = vadd.f32 %v3849_v17, %v12447_v33  ;;  %9021 = vrcp.f32 %v4058_v37  ;;  %v3901_v46 = vmul.f32 %v15392_v58, %v15392_v58  ;;  %v12637_v19 = vsub.f32 1.0, %v12615_v31  ;;  %v15397_v37 = vld [vmem:[#allocation105_spill] sm:$0xff] }
 0x900   : > { %v4169_v7 = vmul.f32 %v12609_v57, %v15393_v18  ;;  %v4201_v29 = vmul.f32 %v12609_v57, %v12513_v28  ;;  %v3787_v35 = vmul.f32 %v12618_v63, %v15394_v8  ;;  %v3915_v32 = vmul.f32 %v12618_v63, %v12618_v63 }
 0x901   : > { %v4408_v52 = vmul.f32 0.99, %v4312_v61  ;;  %v12632_v5 = vadd.f32 %v4278_v50, %v4118_v53  ;;  %v4105_v36 = vmul.f32 %v12615_v31, %v15396_v9  ;;  %v4133_v61 = vmul.f32 %v12410_v0, %v15339_v22  ;;  %v15399_v22 = vld [vmem:[#allocation85_spill] sm:$0xff] }
 0x902   : > { %v4249_v28 = vsub.f32 %v15371_v24, %v4201_v29  ;;  %v4217_v33 = vsub.f32 %v15396_v9, %v4169_v7  ;;  %v3982_v17 = vsel %vm2035_vm9, %v3915_v32, 0.0  ;;  %vm4010_vm0 = vcmp.ge.f32.partialorder %v3850_v47, 0.0 }
 0x903   : > { %15395 = vst [vmem:[#allocation98_spill] sm:$0xff] %v12632_v5  ;;  %v4456_v18 = vadd.f32 %v4408_v52, %v15397_v37  ;;  %v3983_v50 = vadd.f32 %v3982_v17, %v12534_v10  ;;  %v3862_v7 = vsel %vm2035_vm9, %v3773_v26, 0.0  ;;  %v3854_v32 = vsel %vm2035_vm9, %v3787_v35, 0.0  ;;  %v15402_v17 = vld [vmem:[#allocation53_spill] sm:$0xff] }
 0x904   : > { %v12648_v53 = vmul.f32 %v4249_v28, %v12637_v19  ;;  %v4265_v29 = vmul.f32 %v4217_v33, %v12637_v19  ;;  %v4231_v52 = vsub.f32 %v15324_v56, %v4183_v15  ;;  %v12656_v37 = vadd.f32 %v12441_v45, %v4133_v61 }
 0x905   : > { %v9022_v9 = vpop.eup %9021  ;;  %v3990_v0 = vsel %vm2035_vm9, %v3901_v46, 0.0  ;;  %v4184_v28 = vmul.f32 %v12556_v16, %v15399_v22  ;;  %v4059_v54 = vadd.f32 1e-06, %v3983_v50  ;;  %v12662_v10 = vsel %vm4010_vm0, 1.0, %v15322_v20  ;;  %v15400_v22 = vld [vmem:[#allocation92_spill] sm:$0xff] }
 0x906   : > { %15398 = vst [vmem:[#allocation31_spill] sm:$0xff] %v12656_v37  ;;  %v4313_v5 = vadd.f32 %v4265_v29, %v4105_v36  ;;  %v12664_v33 = vmul.f32 %v9022_v9, %v3850_v47  ;;  %v4119_v45 = vmul.f32 %v12503_v23, %v15324_v56  ;;  %v4279_v15 = vmul.f32 %v4231_v52, %v12540_v25  ;;  %v15401_v47 = vld [vmem:[#allocation119_spill] sm:$0xff]  ;;  %v15403_v25 = vld [vmem:[#allocation120_spill] sm:$0xff]  ;;  %v15406_v37 = vld [vmem:[#allocation106_spill] sm:$0xff] }
 0x907   : > { %8424 = vmatmul.msk.f32.gmra.mxu0 %vm2035_vm9, %v4456_v18  ;;  %v12667_v26 = vpop.f32.mrf.mxu3  ;;  %v3855_v35 = vadd.f32 %v3854_v32, %v12527_v12  ;;  %9023 = vrcp.f32 %v4059_v54  ;;  %v3986_v46 = vadd.f32 %v12582_v62, %v15401_v47  ;;  %v3863_v29 = vadd.f32 %v3862_v7, %v15403_v25  ;;  %v15404_v12 = vld [vmem:[#allocation121_spill] sm:$0xff]  ;;  %v15408_v7 = vld [vmem:[#allocation30_spill] sm:$0xff] }
 0x908   : > { %v3788_v16 = vmul.f32 %v12667_v26, %v15400_v22  ;;  %v3916_v36 = vmul.f32 %v12667_v26, %v12667_v26  ;;  %v4170_v18 = vmul.f32 %v12664_v33, %v15402_v17  ;;  %v4202_v61 = vmul.f32 %v12664_v33, %v12566_v34 }
 0x909   : > { %v4409_v50 = vmul.f32 0.99, %v4313_v5  ;;  %v3991_v54 = vadd.f32 %v3990_v0, %v15404_v12  ;;  %v12686_v52 = vadd.f32 %v4279_v15, %v4119_v45  ;;  %v12689_v9 = vsub.f32 1.0, %v12662_v10  ;;  %v15407_v5 = vld [vmem:[#allocation11_spill] sm:$0xff]  ;;  %v15409_v0 = vld [vmem:[#allocation72_spill] sm:$0xff]  ;;  %v15410_v12 = vld [vmem:[#allocation109_spill] sm:$0xff] }
 0x90a   : > { %v3987_v32 = vsel %vm2035_vm9, %v3916_v36, 0.0  ;;  %v4250_v62 = vsub.f32 %v15384_v40, %v4202_v61  ;;  %vm4011_vm1 = vcmp.ge.f32.partialorder %v3855_v35, 0.0  ;;  %v3859_v34 = vsel %vm2035_vm9, %v3788_v16, 0.0 }
 0x90b   : > { %15405 = vst [vmem:[#allocation48_spill] sm:$0xff] %v12686_v52  ;;  %v3988_v47 = vadd.f32 %v3987_v32, %v3986_v46  ;;  %v4457_v17 = vadd.f32 %v4409_v50, %v15406_v37  ;;  %v4218_v56 = vsub.f32 %v15407_v5, %v4170_v18  ;;  %v4232_v25 = vsub.f32 %v15408_v7, %v4184_v28  ;;  %v5291_v37 = vld [vmem:[%s14872_s6 + $0x188] sm:$0xff] }
 0x90c   : > { %v3774_v36 = vmul.f32 %v15410_v12, %v15409_v0  ;;  %v4185_v45 = vmul.f32 %v12609_v57, %v15329_v48  ;;  %v12701_v15 = vmul.f32 %v4250_v62, %v12689_v9  ;;  %v4106_v16 = vmul.f32 %v12662_v10, %v15407_v5  ;;  %5489 = vmatpush.msrb.mxu1 %v5291_v37 }
 0x90d   : > { %v4060_v61 = vadd.f32 1e-06, %v3988_v47  ;;  %v9024_v46 = vpop.eup %9023  ;;  %v4266_v28 = vmul.f32 %v4218_v56, %v12689_v9  ;;  %v4120_v18 = vmul.f32 %v12562_v21, %v15408_v7  ;;  %v4280_v48 = vmul.f32 %v4232_v25, %v12585_v42  ;;  %v15411_v47 = vld [vmem:[#allocation94_spill] sm:$0xff] }
 0x90e   : > { %v12713_v57 = vsel %vm4011_vm1, 1.0, %v15322_v20  ;;  %v12715_v50 = vmul.f32 %v9024_v46, %v3855_v35  ;;  %v3860_v32 = vadd.f32 %v3859_v34, %v12600_v14  ;;  %v3867_v25 = vsel %vm2035_vm9, %v3774_v36, 0.0  ;;  %v15413_v14 = vld [vmem:[#allocation61_spill] sm:$0xff] }
 0x90f   : > { %9025 = vrcp.f32 %v4060_v61  ;;  %8425 = vmatmul.msk.f32.gmra.mxu0 %vm2035_vm9, %v4457_v17  ;;  %v12719_v62 = vpop.f32.mrf.mxu3  ;;  %v4314_v37 = vadd.f32 %v4266_v28, %v4106_v16  ;;  %v12725_v42 = vadd.f32 %v4280_v48, %v4120_v18  ;;  %v3902_v35 = vmul.f32 %v15410_v12, %v15410_v12  ;;  %v15414_v18 = vld [vmem:[#allocation43_spill] sm:$0xff] }
 0x910   : > { %v3789_v56 = vmul.f32 %v12719_v62, %v15411_v47  ;;  %v3917_v5 = vmul.f32 %v12719_v62, %v12719_v62  ;;  %v4171_v34 = vmul.f32 %v12715_v50, %v15413_v14  ;;  %v4203_v17 = vmul.f32 %v12715_v50, %v12618_v63  ;;  %v15416_v63 = vld [vmem:[#allocation40_spill] sm:$0xff] }
 0x911   : > { %15412 = vst [vmem:[#allocation89_spill] sm:$0xff] %v12725_v42  ;;  %v12735_v61 = vsub.f32 1.0, %v12713_v57  ;;  %v4410_v7 = vmul.f32 0.99, %v4314_v37  ;;  %v4134_v16 = vmul.f32 %v12461_v11, %v15349_v1  ;;  %vm4012_vm2 = vcmp.ge.f32.partialorder %v3860_v32, 0.0  ;;  %v15415_v42 = vld [vmem:[#allocation107_spill] sm:$0xff] }
 0x912   : > { %v3992_v46 = vsel %vm2035_vm9, %v3917_v5, 0.0  ;;  %v4251_v36 = vsub.f32 %v15394_v8, %v4203_v17  ;;  %v4219_v48 = vsub.f32 %v15414_v18, %v4171_v34  ;;  %v3864_v14 = vsel %vm2035_vm9, %v3789_v56, 0.0 }
 0x913   : > { %v3993_v28 = vadd.f32 %v3992_v46, %v3991_v54  ;;  %v4458_v52 = vadd.f32 %v4410_v7, %v15415_v42  ;;  %v4233_v13 = vsub.f32 %v15416_v63, %v4185_v45  ;;  %v12746_v2 = vadd.f32 %v12496_v60, %v4134_v16 }
 0x914   : > { %v12749_v37 = vmul.f32 %v4251_v36, %v12735_v61  ;;  %v4107_v17 = vmul.f32 %v12713_v57, %v15414_v18  ;;  %v4267_v54 = vmul.f32 %v4219_v48, %v12735_v61  ;;  %v3995_v34 = vsel %vm2035_vm9, %v3902_v35, 0.0  ;;  %v12767_v36 = vpop.f32.mrf.mxu1 }
 0x915   : > { %15417 = vst [vmem:[#allocation68_spill] sm:$0xff] %v12746_v2  ;;  %v9026_v5 = vpop.eup %9025  ;;  %v4061_v11 = vadd.f32 1e-06, %v3993_v28  ;;  %v4121_v7 = vmul.f32 %v12615_v31, %v15416_v63  ;;  %v4281_v60 = vmul.f32 %v4233_v13, %v12637_v19  ;;  %v12762_v45 = vsel %vm4012_vm2, 1.0, %v15322_v20  ;;  %v15418_v28 = vld [vmem:[#allocation66_spill] sm:$0xff] }
 0x916   : > { %v12755_v56 = vmul.f32 %v9026_v5, %v3860_v32  ;;  %v3865_v42 = vadd.f32 %v3864_v14, %v3863_v29  ;;  %v4315_v16 = vadd.f32 %v4267_v54, %v4107_v17  ;;  %v4186_v35 = vmul.f32 %v12664_v33, %v15347_v44  ;;  %v15419_v19 = vld [vmem:[#allocation102_spill] sm:$0xff]  ;;  %v15420_v32 = vld [vmem:[#allocation123_spill] sm:$0xff]  ;;  %v15421_v33 = vld [vmem:[#allocation12_spill] sm:$0xff] }
 0x917   : > { %9027 = vrcp.f32 %v4061_v11  ;;  %8426 = vmatmul.msk.f32.gmra.mxu0 %vm2035_vm9, %v4458_v52  ;;  %v12765_v46 = vpop.f32.mrf.mxu3  ;;  %v3996_v48 = vadd.f32 %v3995_v34, %v15420_v32  ;;  %v12780_v5 = vadd.f32 %v4281_v60, %v4121_v7  ;;  %v12783_v11 = vsub.f32 1.0, %v12762_v45 }
 0x918   : > { %v4172_v18 = vmul.f32 %v12755_v56, %v15418_v28  ;;  %v4204_v13 = vmul.f32 %v12755_v56, %v12667_v26  ;;  %v3790_v29 = vmul.f32 %v12765_v46, %v15419_v19  ;;  %v3918_v52 = vmul.f32 %v12765_v46, %v12765_v46  ;;  %v15422_v28 = vld [vmem:[#allocation108_spill] sm:$0xff] }
 0x919   : > { %v4411_v14 = vmul.f32 0.99, %v4315_v16  ;;  %v4108_v17 = vmul.f32 %v12762_v45, %v15421_v33  ;;  %vm4013_vm3 = vcmp.ge.f32.partialorder %v3865_v42, 0.0 }
 0x91a   : > { %v4252_v44 = vsub.f32 %v15400_v22, %v4204_v13  ;;  %v4220_v26 = vsub.f32 %v15421_v33, %v4172_v18  ;;  %v3869_v54 = vsel %vm2035_vm9, %v3790_v29, 0.0  ;;  %v3997_v34 = vsel %vm2035_vm9, %v3918_v52, 0.0  ;;  %v5290_v13 = vld [vmem:[%s14872_s6 + $0x180] sm:$0xff]  ;;  %v5289_v18 = vld [vmem:[%s14872_s6 + $0x178] sm:$0xff] }
 0x91b   : > { %v4459_v32 = vadd.f32 %v4411_v14, %v15422_v28  ;;  %v3998_v60 = vadd.f32 %v3997_v34, %v3996_v48  ;;  %v4234_v29 = vsub.f32 %v15346_v39, %v4186_v35  ;;  %v15423_v52 = vld [vmem:[#allocation122_spill] sm:$0xff]  ;;  %v4187_v14 = vmul.f32 %v12715_v50, %v15362_v38  ;;  %5490 = vmatpush.msrb.mxu1 %v5290_v13  ;;  %v5288_v38 = vld [vmem:[%s14872_s6 + $0x170] sm:$0xff] }
 0x91c   : > { %v12793_v7 = vmul.f32 %v4252_v44, %v12783_v11  ;;  %v4268_v16 = vmul.f32 %v4220_v26, %v12783_v11  ;;  %v3868_v2 = vadd.f32 %v3867_v25, %v15423_v52  ;;  %v4122_v48 = vmul.f32 %v12662_v10, %v15346_v39 }
 0x91d   : > { %v9028_v1 = vpop.eup %9027  ;;  %v4135_v44 = vmul.f32 %v12503_v23, %v15356_v27  ;;  %v12812_v26 = vsel %vm4013_vm3, 1.0, %v15322_v20  ;;  %v4062_v28 = vadd.f32 1e-06, %v3998_v60  ;;  %5491 = vmatpush.msrb.mxu1 %v5289_v18  ;;  %v4282_v50 = vmul.f32 %v4234_v29, %v12689_v9  ;;  %v15424_v23 = vld [vmem:[#allocation71_spill] sm:$0xff]  ;;  %v12830_v9 = vpop.f32.mrf.mxu1 }
 0x91e   : > { %v4093_v34 = vmul.f32 %v9028_v1, %v3865_v42  ;;  %v4316_v35 = vadd.f32 %v4268_v16, %v4108_v17  ;;  %v3870_v63 = vadd.f32 %v3869_v54, %v3868_v2  ;;  %v4136_v2 = vmul.f32 %v12562_v21, %v15365_v6 }
 0x91f   : > { %8427 = vmatmul.msk.f32.gmra.mxu0 %vm2035_vm9, %v4459_v32  ;;  %v12820_v25 = vadd.f32 %v12549_v55, %v4135_v44  ;;  %9029 = vrcp.f32 %v4062_v28  ;;  %v4157_v1 = vsub.f32 1.0, %v12812_v26  ;;  %v4364_v42 = vmul.f32 0.01, %v15421_v33  ;;  %5492 = vmatpush.msrb.mxu1 %v5288_v38  ;;  %v15425_v32 = vld [vmem:[#allocation46_spill] sm:$0xff] }
 0x920   : > { %v4173_v13 = vmul.f32 %v4093_v34, %v15424_v23  ;;  %v4205_v52 = vmul.f32 %v4093_v34, %v12719_v62  ;;  %v4412_v17 = vmul.f32 0.99, %v4316_v35  ;;  %v12828_v54 = vadd.f32 %v4282_v50, %v4122_v48 }
 0x921   : > { %v12835_v62 = vadd.f32 %v12594_v43, %v4136_v2  ;;  %v4137_v21 = vmul.f32 %v12615_v31, %v15371_v24  ;;  %v4109_v33 = vmul.f32 %v12812_v26, %v15425_v32  ;;  %v4235_v18 = vsub.f32 %v15361_v51, %v4187_v14 }
 0x922   : > { %v4253_v55 = vsub.f32 %v15411_v47, %v4205_v52  ;;  %v4221_v60 = vsub.f32 %v15425_v32, %v4173_v13  ;;  %v4460_v16 = vadd.f32 %v4412_v17, %v4364_v42  ;;  %vm4014_vm4 = vcmp.ge.f32.partialorder %v3870_v63, 0.0  ;;  %v15426_v52 = vld [vmem:[#allocation73_spill] sm:$0xff]  ;;  %v15427_v17 = vld [vmem:[#allocation14_spill] sm:$0xff] }
 0x923   : > { %v12843_v44 = vadd.f32 %v12648_v53, %v4137_v21  ;;  %v4123_v28 = vmul.f32 %v12713_v57, %v15361_v51  ;;  %v4283_v43 = vmul.f32 %v4235_v18, %v12735_v61  ;;  %v4138_v31 = vmul.f32 %v12662_v10, %v15384_v40 }
 0x924   : > { %v4301_v29 = vmul.f32 %v4253_v55, %v4157_v1  ;;  %v4269_v48 = vmul.f32 %v4221_v60, %v4157_v1  ;;  %v4188_v38 = vmul.f32 %v12755_v56, %v15378_v3  ;;  %v12853_v14 = vsel %vm4014_vm4, 1.0, %v15322_v20 }
 0x925   : > { %v9030_v35 = vpop.eup %9029  ;;  %v12856_v53 = vadd.f32 %v4283_v43, %v4123_v28  ;;  %v12859_v13 = vadd.f32 %v12701_v15, %v4138_v31  ;;  %v4365_v42 = vmul.f32 0.01, %v15425_v32  ;;  %v4158_v3 = vsub.f32 1.0, %v12853_v14  ;;  %v4694_v60 = vpop.f32.mrf.mxu1 }
 0x926   : > { %v4317_v50 = vadd.f32 %v4269_v48, %v4109_v33  ;;  %v4094_v23 = vmul.f32 %v9030_v35, %v3870_v63  ;;  %v4139_v20 = vmul.f32 %v12713_v57, %v15394_v8  ;;  %v4236_v15 = vsub.f32 %v15377_v41, %v4188_v38 }
 0x927   : > { %8428 = vmatmul.msk.f32.gmra.mxu0 %vm2035_vm9, %v4460_v16  ;;  %v4110_v21 = vmul.f32 %v12853_v14, %v15427_v17  ;;  %v4124_v33 = vmul.f32 %v12762_v45, %v15377_v41  ;;  %v4189_v18 = vmul.f32 %v4093_v34, %v15392_v58  ;;  %v4366_v43 = vmul.f32 0.01, %v15427_v17  ;;  %v12894_v34 = vld [vmem:[%s14872_s6 + $0x488] ss:$0 sm:$0xff] }
 0x928   : > { %v4413_v61 = vmul.f32 0.99, %v4317_v50  ;;  %v4174_v2 = vmul.f32 %v4094_v23, %v15426_v52  ;;  %v4206_v10 = vmul.f32 %v4094_v23, %v12765_v46  ;;  %v12873_v46 = vadd.f32 %v12749_v37, %v4139_v20  ;;  %v9128_v37 = vld [vmem:[%s14874_s8 + $0x40] ss:$8 sm:$0x3] }
 0x929   : > { %v4284_v57 = vmul.f32 %v4236_v15, %v12783_v11  ;;  %v12886_v35 = vperm.slane %v9128_v37, 1  ;;  %v4140_v38 = vmul.f32 %v12762_v45, %v15400_v22  ;;  %v4237_v58 = vsub.f32 %v15391_v59, %v4189_v18  ;;  %v15428_v20 = vld [vmem:[#allocation16_spill] sm:$0xff]  ;;  %v15430_v18 = vld [vmem:[#allocation21_spill] sm:$0xff] }
 0x92a   : > { %v4254_v63 = vsub.f32 %v15419_v19, %v4206_v10  ;;  %v4461_v56 = vadd.f32 %v4413_v61, %v4365_v42  ;;  %v4222_v55 = vsub.f32 %v15427_v17, %v4174_v2  ;;  %v4125_v61 = vmul.f32 %v12812_v26, %v15391_v59  ;;  %v15429_v17 = vld [vmem:[#allocation22_spill] sm:$0xff] }
 0x92b   : > { %v12880_v28 = vadd.f32 %v4284_v57, %v4124_v33  ;;  %v12897_v50 = vadd.f32 %v12793_v7, %v4140_v38  ;;  %v4285_v52 = vmul.f32 %v4237_v58, %v4157_v1  ;;  %v12903_v2 = vadd.f32 %v12767_v36, %v12886_v35  ;;  %v15432_v38 = vld [vmem:[#allocation49_spill] sm:$0xff] }
 0x92c   : > { %v4302_v32 = vmul.f32 %v4254_v63, %v4158_v3  ;;  %v4270_v16 = vmul.f32 %v4222_v55, %v4158_v3  ;;  %v4190_v10 = vmul.f32 %v4094_v23, %v15410_v12  ;;  %v12911_v63 = vadd.f32 %v12894_v34, %v15428_v20  ;;  %v15435_v20 = vld [vmem:[#allocation60_spill] sm:$0xff] }
 0x92d   : > { %v4697_v45 = vpop.f32.mrf.mxu1  ;;  %v12907_v42 = vadd.f32 %v4285_v52, %v4125_v61  ;;  %v5144_v1 = vmul.f32 %v12903_v2, %v15429_v17  ;;  %v4141_v55 = vmul.f32 %v12812_v26, %v15411_v47  ;;  %v4367_v12 = vmul.f32 0.01, %v11542_v4  ;;  %v15463_v47 = vld [vmem:[#allocation47_spill] sm:$0xff] }
 0x92e   : > { %v4318_v48 = vadd.f32 %v4270_v16, %v4110_v21  ;;  %v4238_v23 = vsub.f32 %v15409_v0, %v4190_v10  ;;  %v4126_v33 = vmul.f32 %v12853_v14, %v15409_v0  ;;  %v12928_v57 = vadd.f32 %v12830_v9, %v12886_v35  ;;  %v15434_v10 = vld [vmem:[#allocation96_spill] sm:$0xff] }
 0x92f   : > { %8429 = vmatmul.msk.f32.gmra.mxu0 %vm2035_vm9, %v4461_v56  ;;  %v4415_v56 = vmul.f32 0.99, %v12264_v49  ;;  %v12921_v21 = vadd.f32 %v4301_v29, %v4141_v55  ;;  %v12935_v29 = vadd.f32 %v12894_v34, %v15430_v18 }
 0x930   : > { %v4414_v31 = vmul.f32 0.99, %v4318_v48  ;;  %v4286_v49 = vmul.f32 %v4238_v23, %v4158_v3  ;;  %v4416_v48 = vmul.f32 0.99, %v12319_v30  ;;  %v4142_v3 = vmul.f32 %v12853_v14, %v15419_v19 }
 0x931   : > { %v4463_v16 = vadd.f32 %v4415_v56, %v4367_v12  ;;  %v12949_v30 = vadd.f32 %v4694_v60, %v12886_v35  ;;  %v4417_v14 = vmul.f32 0.99, %v15434_v10  ;;  %v12962_v60 = vadd.f32 %v4697_v45, %v12886_v35 }
 0x932   : > { %v4462_v11 = vadd.f32 %v4414_v31, %v4366_v43  ;;  %v12931_v26 = vadd.f32 %v4286_v49, %v4126_v33  ;;  %v15431_v31 = vld [vmem:[#allocation24_spill] sm:$0xff]  ;;  %v12944_v58 = vadd.f32 %v4302_v32, %v4142_v3  ;;  %v15439_v49 = vld [vmem:[#allocation67_spill] sm:$0xff] }
 0x933   : > { %v5145_v37 = vmul.f32 %v12928_v57, %v15431_v31  ;;  %v12968_v18 = vadd.f32 %v12894_v34, %v15439_v49 }
 0x934   : > { %15433 = vst [vmem:[#allocation10_spill] sm:$0xff] %v12944_v58 }
 0x935   : > { %v4700_v4 = vpop.f32.mrf.mxu1 }
 0x937   : > { %8430 = vmatmul.msk.f32.gmra.mxu0 %vm2035_vm9, %v4462_v11  ;;  %v4368_v11 = vmul.f32 0.01, %v15432_v38 }
 0x939   : > { %v5000_v7 = vpop.f32.mrf.mxu0  ;;  %v4464_v52 = vadd.f32 %v4416_v48, %v4368_v11 }
 0x93a   : > { %v5192_v36 = vmul.f32 %v5000_v7, %v12911_v63  ;;  %v12954_v7 = vadd.f32 %v12894_v34, %v15435_v20 }
 0x93c   : > { %v5240_v15 = vadd.f32 %v5192_v36, %v5144_v1  ;;  %v15436_v1 = vld [vmem:[#allocation13_spill] sm:$0xff]  ;;  %v15437_v36 = vld [vmem:[#allocation26_spill] sm:$0xff] }
 0x93d   : > { %v4703_v56 = vpop.f32.mrf.mxu1  ;;  %v4369_v32 = vmul.f32 0.01, %v15436_v1  ;;  %v5146_v55 = vmul.f32 %v12949_v30, %v15437_v36  ;;  %v15445_v36 = vld [vmem:[#allocation32_spill] sm:$0xff] }
 0x93e   : > { %8463 = vmatmul.msk.f32.vlgmr.msrb.gmra.mxu1 %vm2035_vm9, %v5240_v15 }
 0x93f   : > { %8431 = vmatmul.msk.f32.gmra.mxu0 %vm2035_vm9, %v4463_v16  ;;  %v4465_v23 = vadd.f32 %v4417_v14, %v4369_v32  ;;  %v15438_v16 = vld [vmem:[#allocation110_spill] sm:$0xff]  ;;  %v15443_v14 = vld [vmem:[#allocation27_spill] sm:$0xff] }
 0x940   : > { %v4418_v33 = vmul.f32 0.99, %v15438_v16  ;;  %v12982_v20 = vadd.f32 %v12894_v34, %v15443_v14 }
 0x941   : > { %v5003_v43 = vpop.f32.mrf.mxu0 }
 0x942   : > { %v5193_v9 = vmul.f32 %v5003_v43, %v12935_v29  ;;  %v15440_v43 = vld [vmem:[#allocation15_spill] sm:$0xff] }
 0x943   : > { %v4370_v3 = vmul.f32 0.01, %v15440_v43 }
 0x944   : > { %v5241_v61 = vadd.f32 %v5193_v9, %v5145_v37  ;;  %v15441_v37 = vld [vmem:[#allocation29_spill] sm:$0xff] }
 0x945   : > { %v4706_v31 = vpop.f32.mrf.mxu1  ;;  %v5147_v9 = vmul.f32 %v12962_v60, %v15441_v37  ;;  %v4466_v11 = vadd.f32 %v4418_v33, %v4370_v3  ;;  %v15446_v33 = vld [vmem:[#allocation111_spill] sm:$0xff]  ;;  %v15448_v3 = vld [vmem:[#allocation65_spill] sm:$0xff] }
 0x946   : > { %8464 = vmatmul.msk.f32.gmra.mxu1 %vm2035_vm9, %v5241_v61  ;;  %v12977_v61 = vadd.f32 %v4700_v4, %v12886_v35  ;;  %v12990_v4 = vadd.f32 %v4703_v56, %v12886_v35  ;;  %v4420_v49 = vmul.f32 0.99, %v15446_v33  ;;  %v4372_v37 = vmul.f32 0.01, %v15448_v3  ;;  %v15453_v33 = vld [vmem:[#allocation38_spill] sm:$0xff] }
 0x947   : > { %8432 = vmatmul.msk.f32.gmra.mxu0 %vm2035_vm9, %v4464_v52  ;;  %v15442_v52 = vld [vmem:[#allocation8_spill] sm:$0xff] }
 0x948   : > { %v4419_v10 = vmul.f32 0.99, %v15442_v52 }
 0x94a   : > { %v5006_v17 = vpop.f32.mrf.mxu0 }
 0x94b   : > { %v5194_v12 = vmul.f32 %v5006_v17, %v12954_v7  ;;  %v15444_v17 = vld [vmem:[#allocation19_spill] sm:$0xff] }
 0x94c   : > { %v4371_v1 = vmul.f32 0.01, %v15444_v17  ;;  %v13004_v17 = vadd.f32 %v4706_v31, %v12886_v35 }
 0x94d   : > { %v5242_v15 = vadd.f32 %v5194_v12, %v5146_v55  ;;  %v5148_v55 = vmul.f32 %v12977_v61, %v15445_v36  ;;  %v15451_v36 = vld [vmem:[#allocation51_spill] sm:$0xff] }
 0x94f   : > { %8433 = vmatmul.msk.f32.gmra.mxu0 %vm2035_vm9, %v4465_v23  ;;  %8465 = vmatmul.msk.f32.gmra.mxu1 %vm2035_vm9, %v5242_v15  ;;  %v4467_v23 = vadd.f32 %v4419_v10, %v4371_v1  ;;  %v4709_v15 = vpop.f32.mrf.mxu1  ;;  %v4468_v10 = vadd.f32 %v4420_v49, %v4372_v37  ;;  %v15450_v1 = vld [vmem:[#allocation20_spill] sm:$0xff]  ;;  %v5150_v49 = vmul.f32 %v13004_v17, %v15453_v33 }
 0x952   : > { %v5009_v48 = vpop.f32.mrf.mxu0 }
 0x953   : > { %v5195_v38 = vmul.f32 %v5009_v48, %v12968_v18  ;;  %v15447_v48 = vld [vmem:[#allocation37_spill] sm:$0xff] }
 0x954   : > { %v12996_v43 = vadd.f32 %v12894_v34, %v15447_v48 }
 0x955   : > { %v5243_v45 = vadd.f32 %v5195_v38, %v5147_v9  ;;  %v4811_v38 = vpop.f32.mrf.mxu2 }
 0x957   : > { %8434 = vmatmul.msk.f32.gmra.mxu0 %vm2035_vm9, %v4466_v11  ;;  %8466 = vmatmul.msk.f32.gmra.mxu1 %vm2035_vm9, %v5243_v45  ;;  %v15449_v11 = vld [vmem:[#allocation35_spill] sm:$0xff]  ;;  %v4712_v14 = vpop.f32.mrf.mxu1 }
 0x958   : > { %v5149_v45 = vmul.f32 %v12990_v4, %v15449_v11  ;;  %v15454_v11 = vld [vmem:[#allocation98_spill] sm:$0xff] }
 0x95c   : > { %v5012_v32 = vpop.f32.mrf.mxu0 }
 0x95d   : > { %v5196_v12 = vmul.f32 %v5012_v32, %v12982_v20  ;;  %v4421_v32 = vmul.f32 0.99, %v15450_v1  ;;  %v4814_v37 = vpop.f32.mrf.mxu2  ;;  %v15456_v1 = vld [vmem:[#allocation64_spill] sm:$0xff] }
 0x95f   : > { %v5244_v16 = vadd.f32 %v5196_v12, %v5148_v55  ;;  %8435 = vmatmul.msk.f32.gmra.mxu0 %vm2035_vm9, %v4467_v23  ;;  %v13010_v55 = vadd.f32 %v12894_v34, %v15451_v36  ;;  %v15452_v12 = vld [vmem:[#allocation42_spill] sm:$0xff]  ;;  %v4374_v36 = vmul.f32 0.01, %v15456_v1 }
 0x960   : > { %v4373_v23 = vmul.f32 0.01, %v15452_v12 }
 0x961   : > { %8467 = vmatmul.msk.f32.gmra.mxu1 %vm2035_vm9, %v5244_v16 }
 0x962   : > { %v4469_v3 = vadd.f32 %v4421_v32, %v4373_v23  ;;  %v15457_v32 = vld [vmem:[#allocation41_spill] sm:$0xff] }
 0x964   : > { %v5015_v9 = vpop.f32.mrf.mxu0 }
 0x965   : > { %v5197_v52 = vmul.f32 %v5015_v9, %v12996_v43  ;;  %v13018_v9 = vadd.f32 %v4709_v15, %v12886_v35 }
 0x967   : > { %v5245_v56 = vadd.f32 %v5197_v52, %v5149_v45  ;;  %8436 = vmatmul.msk.f32.gmra.mxu0 %vm2035_vm9, %v4468_v10  ;;  %v4422_v45 = vmul.f32 0.99, %v15454_v11  ;;  %v4715_v52 = vpop.f32.mrf.mxu1  ;;  %v15455_v10 = vld [vmem:[#allocation58_spill] sm:$0xff]  ;;  %v5151_v23 = vmul.f32 %v13018_v9, %v15457_v32  ;;  %v13037_v11 = vadd.f32 %v12894_v34, %v4811_v38  ;;  %v15461_v38 = vld [vmem:[#allocation89_spill] sm:$0xff] }
 0x969   : > { %8468 = vmatmul.msk.f32.gmra.mxu1 %vm2035_vm9, %v5245_v56  ;;  %v13024_v56 = vadd.f32 %v12894_v34, %v15455_v10  ;;  %v4470_v33 = vadd.f32 %v4422_v45, %v4374_v36  ;;  %v15459_v10 = vld [vmem:[#allocation23_spill] sm:$0xff] }
 0x96a   : > { %v4375_v1 = vmul.f32 0.01, %v15459_v10  ;;  %v15462_v10 = vld [vmem:[#allocation30_spill] sm:$0xff] }
 0x96b   : > { %v4376_v58 = vmul.f32 0.01, %v15462_v10 }
 0x96c   : > { %v5018_v16 = vpop.f32.mrf.mxu0 }
 0x96d   : > { %v5198_v48 = vmul.f32 %v5018_v16, %v13010_v55 }
 0x96f   : > { %v5246_v31 = vadd.f32 %v5198_v48, %v5150_v49  ;;  %8437 = vmatmul.msk.f32.gmra.mxu0 %vm2035_vm9, %v4469_v3  ;;  %v4817_v49 = vpop.f32.mrf.mxu2  ;;  %v13032_v48 = vadd.f32 %v4712_v14, %v12886_v35  ;;  %v15458_v3 = vld [vmem:[#allocation48_spill] sm:$0xff]  ;;  %v4718_v32 = vpop.f32.mrf.mxu1  ;;  %v13045_v14 = vadd.f32 %v4715_v52, %v12886_v35 }
 0x971   : > { %8469 = vmatmul.msk.f32.gmra.mxu1 %vm2035_vm9, %v5246_v31  ;;  %v4423_v31 = vmul.f32 0.99, %v15458_v3 }
 0x974   : > { %v5021_v12 = vpop.f32.mrf.mxu0 }
 0x975   : > { %v5199_v16 = vmul.f32 %v5021_v12, %v13024_v56  ;;  %v15460_v12 = vld [vmem:[#allocation44_spill] sm:$0xff] }
 0x976   : > { %v5152_v45 = vmul.f32 %v13032_v48, %v15460_v12 }
 0x977   : > { %v5247_v15 = vadd.f32 %v5199_v16, %v5151_v23  ;;  %8438 = vmatmul.msk.f32.gmra.mxu0 %vm2035_vm9, %v4470_v33  ;;  %v4471_v23 = vadd.f32 %v4423_v31, %v4375_v1  ;;  %v4424_v33 = vmul.f32 0.99, %v15461_v38  ;;  %v4820_v3 = vpop.f32.mrf.mxu2 }
 0x979   : > { %8470 = vmatmul.msk.f32.gmra.mxu1 %vm2035_vm9, %v5247_v15  ;;  %v13050_v15 = vadd.f32 %v12894_v34, %v4814_v37  ;;  %v4472_v1 = vadd.f32 %v4424_v33, %v4376_v58  ;;  %v4425_v37 = vmul.f32 0.99, %v12780_v5  ;;  %v4426_v5 = vmul.f32 0.99, %v12828_v54  ;;  %v5315_v54 = vld [vmem:[%s14873_s7 + $0x138] sm:$0xff] }
 0x97a   : > { %6083 = vmatpush.msrb.mxu3 %v5315_v54  ;;  %v4428_v54 = vmul.f32 0.99, %v12880_v28  ;;  %v4429_v28 = vmul.f32 0.99, %v12907_v42  ;;  %v4430_v42 = vmul.f32 0.99, %v12931_v26 }
 0x97b   : > { %v15472_v26 = vld [vmem:[#allocation87_spill] sm:$0xff] }
 0x97c   : > { %v5024_v19 = vpop.f32.mrf.mxu0 }
 0x97d   : > { %v5200_v36 = vmul.f32 %v5024_v19, %v13037_v11  ;;  %v5153_v19 = vmul.f32 %v13045_v14, %v15463_v47 }
 0x97f   : > { %v5248_v16 = vadd.f32 %v5200_v36, %v5152_v45  ;;  %8439 = vmatmul.msk.f32.gmra.mxu0 %vm2035_vm9, %v4471_v23  ;;  %v4721_v45 = vpop.f32.mrf.mxu1  ;;  %v13058_v36 = vadd.f32 %v4718_v32, %v12886_v35  ;;  %v13063_v23 = vadd.f32 %v12894_v34, %v4817_v49  ;;  %v4823_v10 = vpop.f32.mrf.mxu2  ;;  %v13076_v49 = vadd.f32 %v12894_v34, %v4820_v3  ;;  %v5295_v3 = vld [vmem:[%s14872_s6 + $0x1a8] sm:$0xff] }
 0x980   : > { %6292 = vmatpush.msrb.mxu2 %v5295_v3 }
 0x981   : > { %8471 = vmatmul.msk.f32.gmra.mxu1 %vm2035_vm9, %v5248_v16  ;;  %v15464_v16 = vld [vmem:[#allocation40_spill] sm:$0xff] }
 0x982   : > { %v4377_v38 = vmul.f32 0.01, %v15464_v16 }
 0x984   : > { %v5027_v12 = vpop.f32.mrf.mxu0 }
 0x985   : > { %v5201_v31 = vmul.f32 %v5027_v12, %v13050_v15  ;;  %v15465_v12 = vld [vmem:[#allocation50_spill] sm:$0xff] }
 0x986   : > { %v5154_v58 = vmul.f32 %v13058_v36, %v15465_v12  ;;  %v15466_v12 = vld [vmem:[#allocation52_spill] sm:$0xff] }
 0x987   : > { %v5249_v52 = vadd.f32 %v5201_v31, %v5153_v19  ;;  %8440 = vmatmul.msk.f32.gmra.mxu0 %vm2035_vm9, %v4472_v1  ;;  %v4473_v19 = vadd.f32 %v4425_v37, %v4377_v38  ;;  %v4724_v32 = vpop.f32.mrf.mxu1  ;;  %v13071_v1 = vadd.f32 %v4721_v45, %v12886_v35  ;;  %v4427_v45 = vmul.f32 0.99, %v12856_v53  ;;  %v5293_v53 = vld [vmem:[%s14872_s6 + $0x198] sm:$0xff] }
 0x989   : > { %8472 = vmatmul.msk.f32.gmra.mxu1 %vm2035_vm9, %v5249_v52  ;;  %v4378_v52 = vmul.f32 0.01, %v15346_v39  ;;  %v5155_v37 = vmul.f32 %v13071_v1, %v15466_v12  ;;  %v13090_v39 = vadd.f32 %v4724_v32, %v12886_v35  ;;  %v15467_v12 = vld [vmem:[#allocation54_spill] sm:$0xff] }
 0x98b   : > { %v5156_v32 = vmul.f32 %v13090_v39, %v15467_v12 }
 0x98c   : > { %v5030_v47 = vpop.f32.mrf.mxu0 }
 0x98d   : > { %v5202_v33 = vmul.f32 %v5030_v47, %v13063_v23  ;;  %v4474_v47 = vadd.f32 %v4426_v5, %v4378_v52  ;;  %v13098_v5 = vadd.f32 %v12894_v34, %v4823_v10  ;;  %v4379_v52 = vmul.f32 0.01, %v15361_v51  ;;  %v5292_v10 = vld [vmem:[%s14872_s6 + $0x190] sm:$0xff] }
 0x98f   : > { %v5250_v31 = vadd.f32 %v5202_v33, %v5154_v58  ;;  %8441 = vmatmul.msk.f32.gmra.mxu0 %vm2035_vm9, %v4473_v19  ;;  %v4826_v58 = vpop.f32.mrf.mxu2  ;;  %v5294_v19 = vld [vmem:[%s14872_s6 + $0x1a0] sm:$0xff] }
 0x990   : > { %6293 = vmatpush.msrb.mxu2 %v5294_v19  ;;  %v13117_v3 = vadd.f32 %v12894_v34, %v4826_v58 }
 0x991   : > { %8473 = vmatmul.msk.f32.gmra.mxu1 %vm2035_vm9, %v5250_v31  ;;  %v4727_v31 = vpop.f32.mrf.mxu1 }
 0x992   : > { %6294 = vmatpush.msrb.mxu2 %v5293_v53 }
 0x994   : > { %v5033_v16 = vpop.f32.mrf.mxu0  ;;  %6295 = vmatpush.msrb.mxu2 %v5292_v10  ;;  %v15469_v10 = vld [vmem:[#allocation57_spill] sm:$0xff] }
 0x995   : > { %v5203_v38 = vmul.f32 %v5033_v16, %v13076_v49 }
 0x997   : > { %v5251_v33 = vadd.f32 %v5203_v38, %v5155_v37  ;;  %8442 = vmatmul.msk.f32.gmra.mxu0 %vm2035_vm9, %v4474_v47  ;;  %v4475_v38 = vadd.f32 %v4427_v45, %v4379_v52  ;;  %v4829_v51 = vpop.f32.mrf.mxu2  ;;  %v4380_v45 = vmul.f32 0.01, %v15377_v41 }
 0x998   : > { %v13130_v41 = vadd.f32 %v12894_v34, %v4829_v51 }
 0x999   : > { %8474 = vmatmul.msk.f32.gmra.mxu1 %vm2035_vm9, %v5251_v33  ;;  %v13112_v33 = vadd.f32 %v4727_v31, %v12886_v35  ;;  %v4730_v19 = vpop.f32.mrf.mxu1 }
 0x99c   : > { %v5036_v16 = vpop.f32.mrf.mxu0 }
 0x99d   : > { %v5204_v37 = vmul.f32 %v5036_v16, %v13098_v5  ;;  %v15468_v16 = vld [vmem:[#allocation55_spill] sm:$0xff] }
 0x99e   : > { %v5157_v12 = vmul.f32 %v13112_v33, %v15468_v16 }
 0x99f   : > { %v5252_v47 = vadd.f32 %v5204_v37, %v5156_v32  ;;  %8443 = vmatmul.msk.f32.gmra.mxu0 %vm2035_vm9, %v4475_v38  ;;  %v4476_v37 = vadd.f32 %v4428_v54, %v4380_v45  ;;  %v13125_v38 = vadd.f32 %v4730_v19, %v12886_v35  ;;  %v4832_v58 = vpop.f32.mrf.mxu2 }
 0x9a1   : > { %8475 = vmatmul.msk.f32.gmra.mxu1 %vm2035_vm9, %v5252_v47  ;;  %v4381_v47 = vmul.f32 0.01, %v15391_v59  ;;  %v5158_v54 = vmul.f32 %v13125_v38, %v15469_v10  ;;  %v4733_v16 = vpop.f32.mrf.mxu1  ;;  %v13143_v59 = vadd.f32 %v12894_v34, %v4832_v58  ;;  %v4431_v10 = vmul.f32 0.99, %v15472_v26  ;;  %v15473_v58 = vld [vmem:[#allocation74_spill] sm:$0xff] }
 0x9a4   : > { %v5039_v52 = vpop.f32.mrf.mxu0 }
 0x9a5   : > { %v5205_v32 = vmul.f32 %v5039_v52, %v13117_v3  ;;  %v4477_v52 = vadd.f32 %v4429_v28, %v4381_v47 }
 0x9a7   : > { %v5253_v31 = vadd.f32 %v5205_v32, %v5157_v12  ;;  %8444 = vmatmul.msk.f32.gmra.mxu0 %vm2035_vm9, %v4476_v37  ;;  %v13138_v12 = vadd.f32 %v4733_v16, %v12886_v35  ;;  %v13145_v51 = vpop.f32.mrf.mxu2  ;;  %v4382_v32 = vmul.f32 0.01, %v15409_v0 }
 0x9a8   : > { %15470 = vst [vmem:[#allocation113_spill] sm:$0xff] %v13145_v51 }
 0x9a9   : > { %8476 = vmatmul.msk.f32.gmra.mxu1 %vm2035_vm9, %v5253_v31  ;;  %v15471_v31 = vld [vmem:[#allocation59_spill] sm:$0xff] }
 0x9aa   : > { %v5159_v28 = vmul.f32 %v13138_v12, %v15471_v31 }
 0x9ac   : > { %v5042_v53 = vpop.f32.mrf.mxu0 }
 0x9ad   : > { %v5206_v45 = vmul.f32 %v5042_v53, %v13130_v41  ;;  %v4478_v53 = vadd.f32 %v4430_v42, %v4382_v32 }
 0x9af   : > { %v5254_v19 = vadd.f32 %v5206_v45, %v5158_v54  ;;  %8445 = vmatmul.msk.f32.gmra.mxu0 %vm2035_vm9, %v4477_v52  ;;  %v4383_v54 = vmul.f32 0.01, %v15473_v58  ;;  %v1919_v45 = vpop.permute.xlu2 %1918  ;;  %v13159_v52 = vpop.f32.mrf.mxu2 }
 0x9b0   : > { %15474 = vst [vmem:[#allocation99_spill] sm:$0xff] %v13159_v52  ;;  %v5160_v16 = vmul.f32 %v12903_v2, %v1919_v45 }
 0x9b1   : > { %8477 = vmatmul.msk.f32.gmra.mxu1 %vm2035_vm9, %v5254_v19  ;;  %v4479_v42 = vadd.f32 %v4431_v10, %v4383_v54 }
 0x9b4   : > { %v5045_v37 = vpop.f32.mrf.mxu0 }
 0x9b5   : > { %v5207_v47 = vmul.f32 %v5045_v37, %v13143_v59  ;;  %v15475_v37 = vld [vmem:[#allocation17_spill] sm:$0xff] }
 0x9b6   : > { %v4432_v31 = vmul.f32 0.99, %v15475_v37 }
 0x9b7   : > { %v5255_v35 = vadd.f32 %v5207_v47, %v5159_v28  ;;  %8446 = vmatmul.msk.f32.gmra.mxu0 %vm2035_vm9, %v4478_v53  ;;  %v1921_v28 = vpop.permute.xlu1 %1920  ;;  %v15476_v47 = vld [vmem:[#allocation75_spill] sm:$0xff]  ;;  %v13173_v10 = vpop.f32.mrf.mxu2 }
 0x9b8   : > { %v4384_v53 = vmul.f32 0.01, %v15476_v47  ;;  %v5161_v58 = vmul.f32 %v12928_v57, %v1921_v28  ;;  %15477 = vst [vmem:[#allocation62_spill] sm:$0xff] %v13173_v10 }
 0x9b9   : > { %8478 = vmatmul.msk.f32.gmra.mxu1 %vm2035_vm9, %v5255_v35 }
 0x9ba   : > { %v4480_v52 = vadd.f32 %v4432_v31, %v4384_v53 }
 0x9bb   : > { %v13154_v34 = vpop.f32.mrf.mxu1 }
 0x9bc   : > { %v5048_v0 = vpop.f32.mrf.mxu0  ;;  %8527 = vmatmul.msk.f32.vlgmr.msrb.gmra.mxu2 %vm2035_vm9, %v13154_v34 }
 0x9bd   : > { %v5208_v19 = vmul.f32 %v5048_v0, %v12911_v63  ;;  %v15478_v0 = vld [vmem:[#allocation28_spill] sm:$0xff] }
 0x9bf   : > { %v5256_v32 = vadd.f32 %v5208_v19, %v5160_v16  ;;  %8447 = vmatmul.msk.f32.gmra.mxu0 %vm2035_vm9, %v4479_v42  ;;  %v4433_v16 = vmul.f32 0.99, %v15478_v0  ;;  %v15479_v19 = vld [vmem:[#allocation76_spill] sm:$0xff] }
 0x9c0   : > { %v4385_v42 = vmul.f32 0.01, %v15479_v19  ;;  %v1925_v19 = vpop.permute.xlu2 %1924 }
 0x9c1   : > { %8479 = vmatmul.msk.f32.gmra.mxu1 %vm2035_vm9, %v5256_v32  ;;  %v1923_v32 = vpop.permute.xlu0 %1922 }
 0x9c2   : > { %v5162_v28 = vmul.f32 %v12949_v30, %v1923_v32  ;;  %v4481_v53 = vadd.f32 %v4433_v16, %v4385_v42 }
 0x9c3   : > { %v13167_v26 = vpop.f32.mrf.mxu1 }
 0x9c4   : > { %v5051_v35 = vpop.f32.mrf.mxu0  ;;  %8528 = vmatmul.msk.f32.gmra.mxu2 %vm2035_vm9, %v13167_v26 }
 0x9c5   : > { %v5209_v45 = vmul.f32 %v5051_v35, %v12935_v29 }
 0x9c7   : > { %v5257_v54 = vadd.f32 %v5209_v45, %v5161_v58  ;;  %8448 = vmatmul.msk.f32.gmra.mxu0 %vm2035_vm9, %v4480_v52  ;;  %v13186_v52 = vpop.f32.mrf.mxu2  ;;  %v15481_v58 = vld [vmem:[#allocation18_spill] sm:$0xff] }
 0x9c8   : > { %15480 = vst [vmem:[#allocation83_spill] sm:$0xff] %v13186_v52  ;;  %v4434_v45 = vmul.f32 0.99, %v15481_v58  ;;  %v15485_v58 = vld [vmem:[#allocation78_spill] sm:$0xff] }
 0x9c9   : > { %8480 = vmatmul.msk.f32.gmra.mxu1 %vm2035_vm9, %v5257_v54  ;;  %v15482_v54 = vld [vmem:[#allocation77_spill] sm:$0xff] }
 0x9ca   : > { %v4386_v0 = vmul.f32 0.01, %v15482_v54  ;;  %v4387_v54 = vmul.f32 0.01, %v15485_v58  ;;  %v1929_v58 = vpop.permute.xlu0 %1928 }
 0x9cc   : > { %v5054_v37 = vpop.f32.mrf.mxu0  ;;  %v13181_v47 = vpop.f32.mrf.mxu1  ;;  %v4482_v10 = vadd.f32 %v4434_v45, %v4386_v0 }
 0x9cd   : > { %v5210_v31 = vmul.f32 %v5054_v37, %v12954_v7  ;;  %8529 = vmatmul.msk.f32.gmra.mxu2 %vm2035_vm9, %v13181_v47  ;;  %v5163_v37 = vmul.f32 %v12962_v60, %v1925_v19  ;;  %v1927_v19 = vpop.permute.xlu1 %1926 }
 0x9cf   : > { %v5258_v35 = vadd.f32 %v5210_v31, %v5162_v28  ;;  %8449 = vmatmul.msk.f32.gmra.mxu0 %vm2035_vm9, %v4481_v53  ;;  %v15483_v31 = vld [vmem:[#allocation97_spill] sm:$0xff] }
 0x9d0   : > { %v4435_v53 = vmul.f32 0.99, %v15483_v31 }
 0x9d1   : > { %8481 = vmatmul.msk.f32.gmra.mxu1 %vm2035_vm9, %v5258_v35  ;;  %v13200_v35 = vpop.f32.mrf.mxu2 }
 0x9d2   : > { %15484 = vst [vmem:[#allocation34_spill] sm:$0xff] %v13200_v35  ;;  %v4483_v0 = vadd.f32 %v4435_v53, %v4387_v54 }
 0x9d4   : > { %v5057_v32 = vpop.f32.mrf.mxu0  ;;  %v13193_v42 = vpop.f32.mrf.mxu1 }
 0x9d5   : > { %v5211_v16 = vmul.f32 %v5057_v32, %v12968_v18  ;;  %8530 = vmatmul.msk.f32.gmra.mxu2 %vm2035_vm9, %v13193_v42  ;;  %v5164_v32 = vmul.f32 %v12977_v61, %v1927_v19 }
 0x9d7   : > { %v5259_v28 = vadd.f32 %v5211_v16, %v5163_v37  ;;  %8450 = vmatmul.msk.f32.gmra.mxu0 %vm2035_vm9, %v4482_v10  ;;  %v15487_v10 = vld [vmem:[#allocation112_spill] sm:$0xff] }
 0x9d8   : > { %v4436_v16 = vmul.f32 0.99, %v15487_v10  ;;  %v15492_v10 = vld [vmem:[#allocation80_spill] sm:$0xff] }
 0x9d9   : > { %8482 = vmatmul.msk.f32.gmra.mxu1 %vm2035_vm9, %v5259_v28  ;;  %v15488_v28 = vld [vmem:[#allocation79_spill] sm:$0xff]  ;;  %v13213_v19 = vpop.f32.mrf.mxu2 }
 0x9da   : > { %v4388_v31 = vmul.f32 0.01, %v15488_v28  ;;  %15489 = vst [vmem:[#allocation114_spill] sm:$0xff] %v13213_v19  ;;  %v4389_v28 = vmul.f32 0.01, %v15492_v10  ;;  %v1931_v19 = vpop.permute.xlu2 %1930 }
 0x9dc   : > { %v5060_v52 = vpop.f32.mrf.mxu0  ;;  %v4484_v54 = vadd.f32 %v4436_v16, %v4388_v31 }
 0x9dd   : > { %v5212_v45 = vmul.f32 %v5060_v52, %v12982_v20  ;;  %v5165_v52 = vmul.f32 %v12990_v4, %v1929_v58  ;;  %v5166_v58 = vmul.f32 %v13004_v17, %v1931_v19  ;;  %v1933_v19 = vpop.permute.xlu1 %1932 }
 0x9de   : > { %v13205_v51 = vpop.f32.mrf.mxu1 }
 0x9df   : > { %15486 = vst [vmem:[#allocation100_spill] sm:$0xff] %v13205_v51  ;;  %v5260_v37 = vadd.f32 %v5212_v45, %v5164_v32  ;;  %8451 = vmatmul.msk.f32.gmra.mxu0 %vm2035_vm9, %v4483_v0  ;;  %8531 = vmatmul.msk.f32.gmra.mxu2 %vm2035_vm9, %v13205_v51  ;;  %v15491_v0 = vld [vmem:[#allocation31_spill] sm:$0xff] }
 0x9e1   : > { %8483 = vmatmul.msk.f32.gmra.mxu1 %vm2035_vm9, %v5260_v37  ;;  %v4437_v37 = vmul.f32 0.99, %v15491_v0  ;;  %v15495_v0 = vld [vmem:[#allocation81_spill] sm:$0xff] }
 0x9e2   : > { %v4390_v10 = vmul.f32 0.01, %v15495_v0 }
 0x9e3   : > { %v4485_v16 = vadd.f32 %v4437_v37, %v4389_v28 }
 0x9e4   : > { %v5063_v35 = vpop.f32.mrf.mxu0 }
 0x9e5   : > { %v5213_v53 = vmul.f32 %v5063_v35, %v12996_v43 }
 0x9e6   : > { %v13217_v32 = vpop.f32.mrf.mxu1 }
 0x9e7   : > { %15490 = vst [vmem:[#allocation56_spill] sm:$0xff] %v13217_v32  ;;  %v5261_v45 = vadd.f32 %v5213_v53, %v5165_v52  ;;  %8452 = vmatmul.msk.f32.gmra.mxu0 %vm2035_vm9, %v4484_v54  ;;  %8532 = vmatmul.msk.f32.gmra.mxu2 %vm2035_vm9, %v13217_v32  ;;  %v13229_v52 = vpop.f32.mrf.mxu2  ;;  %v15494_v54 = vld [vmem:[#allocation68_spill] sm:$0xff] }
 0x9e8   : > { %15493 = vst [vmem:[#allocation91_spill] sm:$0xff] %v13229_v52 }
 0x9e9   : > { %8484 = vmatmul.msk.f32.gmra.mxu1 %vm2035_vm9, %v5261_v45  ;;  %v4438_v45 = vmul.f32 0.99, %v15494_v54  ;;  %v1935_v54 = vpop.permute.xlu0 %1934 }
 0x9ea   : > { %v5168_v0 = vmul.f32 %v13032_v48, %v1935_v54 }
 0x9eb   : > { %v4486_v28 = vadd.f32 %v4438_v45, %v4390_v10 }
 0x9ec   : > { %v5066_v51 = vpop.f32.mrf.mxu0 }
 0x9ed   : > { %v5214_v35 = vmul.f32 %v5066_v51, %v13010_v55  ;;  %v5167_v51 = vmul.f32 %v13018_v9, %v1933_v19 }
 0x9ee   : > { %v13227_v31 = vpop.f32.mrf.mxu1 }
 0x9ef   : > { %v5262_v53 = vadd.f32 %v5214_v35, %v5166_v58  ;;  %8453 = vmatmul.msk.f32.gmra.mxu0 %vm2035_vm9, %v4485_v16  ;;  %8533 = vmatmul.msk.f32.gmra.mxu2 %vm2035_vm9, %v13227_v31  ;;  %v13244_v35 = vpop.f32.mrf.mxu2  ;;  %v4439_v16 = vmul.f32 0.99, %v12820_v25  ;;  %v4440_v25 = vmul.f32 0.99, %v12835_v62  ;;  %v4441_v62 = vmul.f32 0.99, %v12843_v44 }
 0x9f0   : > { %v4394_v44 = vmul.f32 0.01, %v15384_v40  ;;  %v4443_v40 = vmul.f32 0.99, %v12873_v46  ;;  %v4396_v46 = vmul.f32 0.01, %v15400_v22 }
 0x9f1   : > { %8485 = vmatmul.msk.f32.gmra.mxu1 %vm2035_vm9, %v5262_v53  ;;  %v5314_v53 = vld [vmem:[%s14873_s7 + $0x130] sm:$0xff] }
 0x9f2   : > { %6084 = vmatpush.msrb.mxu3 %v5314_v53 }
 0x9f4   : > { %v5069_v32 = vpop.f32.mrf.mxu0 }
 0x9f5   : > { %v5215_v37 = vmul.f32 %v5069_v32, %v13024_v56  ;;  %v4391_v32 = vmul.f32 0.01, %v15356_v27 }
 0x9f6   : > { %v13239_v52 = vpop.f32.mrf.mxu1 }
 0x9f7   : > { %v5263_v58 = vadd.f32 %v5215_v37, %v5167_v51  ;;  %8454 = vmatmul.msk.f32.gmra.mxu0 %vm2035_vm9, %v4486_v28  ;;  %8534 = vmatmul.msk.f32.gmra.mxu2 %vm2035_vm9, %v13239_v52  ;;  %v4487_v19 = vadd.f32 %v4439_v16, %v4391_v32  ;;  %v13261_v27 = vpop.f32.mrf.mxu2  ;;  %v4392_v28 = vmul.f32 0.01, %v15365_v6  ;;  %v4393_v6 = vmul.f32 0.01, %v15371_v24 }
 0x9f8   : > { %v4442_v24 = vmul.f32 0.99, %v12859_v13  ;;  %v4395_v13 = vmul.f32 0.01, %v15394_v8  ;;  %v4444_v8 = vmul.f32 0.99, %v12897_v50 }
 0x9f9   : > { %8486 = vmatmul.msk.f32.gmra.mxu1 %vm2035_vm9, %v5263_v58  ;;  %v1937_v58 = vpop.permute.xlu2 %1936  ;;  %v4488_v54 = vadd.f32 %v4440_v25, %v4392_v28  ;;  %v4445_v50 = vmul.f32 0.99, %v12921_v21  ;;  %v15498_v21 = vld [vmem:[#allocation10_spill] sm:$0xff] }
 0x9fa   : > { %v5169_v16 = vmul.f32 %v13045_v14, %v1937_v58  ;;  %v4489_v58 = vadd.f32 %v4441_v62, %v4393_v6  ;;  %v4490_v6 = vadd.f32 %v4442_v24, %v4394_v44  ;;  %v4491_v44 = vadd.f32 %v4443_v40, %v4395_v13 }
 0x9fb   : > { %v4492_v13 = vadd.f32 %v4444_v8, %v4396_v46 }
 0x9fc   : > { %v5072_v45 = vpop.f32.mrf.mxu0 }
 0x9fd   : > { %v5216_v10 = vmul.f32 %v5072_v45, %v13037_v11 }
 0x9fe   : > { %v13254_v51 = vpop.f32.mrf.mxu1 }
 0x9ff   : > { %v5264_v37 = vadd.f32 %v5216_v10, %v5168_v0  ;;  %8455 = vmatmul.msk.f32.gmra.mxu0 %vm2035_vm9, %v4487_v19  ;;  %8535 = vmatmul.msk.f32.gmra.mxu2 %vm2035_vm9, %v13254_v51  ;;  %v1939_v10 = vpop.permute.xlu1 %1938 }
 0xa00   : > { %v5170_v25 = vmul.f32 %v13058_v36, %v1939_v10 }
 0xa01   : > { %8487 = vmatmul.msk.f32.gmra.mxu1 %vm2035_vm9, %v5264_v37  ;;  %v13274_v37 = vpop.f32.mrf.mxu2 }
 0xa04   : > { %v5075_v53 = vpop.f32.mrf.mxu0 }
 0xa05   : > { %v5217_v32 = vmul.f32 %v5075_v53, %v13050_v15 }
 0xa06   : > { %v13266_v45 = vpop.f32.mrf.mxu1 }
 0xa07   : > { %v5265_v0 = vadd.f32 %v5217_v32, %v5169_v16  ;;  %8456 = vmatmul.msk.f32.gmra.mxu0 %vm2035_vm9, %v4488_v54  ;;  %8536 = vmatmul.msk.f32.gmra.mxu2 %vm2035_vm9, %v13266_v45  ;;  %v1941_v32 = vpop.permute.xlu0 %1940 }
 0xa09   : > { %8488 = vmatmul.msk.f32.gmra.mxu1 %vm2035_vm9, %v5265_v0  ;;  %v5171_v0 = vmul.f32 %v13071_v1, %v1941_v32 }
 0xa0c   : > { %v5078_v19 = vpop.f32.mrf.mxu0 }
 0xa0d   : > { %v5218_v28 = vmul.f32 %v5078_v19, %v13063_v23  ;;  %v13290_v19 = vpop.f32.mrf.mxu2 }
 0xa0e   : > { %v13278_v53 = vpop.f32.mrf.mxu1 }
 0xa0f   : > { %v5266_v16 = vadd.f32 %v5218_v28, %v5170_v25  ;;  %8457 = vmatmul.msk.f32.gmra.mxu0 %vm2035_vm9, %v4489_v58  ;;  %8537 = vmatmul.msk.f32.gmra.mxu2 %vm2035_vm9, %v13278_v53  ;;  %v1943_v28 = vpop.permute.xlu2 %1942 }
 0xa11   : > { %8489 = vmatmul.msk.f32.gmra.mxu1 %vm2035_vm9, %v5266_v16  ;;  %v5172_v16 = vmul.f32 %v13090_v39, %v1943_v28 }
 0xa14   : > { %v5081_v54 = vpop.f32.mrf.mxu0 }
 0xa15   : > { %v5219_v62 = vmul.f32 %v5081_v54, %v13076_v49 }
 0xa16   : > { %v13288_v10 = vpop.f32.mrf.mxu1 }
 0xa17   : > { %v5267_v25 = vadd.f32 %v5219_v62, %v5171_v0  ;;  %8458 = vmatmul.msk.f32.gmra.mxu0 %vm2035_vm9, %v4490_v6  ;;  %8538 = vmatmul.msk.f32.gmra.mxu2 %vm2035_vm9, %v13288_v10  ;;  %v13305_v0 = vpop.f32.mrf.mxu2  ;;  %v1945_v62 = vpop.permute.xlu1 %1944 }
 0xa19   : > { %8490 = vmatmul.msk.f32.gmra.mxu1 %vm2035_vm9, %v5267_v25  ;;  %v5173_v25 = vmul.f32 %v13112_v33, %v1945_v62 }
 0xa1c   : > { %v5084_v58 = vpop.f32.mrf.mxu0 }
 0xa1d   : > { %v5220_v24 = vmul.f32 %v5084_v58, %v13098_v5 }
 0xa1e   : > { %v13300_v32 = vpop.f32.mrf.mxu1 }
 0xa1f   : > { %v5268_v54 = vadd.f32 %v5220_v24, %v5172_v16  ;;  %8459 = vmatmul.msk.f32.gmra.mxu0 %vm2035_vm9, %v4491_v44  ;;  %8539 = vmatmul.msk.f32.gmra.mxu2 %vm2035_vm9, %v13300_v32  ;;  %v13319_v22 = vpop.f32.mrf.mxu2  ;;  %v15497_v16 = vld [vmem:[#allocation94_spill] sm:$0xff]  ;;  %v1947_v44 = vpop.permute.xlu0 %1946 }
 0xa20   : > { %15496 = vst [vmem:[#allocation84_spill] sm:$0xff] %v13319_v22  ;;  %v4397_v24 = vmul.f32 0.01, %v15497_v16  ;;  %v5174_v8 = vmul.f32 %v13125_v38, %v1947_v44  ;;  %v1949_v16 = vpop.permute.xlu2 %1948 }
 0xa21   : > { %8491 = vmatmul.msk.f32.gmra.mxu1 %vm2035_vm9, %v5268_v54 }
 0xa22   : > { %v4493_v62 = vadd.f32 %v4445_v50, %v4397_v24  ;;  %v5175_v50 = vmul.f32 %v13138_v12, %v1949_v16 }
 0xa24   : > { %v5087_v6 = vpop.f32.mrf.mxu0 }
 0xa25   : > { %v5221_v40 = vmul.f32 %v5087_v6, %v13117_v3 }
 0xa26   : > { %v13312_v28 = vpop.f32.mrf.mxu1 }
 0xa27   : > { %v5269_v58 = vadd.f32 %v5221_v40, %v5173_v25  ;;  %8460 = vmatmul.msk.f32.gmra.mxu0 %vm2035_vm9, %v4492_v13  ;;  %8540 = vmatmul.msk.f32.gmra.mxu2 %vm2035_vm9, %v13312_v28  ;;  %v4446_v40 = vmul.f32 0.99, %v15498_v21  ;;  %v15499_v13 = vld [vmem:[#allocation102_spill] sm:$0xff]  ;;  %v13332_v44 = vpop.f32.mrf.mxu2 }
 0xa29   : > { %8492 = vmatmul.msk.f32.gmra.mxu1 %vm2035_vm9, %v5269_v58  ;;  %v4398_v58 = vmul.f32 0.01, %v15499_v13 }
 0xa2c   : > { %v5090_v54 = vpop.f32.mrf.mxu0 }
 0xa2d   : > { %v5222_v46 = vmul.f32 %v5090_v54, %v13130_v41  ;;  %v4494_v54 = vadd.f32 %v4446_v40, %v4398_v58  ;;  %v1969_v58 = vpop.permute.xlu0 %1968 }
 0xa2e   : > { %v13324_v6 = vpop.f32.mrf.mxu1 }
 0xa2f   : > { %v5270_v25 = vadd.f32 %v5222_v46, %v5174_v8  ;;  %8461 = vmatmul.msk.f32.gmra.mxu0 %vm2035_vm9, %v4493_v62  ;;  %8541 = vmatmul.msk.f32.gmra.mxu2 %vm2035_vm9, %v13324_v6  ;;  %v1967_v62 = vpop.permute.xlu1 %1966 }
 0xa30   : > { %v5176_v21 = vmul.f32 %v12903_v2, %v1967_v62  ;;  %v1971_v62 = vpop.permute.xlu2 %1970 }
 0xa31   : > { %8493 = vmatmul.msk.f32.gmra.mxu1 %vm2035_vm9, %v5270_v25 }
 0xa34   : > { %v5093_v22 = vpop.f32.mrf.mxu0 }
 0xa35   : > { %v5223_v24 = vmul.f32 %v5093_v22, %v13143_v59  ;;  %v13346_v22 = vpop.f32.mrf.mxu2 }
 0xa36   : > { %v13336_v8 = vpop.f32.mrf.mxu1 }
 0xa37   : > { %v5271_v46 = vadd.f32 %v5223_v24, %v5175_v50  ;;  %8462 = vmatmul.msk.f32.gmra.mxu0 %vm2035_vm9, %v4494_v54  ;;  %8542 = vmatmul.msk.f32.gmra.mxu2 %vm2035_vm9, %v13336_v8  ;;  %v5177_v24 = vmul.f32 %v12928_v57, %v1969_v58  ;;  %v1973_v58 = vpop.permute.xlu1 %1972 }
 0xa39   : > { %8494 = vmatmul.msk.f32.gmra.mxu1 %vm2035_vm9, %v5271_v46 }
 0xa3c   : > { %v5096_v25 = vpop.f32.mrf.mxu0 }
 0xa3d   : > { %v5224_v13 = vmul.f32 %v5096_v25, %v12911_v63  ;;  %v13357_v63 = vpop.f32.mrf.mxu2 }
 0xa3e   : > { %v13344_v16 = vpop.f32.mrf.mxu1 }
 0xa3f   : > { %v5272_v40 = vadd.f32 %v5224_v13, %v5176_v21  ;;  %8543 = vmatmul.msk.f32.gmra.mxu2 %vm2035_vm9, %v13344_v16  ;;  %v5178_v21 = vmul.f32 %v12949_v30, %v1971_v62 }
 0xa41   : > { %8495 = vmatmul.msk.f32.gmra.mxu1 %vm2035_vm9, %v5272_v40 }
 0xa44   : > { %v5099_v50 = vpop.f32.mrf.mxu0 }
 0xa45   : > { %v5225_v54 = vmul.f32 %v5099_v50, %v12935_v29  ;;  %v13366_v29 = vpop.f32.mrf.mxu2 }
 0xa46   : > { %v13353_v46 = vpop.f32.mrf.mxu1  ;;  %15500 = vst [vmem:[#allocation69_spill] sm:$0xff] %v13366_v29 }
 0xa47   : > { %v5273_v2 = vadd.f32 %v5225_v54, %v5177_v24  ;;  %8544 = vmatmul.msk.f32.gmra.mxu2 %vm2035_vm9, %v13353_v46  ;;  %v5179_v24 = vmul.f32 %v12962_v60, %v1973_v58  ;;  %v1977_v58 = vpop.permute.xlu2 %1976 }
 0xa49   : > { %8496 = vmatmul.msk.f32.gmra.mxu1 %vm2035_vm9, %v5273_v2 }
 0xa4c   : > { %v5102_v25 = vpop.f32.mrf.mxu0 }
 0xa4d   : > { %v5226_v13 = vmul.f32 %v5102_v25, %v12954_v7  ;;  %v5313_v7 = vld [vmem:[%s14873_s7 + $0x128] sm:$0xff]  ;;  %v13379_v62 = vpop.f32.mrf.mxu2  ;;  %v1975_v25 = vpop.permute.xlu0 %1974 }
 0xa4e   : > { %v13362_v40 = vpop.f32.mrf.mxu1  ;;  %15501 = vst [vmem:[#allocation101_spill] sm:$0xff] %v13379_v62  ;;  %6085 = vmatpush.msrb.mxu3 %v5313_v7  ;;  %v5180_v60 = vmul.f32 %v12977_v61, %v1975_v25  ;;  %v6669_v62 = vld [vmem:[%s9307_s22 + $0x10] sm:$0xff] }
 0xa4f   : > { %v5274_v57 = vadd.f32 %v5226_v13, %v5178_v21  ;;  %8545 = vmatmul.msk.f32.gmra.mxu2 %vm2035_vm9, %v13362_v40 }
 0xa51   : > { %8497 = vmatmul.msk.f32.gmra.mxu1 %vm2035_vm9, %v5274_v57 }
 0xa54   : > { %v5105_v50 = vpop.f32.mrf.mxu0 }
 0xa55   : > { %v5227_v54 = vmul.f32 %v5105_v50, %v12968_v18 }
 0xa56   : > { %v13371_v2 = vpop.f32.mrf.mxu1 }
 0xa57   : > { %v5275_v30 = vadd.f32 %v5227_v54, %v5179_v24  ;;  %8546 = vmatmul.msk.f32.gmra.mxu2 %vm2035_vm9, %v13371_v2  ;;  %v13388_v24 = vpop.f32.mrf.mxu2  ;;  %v5181_v54 = vmul.f32 %v12990_v4, %v1977_v58 }
 0xa58   : > { %15502 = vst [vmem:[#allocation7_spill] sm:$0xff] %v13388_v24 }
 0xa59   : > { %8498 = vmatmul.msk.f32.gmra.mxu1 %vm2035_vm9, %v5275_v30 }
 0xa5c   : > { %v5108_v21 = vpop.f32.mrf.mxu0 }
 0xa5d   : > { %v5228_v18 = vmul.f32 %v5108_v21, %v12982_v20  ;;  %v1979_v20 = vpop.permute.xlu1 %1978 }
 0xa5e   : > { %v13383_v13 = vpop.f32.mrf.mxu1  ;;  %v5182_v21 = vmul.f32 %v13004_v17, %v1979_v20 }
 0xa5f   : > { %v5276_v57 = vadd.f32 %v5228_v18, %v5180_v60  ;;  %8547 = vmatmul.msk.f32.gmra.mxu2 %vm2035_vm9, %v13383_v13 }
 0xa61   : > { %8499 = vmatmul.msk.f32.gmra.mxu1 %vm2035_vm9, %v5276_v57  ;;  %v13401_v57 = vpop.f32.mrf.mxu2 }
 0xa62   : > { %15503 = vst [vmem:[#allocation86_spill] sm:$0xff] %v13401_v57 }
 0xa64   : > { %v5111_v50 = vpop.f32.mrf.mxu0 }
 0xa65   : > { %v5229_v30 = vmul.f32 %v5111_v50, %v12996_v43  ;;  %v1981_v43 = vpop.permute.xlu0 %1980 }
 0xa66   : > { %v13392_v7 = vpop.f32.mrf.mxu1  ;;  %v5183_v50 = vmul.f32 %v13018_v9, %v1981_v43 }
 0xa67   : > { %v5277_v61 = vadd.f32 %v5229_v30, %v5181_v54  ;;  %8548 = vmatmul.msk.f32.gmra.mxu2 %vm2035_vm9, %v13392_v7 }
 0xa69   : > { %8500 = vmatmul.msk.f32.gmra.mxu1 %vm2035_vm9, %v5277_v61  ;;  %v1983_v61 = vpop.permute.xlu2 %1982 }
 0xa6c   : > { %v5114_v25 = vpop.f32.mrf.mxu0 }
 0xa6d   : > { %v5230_v60 = vmul.f32 %v5114_v25, %v13010_v55  ;;  %v13412_v55 = vpop.f32.mrf.mxu2  ;;  %v5184_v25 = vmul.f32 %v13032_v48, %v1983_v61 }
 0xa6e   : > { %v13399_v18 = vpop.f32.mrf.mxu1  ;;  %15504 = vst [vmem:[#allocation115_spill] sm:$0xff] %v13412_v55 }
 0xa6f   : > { %v5278_v4 = vadd.f32 %v5230_v60, %v5182_v21  ;;  %8549 = vmatmul.msk.f32.gmra.mxu2 %vm2035_vm9, %v13399_v18 }
 0xa71   : > { %8501 = vmatmul.msk.f32.gmra.mxu1 %vm2035_vm9, %v5278_v4  ;;  %v1985_v4 = vpop.permute.xlu1 %1984 }
 0xa74   : > { %v5117_v58 = vpop.f32.mrf.mxu0 }
 0xa75   : > { %v5231_v54 = vmul.f32 %v5117_v58, %v13024_v56  ;;  %v13422_v56 = vpop.f32.mrf.mxu2  ;;  %v5185_v58 = vmul.f32 %v13045_v14, %v1985_v4 }
 0xa76   : > { %v13408_v30 = vpop.f32.mrf.mxu1  ;;  %15505 = vst [vmem:[#allocation116_spill] sm:$0xff] %v13422_v56 }
 0xa77   : > { %v5279_v17 = vadd.f32 %v5231_v54, %v5183_v50  ;;  %8550 = vmatmul.msk.f32.gmra.mxu2 %vm2035_vm9, %v13408_v30 }
 0xa79   : > { %8502 = vmatmul.msk.f32.gmra.mxu1 %vm2035_vm9, %v5279_v17 }
 0xa7c   : > { %v5120_v20 = vpop.f32.mrf.mxu0 }
 0xa7d   : > { %v5232_v21 = vmul.f32 %v5120_v20, %v13037_v11  ;;  %v1987_v11 = vpop.permute.xlu0 %1986  ;;  %v13431_v61 = vpop.f32.mrf.mxu2 }
 0xa7e   : > { %v13417_v60 = vpop.f32.mrf.mxu1  ;;  %15506 = vst [vmem:[#allocation25_spill] sm:$0xff] %v13431_v61  ;;  %v5186_v20 = vmul.f32 %v13058_v36, %v1987_v11 }
 0xa7f   : > { %v5280_v9 = vadd.f32 %v5232_v21, %v5184_v25  ;;  %8551 = vmatmul.msk.f32.gmra.mxu2 %vm2035_vm9, %v13417_v60 }
 0xa81   : > { %8503 = vmatmul.msk.f32.gmra.mxu1 %vm2035_vm9, %v5280_v9 }
 0xa84   : > { %v5123_v43 = vpop.f32.mrf.mxu0 }
 0xa85   : > { %v5233_v50 = vmul.f32 %v5123_v43, %v13050_v15  ;;  %v1989_v15 = vpop.permute.xlu2 %1988 }
 0xa86   : > { %v13426_v54 = vpop.f32.mrf.mxu1  ;;  %v5187_v4 = vmul.f32 %v13071_v1, %v1989_v15 }
 0xa87   : > { %v5281_v48 = vadd.f32 %v5233_v50, %v5185_v58  ;;  %8552 = vmatmul.msk.f32.gmra.mxu2 %vm2035_vm9, %v13426_v54  ;;  %v13444_v50 = vpop.f32.mrf.mxu2 }
 0xa88   : > { %15507 = vst [vmem:[#allocation117_spill] sm:$0xff] %v13444_v50 }
 0xa89   : > { %8504 = vmatmul.msk.f32.gmra.mxu1 %vm2035_vm9, %v5281_v48 }
 0xa8c   : > { %v5126_v17 = vpop.f32.mrf.mxu0 }
 0xa8d   : > { %v5234_v25 = vmul.f32 %v5126_v17, %v13063_v23  ;;  %v1991_v23 = vpop.permute.xlu1 %1990 }
 0xa8e   : > { %v13435_v21 = vpop.f32.mrf.mxu1  ;;  %v5188_v11 = vmul.f32 %v13090_v39, %v1991_v23 }
 0xa8f   : > { %v5282_v14 = vadd.f32 %v5234_v25, %v5186_v20  ;;  %8553 = vmatmul.msk.f32.gmra.mxu2 %vm2035_vm9, %v13435_v21  ;;  %v1993_v25 = vpop.permute.xlu0 %1992 }
 0xa90   : > { %v5189_v15 = vmul.f32 %v13112_v33, %v1993_v25 }
 0xa91   : > { %8505 = vmatmul.msk.f32.gmra.mxu1 %vm2035_vm9, %v5282_v14 }
 0xa94   : > { %v5129_v9 = vpop.f32.mrf.mxu0 }
 0xa95   : > { %v5235_v43 = vmul.f32 %v5129_v9, %v13076_v49  ;;  %v13455_v49 = vpop.f32.mrf.mxu2 }
 0xa96   : > { %v13442_v58 = vpop.f32.mrf.mxu1  ;;  %15508 = vst [vmem:[#allocation63_spill] sm:$0xff] %v13455_v49 }
 0xa97   : > { %v5283_v36 = vadd.f32 %v5235_v43, %v5187_v4  ;;  %8554 = vmatmul.msk.f32.gmra.mxu2 %vm2035_vm9, %v13442_v58  ;;  %v1995_v43 = vpop.permute.xlu2 %1994 }
 0xa98   : > { %v5190_v23 = vmul.f32 %v13125_v38, %v1995_v43  ;;  %v6681_v43 = vld [vmem:[%s9307_s22 + $0x70] sm:$0xff] }
 0xa99   : > { %8506 = vmatmul.msk.f32.gmra.mxu1 %vm2035_vm9, %v5283_v36  ;;  %6755 = vperm.xlu2 %8720, %v6681_v43  }
 0xa9c   : > { %v5132_v48 = vpop.f32.mrf.mxu0 }
 0xa9d   : > { %v5236_v17 = vmul.f32 %v5132_v48, %v13098_v5  ;;  %v13465_v4 = vpop.f32.mrf.mxu2 }
 0xa9e   : > { %v13451_v20 = vpop.f32.mrf.mxu1  ;;  %15509 = vst [vmem:[#allocation93_spill] sm:$0xff] %v13465_v4 }
 0xa9f   : > { %v5284_v1 = vadd.f32 %v5236_v17, %v5188_v11  ;;  %8555 = vmatmul.msk.f32.gmra.mxu2 %vm2035_vm9, %v13451_v20  ;;  %v1997_v17 = vpop.permute.xlu1 %1996 }
 0xaa0   : > { %v5191_v38 = vmul.f32 %v13138_v12, %v1997_v17  ;;  %v5638_v12 = vmul.f32 %v13154_v34, %v13154_v34  ;;  %v5655_v34 = vmul.f32 %v13353_v46, %v13353_v46 }
 0xaa1   : > { %8507 = vmatmul.msk.f32.gmra.mxu1 %vm2035_vm9, %v5284_v1 }
 0xaa2   : > { %v5692_v46 = vsel %vm2035_vm9, %v5655_v34, 0.0  ;;  %v6671_v34 = vld [vmem:[%s9307_s22 + $0x20] sm:$0xff] }
 0xaa4   : > { %v5135_v14 = vpop.f32.mrf.mxu0 }
 0xaa5   : > { %v5237_v9 = vmul.f32 %v5135_v14, %v13117_v3  ;;  %v6682_v3 = vld [vmem:[%s9307_s22 + $0x78] sm:$0xff]  ;;  %v13475_v25 = vpop.f32.mrf.mxu2 }
 0xaa6   : > { %v13460_v39 = vpop.f32.mrf.mxu1  ;;  %6760 = vperm.xlu0 %8719, %v6682_v3   ;;  %15510 = vst [vmem:[#allocation36_spill] sm:$0xff] %v13475_v25 }
 0xaa7   : > { %v5285_v5 = vadd.f32 %v5237_v9, %v5189_v15  ;;  %8556 = vmatmul.msk.f32.gmra.mxu2 %vm2035_vm9, %v13460_v39  ;;  %v5654_v9 = vmul.f32 %v13344_v16, %v13344_v16 }
 0xaa9   : > { %8508 = vmatmul.msk.f32.gmra.mxu1 %vm2035_vm9, %v5285_v5  ;;  %v5312_v5 = vld [vmem:[%s14873_s7 + $0x120] sm:$0xff]  ;;  %v5687_v16 = vsel %vm2035_vm9, %v5654_v9, 0.0  ;;  %v5639_v9 = vmul.f32 %v13167_v26, %v13167_v26  ;;  %v5656_v26 = vmul.f32 %v13362_v40, %v13362_v40 }
 0xaaa   : > { %6086 = vmatpush.msrb.mxu3 %v5312_v5  ;;  %v6674_v5 = vld [vmem:[%s9307_s22 + $0x38] sm:$0xff] }
 0xaab   : > { %v5697_v40 = vsel %vm2035_vm9, %v5656_v26, 0.0  ;;  %v5641_v26 = vmul.f32 %v13193_v42, %v13193_v42 }
 0xaac   : > { %v5138_v36 = vpop.f32.mrf.mxu0 }
 0xaad   : > { %v5238_v48 = vmul.f32 %v5138_v36, %v13130_v41  ;;  %v6680_v36 = vld [vmem:[%s9307_s22 + $0x68] sm:$0xff] }
 0xaae   : > { %v13469_v11 = vpop.f32.mrf.mxu1  ;;  %6750 = vperm.xlu1 %8721, %v6680_v36   ;;  %v5691_v36 = vsel %vm2035_vm9, %v5639_v9, 0.0 }
 0xaaf   : > { %v5286_v33 = vadd.f32 %v5238_v48, %v5190_v23  ;;  %8557 = vmatmul.msk.f32.gmra.mxu2 %vm2035_vm9, %v13469_v11  ;;  %v5686_v48 = vsel %vm2035_vm9, %v5638_v12, 0.0 }
 0xab0   : > { %v5688_v17 = vadd.f32 %v5687_v16, %v5686_v48 }
 0xab1   : > { %8509 = vmatmul.msk.f32.gmra.mxu1 %vm2035_vm9, %v5286_v33  ;;  %v13496_v33 = vpop.f32.mrf.mxu2 }
 0xab4   : > { %v5141_v1 = vpop.f32.mrf.mxu0 }
 0xab5   : > { %v5239_v41 = vmul.f32 %v5141_v1, %v13143_v59  ;;  %v6677_v59 = vld [vmem:[%s9307_s22 + $0x50] sm:$0xff] }
 0xab6   : > { %v13479_v14 = vpop.f32.mrf.mxu1  ;;  %6735 = vperm.xlu0 %8719, %v6677_v59   ;;  %v5693_v59 = vadd.f32 %v5692_v46, %v5691_v36 }
 0xab7   : > { %v5287_v15 = vadd.f32 %v5239_v41, %v5191_v38  ;;  %8558 = vmatmul.msk.f32.gmra.mxu2 %vm2035_vm9, %v13479_v14  ;;  %v6679_v41 = vld [vmem:[%s9307_s22 + $0x60] sm:$0xff] }
 0xab8   : > { %6745 = vperm.xlu2 %8720, %v6679_v41   ;;  %v5640_v41 = vmul.f32 %v13181_v47, %v13181_v47 }
 0xab9   : > { %8510 = vmatmul.msk.f32.gmra.mxu1 %vm2035_vm9, %v5287_v15  ;;  %v6678_v15 = vld [vmem:[%s9307_s22 + $0x58] sm:$0xff]  ;;  %v13515_v16 = vpop.f32.mrf.mxu2 }
 0xaba   : > { %6740 = vperm.xlu1 %8721, %v6678_v15   ;;  %15511 = vst [vmem:[#allocation103_spill] sm:$0xff] %v13515_v16  ;;  %v5696_v46 = vsel %vm2035_vm9, %v5640_v41, 0.0  ;;  %v6668_v41 = vld [vmem:[%s9307_s22 + $0x8] sm:$0xff] }
 0xabb   : > { %v5698_v36 = vadd.f32 %v5697_v40, %v5696_v46  ;;  %v5701_v46 = vsel %vm2035_vm9, %v5641_v26, 0.0  ;;  %v5658_v26 = vmul.f32 %v13383_v13, %v13383_v13 }
 0xabd   : > { %v5707_v13 = vsel %vm2035_vm9, %v5658_v26, 0.0 }
 0xabe   : > { %v5590_v23 = vpop.f32.mrf.mxu1  ;;  %6720 = vperm.xlu0 %8719, %v6674_v5  }
 0xabf   : > { %v5670_v3 = vmul.f32 %v5590_v23, %v5590_v23  ;;  %8559 = vmatmul.msk.f32.gmra.mxu2 %vm2035_vm9, %v5590_v23 }
 0xac1   : > { %v5689_v1 = vsel %vm2035_vm9, %v5670_v3, 0.0  ;;  %v13540_v29 = vpop.f32.mrf.mxu2 }
 0xac2   : > { %v13502_v38 = vadd.f32 %v5689_v1, %v5688_v17  ;;  %v6676_v17 = vld [vmem:[%s9307_s22 + $0x48] sm:$0xff]  ;;  %v6675_v1 = vld [vmem:[%s9307_s22 + $0x40] sm:$0xff] }
 0xac3   : > { %6730 = vperm.xlu2 %8720, %v6676_v17   ;;  %6725 = vperm.xlu1 %8721, %v6675_v1  }
 0xac4   : > { %9031 = vrsqrt.f32 %v13502_v38  ;;  %vm5773_vm5 = vcmp.eq.f32.partialorder %v13502_v38, inf  ;;  %vm5775_vm6 = vcmp.eq.f32.partialorder %v13502_v38, 0.0 }
 0xac6   : > { %v5593_v43 = vpop.f32.mrf.mxu1  ;;  %6705 = vperm.xlu0 %8719, %v6671_v34   ;;  %v6673_v34 = vld [vmem:[%s9307_s22 + $0x30] sm:$0xff] }
 0xac7   : > { %v5671_v12 = vmul.f32 %v5593_v43, %v5593_v43  ;;  %8560 = vmatmul.msk.f32.gmra.mxu2 %vm2035_vm9, %v5593_v43 }
 0xac9   : > { %v5694_v23 = vsel %vm2035_vm9, %v5671_v12, 0.0  ;;  %v5657_v12 = vmul.f32 %v13371_v2, %v13371_v2 }
 0xaca   : > { %v9032_v48 = vpop.eup %9031  ;;  %v13518_v3 = vadd.f32 %v5694_v23, %v5693_v59 }
 0xacb   : > { %v5767_v15 = vmul.f32 %v9032_v48, %v13502_v38  ;;  %6715 = vperm.xlu2 %8720, %v6673_v34   ;;  %v5702_v2 = vsel %vm2035_vm9, %v5657_v12, 0.0 }
 0xacc   : > { %9033 = vrsqrt.f32 %v13518_v3  ;;  %vm5785_vm8 = vcmp.eq.f32.partialorder %v13518_v3, inf  ;;  %vm5787_vm10 = vcmp.eq.f32.partialorder %v13518_v3, 0.0 }
 0xacd   : > { %v5768_v5 = vmul.f32 %v9032_v48, %v5767_v15  ;;  %v6672_v15 = vld [vmem:[%s9307_s22 + $0x28] sm:$0xff] }
 0xace   : > { %v5596_v9 = vpop.f32.mrf.mxu1  ;;  %6710 = vperm.xlu1 %8721, %v6672_v15   ;;  %6690 = vperm.xlu0 %8719, %v6668_v41  }
 0xacf   : > { %v5672_v43 = vmul.f32 %v5596_v9, %v5596_v9  ;;  %8561 = vmatmul.msk.f32.gmra.mxu2 %vm2035_vm9, %v5596_v9  ;;  %v5769_v47 = vmul.f32 0.5, %v5768_v5 }
 0xad1   : > { %v5699_v59 = vsel %vm2035_vm9, %v5672_v43, 0.0  ;;  %v5770_v23 = vsub.f32 1.5, %v5769_v47 }
 0xad2   : > { %v9034_v17 = vpop.eup %9033  ;;  %v13535_v1 = vadd.f32 %v5699_v59, %v5698_v36  ;;  %v5703_v59 = vadd.f32 %v5702_v2, %v5701_v46 }
 0xad3   : > { %v5771_v9 = vmul.f32 %v9032_v48, %v5770_v23  ;;  %v5779_v40 = vmul.f32 %v9034_v17, %v13518_v3  ;;  %v5776_v48 = vand.u32 2147483648, %v13502_v38 }
 0xad4   : > { %9035 = vrsqrt.f32 %v13535_v1  ;;  %vm5797_vm11 = vcmp.eq.f32.partialorder %v13535_v1, inf  ;;  %vm5799_vm12 = vcmp.eq.f32.partialorder %v13535_v1, 0.0 }
 0xad5   : > { %v5772_v5 = vmul.f32 %v5771_v9, %v13502_v38  ;;  %v5780_v42 = vmul.f32 %v9034_v17, %v5779_v40  ;;  %v15512_v9 = vld [vmem:[#allocation100_spill] sm:$0xff] }
 0xad6   : > { %v5599_v43 = vpop.f32.mrf.mxu1  ;;  %v5642_v40 = vmul.f32 %v15512_v9, %v15512_v9  ;;  %6695 = vperm.xlu1 %8721, %v6669_v62  }
 0xad7   : > { %v5673_v47 = vmul.f32 %v5599_v43, %v5599_v43  ;;  %8562 = vmatmul.msk.f32.gmra.mxu2 %vm2035_vm9, %v5599_v43  ;;  %v5774_v36 = vsel %vm5773_vm5, %v13502_v38, %v5772_v5  ;;  %v5781_v12 = vmul.f32 0.5, %v5780_v42  ;;  %v6670_v5 = vld [vmem:[%s9307_s22 + $0x18] sm:$0xff]  ;;  %v13565_v42 = vpop.f32.mrf.mxu2 }
 0xad8   : > { %v5777_v23 = vsel %vm5775_vm6, %v5776_v48, %v5774_v36  ;;  %6700 = vperm.xlu2 %8720, %v6670_v5   ;;  %v15513_v5 = vld [vmem:[#allocation56_spill] sm:$0xff] }
 0xad9   : > { %v5704_v34 = vsel %vm2035_vm9, %v5673_v47, 0.0  ;;  %8511 = vmatmul.msk.f32.vlgmr.msrb.gmra.mxu3 %vm2035_vm9, %v5777_v23  ;;  %v5782_v15 = vsub.f32 1.5, %v5781_v12  ;;  %v5706_v47 = vsel %vm2035_vm9, %v5642_v40, 0.0 }
 0xada   : > { %v9036_v41 = vpop.eup %9035  ;;  %v13558_v43 = vadd.f32 %v5704_v34, %v5703_v59  ;;  %v5708_v23 = vadd.f32 %v5707_v13, %v5706_v47  ;;  %v5659_v34 = vmul.f32 %v13392_v7, %v13392_v7 }
 0xadb   : > { %v5783_v38 = vmul.f32 %v9034_v17, %v5782_v15  ;;  %v5791_v2 = vmul.f32 %v9036_v41, %v13535_v1  ;;  %v5788_v17 = vand.u32 2147483648, %v13518_v3 }
 0xadc   : > { %9037 = vrsqrt.f32 %v13558_v43  ;;  %v5712_v7 = vsel %vm2035_vm9, %v5659_v34, 0.0  ;;  %vm5809_vm14 = vcmp.eq.f32.partialorder %v13558_v43, inf  ;;  %vm5811_vm15 = vcmp.eq.f32.partialorder %v13558_v43, 0.0 }
 0xadd   : > { %v5784_v46 = vmul.f32 %v5783_v38, %v13518_v3  ;;  %v5792_v48 = vmul.f32 %v9036_v41, %v5791_v2  ;;  %v5643_v38 = vmul.f32 %v15513_v5, %v15513_v5 }
 0xade   : > { %v5602_v36 = vpop.f32.mrf.mxu1 }
 0xadf   : > { %v5674_v12 = vmul.f32 %v5602_v36, %v5602_v36  ;;  %8563 = vmatmul.msk.f32.gmra.mxu2 %vm2035_vm9, %v5602_v36  ;;  %v5786_v62 = vsel %vm5785_vm8, %v13518_v3, %v5784_v46  ;;  %v5793_v59 = vmul.f32 0.5, %v5792_v48  ;;  %v6667_v46 = vld [vmem:[%s9307_s22] sm:$0xff]  ;;  %v5711_v47 = vsel %vm2035_vm9, %v5643_v38, 0.0 }
 0xae0   : > { %v5789_v26 = vsel %vm5787_vm10, %v5788_v17, %v5786_v62  ;;  %6685 = vperm.xlu2 %8720, %v6667_v46   ;;  %v13590_v62 = vpop.f32.mrf.mxu2  ;;  %v5644_v46 = vmul.f32 %v13227_v31, %v13227_v31 }
 0xae1   : > { %v5709_v15 = vsel %vm2035_vm9, %v5674_v12, 0.0  ;;  %8512 = vmatmul.msk.f32.gmra.mxu3 %vm2035_vm9, %v5789_v26  ;;  %v5794_v9 = vsub.f32 1.5, %v5793_v59  ;;  %v5800_v12 = vand.u32 2147483648, %v13535_v1  ;;  %v5713_v26 = vadd.f32 %v5712_v7, %v5711_v47 }
 0xae2   : > { %v9038_v40 = vpop.eup %9037  ;;  %v13580_v2 = vadd.f32 %v5709_v15, %v5708_v23  ;;  %v5660_v15 = vmul.f32 %v13399_v18, %v13399_v18 }
 0xae3   : > { %v5795_v36 = vmul.f32 %v9036_v41, %v5794_v9  ;;  %v5803_v3 = vmul.f32 %v9038_v40, %v13558_v43 }
 0xae4   : > { %9039 = vrsqrt.f32 %v13580_v2  ;;  %v5717_v7 = vsel %vm2035_vm9, %v5660_v15, 0.0  ;;  %vm5821_vm13 = vcmp.eq.f32.partialorder %v13580_v2, inf  ;;  %vm5823_vm0 = vcmp.eq.f32.partialorder %v13580_v2, 0.0 }
 0xae5   : > { %v5796_v13 = vmul.f32 %v5795_v36, %v13535_v1  ;;  %v5804_v48 = vmul.f32 %v9038_v40, %v5803_v3 }
 0xae6   : > { %v5605_v17 = vpop.f32.mrf.mxu1 }
 0xae7   : > { %v5675_v41 = vmul.f32 %v5605_v17, %v5605_v17  ;;  %8564 = vmatmul.msk.f32.gmra.mxu2 %vm2035_vm9, %v5605_v17  ;;  %v5798_v59 = vsel %vm5797_vm11, %v13535_v1, %v5796_v13  ;;  %v5805_v23 = vmul.f32 0.5, %v5804_v48  ;;  %v5716_v48 = vsel %vm2035_vm9, %v5644_v46, 0.0 }
 0xae8   : > { %v5801_v34 = vsel %vm5799_vm12, %v5800_v12, %v5798_v59  ;;  %v5812_v17 = vand.u32 2147483648, %v13558_v43 }
 0xae9   : > { %v5714_v9 = vsel %vm2035_vm9, %v5675_v41, 0.0  ;;  %8513 = vmatmul.msk.f32.gmra.mxu3 %vm2035_vm9, %v5801_v34  ;;  %v5806_v5 = vsub.f32 1.5, %v5805_v23  ;;  %v5718_v41 = vadd.f32 %v5717_v7, %v5716_v48  ;;  %v5661_v23 = vmul.f32 %v13408_v30, %v13408_v30 }
 0xaea   : > { %v9040_v38 = vpop.eup %9039  ;;  %v13601_v36 = vadd.f32 %v5714_v9, %v5713_v26  ;;  %v13615_v26 = vpop.f32.mrf.mxu2  ;;  %v5824_v48 = vand.u32 2147483648, %v13580_v2 }
 0xaeb   : > { %v5807_v3 = vmul.f32 %v9038_v40, %v5806_v5  ;;  %v5815_v1 = vmul.f32 %v9040_v38, %v13580_v2  ;;  %v5645_v5 = vmul.f32 %v13239_v52, %v13239_v52  ;;  %v5722_v30 = vsel %vm2035_vm9, %v5661_v23, 0.0 }
 0xaec   : > { %9041 = vrsqrt.f32 %v13601_v36  ;;  %v5646_v23 = vmul.f32 %v13254_v51, %v13254_v51  ;;  %vm5833_vm1 = vcmp.eq.f32.partialorder %v13601_v36, inf  ;;  %v5836_v51 = vand.u32 2147483648, %v13601_v36 }
 0xaed   : > { %v5808_v18 = vmul.f32 %v5807_v3, %v13558_v43  ;;  %v5816_v13 = vmul.f32 %v9040_v38, %v5815_v1  ;;  %vm5835_vm2 = vcmp.eq.f32.partialorder %v13601_v36, 0.0 }
 0xaee   : > { %v5608_v47 = vpop.f32.mrf.mxu1 }
 0xaef   : > { %v5676_v31 = vmul.f32 %v5608_v47, %v5608_v47  ;;  %8565 = vmatmul.msk.f32.gmra.mxu2 %vm2035_vm9, %v5608_v47  ;;  %v5810_v40 = vsel %vm5809_vm14, %v13558_v43, %v5808_v18  ;;  %v5817_v12 = vmul.f32 0.5, %v5816_v13  ;;  %v5721_v18 = vsel %vm2035_vm9, %v5645_v5, 0.0 }
 0xaf0   : > { %v5813_v59 = vsel %vm5811_vm15, %v5812_v17, %v5810_v40  ;;  %v5723_v17 = vadd.f32 %v5722_v30, %v5721_v18  ;;  %v5662_v40 = vmul.f32 %v13417_v60, %v13417_v60  ;;  %v5726_v30 = vsel %vm2035_vm9, %v5646_v23, 0.0 }
 0xaf1   : > { %v5719_v34 = vsel %vm2035_vm9, %v5676_v31, 0.0  ;;  %8514 = vmatmul.msk.f32.gmra.mxu3 %vm2035_vm9, %v5813_v59  ;;  %v5818_v15 = vsub.f32 1.5, %v5817_v12 }
 0xaf2   : > { %v9042_v9 = vpop.eup %9041  ;;  %v13621_v46 = vadd.f32 %v5719_v34, %v5718_v41  ;;  %v5727_v60 = vsel %vm2035_vm9, %v5662_v40, 0.0 }
 0xaf3   : > { %v5819_v43 = vmul.f32 %v9040_v38, %v5818_v15  ;;  %v5827_v3 = vmul.f32 %v9042_v9, %v13601_v36  ;;  %v13641_v15 = vpop.f32.mrf.mxu2 }
 0xaf4   : > { %9043 = vrsqrt.f32 %v13621_v46  ;;  %vm5845_vm3 = vcmp.eq.f32.partialorder %v13621_v46, inf  ;;  %vm5847_vm4 = vcmp.eq.f32.partialorder %v13621_v46, 0.0 }
 0xaf5   : > { %v5820_v1 = vmul.f32 %v5819_v43, %v13580_v2  ;;  %v5828_v7 = vmul.f32 %v9042_v9, %v5827_v3 }
 0xaf6   : > { %v5611_v13 = vpop.f32.mrf.mxu1 }
 0xaf7   : > { %v5677_v52 = vmul.f32 %v5611_v13, %v5611_v13  ;;  %8566 = vmatmul.msk.f32.gmra.mxu2 %vm2035_vm9, %v5611_v13  ;;  %v5822_v38 = vsel %vm5821_vm13, %v13580_v2, %v5820_v1  ;;  %v5829_v47 = vmul.f32 0.5, %v5828_v7  ;;  %v5728_v13 = vadd.f32 %v5727_v60, %v5726_v30 }
 0xaf8   : > { %v5825_v31 = vsel %vm5823_vm0, %v5824_v48, %v5822_v38 }
 0xaf9   : > { %v5724_v12 = vsel %vm2035_vm9, %v5677_v52, 0.0  ;;  %8515 = vmatmul.msk.f32.gmra.mxu3 %vm2035_vm9, %v5825_v31  ;;  %v5830_v41 = vsub.f32 1.5, %v5829_v47  ;;  %v5663_v52 = vmul.f32 %v13426_v54, %v13426_v54  ;;  %v5647_v31 = vmul.f32 %v13266_v45, %v13266_v45 }
 0xafa   : > { %v9044_v59 = vpop.eup %9043  ;;  %v13639_v34 = vadd.f32 %v5724_v12, %v5723_v17  ;;  %v5848_v45 = vand.u32 2147483648, %v13621_v46 }
 0xafb   : > { %v5831_v2 = vmul.f32 %v9042_v9, %v5830_v41  ;;  %v5839_v5 = vmul.f32 %v9044_v59, %v13621_v46  ;;  %v5732_v41 = vsel %vm2035_vm9, %v5663_v52, 0.0  ;;  %v13664_v23 = vpop.f32.mrf.mxu2 }
 0xafc   : > { %9045 = vrsqrt.f32 %v13639_v34  ;;  %vm5857_vm5 = vcmp.eq.f32.partialorder %v13639_v34, inf  ;;  %vm5859_vm6 = vcmp.eq.f32.partialorder %v13639_v34, 0.0 }
 0xafd   : > { %v5832_v43 = vmul.f32 %v5831_v2, %v13601_v36  ;;  %v5840_v3 = vmul.f32 %v9044_v59, %v5839_v5  ;;  %v5731_v5 = vsel %vm2035_vm9, %v5647_v31, 0.0 }
 0xafe   : > { %v5614_v1 = vpop.f32.mrf.mxu1  ;;  %v5733_v30 = vadd.f32 %v5732_v41, %v5731_v5 }
 0xaff   : > { %v5678_v7 = vmul.f32 %v5614_v1, %v5614_v1  ;;  %8567 = vmatmul.msk.f32.gmra.mxu2 %vm2035_vm9, %v5614_v1  ;;  %v5834_v9 = vsel %vm5833_vm1, %v13601_v36, %v5832_v43  ;;  %v5841_v18 = vmul.f32 0.5, %v5840_v3 }
 0xb00   : > { %v5837_v48 = vsel %vm5835_vm2, %v5836_v51, %v5834_v9  ;;  %v5664_v51 = vmul.f32 %v13435_v21, %v13435_v21 }
 0xb01   : > { %v5729_v38 = vsel %vm2035_vm9, %v5678_v7, 0.0  ;;  %8516 = vmatmul.msk.f32.gmra.mxu3 %vm2035_vm9, %v5837_v48  ;;  %v5842_v47 = vsub.f32 1.5, %v5841_v18 }
 0xb02   : > { %v9046_v17 = vpop.eup %9045  ;;  %v13659_v40 = vadd.f32 %v5729_v38, %v5728_v13  ;;  %v5648_v13 = vmul.f32 %v13278_v53, %v13278_v53  ;;  %v5737_v38 = vsel %vm2035_vm9, %v5664_v51, 0.0 }
 0xb03   : > { %v5843_v12 = vmul.f32 %v9044_v59, %v5842_v47  ;;  %v5851_v36 = vmul.f32 %v9046_v17, %v13639_v34  ;;  %v13688_v53 = vpop.f32.mrf.mxu2 }
 0xb04   : > { %9047 = vrsqrt.f32 %v13659_v40  ;;  %v5736_v31 = vsel %vm2035_vm9, %v5648_v13, 0.0  ;;  %vm5869_vm8 = vcmp.eq.f32.partialorder %v13659_v40, inf  ;;  %vm5871_vm10 = vcmp.eq.f32.partialorder %v13659_v40, 0.0 }
 0xb05   : > { %v5844_v54 = vmul.f32 %v5843_v12, %v13621_v46  ;;  %v5852_v2 = vmul.f32 %v9046_v17, %v5851_v36  ;;  %v5860_v36 = vand.u32 2147483648, %v13639_v34 }
 0xb06   : > { %v5617_v60 = vpop.f32.mrf.mxu1 }
 0xb07   : > { %v5679_v43 = vmul.f32 %v5617_v60, %v5617_v60  ;;  %8568 = vmatmul.msk.f32.gmra.mxu2 %vm2035_vm9, %v5617_v60  ;;  %v5846_v59 = vsel %vm5845_vm3, %v13621_v46, %v5844_v54  ;;  %v5853_v3 = vmul.f32 0.5, %v5852_v2  ;;  %v5738_v2 = vadd.f32 %v5737_v38, %v5736_v31 }
 0xb08   : > { %v5849_v1 = vsel %vm5847_vm4, %v5848_v45, %v5846_v59  ;;  %v5665_v60 = vmul.f32 %v13442_v58, %v13442_v58 }
 0xb09   : > { %v5734_v7 = vsel %vm2035_vm9, %v5679_v43, 0.0  ;;  %8517 = vmatmul.msk.f32.gmra.mxu3 %vm2035_vm9, %v5849_v1  ;;  %v5854_v9 = vsub.f32 1.5, %v5853_v3  ;;  %v5649_v3 = vmul.f32 %v13288_v10, %v13288_v10 }
 0xb0a   : > { %v9048_v18 = vpop.eup %9047  ;;  %v13679_v48 = vadd.f32 %v5734_v7, %v5733_v30  ;;  %v5742_v51 = vsel %vm2035_vm9, %v5665_v60, 0.0 }
 0xb0b   : > { %v5855_v52 = vmul.f32 %v9046_v17, %v5854_v9  ;;  %v5863_v46 = vmul.f32 %v9048_v18, %v13659_v40  ;;  %v5741_v9 = vsel %vm2035_vm9, %v5649_v3, 0.0  ;;  %v13713_v31 = vpop.f32.mrf.mxu2 }
 0xb0c   : > { %9049 = vrsqrt.f32 %v13679_v48  ;;  %v5743_v38 = vadd.f32 %v5742_v51, %v5741_v9  ;;  %vm5881_vm11 = vcmp.eq.f32.partialorder %v13679_v48, inf  ;;  %v5884_v3 = vand.u32 2147483648, %v13679_v48 }
 0xb0d   : > { %v5856_v21 = vmul.f32 %v5855_v52, %v13639_v34  ;;  %v5864_v47 = vmul.f32 %v9048_v18, %v5863_v46  ;;  %v5872_v52 = vand.u32 2147483648, %v13659_v40  ;;  %vm5883_vm12 = vcmp.eq.f32.partialorder %v13679_v48, 0.0 }
 0xb0e   : > { %v5620_v12 = vpop.f32.mrf.mxu1 }
 0xb0f   : > { %v5680_v41 = vmul.f32 %v5620_v12, %v5620_v12  ;;  %8569 = vmatmul.msk.f32.gmra.mxu2 %vm2035_vm9, %v5620_v12  ;;  %v5858_v17 = vsel %vm5857_vm5, %v13639_v34, %v5856_v21  ;;  %v5865_v54 = vmul.f32 0.5, %v5864_v47  ;;  %v5666_v47 = vmul.f32 %v13451_v20, %v13451_v20 }
 0xb10   : > { %v5861_v5 = vsel %vm5859_vm6, %v5860_v36, %v5858_v17  ;;  %v5650_v17 = vmul.f32 %v13300_v32, %v13300_v32 }
 0xb11   : > { %v5739_v45 = vsel %vm2035_vm9, %v5680_v41, 0.0  ;;  %8518 = vmatmul.msk.f32.gmra.mxu3 %vm2035_vm9, %v5861_v5  ;;  %v5866_v43 = vsub.f32 1.5, %v5865_v54  ;;  %v5747_v5 = vsel %vm2035_vm9, %v5666_v47, 0.0 }
 0xb12   : > { %v9050_v59 = vpop.eup %9049  ;;  %v13699_v30 = vadd.f32 %v5739_v45, %v5738_v2 }
 0xb13   : > { %v5867_v1 = vmul.f32 %v9048_v18, %v5866_v43  ;;  %v5875_v34 = vmul.f32 %v9050_v59, %v13679_v48  ;;  %v5746_v43 = vsel %vm2035_vm9, %v5650_v17, 0.0 }
 0xb14   : > { %9051 = vrsqrt.f32 %v13699_v30  ;;  %v5748_v51 = vadd.f32 %v5747_v5, %v5746_v43  ;;  %vm5893_vm14 = vcmp.eq.f32.partialorder %v13699_v30, inf  ;;  %vm5895_vm15 = vcmp.eq.f32.partialorder %v13699_v30, 0.0 }
 0xb15   : > { %v5868_v58 = vmul.f32 %v5867_v1, %v13659_v40  ;;  %v5876_v7 = vmul.f32 %v9050_v59, %v5875_v34 }
 0xb16   : > { %v5623_v13 = vpop.f32.mrf.mxu1 }
 0xb17   : > { %v5681_v10 = vmul.f32 %v5623_v13, %v5623_v13  ;;  %8570 = vmatmul.msk.f32.gmra.mxu2 %vm2035_vm9, %v5623_v13  ;;  %v5870_v18 = vsel %vm5869_vm8, %v13659_v40, %v5868_v58  ;;  %v5877_v46 = vmul.f32 0.5, %v5876_v7  ;;  %v5331_v40 = vld [vmem:[%s14872_s6 + $0x228] sm:$0xff]  ;;  %v5667_v7 = vmul.f32 %v13460_v39, %v13460_v39  ;;  %v13748_v39 = vpop.f32.mrf.mxu2 }
 0xb18   : > { %v5873_v21 = vsel %vm5871_vm10, %v5872_v52, %v5870_v18  ;;  %6442 = vmatpush.msra.mxu3 %v5331_v40 }
 0xb19   : > { %v5744_v12 = vsel %vm2035_vm9, %v5681_v10, 0.0  ;;  %8519 = vmatmul.msk.f32.gmra.mxu3 %vm2035_vm9, %v5873_v21  ;;  %v5878_v36 = vsub.f32 1.5, %v5877_v46  ;;  %v5651_v10 = vmul.f32 %v13312_v28, %v13312_v28  ;;  %v5329_v46 = vld [vmem:[%s14872_s6 + $0x218] sm:$0xff]  ;;  %v5328_v28 = vld [vmem:[%s14872_s6 + $0x210] sm:$0xff]  ;;  %v5752_v47 = vsel %vm2035_vm9, %v5667_v7, 0.0 }
 0xb1a   : > { %v9052_v41 = vpop.eup %9051  ;;  %v13719_v54 = vadd.f32 %v5744_v12, %v5743_v38 }
 0xb1b   : > { %v5879_v2 = vmul.f32 %v9050_v59, %v5878_v36  ;;  %v5887_v20 = vmul.f32 %v9052_v41, %v13699_v30  ;;  %v5751_v17 = vsel %vm2035_vm9, %v5651_v10, 0.0 }
 0xb1c   : > { %9053 = vrsqrt.f32 %v13719_v54  ;;  %vm5905_vm13 = vcmp.eq.f32.partialorder %v13719_v54, inf  ;;  %vm5907_vm0 = vcmp.eq.f32.partialorder %v13719_v54, 0.0 }
 0xb1d   : > { %v5880_v60 = vmul.f32 %v5879_v2, %v13679_v48  ;;  %v5888_v45 = vmul.f32 %v9052_v41, %v5887_v20 }
 0xb1e   : > { %v5626_v32 = vpop.f32.mrf.mxu1 }
 0xb1f   : > { %v5682_v1 = vmul.f32 %v5626_v32, %v5626_v32  ;;  %8571 = vmatmul.msk.f32.gmra.mxu2 %vm2035_vm9, %v5626_v32  ;;  %v5882_v59 = vsel %vm5881_vm11, %v13679_v48, %v5880_v60  ;;  %v5889_v34 = vmul.f32 0.5, %v5888_v45  ;;  %v5330_v48 = vld [vmem:[%s14872_s6 + $0x220] sm:$0xff]  ;;  %v5327_v60 = vld [vmem:[%s14872_s6 + $0x208] sm:$0xff]  ;;  %v5753_v45 = vadd.f32 %v5752_v47, %v5751_v17 }
 0xb20   : > { %v5885_v58 = vsel %vm5883_vm12, %v5884_v3, %v5882_v59  ;;  %6443 = vmatpush.msra.mxu3 %v5330_v48  ;;  %v5668_v32 = vmul.f32 %v13469_v11, %v13469_v11  ;;  %v5325_v11 = vld [vmem:[%s14872_s6 + $0x1f8] sm:$0xff] }
 0xb21   : > { %v5749_v9 = vsel %vm2035_vm9, %v5682_v1, 0.0  ;;  %8520 = vmatmul.msk.f32.gmra.mxu3 %vm2035_vm9, %v5885_v58  ;;  %v5890_v13 = vsub.f32 1.5, %v5889_v34 }
 0xb22   : > { %v9054_v52 = vpop.eup %9053  ;;  %v13740_v18 = vadd.f32 %v5749_v9, %v5748_v51  ;;  %6444 = vmatpush.msra.mxu3 %v5329_v46  ;;  %v5326_v51 = vld [vmem:[%s14872_s6 + $0x200] sm:$0xff]  ;;  %v5757_v9 = vsel %vm2035_vm9, %v5668_v32, 0.0 }
 0xb23   : > { %v5891_v38 = vmul.f32 %v9052_v41, %v5890_v13  ;;  %v5899_v21 = vmul.f32 %v9054_v52, %v13719_v54  ;;  %v5896_v41 = vand.u32 2147483648, %v13699_v30 }
 0xb24   : > { %9055 = vrsqrt.f32 %v13740_v18  ;;  %6445 = vmatpush.msra.mxu3 %v5328_v28  ;;  %vm5917_vm1 = vcmp.eq.f32.partialorder %v13740_v18, inf  ;;  %vm5919_vm2 = vcmp.eq.f32.partialorder %v13740_v18, 0.0 }
 0xb25   : > { %v5892_v12 = vmul.f32 %v5891_v38, %v13699_v30  ;;  %v5900_v36 = vmul.f32 %v9054_v52, %v5899_v21  ;;  %v5908_v38 = vand.u32 2147483648, %v13719_v54 }
 0xb26   : > { %v5629_v40 = vpop.f32.mrf.mxu1  ;;  %6446 = vmatpush.msra.mxu3 %v5327_v60  ;;  %v5322_v60 = vld [vmem:[%s14872_s6 + $0x1e0] sm:$0xff] }
 0xb27   : > { %v5683_v2 = vmul.f32 %v5629_v40, %v5629_v40  ;;  %8572 = vmatmul.msk.f32.gmra.mxu2 %vm2035_vm9, %v5629_v40  ;;  %v5894_v20 = vsel %vm5893_vm14, %v13699_v30, %v5892_v12  ;;  %v5901_v5 = vmul.f32 0.5, %v5900_v36  ;;  %v5652_v30 = vmul.f32 %v13324_v6, %v13324_v6  ;;  %v13783_v6 = vpop.f32.mrf.mxu2  ;;  %v5323_v12 = vld [vmem:[%s14872_s6 + $0x1e8] sm:$0xff] }
 0xb28   : > { %v5897_v43 = vsel %vm5895_vm15, %v5896_v41, %v5894_v20  ;;  %6447 = vmatpush.msra.mxu3 %v5326_v51  ;;  %v5669_v40 = vmul.f32 %v13479_v14, %v13479_v14  ;;  %v5321_v14 = vld [vmem:[%s14872_s6 + $0x1d8] sm:$0xff]  ;;  %v5920_v51 = vand.u32 2147483648, %v13740_v18  ;;  %vm7042_vm14 = vcmask 785408  }
 0xb29   : > { %v5754_v3 = vsel %vm2035_vm9, %v5683_v2, 0.0  ;;  %8521 = vmatmul.msk.f32.gmra.mxu3 %vm2035_vm9, %v5897_v43  ;;  %v5902_v1 = vsub.f32 1.5, %v5901_v5  ;;  %v5756_v48 = vsel %vm2035_vm9, %v5652_v30, 0.0 }
 0xb2a   : > { %v9056_v59 = vpop.eup %9055  ;;  %v13772_v34 = vadd.f32 %v5754_v3, %v5753_v45  ;;  %6448 = vmatpush.msra.mxu3 %v5325_v11  ;;  %v5758_v36 = vadd.f32 %v5757_v9, %v5756_v48  ;;  %v5762_v32 = vsel %vm2035_vm9, %v5669_v40, 0.0  ;;  %v5316_v40 = vld [vmem:[%s14872_s6 + $0x1b0] sm:$0xff] }
 0xb2b   : > { %v5903_v58 = vmul.f32 %v9054_v52, %v5902_v1  ;;  %v5911_v7 = vmul.f32 %v9056_v59, %v13740_v18  ;;  %v5324_v52 = vld [vmem:[%s14872_s6 + $0x1f0] sm:$0xff] }
 0xb2c   : > { %9057 = vrsqrt.f32 %v13772_v34  ;;  %6449 = vmatpush.msra.mxu3 %v5324_v52  ;;  %v5320_v1 = vld [vmem:[%s14872_s6 + $0x1d0] sm:$0xff]  ;;  %vm5929_vm3 = vcmp.eq.f32.partialorder %v13772_v34, inf  ;;  %vm5931_vm4 = vcmp.eq.f32.partialorder %v13772_v34, 0.0 }
 0xb2d   : > { %v5904_v13 = vmul.f32 %v5903_v58, %v13719_v54  ;;  %v5912_v10 = vmul.f32 %v9056_v59, %v5911_v7 }
 0xb2e   : > { %v5632_v46 = vpop.f32.mrf.mxu1  ;;  %6450 = vmatpush.msra.mxu3 %v5323_v12 }
 0xb2f   : > { %v5684_v21 = vmul.f32 %v5632_v46, %v5632_v46  ;;  %8573 = vmatmul.msk.f32.gmra.mxu2 %vm2035_vm9, %v5632_v46  ;;  %v5906_v28 = vsel %vm5905_vm13, %v13719_v54, %v5904_v13  ;;  %v5913_v47 = vmul.f32 0.5, %v5912_v10  ;;  %v5653_v54 = vmul.f32 %v13336_v8, %v13336_v8  ;;  %v13822_v58 = vpop.f32.mrf.mxu2  ;;  %v5319_v13 = vld [vmem:[%s14872_s6 + $0x1c8] sm:$0xff] }
 0xb30   : > { %v5909_v17 = vsel %vm5907_vm0, %v5908_v38, %v5906_v28  ;;  %6451 = vmatpush.msra.mxu3 %v5322_v60 }
 0xb31   : > { %v5759_v41 = vsel %vm2035_vm9, %v5684_v21, 0.0  ;;  %8522 = vmatmul.msk.f32.gmra.mxu3 %vm2035_vm9, %v5909_v17  ;;  %v5914_v2 = vsub.f32 1.5, %v5913_v47  ;;  %v5317_v17 = vld [vmem:[%s14872_s6 + $0x1b8] sm:$0xff] }
 0xb32   : > { %v9058_v20 = vpop.eup %9057  ;;  %v13804_v5 = vadd.f32 %v5759_v41, %v5758_v36  ;;  %6452 = vmatpush.msra.mxu3 %v5321_v14  ;;  %v5932_v41 = vand.u32 2147483648, %v13772_v34 }
 0xb33   : > { %v5915_v45 = vmul.f32 %v9056_v59, %v5914_v2  ;;  %v5923_v43 = vmul.f32 %v9058_v20, %v13772_v34  ;;  %v5761_v59 = vsel %vm2035_vm9, %v5653_v54, 0.0 }
 0xb34   : > { %9059 = vrsqrt.f32 %v13804_v5  ;;  %v5763_v10 = vadd.f32 %v5762_v32, %v5761_v59  ;;  %6453 = vmatpush.msra.mxu3 %v5320_v1  ;;  %vm5941_vm5 = vcmp.eq.f32.partialorder %v13804_v5, inf  ;;  %vm5943_vm6 = vcmp.eq.f32.partialorder %v13804_v5, 0.0 }
 0xb35   : > { %v5916_v8 = vmul.f32 %v5915_v45, %v13740_v18  ;;  %v5924_v3 = vmul.f32 %v9058_v20, %v5923_v43 }
 0xb36   : > { %v5635_v30 = vpop.f32.mrf.mxu1  ;;  %6454 = vmatpush.msra.mxu3 %v5319_v13 }
 0xb37   : > { %v5685_v7 = vmul.f32 %v5635_v30, %v5635_v30  ;;  %8574 = vmatmul.msk.f32.gmra.mxu2 %vm2035_vm9, %v5635_v30  ;;  %v5918_v11 = vsel %vm5917_vm1, %v13740_v18, %v5916_v8  ;;  %v5925_v9 = vmul.f32 0.5, %v5924_v3  ;;  %v5318_v18 = vld [vmem:[%s14872_s6 + $0x1c0] sm:$0xff]  ;;  %v5944_v3 = vand.u32 2147483648, %v13804_v5 }
 0xb38   : > { %v5921_v52 = vsel %vm5919_vm2, %v5920_v51, %v5918_v11  ;;  %6455 = vmatpush.msra.mxu3 %v5318_v18 }
 0xb39   : > { %v5764_v48 = vsel %vm2035_vm9, %v5685_v7, 0.0  ;;  %8523 = vmatmul.msk.f32.gmra.mxu3 %vm2035_vm9, %v5921_v52  ;;  %v5926_v46 = vsub.f32 1.5, %v5925_v9  ;;  %v15514_v52 = vld [vmem:[#allocation113_spill] sm:$0xff] }
 0xb3a   : > { %v9060_v38 = vpop.eup %9059  ;;  %v5765_v21 = vadd.f32 %v5764_v48, %v5763_v10  ;;  %6456 = vmatpush.msra.mxu3 %v5317_v17 }
 0xb3b   : > { %v5927_v28 = vmul.f32 %v9058_v20, %v5926_v46  ;;  %v5935_v47 = vmul.f32 %v9060_v38, %v13804_v5  ;;  %v15515_v46 = vld [vmem:[#allocation99_spill] sm:$0xff] }
 0xb3c   : > { %9061 = vrsqrt.f32 %v5765_v21  ;;  %6457 = vmatpush.msra.mxu3 %v5316_v40  ;;  %vm5953_vm8 = vcmp.eq.f32.partialorder %v5765_v21, inf  ;;  %v5956_v11 = vand.u32 2147483648, %v5765_v21  ;;  %vm5955_vm10 = vcmp.eq.f32.partialorder %v5765_v21, 0.0  ;;  %v15518_v40 = vld [vmem:[#allocation34_spill] sm:$0xff] }
 0xb3d   : > { %v5928_v12 = vmul.f32 %v5927_v28, %v13772_v34  ;;  %v5936_v36 = vmul.f32 %v9060_v38, %v5935_v47  ;;  %v15516_v28 = vld [vmem:[#allocation62_spill] sm:$0xff] }
 0xb3f   : > { %v5930_v2 = vsel %vm5929_vm3, %v13772_v34, %v5928_v12  ;;  %v5937_v20 = vmul.f32 0.5, %v5936_v36  ;;  %v15517_v12 = vld [vmem:[#allocation83_spill] sm:$0xff] }
 0xb40   : > { %v5933_v54 = vsel %vm5931_vm4, %v5932_v41, %v5930_v2 }
 0xb41   : > { %8524 = vmatmul.msk.f32.gmra.mxu3 %vm2035_vm9, %v5933_v54  ;;  %v5938_v60 = vsub.f32 1.5, %v5937_v20  ;;  %v15519_v20 = vld [vmem:[#allocation114_spill] sm:$0xff] }
 0xb42   : > { %v9062_v45 = vpop.eup %9061 }
 0xb43   : > { %v5939_v43 = vmul.f32 %v9060_v38, %v5938_v60  ;;  %v5947_v14 = vmul.f32 %v9062_v45, %v5765_v21  ;;  %v13879_v60 = vpop.f32.mrf.mxu2 }
 0xb45   : > { %v5940_v32 = vmul.f32 %v5939_v43, %v13804_v5  ;;  %v5948_v8 = vmul.f32 %v9062_v45, %v5947_v14  ;;  %v15520_v43 = vld [vmem:[#allocation91_spill] sm:$0xff] }
 0xb47   : > { %v5942_v1 = vsel %vm5941_vm5, %v13804_v5, %v5940_v32  ;;  %v5949_v34 = vmul.f32 0.5, %v5948_v8 }
 0xb48   : > { %v5945_v59 = vsel %vm5943_vm6, %v5944_v3, %v5942_v1 }
 0xb49   : > { %8525 = vmatmul.msk.f32.gmra.mxu3 %vm2035_vm9, %v5945_v59  ;;  %v5950_v30 = vsub.f32 1.5, %v5949_v34 }
 0xb4b   : > { %v5951_v51 = vmul.f32 %v9062_v45, %v5950_v30  ;;  %v13888_v3 = vpop.f32.mrf.mxu2 }
 0xb4d   : > { %v5952_v7 = vmul.f32 %v5951_v51, %v5765_v21 }
 0xb4f   : > { %v5954_v9 = vsel %vm5953_vm8, %v5765_v21, %v5952_v7 }
 0xb50   : > { %v5957_v13 = vsel %vm5955_vm10, %v5956_v11, %v5954_v9 }
 0xb51   : > { %8526 = vmatmul.msk.f32.gmra.mxu3 %vm2035_vm9, %v5957_v13 }
 0xb53   : > { %v13892_v59 = vpop.f32.mrf.mxu2 }
 0xb5b   : > { %v13895_v7 = vpop.f32.mrf.mxu2 }
 0xb5c   : > { %v6088_v10 = vpop.f32.mrf.mxu3 }
 0xb5d   : > { %v13856_v48 = vadd.f32 %v6088_v10, %v15514_v52  ;;  %v15521_v52 = vld [vmem:[#allocation84_spill] sm:$0xff] }
 0xb5f   : > { %6458 = vmatmul.f32.vlgmr.msra.gmra.mxu3 %v13856_v48 }
 0xb63   : > { %v13898_v9 = vpop.f32.mrf.mxu2 }
 0xb64   : > { %v6091_v5 = vpop.f32.mrf.mxu3 }
 0xb65   : > { %v13860_v38 = vadd.f32 %v6091_v5, %v15515_v46 }
 0xb67   : > { %6461 = vmatmul.f32.gmra.mxu3 %v13860_v38 }
 0xb6b   : > { %v13902_v46 = vpop.f32.mrf.mxu2 }
 0xb6c   : > { %v6094_v18 = vpop.f32.mrf.mxu3 }
 0xb6d   : > { %v13864_v47 = vadd.f32 %v6094_v18, %v15516_v28 }
 0xb6f   : > { %6464 = vmatmul.f32.gmra.mxu3 %v13864_v47 }
 0xb74   : > { %v6097_v21 = vpop.f32.mrf.mxu3 }
 0xb75   : > { %v13868_v36 = vadd.f32 %v6097_v21, %v15517_v12  ;;  %v13907_v21 = vpop.permute.xlu1 %6750  ;;  %v13911_v12 = vpop.permute.xlu0 %6760 }
 0xb77   : > { %6467 = vmatmul.f32.gmra.mxu3 %v13868_v36 }
 0xb7c   : > { %v6100_v17 = vpop.f32.mrf.mxu3 }
 0xb7d   : > { %v13872_v41 = vadd.f32 %v6100_v17, %v15518_v40 }
 0xb7f   : > { %6470 = vmatmul.f32.gmra.mxu3 %v13872_v41 }
 0xb84   : > { %v6103_v2 = vpop.f32.mrf.mxu3 }
 0xb85   : > { %v13876_v54 = vadd.f32 %v6103_v2, %v15519_v20  ;;  %v13916_v2 = vpop.permute.xlu1 %6740 }
 0xb87   : > { %6473 = vmatmul.f32.gmra.mxu3 %v13876_v54 }
 0xb8c   : > { %v6106_v45 = vpop.f32.mrf.mxu3 }
 0xb8d   : > { %v13882_v14 = vadd.f32 %v6106_v45, %v15520_v43  ;;  %v13920_v45 = vpop.permute.xlu0 %6735 }
 0xb8f   : > { %6476 = vmatmul.f32.gmra.mxu3 %v13882_v14 }
 0xb94   : > { %v6109_v32 = vpop.f32.mrf.mxu3 }
 0xb95   : > { %v13886_v8 = vadd.f32 %v6109_v32, %v13244_v35 }
 0xb97   : > { %6479 = vmatmul.f32.gmra.mxu3 %v13886_v8 }
 0xb9c   : > { %v6112_v1 = vpop.f32.mrf.mxu3 }
 0xb9d   : > { %v6113_v34 = vadd.f32 %v6112_v1, %v13261_v27 }
 0xb9f   : > { %6482 = vmatmul.f32.gmra.mxu3 %v6113_v34 }
 0xba4   : > { %v6115_v30 = vpop.f32.mrf.mxu3 }
 0xba5   : > { %v6116_v51 = vadd.f32 %v6115_v30, %v13274_v37  ;;  %v13904_v37 = vpop.permute.xlu2 %6755 }
 0xba7   : > { %6485 = vmatmul.f32.gmra.mxu3 %v6116_v51 }
 0xbac   : > { %v6118_v11 = vpop.f32.mrf.mxu3 }
 0xbad   : > { %v6119_v35 = vadd.f32 %v6118_v11, %v13290_v19  ;;  %v13909_v19 = vpop.f32.mrf.mxu2  ;;  %v13927_v11 = vpop.permute.xlu1 %6725 }
 0xbaf   : > { %6488 = vmatmul.f32.gmra.mxu3 %v6119_v35 }
 0xbb4   : > { %v6121_v13 = vpop.f32.mrf.mxu3 }
 0xbb5   : > { %v6122_v10 = vadd.f32 %v6121_v13, %v13305_v0  ;;  %v13913_v0 = vpop.permute.xlu2 %6745  ;;  %v13918_v20 = vpop.f32.mrf.mxu2 }
 0xbb7   : > { %6491 = vmatmul.f32.gmra.mxu3 %v6122_v10 }
 0xbbc   : > { %v6124_v27 = vpop.f32.mrf.mxu3 }
 0xbbd   : > { %v6125_v5 = vadd.f32 %v6124_v27, %v15521_v52  ;;  %v13930_v13 = vpop.f32.mrf.mxu2  ;;  %v13932_v27 = vpop.permute.xlu0 %6720 }
 0xbbf   : > { %6494 = vmatmul.f32.gmra.mxu3 %v6125_v5  ;;  %v6775_v52 = vmul.f32 %v13913_v0, %v6125_v5 }
 0xbc4   : > { %v6127_v18 = vpop.f32.mrf.mxu3 }
 0xbc5   : > { %v6128_v28 = vadd.f32 %v6127_v18, %v13332_v44  ;;  %v13922_v44 = vpop.permute.xlu2 %6730  ;;  %v13945_v5 = vpop.permute.xlu0 %6705 }
 0xbc6   : > { %15523 = vst [vmem:[#allocation33_spill] sm:$0xff] %v13945_v5 }
 0xbc7   : > { %6497 = vmatmul.f32.gmra.mxu3 %v6128_v28 }
 0xbcc   : > { %v6130_v17 = vpop.f32.mrf.mxu3 }
 0xbcd   : > { %v6131_v40 = vadd.f32 %v6130_v17, %v13346_v22  ;;  %v6776_v22 = vmul.f32 %v13907_v21, %v6128_v28  ;;  %v13935_v18 = vpop.permute.xlu2 %6715  ;;  %v6773_v17 = vmul.f32 %v13920_v45, %v6119_v35  ;;  %v13940_v28 = vpop.permute.xlu1 %6710 }
 0xbce   : > { %15522 = vst [vmem:[#allocation82_spill] sm:$0xff] %v13940_v28  ;;  %v6769_v35 = vmul.f32 %v13935_v18, %v13882_v14 }
 0xbcf   : > { %6500 = vmatmul.f32.gmra.mxu3 %v6131_v40  ;;  %v6777_v30 = vmul.f32 %v13904_v37, %v6131_v40 }
 0xbd4   : > { %v6133_v43 = vpop.f32.mrf.mxu3 }
 0xbd5   : > { %v6134_v32 = vadd.f32 %v6133_v43, %v13357_v63  ;;  %v6774_v63 = vmul.f32 %v13916_v2, %v6122_v10  ;;  %v6772_v43 = vmul.f32 %v13922_v44, %v6116_v51  ;;  %v6770_v10 = vmul.f32 %v13932_v27, %v13886_v8  ;;  %v13956_v51 = vld [vmem:[%s14872_s6 + $0x230] ss:$0 sm:$0xff] }
 0xbd6   : > { %v6767_v8 = vmul.f32 %v13945_v5, %v13872_v41 }
 0xbd7   : > { %v6778_v1 = vmul.f32 %v13911_v12, %v6134_v32  ;;  %6503 = vmatmul.f32.gmra.mxu3 %v6134_v32  ;;  %v6771_v32 = vmul.f32 %v13927_v11, %v6113_v34 }
 0xbd9   : > { %6991 = vmatpush.msrb.mxu0 %v6778_v1  ;;  %v13943_v1 = vpop.f32.mrf.mxu2 }
 0xbdb   : > { %6992 = vmatpush.msrb.mxu0 %v6777_v30  ;;  %v13949_v30 = vpop.permute.xlu2 %6700 }
 0xbdc   : > { %15524 = vst [vmem:[#allocation88_spill] sm:$0xff] %v13949_v30  ;;  %v6766_v14 = vmul.f32 %v13949_v30, %v13868_v36 }
 0xbdd   : > { %6993 = vmatpush.msrb.mxu0 %v6776_v22  ;;  %v6768_v22 = vmul.f32 %v13940_v28, %v13876_v54 }
 0xbdf   : > { %6994 = vmatpush.msrb.mxu0 %v6775_v52  ;;  %v13962_v52 = vpop.permute.xlu1 %6695 }
 0xbe0   : > { %15525 = vst [vmem:[#allocation9_spill] sm:$0xff] %v13962_v52  ;;  %v6765_v54 = vmul.f32 %v13962_v52, %v13864_v47 }
 0xbe1   : > { %6995 = vmatpush.msrb.mxu0 %v6774_v63 }
 0xbe2   : > { %v6459_v40 = vpop.f32.mrf.mxu3 }
 0xbe3   : > { %6996 = vmatpush.msrb.mxu0 %v6773_v17  ;;  %v6460_v63 = vadd.f32 %v13956_v51, %v6459_v40  ;;  %v13967_v17 = vpop.f32.mrf.mxu2  ;;  %v13974_v41 = vpop.permute.xlu2 %6685 }
 0xbe4   : > { %15527 = vst [vmem:[#allocation118_spill] sm:$0xff] %v13974_v41 }
 0xbe5   : > { %6997 = vmatpush.msrb.mxu0 %v6772_v43  ;;  %v13969_v43 = vpop.permute.xlu0 %6690 }
 0xbe6   : > { %15526 = vst [vmem:[#allocation104_spill] sm:$0xff] %v13969_v43  ;;  %v6764_v40 = vmul.f32 %v13969_v43, %v13860_v38 }
 0xbe7   : > { %6998 = vmatpush.msrb.mxu0 %v6771_v32 }
 0xbe9   : > { %6999 = vmatpush.msrb.mxu0 %v6770_v10  ;;  %v8575_v10 = vclamps-f32 %v6460_v63, 30.0 }
 0xbea   : > { %v6462_v34 = vpop.f32.mrf.mxu3 }
 0xbeb   : > { %7000 = vmatpush.msrb.mxu0 %v6769_v35  ;;  %v6463_v32 = vadd.f32 %v13956_v51, %v6462_v34 }
 0xbed   : > { %7001 = vmatpush.msrb.mxu0 %v6768_v22  ;;  %v8576_v36 = vclamps-f32 %v6463_v32, 30.0  ;;  %v6763_v22 = vmul.f32 %v13974_v41, %v13856_v48 }
 0xbef   : > { %7002 = vmatpush.msrb.mxu0 %v6767_v8  ;;  %v6539_v8 = vsub.f32 0.0, %v8575_v10  ;;  %v6540_v34 = vsub.f32 0.0, %v8576_v36 }
 0xbf1   : > { %7003 = vmatpush.msrb.mxu0 %v6766_v14  ;;  %v13980_v14 = vpop.f32.mrf.mxu2  ;;  %v6555_v57 = vmul.f32 1.442695, %v6539_v8  ;;  %v6557_v24 = vmul.f32 1.442695, %v6540_v34 }
 0xbf2   : > { %v6465_v35 = vpop.f32.mrf.mxu3 }
 0xbf3   : > { %7004 = vmatpush.msrb.mxu0 %v6765_v54  ;;  %9063 = vpow2.f32 %v6555_v57  ;;  %v6466_v63 = vadd.f32 %v13956_v51, %v6465_v35 }
 0xbf4   : > { %9065 = vpow2.f32 %v6557_v24 }
 0xbf5   : > { %7005 = vmatpush.msrb.mxu0 %v6764_v40  ;;  %v8577_v38 = vclamps-f32 %v6466_v63, 30.0 }
 0xbf7   : > { %7006 = vmatpush.msrb.mxu0 %v6763_v22  ;;  %v6541_v22 = vsub.f32 0.0, %v8577_v38 }
 0xbf9   : > { %v9064_v40 = vpop.eup %9063  ;;  %v13984_v55 = vpop.f32.mrf.mxu2  ;;  %v6559_v8 = vmul.f32 1.442695, %v6541_v22 }
 0xbfa   : > { %v6468_v47 = vpop.f32.mrf.mxu3  ;;  %v9066_v10 = vpop.eup %9065  ;;  %v6587_v36 = vadd.f32 1.0, %v9064_v40 }
 0xbfb   : > { %v6469_v54 = vadd.f32 %v13956_v51, %v6468_v47  ;;  %v6588_v61 = vadd.f32 1.0, %v9066_v10 }
 0xbfc   : > { %9067 = vrcp.f32 %v6587_v36 }
 0xbfd   : > { %v8578_v48 = vclamps-f32 %v6469_v54, 30.0  ;;  %9069 = vrcp.f32 %v6588_v61 }
 0xbfe   : > { %9071 = vpow2.f32 %v6559_v8 }
 0xbff   : > { %v6542_v56 = vsub.f32 0.0, %v8578_v48 }
 0xc01   : > { %v6561_v57 = vmul.f32 1.442695, %v6542_v56  ;;  %v13986_v35 = vpop.f32.mrf.mxu2 }
 0xc02   : > { %v6471_v32 = vpop.f32.mrf.mxu3  ;;  %v13990_v47 = vpop.eup %9067 }
 0xc03   : > { %v6472_v24 = vadd.f32 %v13956_v51, %v6471_v32  ;;  %9073 = vpow2.f32 %v6561_v57  ;;  %15528 = vst [vmem:[#allocation70_spill] sm:$0xff] %v13990_v47  ;;  %v13994_v38 = vpop.eup %9069  ;;  %v6635_v56 = vmul.f32 %v13990_v47, %v13615_v26  ;;  %v6651_v61 = vmul.f32 %v13990_v47, %v13930_v13 }
 0xc04   : > { %15529 = vst [vmem:[#allocation95_spill] sm:$0xff] %v13994_v38  ;;  %v9072_v48 = vpop.eup %9071  ;;  %v6652_v22 = vmul.f32 %v13994_v38, %v13943_v1 }
 0xc05   : > { %v8579_v63 = vclamps-f32 %v6472_v24, 30.0  ;;  %v6589_v36 = vadd.f32 1.0, %v9072_v48  ;;  %v14007_v24 = vmul.f32 %v13974_v41, %v6635_v56  ;;  %v14013_v13 = vmul.f32 %v13974_v41, %v6651_v61 }
 0xc07   : > { %v6543_v32 = vsub.f32 0.0, %v8579_v63  ;;  %9075 = vrcp.f32 %v6589_v36 }
 0xc09   : > { %v9074_v10 = vpop.eup %9073  ;;  %v14004_v57 = vpop.f32.mrf.mxu2  ;;  %v6563_v63 = vmul.f32 1.442695, %v6543_v32 }
 0xc0a   : > { %v6474_v50 = vpop.f32.mrf.mxu3 }
 0xc0b   : > { %v6475_v34 = vadd.f32 %v13956_v51, %v6474_v50  ;;  %v6636_v50 = vmul.f32 %v13994_v38, %v13641_v15  ;;  %v6590_v15 = vadd.f32 1.0, %v9074_v10 }
 0xc0d   : > { %v8580_v40 = vclamps-f32 %v6475_v34, 30.0  ;;  %v14010_v26 = vmul.f32 %v13969_v43, %v6636_v50  ;;  %v14016_v34 = vmul.f32 %v13969_v43, %v6652_v22  ;;  %9077 = vrcp.f32 %v6590_v15  ;;  %v14022_v56 = vpop.eup %9075 }
 0xc0e   : > { %9079 = vpow2.f32 %v6563_v63  ;;  %15530 = vst [vmem:[#allocation45_spill] sm:$0xff] %v14022_v56  ;;  %v6653_v32 = vmul.f32 %v14022_v56, %v13967_v17  ;;  %v6637_v1 = vmul.f32 %v14022_v56, %v13664_v23 }
 0xc0f   : > { %v6544_v8 = vsub.f32 0.0, %v8580_v40 }
 0xc10   : > { %v14044_v17 = vmul.f32 %v13962_v52, %v6637_v1 }
 0xc11   : > { %v6565_v48 = vmul.f32 1.442695, %v6544_v8  ;;  %v14024_v61 = vpop.f32.mrf.mxu2 }
 0xc12   : > { %v13992_v54 = vpop.f32.mrf.mxu3 }
 0xc13   : > { %9081 = vpow2.f32 %v6565_v48  ;;  %v14026_v22 = vpop.eup %9077  ;;  %v14038_v48 = vmul.f32 %v13962_v52, %v6653_v32 }
 0xc14   : > { %15531 = vst [vmem:[#allocation90_spill] sm:$0xff] %v14026_v22  ;;  %v9080_v10 = vpop.eup %9079  ;;  %v6654_v36 = vmul.f32 %v14026_v22, %v13980_v14  ;;  %v6638_v8 = vmul.f32 %v14026_v22, %v13688_v53 }
 0xc15   : > { %v6591_v15 = vadd.f32 1.0, %v9080_v10 }
 0xc16   : > { %v14041_v41 = vmul.f32 %v13949_v30, %v6654_v36  ;;  %v14047_v23 = vmul.f32 %v13949_v30, %v6638_v8 }
 0xc17   : > { %9083 = vrcp.f32 %v6591_v15 }
 0xc19   : > { %v9082_v40 = vpop.eup %9081  ;;  %v6417_v32 = vpop.f32.mrf.mxu2 }
 0xc1a   : > { %v6480_v47 = vpop.f32.mrf.mxu3  ;;  %v6592_v43 = vadd.f32 1.0, %v9082_v40 }
 0xc1c   : > { %9085 = vrcp.f32 %v6592_v43 }
 0xc1d   : > { %v14055_v38 = vpop.eup %9083 }
 0xc1e   : > { %15532 = vst [vmem:[#allocation39_spill] sm:$0xff] %v14055_v38  ;;  %v6655_v30 = vmul.f32 %v14055_v38, %v13984_v55  ;;  %v6639_v53 = vmul.f32 %v14055_v38, %v13713_v31 }
 0xc20   : > { %v14077_v55 = vmul.f32 %v13945_v5, %v6639_v53 }
 0xc21   : > { %v14064_v15 = vpop.f32.mrf.mxu2 }
 0xc22   : > { %v6483_v50 = vpop.f32.mrf.mxu3  ;;  %v14057_v52 = vpop.eup %9085 }
 0xc23   : > { %v6484_v63 = vadd.f32 %v13956_v51, %v6483_v50  ;;  %15533 = vst [vmem:[#allocation105_spill] sm:$0xff] %v14057_v52  ;;  %v6656_v43 = vmul.f32 %v14057_v52, %v13986_v35 }
 0xc25   : > { %v8583_v10 = vclamps-f32 %v6484_v63, 30.0  ;;  %v6640_v63 = vmul.f32 %v14057_v52, %v13748_v39 }
 0xc27   : > { %v6547_v36 = vsub.f32 0.0, %v8583_v10  ;;  %v14080_v31 = vmul.f32 %v13940_v28, %v6640_v63 }
 0xc29   : > { %v6571_v8 = vmul.f32 1.442695, %v6547_v36  ;;  %v14071_v36 = vmul.f32 %v13945_v5, %v6655_v30  ;;  %v6423_v56 = vpop.f32.mrf.mxu2  ;;  %v6481_v5 = vadd.f32 %v13956_v51, %v6480_v47 }
 0xc2a   : > { %v14049_v14 = vpop.f32.mrf.mxu3 }
 0xc2b   : > { %9087 = vpow2.f32 %v6571_v8 }
 0xc31   : > { %v6426_v47 = vpop.f32.mrf.mxu2 }
 0xc32   : > { %v6489_v1 = vpop.f32.mrf.mxu3 }
 0xc33   : > { %v6490_v40 = vadd.f32 %v13956_v51, %v6489_v1  ;;  %v14074_v1 = vmul.f32 %v13940_v28, %v6656_v43 }
 0xc35   : > { %v8585_v50 = vclamps-f32 %v6490_v40, 30.0 }
 0xc37   : > { %v6549_v10 = vsub.f32 0.0, %v8585_v50  ;;  %v9088_v50 = vpop.eup %9087 }
 0xc38   : > { %v6595_v63 = vadd.f32 1.0, %v9088_v50 }
 0xc39   : > { %v6575_v40 = vmul.f32 1.442695, %v6549_v10  ;;  %v6478_v10 = vadd.f32 %v13956_v51, %v13992_v54 }
 0xc3a   : > { %v6492_v22 = vpop.f32.mrf.mxu3 }
 0xc3b   : > { %9089 = vpow2.f32 %v6575_v40  ;;  %v6493_v30 = vadd.f32 %v13956_v51, %v6492_v22  ;;  %v8582_v40 = vclamps-f32 %v6481_v5, 30.0  ;;  %v8581_v52 = vclamps-f32 %v6478_v10, 30.0 }
 0xc3d   : > { %v8586_v8 = vclamps-f32 %v6493_v30, 30.0  ;;  %v6546_v49 = vsub.f32 0.0, %v8582_v40  ;;  %v6545_v50 = vsub.f32 0.0, %v8581_v52  ;;  %v6487_v52 = vadd.f32 %v13956_v51, %v14049_v14 }
 0xc3f   : > { %v6550_v43 = vsub.f32 0.0, %v8586_v8  ;;  %v6569_v5 = vmul.f32 1.442695, %v6546_v49 }
 0xc41   : > { %v9090_v53 = vpop.eup %9089  ;;  %v6577_v28 = vmul.f32 1.442695, %v6550_v43 }
 0xc42   : > { %v6495_v38 = vpop.f32.mrf.mxu3  ;;  %v6597_v35 = vadd.f32 1.0, %v9090_v53 }
 0xc43   : > { %9091 = vpow2.f32 %v6577_v28  ;;  %v6496_v39 = vadd.f32 %v13956_v51, %v6495_v38 }
 0xc44   : > { %9093 = vrcp.f32 %v6595_v63 }
 0xc45   : > { %v8587_v22 = vclamps-f32 %v6496_v39, 30.0  ;;  %9095 = vrcp.f32 %v6597_v35  ;;  %v6567_v39 = vmul.f32 1.442695, %v6545_v50 }
 0xc47   : > { %v6551_v30 = vsub.f32 0.0, %v8587_v22 }
 0xc49   : > { %v9092_v8 = vpop.eup %9091  ;;  %v6579_v4 = vmul.f32 1.442695, %v6551_v30  ;;  %v6429_v30 = vpop.f32.mrf.mxu2 }
 0xc4a   : > { %v6598_v43 = vadd.f32 1.0, %v9092_v8  ;;  %v6498_v25 = vpop.f32.mrf.mxu3  ;;  %v14091_v16 = vpop.eup %9093 }
 0xc4b   : > { %9097 = vpow2.f32 %v6579_v4  ;;  %v6499_v28 = vadd.f32 %v13956_v51, %v6498_v25  ;;  %v14094_v54 = vpop.eup %9095  ;;  %v14097_v35 = vmul.f32 %v14091_v16, %v6417_v32 }
 0xc4c   : > { %9099 = vrcp.f32 %v6598_v43  ;;  %15534 = vst [vmem:[#allocation85_spill] sm:$0xff] %v14094_v54  ;;  %v6661_v63 = vmul.f32 %v14094_v54, %v6423_v56  ;;  %v6645_v25 = vmul.f32 %v14094_v54, %v13892_v59  ;;  %v8584_v56 = vclamps-f32 %v6487_v52, 30.0 }
 0xc4d   : > { %v8588_v38 = vclamps-f32 %v6499_v28, 30.0  ;;  %9101 = vpow2.f32 %v6569_v5 }
 0xc4e   : > { %9103 = vpow2.f32 %v6567_v39  ;;  %v6821_v50 = vmul.f32 %v13920_v45, %v6661_v63  ;;  %v6805_v28 = vmul.f32 %v13920_v45, %v6645_v25 }
 0xc4f   : > { %v6552_v53 = vsub.f32 0.0, %v8588_v38 }
 0xc51   : > { %v9098_v10 = vpop.eup %9097  ;;  %v6581_v4 = vmul.f32 1.442695, %v6552_v53 }
 0xc52   : > { %v14104_v40 = vpop.eup %9099  ;;  %v6501_v49 = vpop.f32.mrf.mxu3  ;;  %v6599_v8 = vadd.f32 1.0, %v9098_v10 }
 0xc53   : > { %9105 = vpow2.f32 %v6581_v4  ;;  %v6502_v32 = vadd.f32 %v13956_v51, %v6501_v49  ;;  %v6662_v22 = vmul.f32 %v14104_v40, %v6426_v47  ;;  %v6646_v14 = vmul.f32 %v14104_v40, %v13895_v7  ;;  %v9102_v38 = vpop.eup %9101 }
 0xc54   : > { %v9104_v47 = vpop.eup %9103  ;;  %9107 = vrcp.f32 %v6599_v8  ;;  %v6548_v7 = vsub.f32 0.0, %v8584_v56  ;;  %v6594_v52 = vadd.f32 1.0, %v9102_v38  ;;  %v6432_v8 = vpop.f32.mrf.mxu2 }
 0xc55   : > { %v8589_v43 = vclamps-f32 %v6502_v32, 30.0  ;;  %v6822_v59 = vmul.f32 %v13916_v2, %v6662_v22  ;;  %v6806_v5 = vmul.f32 %v13916_v2, %v6646_v14  ;;  %v6593_v32 = vadd.f32 1.0, %v9104_v47 }
 0xc56   : > { %v6573_v22 = vmul.f32 1.442695, %v6548_v7 }
 0xc57   : > { %v6553_v39 = vsub.f32 0.0, %v8589_v43  ;;  %v8727_v53 = vpack.i.bf16 %v6821_v50, %v6822_v59  ;;  %v8722_v4 = vpack.i.bf16 %v6805_v28, %v6806_v5 }
 0xc59   : > { %v9106_v49 = vpop.eup %9105  ;;  %v6583_v54 = vmul.f32 1.442695, %v6553_v39  ;;  %8728 = vrot.lane.b32.xlu2 %v8727_v53, %s9220_s28  ;;  %8723 = vrot.lane.b32.xlu0 %v8722_v4, %s9218_s14 }
 0xc5a   : > { %v6600_v63 = vadd.f32 1.0, %v9106_v49  ;;  %v6504_v10 = vpop.f32.mrf.mxu3  ;;  %v14117_v50 = vpop.eup %9107 }
 0xc5b   : > { %9109 = vpow2.f32 %v6583_v54  ;;  %v6505_v25 = vadd.f32 %v13956_v51, %v6504_v10  ;;  %v6663_v28 = vmul.f32 %v14117_v50, %v6429_v30  ;;  %v6647_v54 = vmul.f32 %v14117_v50, %v13898_v9 }
 0xc5c   : > { %9111 = vrcp.f32 %v6600_v63 }
 0xc5d   : > { %v8590_v14 = vclamps-f32 %v6505_v25, 30.0  ;;  %9113 = vrcp.f32 %v6594_v52  ;;  %v6823_v4 = vmul.f32 %v13913_v0, %v6663_v28  ;;  %v6807_v30 = vmul.f32 %v13913_v0, %v6647_v54 }
 0xc5e   : > { %9115 = vrcp.f32 %v6593_v32 }
 0xc5f   : > { %v6554_v56 = vsub.f32 0.0, %v8590_v14  ;;  %9117 = vpow2.f32 %v6573_v22 }
 0xc61   : > { %v9110_v43 = vpop.eup %9109  ;;  %v6585_v59 = vmul.f32 1.442695, %v6554_v56 }
 0xc62   : > { %v14122_v5 = vpop.eup %9111  ;;  %v6601_v53 = vadd.f32 1.0, %v9110_v43 }
 0xc63   : > { %9119 = vpow2.f32 %v6585_v59  ;;  %v6664_v51 = vmul.f32 %v14122_v5, %v6432_v8  ;;  %v6648_v38 = vmul.f32 %v14122_v5, %v13902_v46  ;;  %v14127_v39 = vpop.eup %9113  ;;  %v6435_v46 = vpop.f32.mrf.mxu2 }
 0xc64   : > { %v14133_v9 = vpop.eup %9115  ;;  %v6642_v10 = vmul.f32 %v14127_v39, %v13822_v58  ;;  %9121 = vrcp.f32 %v6601_v53 }
 0xc65   : > { %v6824_v47 = vmul.f32 %v13907_v21, %v6664_v51  ;;  %v6808_v49 = vmul.f32 %v13907_v21, %v6648_v38  ;;  %v9118_v7 = vpop.eup %9117  ;;  %v6641_v32 = vmul.f32 %v14133_v9, %v13783_v6 }
 0xc66   : > { %v6596_v22 = vadd.f32 1.0, %v9118_v7  ;;  %v6802_v8 = vmul.f32 %v13932_v27, %v6642_v10  ;;  %v15535_v10 = vpack.i.bf16 %v14071_v36, %v14074_v1  ;;  %v15536_v36 = vpack.i.bf16 %v14007_v24, %v14010_v26 }
 0xc67   : > { %v8737_v52 = vpack.i.bf16 %v6823_v4, %v6824_v47  ;;  %v8732_v63 = vpack.i.bf16 %v6807_v30, %v6808_v49  ;;  %v6801_v56 = vmul.f32 %v13935_v18, %v6641_v32  ;;  %v15539_v24 = vpack.i.bf16 %v14044_v17, %v14047_v23 }
 0xc68   : > { %v15540_v26 = vpack.i.bf16 %v14013_v13, %v14016_v34  ;;  %v6632_v17 = vmul.f32 %v14122_v5, %v13540_v29 }
 0xc69   : > { %v9120_v25 = vpop.eup %9119  ;;  %8738 = vrot.lane.b32.xlu1 %v8737_v52, %s9220_s28  ;;  %8733 = vrot.lane.b32.xlu2 %v8732_v63, %s9218_s14  ;;  %v8762_v58 = vpack.i.bf16 %v6801_v56, %v6802_v8 }
 0xc6a   : > { %v6602_v14 = vadd.f32 1.0, %v9120_v25  ;;  %v9122_v43 = vpop.eup %9121 }
 0xc6b   : > { %v6665_v59 = vmul.f32 %v9122_v43, %v6435_v46  ;;  %v6649_v28 = vmul.f32 %v9122_v43, %v13909_v19  ;;  %v6438_v51 = vpop.f32.mrf.mxu2 }
 0xc6c   : > { %9123 = vrcp.f32 %v6602_v14  ;;  %v6658_v14 = vmul.f32 %v14127_v39, %v14024_v61  ;;  %v15537_v61 = vpack.i.bf16 %v14077_v55, %v14080_v31 }
 0xc6d   : > { %9125 = vrcp.f32 %v6596_v22  ;;  %v6825_v4 = vmul.f32 %v13904_v37, %v6665_v59  ;;  %v6809_v30 = vmul.f32 %v13904_v37, %v6649_v28 }
 0xc6e   : > { %v6818_v1 = vmul.f32 %v13932_v27, %v6658_v14  ;;  %v15546_v14 = vld [vmem:[#allocation63_spill] sm:$0xff] }
 0xc71   : > { %8763 = vrot.lane.b32.xlu2 %v8762_v58, %s9218_s14  ;;  %v6633_v58 = vmul.f32 %v9122_v43, %v13565_v42 }
 0xc72   : > { %v9124_v54 = vpop.eup %9123 }
 0xc73   : > { %v6666_v38 = vmul.f32 %v9124_v54, %v6438_v51  ;;  %v6650_v6 = vmul.f32 %v9124_v54, %v13918_v20  ;;  %v9126_v53 = vpop.eup %9125  ;;  %v6643_v20 = vmul.f32 %v14091_v16, %v13879_v60  ;;  %v6657_v60 = vmul.f32 %v14133_v9, %v14004_v57 }
 0xc74   : > { %v6660_v63 = vmul.f32 %v9126_v53, %v14064_v15  ;;  %v6644_v19 = vmul.f32 %v9126_v53, %v13888_v3  ;;  %v6819_v15 = vmul.f32 %v13927_v11, %v14097_v35  ;;  %v15538_v57 = vpack.i.bf16 %v14038_v48, %v14041_v41 }
 0xc75   : > { %v6826_v47 = vmul.f32 %v13911_v12, %v6666_v38  ;;  %v6810_v49 = vmul.f32 %v13911_v12, %v6650_v6  ;;  %v6803_v3 = vmul.f32 %v13927_v11, %v6643_v20  ;;  %v6817_v35 = vmul.f32 %v13935_v18, %v6657_v60 }
 0xc76   : > { %v6820_v46 = vmul.f32 %v13922_v44, %v6660_v63  ;;  %v6804_v25 = vmul.f32 %v13922_v44, %v6644_v19  ;;  %v6634_v41 = vmul.f32 %v9124_v54, %v13590_v62  ;;  %v6793_v51 = vmul.f32 %v13904_v37, %v6633_v58  ;;  %v15541_v54 = vld [vmem:[#allocation103_spill] sm:$0xff]  ;;  %v15544_v63 = vld [vmem:[#allocation93_spill] sm:$0xff] }
 0xc77   : > { %v8752_v7 = vpack.i.bf16 %v6825_v4, %v6826_v47  ;;  %v8742_v52 = vpack.i.bf16 %v6809_v30, %v6810_v49  ;;  %v8767_v8 = vpack.i.bf16 %v6817_v35, %v6818_v1  ;;  %v6630_v4 = vmul.f32 %v14104_v40, %v13496_v33  ;;  %v15542_v49 = vld [vmem:[#allocation36_spill] sm:$0xff] }
 0xc78   : > { %v8757_v32 = vpack.i.bf16 %v6819_v15, %v6820_v46  ;;  %v8747_v22 = vpack.i.bf16 %v6803_v3, %v6804_v25  ;;  %v6794_v34 = vmul.f32 %v13911_v12, %v6634_v41  ;;  %v6631_v37 = vmul.f32 %v14117_v50, %v15541_v54  ;;  %v14222_v50 = vld [vmem:[%s378_s15] ss:$0 sm:$0xff] }
 0xc79   : > { %8753 = vrot.lane.b32.xlu0 %v8752_v7, %s9220_s28  ;;  %8743 = vrot.lane.b32.xlu1 %v8742_v52, %s9218_s14  ;;  %v6792_v12 = vmul.f32 %v13907_v21, %v6632_v17  ;;  %v15543_v7 = vld [vmem:[#allocation85_spill] sm:$0xff]  ;;  %v6628_v19 = vmul.f32 %v9126_v53, %v15544_v63  ;;  %v15545_v20 = vlaneseq  ;;  %v6790_v3 = vmul.f32 %v13916_v2, %v6630_v4 }
 0xc7a   : > { %8778 = vrot.lane.b32.xlu2 %v15535_v10, %s9220_s28  ;;  %v6629_v33 = vmul.f32 %v15543_v7, %v15542_v49  ;;  %v6791_v15 = vmul.f32 %v13913_v0, %v6631_v37  ;;  %v6627_v60 = vmul.f32 %v14091_v16, %v15546_v14  ;;  %v15548_v17 = vld [vmem:[#allocation25_spill] sm:$0xff]  ;;  %v15551_v37 = vld [vmem:[#allocation115_spill] sm:$0xff]  ;;  %v15553_v7 = vld [vmem:[#allocation82_spill] sm:$0xff] }
 0xc7b   : > { %v14215_v10 = vshrl.u32 %v15545_v20, 7 }
 0xc7c   : > { %v6789_v0 = vmul.f32 %v13920_v45, %v6629_v33 }
 0xc7d   : > { %vm1713_vm11 = vcmp.eq.s32.totalorder %v14215_v10, %v14222_v50 }
 0xc81   : > { %8758 = vrot.lane.b32.xlu0 %v8757_v32, %s9220_s28  ;;  %8748 = vrot.lane.b32.xlu1 %v8747_v22, %s9218_s14 }
 0xc82   : > { %8793 = vrot.lane.b32.xlu2 %v15536_v36, %s9218_s14 }
 0xc89   : > { %8773 = vrot.lane.b32.xlu0 %v15537_v61, %s9218_s14  ;;  %8768 = vrot.lane.b32.xlu1 %v8767_v8, %s9220_s28  ;;  %v9221_v8 = vmov 1.0  }
 0xc8a   : > { %8591 = vmatmul.msk.f32.vlgmr.msrb.gmra.mxu0 %vm1713_vm11, %v9221_v8 }
 0xc91   : > { %8788 = vrot.lane.b32.xlu0 %v15538_v57, %s9220_s28  ;;  %8783 = vrot.lane.b32.xlu1 %v15539_v24, %s9218_s14  ;;  %v6788_v24 = vmul.f32 %v13922_v44, %v6628_v19 }
 0xc99   : > { %8798 = vrot.lane.b32.xlu1 %v15540_v26, %s9220_s28  ;;  %v15547_v26 = vld [vmem:[#allocation117_spill] sm:$0xff] }
 0xcb3   : > { %v14194_v56 = vpop.permute.xlu2 %8728 }
 0xcb4   : > { %v8730_v2 = vunpack.i.l.bf16 %v14194_v56  ;;  %v8731_v45 = vunpack.i.h.bf16 %v14194_v56  ;;  %v6625_v56 = vmul.f32 %v14133_v9, %v15548_v17  ;;  %v15564_v17 = vld [vmem:[#allocation70_spill] sm:$0xff] }
 0xcb6   : > { %v6785_v49 = vmul.f32 %v13935_v18, %v6625_v56 }
 0xcc3   : > { %v8734_v59 = vpop.permute.xlu2 %8733 }
 0xcc4   : > { %v8735_v42 = vunpack.i.l.bf16 %v8734_v59  ;;  %v8736_v5 = vunpack.i.h.bf16 %v8734_v59  ;;  %v14248_v59 = vadd.s32 8, %v14215_v10  ;;  %v6990_v10 = vld [vmem:[#allocation3 + $0x18] sm:$0xff] }
 0xcc6   : > { %v6968_v21 = vsel %vm2035_vm9, %v6792_v12, %v8735_v42  ;;  %v6967_v1 = vsel %vm2035_vm9, %v6791_v15, %v8736_v5  ;;  %vm1714_vm12 = vcmp.eq.s32.totalorder %v14248_v59, %v14222_v50  ;;  %v15558_v15 = vld [vmem:[#allocation90_spill] sm:$0xff] }
 0xcc7   : > { %8592 = vmatmul.msk.f32.gmra.mxu0 %vm1714_vm12, %v9221_v8 }
 0xccb   : > { %v8724_v55 = vpop.permute.xlu0 %8723  ;;  %v8764_v25 = vpop.permute.xlu2 %8763 }
 0xccc   : > { %v8725_v30 = vunpack.i.l.bf16 %v8724_v55  ;;  %v8726_v46 = vunpack.i.h.bf16 %v8724_v55  ;;  %v6626_v55 = vmul.f32 %v14127_v39, %v15547_v26 }
 0xcce   : > { %v6966_v35 = vsel %vm2035_vm9, %v6790_v3, %v8725_v30  ;;  %v6965_v57 = vsel %vm2035_vm9, %v6789_v0, %v8726_v46  ;;  %v6786_v42 = vmul.f32 %v13932_v27, %v6626_v55  ;;  %v15556_v46 = vld [vmem:[#allocation33_spill] sm:$0xff] }
 0xccf   : > { %v6982_v58 = vsel %vm2741_vm7, %v6966_v35, %v8730_v2  ;;  %v6981_v44 = vsel %vm2741_vm7, %v6965_v57, %v8731_v45 }
 0xcdb   : > { %v8739_v31 = vpop.permute.xlu1 %8738 }
 0xcdc   : > { %v8740_v47 = vunpack.i.l.bf16 %v8739_v31  ;;  %v8741_v40 = vunpack.i.h.bf16 %v8739_v31 }
 0xcde   : > { %v6984_v22 = vsel %vm2741_vm7, %v6968_v21, %v8740_v47  ;;  %v6983_v16 = vsel %vm2741_vm7, %v6967_v1, %v8741_v40  ;;  %v15552_v47 = vld [vmem:[#allocation39_spill] sm:$0xff]  ;;  %v15557_v21 = vld [vmem:[#allocation86_spill] sm:$0xff]  ;;  %v15559_v1 = vld [vmem:[#allocation9_spill] sm:$0xff] }
 0xcdf   : > { %v6623_v9 = vmul.f32 %v15552_v47, %v15551_v37  ;;  %v15554_v40 = vld [vmem:[#allocation7_spill] sm:$0xff]  ;;  %v6622_v3 = vmul.f32 %v15558_v15, %v15557_v21 }
 0xce0   : > { %v6987_v47 = vld [vmem:[#allocation3] sm:$0xff] }
 0xceb   : > { %v8754_v48 = vpop.permute.xlu0 %8753  ;;  %v8744_v28 = vpop.permute.xlu1 %8743 }
 0xcec   : > { %v8755_v23 = vunpack.i.l.bf16 %v8754_v48  ;;  %v8746_v38 = vunpack.i.h.bf16 %v8744_v28  ;;  %v8745_v13 = vunpack.i.l.bf16 %v8744_v28  ;;  %v8756_v6 = vunpack.i.h.bf16 %v8754_v48 }
 0xced   : > { %v6787_v48 = vmul.f32 %v13927_v11, %v6627_v60  ;;  %v8765_v28 = vunpack.i.l.bf16 %v8764_v25  ;;  %v8766_v11 = vunpack.i.h.bf16 %v8764_v25  ;;  %v6783_v25 = vmul.f32 %v15556_v46, %v6623_v9 }
 0xcee   : > { %v6970_v62 = vsel %vm2035_vm9, %v6794_v34, %v8745_v13  ;;  %v6969_v43 = vsel %vm2035_vm9, %v6793_v51, %v8746_v38  ;;  %v15550_v38 = vld [vmem:[#allocation105_spill] sm:$0xff] }
 0xcef   : > { %v6986_v29 = vsel %vm2741_vm7, %v6970_v62, %v8755_v23  ;;  %v6985_v52 = vsel %vm2741_vm7, %v6969_v43, %v8756_v6  ;;  %v15549_v23 = vld [vmem:[#allocation116_spill] sm:$0xff]  ;;  %v8779_v62 = vpop.permute.xlu2 %8778  ;;  %v6962_v27 = vsel %vm2035_vm9, %v6786_v42, %v8765_v28  ;;  %v6961_v19 = vsel %vm2035_vm9, %v6785_v49, %v8766_v11  ;;  %v15566_v11 = vld [vmem:[#allocation118_spill] sm:$0xff] }
 0xcf0   : > { %7014 = vmatpush.msrb.mxu3 %v6986_v29  ;;  %v6624_v13 = vmul.f32 %v15550_v38, %v15549_v23 }
 0xcf2   : > { %7015 = vmatpush.msrb.mxu3 %v6985_v52  ;;  %v6784_v33 = vmul.f32 %v15553_v7, %v6624_v13  ;;  %v15555_v52 = vld [vmem:[#allocation45_spill] sm:$0xff]  ;;  %v15565_v13 = vld [vmem:[#allocation104_spill] sm:$0xff] }
 0xcf3   : > { %v8759_v32 = vpop.permute.xlu0 %8758  ;;  %v8749_v53 = vpop.permute.xlu1 %8748  ;;  %v6621_v63 = vmul.f32 %v15555_v52, %v15554_v40 }
 0xcf4   : > { %v8750_v36 = vunpack.i.l.bf16 %v8749_v53  ;;  %7016 = vmatpush.msrb.mxu3 %v6984_v22  ;;  %v8751_v61 = vunpack.i.h.bf16 %v8749_v53  ;;  %v8760_v31 = vunpack.i.l.bf16 %v8759_v32  ;;  %v8761_v51 = vunpack.i.h.bf16 %v8759_v32 }
 0xcf5   : > { %v8780_v32 = vunpack.i.l.bf16 %v8779_v62  ;;  %v8781_v22 = vunpack.i.h.bf16 %v8779_v62  ;;  %v6781_v35 = vmul.f32 %v15559_v1, %v6621_v63 }
 0xcf6   : > { %7017 = vmatpush.msrb.mxu3 %v6983_v16  ;;  %v6964_v41 = vsel %vm2035_vm9, %v6788_v24, %v8750_v36  ;;  %v6963_v39 = vsel %vm2035_vm9, %v6787_v48, %v8751_v61  ;;  %v15560_v61 = vld [vmem:[#allocation88_spill] sm:$0xff]  ;;  %v15562_v48 = vld [vmem:[#allocation95_spill] sm:$0xff] }
 0xcf7   : > { %v6980_v4 = vsel %vm2741_vm7, %v6964_v41, %v8760_v31  ;;  %v6979_v5 = vsel %vm2741_vm7, %v6963_v39, %v8761_v51  ;;  %v6782_v57 = vmul.f32 %v15560_v61, %v6622_v3  ;;  %v8794_v55 = vpop.permute.xlu2 %8793  ;;  %v15561_v41 = vld [vmem:[#allocation101_spill] sm:$0xff] }
 0xcf8   : > { %7018 = vmatpush.msrb.mxu3 %v6982_v58  ;;  %v6620_v28 = vmul.f32 %v15562_v48, %v15561_v41  ;;  %v8795_v51 = vunpack.i.l.bf16 %v8794_v55  ;;  %v15563_v39 = vld [vmem:[#allocation69_spill] sm:$0xff]  ;;  %v8796_v23 = vunpack.i.h.bf16 %v8794_v55 }
 0xcf9   : > { %v6619_v56 = vmul.f32 %v15564_v17, %v15563_v39 }
 0xcfa   : > { %7019 = vmatpush.msrb.mxu3 %v6981_v44 }
 0xcfb   : > { %v8774_v34 = vpop.permute.xlu0 %8773  ;;  %v8769_v6 = vpop.permute.xlu1 %8768  ;;  %v6779_v62 = vmul.f32 %v15566_v11, %v6619_v56 }
 0xcfc   : > { %v8775_v43 = vunpack.i.l.bf16 %v8774_v34  ;;  %v8770_v54 = vunpack.i.l.bf16 %v8769_v6  ;;  %7020 = vmatpush.msrb.mxu3 %v6980_v4  ;;  %v8771_v29 = vunpack.i.h.bf16 %v8769_v6  ;;  %v8776_v30 = vunpack.i.h.bf16 %v8774_v34 }
 0xcfd   : > { %v6780_v34 = vmul.f32 %v15565_v13, %v6620_v28 }
 0xcfe   : > { %7021 = vmatpush.msrb.mxu3 %v6979_v5  ;;  %v6978_v12 = vsel %vm2741_vm7, %v6962_v27, %v8770_v54  ;;  %v6960_v20 = vsel %vm2035_vm9, %v6784_v33, %v8775_v43  ;;  %v6977_v53 = vsel %vm2741_vm7, %v6961_v19, %v8771_v29  ;;  %v6959_v18 = vsel %vm2035_vm9, %v6783_v25, %v8776_v30  ;;  %v6989_v5 = vld [vmem:[#allocation3 + $0x10] sm:$0xff] }
 0xcff   : > { %v6976_v36 = vsel %vm2741_vm7, %v6960_v20, %v8780_v32  ;;  %v6975_v26 = vsel %vm2741_vm7, %v6959_v18, %v8781_v22  ;;  %v6956_v42 = vsel %vm2035_vm9, %v6780_v34, %v8795_v51  ;;  %v6955_v54 = vsel %vm2035_vm9, %v6779_v62, %v8796_v23 }
 0xd00   : > { %7022 = vmatpush.msrb.mxu3 %v6978_v12  ;;  %v6988_v12 = vld [vmem:[#allocation3 + $0x8] sm:$0xff] }
 0xd02   : > { %7023 = vmatpush.msrb.mxu3 %v6977_v53 }
 0xd03   : > { %v8789_v14 = vpop.permute.xlu0 %8788  ;;  %v8784_v60 = vpop.permute.xlu1 %8783 }
 0xd04   : > { %v8790_v0 = vunpack.i.l.bf16 %v8789_v14  ;;  %v8786_v2 = vunpack.i.h.bf16 %v8784_v60  ;;  %v8785_v16 = vunpack.i.l.bf16 %v8784_v60  ;;  %7024 = vmatpush.msrb.mxu3 %v6976_v36  ;;  %v8791_v24 = vunpack.i.h.bf16 %v8789_v14 }
 0xd06   : > { %7025 = vmatpush.msrb.mxu3 %v6975_v26  ;;  %v6958_v45 = vsel %vm2035_vm9, %v6782_v57, %v8785_v16  ;;  %v6957_v31 = vsel %vm2035_vm9, %v6781_v35, %v8786_v2 }
 0xd07   : > { %v6974_v58 = vsel %vm2741_vm7, %v6958_v45, %v8790_v0  ;;  %v6973_v44 = vsel %vm2741_vm7, %v6957_v31, %v8791_v24  ;;  %v7008_v9 = vpop.f32.mrf.mxu0 }
 0xd08   : > { %7026 = vmatpush.msrb.mxu3 %v6974_v58  ;;  %v7037_v29 = vadd.f32 %v7008_v9, %v6987_v47 }
 0xd0a   : > { %7027 = vmatpush.msrb.mxu3 %v6973_v44  ;;  %7041 = vst [vmem:[#allocation3] sm:$0xff] %v7037_v29 }
 0xd0b   : > { %v8799_v38 = vpop.permute.xlu1 %8798 }
 0xd0c   : > { %v8801_v6 = vunpack.i.h.bf16 %v8799_v38  ;;  %v8800_v4 = vunpack.i.l.bf16 %v8799_v38 }
 0xd0e   : > { %v6972_v43 = vsel %vm2741_vm7, %v6956_v42, %v8800_v4  ;;  %v6971_v37 = vsel %vm2741_vm7, %v6955_v54, %v8801_v6 }
 0xd0f   : > { %7028 = vmatpush.msrb.mxu3 %v6972_v43 }
 0xd11   : > { %7029 = vmatpush.msrb.mxu3 %v6971_v37 }
 0xd12   : > { %8593 = vmatmul.msk.f32.vlgmr.msrb.gmra.mxu3 %vm1713_vm11, %v9221_v8 }
 0xd1a   : > { %8594 = vmatmul.msk.f32.gmra.mxu3 %vm1714_vm12, %v9221_v8 }
 0xd44   : > { %v7011_v27 = vpop.f32.mrf.mxu0 }
 0xd45   : > { %v7039_v30 = vadd.f32 %v7011_v27, %v6989_v5 }
 0xd47   : > { %7044 = vst [vmem:[#allocation3 + $0x10] sm:$0xff] %v7039_v30 }
 0xd95   : > { %v7031_v49 = vpop.f32.mrf.mxu3 }
 0xd96   : > { %v7038_v7 = vadd.f32 %v7031_v49, %v6988_v12 }
 0xd98   : > { %7043 = vst.msk [vmem:[#allocation3 + $0x8] sm:$0xff] %vm7042_vm14, %v7038_v7 }
 0xd9c   : > { %7049 = sbr.rel (%p8595_p6) target bundleno = 5057 (0x13c1), region = 64 }
 0xd9d   : > { %v7034_v33 = vpop.f32.mrf.mxu3 }
 0xd9e   : > { %v7040_v40 = vadd.f32 %v7034_v33, %v6990_v10 }
 0xda0   : > { %7045 = vst.msk [vmem:[#allocation3 + $0x18] sm:$0xff] %vm7042_vm14, %v7040_v40 }
 0xda1   : > { %v7061_v50 = vld [vmem:[%s14872_s6 + $0x250] sm:$0xff]  ;;  %v7060_v8 = vld [vmem:[%s14872_s6 + $0x248] sm:$0xff]  ;;  %v7059_v59 = vld [vmem:[%s14872_s6 + $0x240] sm:$0xff] }
 0xda2   : > { %7133 = vmatpush.msra.mxu0 %v7061_v50  ;;  %v7058_v52 = vld [vmem:[%s14872_s6 + $0x238] sm:$0xff]  ;;  %v7052_v63 = vld [vmem:[%s14867_s1] sm:$0xff]  ;;  %v7053_v19 = vld [vmem:[%s14867_s1 + $0x8] sm:$0xff] }
 0xda3   : > { %v7065_v20 = vld [vmem:[%s14872_s6 + $0x270] sm:$0xff]  ;;  %v7064_v46 = vld [vmem:[%s14872_s6 + $0x268] sm:$0xff]  ;;  %v7063_v25 = vld [vmem:[%s14872_s6 + $0x260] sm:$0xff] }
 0xda4   : > { %7134 = vmatpush.msra.mxu0 %v7060_v8  ;;  %7278 = vmatpush.msra.mxu3 %v7065_v20  ;;  %v7054_v21 = vld [vmem:[%s14867_s1 + $0x10] sm:$0xff]  ;;  %v7055_v15 = vld [vmem:[%s14867_s1 + $0x18] sm:$0xff]  ;;  %v7056_v3 = vld [vmem:[%s14867_s1 + $0x20] sm:$0xff] }
 0xda5   : > { %v7057_v32 = vld [vmem:[%s14867_s1 + $0x28] sm:$0xff]  ;;  %v7062_v53 = vld [vmem:[%s14872_s6 + $0x258] sm:$0xff]  ;;  %v7080_v22 = vld [vmem:[%s14873_s7 + $0x1b0] sm:$0xff] }
 0xda6   : > { %7135 = vmatpush.msra.mxu0 %v7059_v59  ;;  %7279 = vmatpush.msra.mxu3 %v7064_v46  ;;  %v7081_v18 = vld [vmem:[%s14873_s7 + $0x1b8] sm:$0xff]  ;;  %v7079_v14 = vld [vmem:[%s14873_s7 + $0x1a8] sm:$0xff]  ;;  %v7078_v60 = vld [vmem:[%s14873_s7 + $0x1a0] sm:$0xff] }
 0xda7   : > { %7202 = vmatpush.msra.mxu1 %v7081_v18  ;;  %v7077_v36 = vld [vmem:[%s14873_s7 + $0x198] sm:$0xff]  ;;  %v7076_v1 = vld [vmem:[%s14873_s7 + $0x190] sm:$0xff]  ;;  %v7075_v35 = vld [vmem:[%s14873_s7 + $0x188] sm:$0xff] }
 0xda8   : > { %7136 = vmatpush.msra.mxu0 %v7058_v52  ;;  %7280 = vmatpush.msra.mxu3 %v7063_v25  ;;  %v7074_v0 = vld [vmem:[%s14873_s7 + $0x180] sm:$0xff]  ;;  %v7073_v2 = vld [vmem:[%s14873_s7 + $0x178] sm:$0xff]  ;;  %v7072_v16 = vld [vmem:[%s14873_s7 + $0x170] sm:$0xff] }
 0xda9   : > { %8596 = vmatmul.msk.f32.vlgmr.msra.gmra.mxu0 %vm2035_vm9, %v7052_v63  ;;  %7203 = vmatpush.msra.mxu1 %v7080_v22  ;;  %v7071_v61 = vld [vmem:[%s14873_s7 + $0x168] sm:$0xff]  ;;  %v7070_v24 = vld [vmem:[%s14873_s7 + $0x160] sm:$0xff]  ;;  %v7069_v26 = vld [vmem:[%s14873_s7 + $0x158] sm:$0xff] }
 0xdaa   : > { %7281 = vmatpush.msra.mxu3 %v7062_v53  ;;  %v7068_v55 = vld [vmem:[%s14873_s7 + $0x150] sm:$0xff]  ;;  %v7067_v45 = vld [vmem:[%s14873_s7 + $0x148] sm:$0xff]  ;;  %v7066_v58 = vld [vmem:[%s14873_s7 + $0x140] sm:$0xff] }
 0xdab   : > { %7204 = vmatpush.msra.mxu1 %v7079_v14  ;;  %v7050_v41 = vld [vmem:[%s14866_s0] sm:$0xff]  ;;  %v7085_v48 = vld [vmem:[%s14873_s7 + $0x1d8] sm:$0xff]  ;;  %v7084_v28 = vld [vmem:[%s14873_s7 + $0x1d0] sm:$0xff] }
 0xdac   : > { %v7083_v51 = vld [vmem:[%s14873_s7 + $0x1c8] sm:$0xff]  ;;  %v7082_v17 = vld [vmem:[%s14873_s7 + $0x1c0] sm:$0xff]  ;;  %v7101_v18 = vld [vmem:[%s14872_s6 + $0x2f0] sm:$0xff] }
 0xdad   : > { %7205 = vmatpush.msra.mxu1 %v7078_v60  ;;  %v7051_v39 = vld [vmem:[%s14866_s0 + $0x8] sm:$0xff]  ;;  %7302 = vmatpush.msra.mxu2 %v7101_v18  ;;  %v7099_v14 = vld [vmem:[%s14872_s6 + $0x2e0] sm:$0xff]  ;;  %v7098_v60 = vld [vmem:[%s14872_s6 + $0x2d8] sm:$0xff] }
 0xdae   : > { %v7100_v22 = vld [vmem:[%s14872_s6 + $0x2e8] sm:$0xff] }
 0xdaf   : > { %7206 = vmatpush.msra.mxu1 %v7077_v36  ;;  %7303 = vmatpush.msra.mxu2 %v7100_v22  ;;  %v7097_v36 = vld [vmem:[%s14872_s6 + $0x2d0] sm:$0xff] }
 0xdb1   : > { %8597 = vmatmul.msk.f32.gmra.mxu0 %vm2035_vm9, %v7053_v19  ;;  %7207 = vmatpush.msra.mxu1 %v7076_v1  ;;  %v7096_v1 = vld [vmem:[%s14872_s6 + $0x2c8] sm:$0xff] }
 0xdb2   : > { %7304 = vmatpush.msra.mxu2 %v7099_v14 }
 0xdb3   : > { %7208 = vmatpush.msra.mxu1 %v7075_v35  ;;  %v7095_v35 = vld [vmem:[%s14872_s6 + $0x2c0] sm:$0xff] }
 0xdb4   : > { %7305 = vmatpush.msra.mxu2 %v7098_v60 }
 0xdb5   : > { %7209 = vmatpush.msra.mxu1 %v7074_v0  ;;  %v7094_v0 = vld [vmem:[%s14872_s6 + $0x2b8] sm:$0xff] }
 0xdb6   : > { %7306 = vmatpush.msra.mxu2 %v7097_v36 }
 0xdb7   : > { %7210 = vmatpush.msra.mxu1 %v7073_v2  ;;  %v7093_v2 = vld [vmem:[%s14872_s6 + $0x2b0] sm:$0xff] }
 0xdb8   : > { %7307 = vmatpush.msra.mxu2 %v7096_v1 }
 0xdb9   : > { %8598 = vmatmul.msk.f32.gmra.mxu0 %vm2035_vm9, %v7054_v21  ;;  %7211 = vmatpush.msra.mxu1 %v7072_v16  ;;  %v7092_v16 = vld [vmem:[%s14872_s6 + $0x2a8] sm:$0xff] }
 0xdba   : > { %7308 = vmatpush.msra.mxu2 %v7095_v35 }
 0xdbb   : > { %7212 = vmatpush.msra.mxu1 %v7071_v61  ;;  %v7091_v61 = vld [vmem:[%s14872_s6 + $0x2a0] sm:$0xff] }
 0xdbc   : > { %7309 = vmatpush.msra.mxu2 %v7094_v0 }
 0xdbd   : > { %7213 = vmatpush.msra.mxu1 %v7070_v24  ;;  %v7089_v24 = vld [vmem:[%s14872_s6 + $0x290] sm:$0xff] }
 0xdbe   : > { %7310 = vmatpush.msra.mxu2 %v7093_v2 }
 0xdbf   : > { %7214 = vmatpush.msra.mxu1 %v7069_v26  ;;  %v7088_v26 = vld [vmem:[%s14872_s6 + $0x288] sm:$0xff] }
 0xdc0   : > { %7311 = vmatpush.msra.mxu2 %v7092_v16 }
 0xdc1   : > { %8599 = vmatmul.msk.f32.gmra.mxu0 %vm2035_vm9, %v7055_v15  ;;  %7215 = vmatpush.msra.mxu1 %v7068_v55  ;;  %v7087_v55 = vld [vmem:[%s14872_s6 + $0x280] sm:$0xff] }
 0xdc2   : > { %7312 = vmatpush.msra.mxu2 %v7091_v61 }
 0xdc3   : > { %7216 = vmatpush.msra.mxu1 %v7067_v45  ;;  %v7086_v45 = vld [vmem:[%s14872_s6 + $0x278] sm:$0xff] }
 0xdc5   : > { %7217 = vmatpush.msra.mxu1 %v7066_v58  ;;  %v7348_v58 = vld [vmem:[#allocation3 + $0x18] sm:$0xff] }
 0xdc6   : > { %7218 = vmatmul.f32.vlgmr.msra.gmra.mxu1 %v7050_v41  ;;  %7355 = vrot.lane.b32.xlu1 %v7348_v58, %s9222_s25 }
 0xdc7   : > { %7237 = vmatpush.msrb.mxu1 %v7085_v48 }
 0xdc9   : > { %8600 = vmatmul.msk.f32.gmra.mxu0 %vm2035_vm9, %v7056_v3  ;;  %7238 = vmatpush.msrb.mxu1 %v7084_v28 }
 0xdcb   : > { %7239 = vmatpush.msrb.mxu1 %v7083_v51 }
 0xdcd   : > { %7240 = vmatpush.msrb.mxu1 %v7082_v17 }
 0xdce   : > { %7221 = vmatmul.f32.gmra.mxu1 %v7051_v39  ;;  %7361 = vrot.lane.b32.xlu1 %v7348_v58, %s9223_s13 }
 0xdd1   : > { %8601 = vmatmul.msk.f32.gmra.mxu0 %vm2035_vm9, %v7057_v32 }
 0xe26   : > { %v7138_v57 = vpop.f32.mrf.mxu0 }
 0xe27   : > { %8604 = vmatmul.msk.f32.vlgmr.msra.gmra.mxu3 %vm2035_vm9, %v7138_v57  ;;  %v7156_v38 = vmul.f32 %v7138_v57, %v7138_v57  ;;  %v7090_v57 = vld [vmem:[%s14872_s6 + $0x298] sm:$0xff] }
 0xe28   : > { %7313 = vmatpush.msra.mxu2 %v7090_v57 }
 0xe29   : > { %v7162_v6 = vsel %vm2035_vm9, %v7156_v38, 0.0 }
 0xe2a   : > { %7314 = vmatpush.msra.mxu2 %v7089_v24 }
 0xe2c   : > { %7315 = vmatpush.msra.mxu2 %v7088_v26 }
 0xe2e   : > { %v7141_v31 = vpop.f32.mrf.mxu0  ;;  %7316 = vmatpush.msra.mxu2 %v7087_v55 }
 0xe2f   : > { %8605 = vmatmul.msk.f32.gmra.mxu3 %vm2035_vm9, %v7141_v31  ;;  %v7157_v54 = vmul.f32 %v7141_v31, %v7141_v31  ;;  %v7346_v31 = vld [vmem:[#allocation3 + $0x8] sm:$0xff] }
 0xe30   : > { %7317 = vmatpush.msra.mxu2 %v7086_v45  ;;  %7353 = vrot.lane.b32.xlu0 %v7346_v31, %s9222_s25 }
 0xe31   : > { %v7167_v9 = vsel %vm2035_vm9, %v7157_v54, 0.0 }
 0xe36   : > { %v7144_v44 = vpop.f32.mrf.mxu0 }
 0xe37   : > { %8606 = vmatmul.msk.f32.gmra.mxu3 %vm2035_vm9, %v7144_v44  ;;  %v7158_v23 = vmul.f32 %v7144_v44, %v7144_v44 }
 0xe38   : > { %7359 = vrot.lane.b32.xlu0 %v7346_v31, %s9223_s13 }
 0xe39   : > { %v7163_v13 = vsel %vm2035_vm9, %v7158_v23, 0.0  ;;  %v9129_v23 = vld [vmem:[%s14872_s6 + $0x2f8] ss:$0 sm:$0xff] }
 0xe3a   : > { %v7164_v42 = vadd.f32 %v7163_v13, %v7162_v6 }
 0xe3e   : > { %v7147_v56 = vpop.f32.mrf.mxu0 }
 0xe3f   : > { %8607 = vmatmul.msk.f32.gmra.mxu3 %vm2035_vm9, %v7147_v56  ;;  %v7159_v11 = vmul.f32 %v7147_v56, %v7147_v56 }
 0xe41   : > { %v7168_v37 = vsel %vm2035_vm9, %v7159_v11, 0.0 }
 0xe42   : > { %v7169_v5 = vadd.f32 %v7168_v37, %v7167_v9 }
 0xe43   : > { %v7219_v41 = vpop.f32.mrf.mxu1 }
 0xe46   : > { %v7150_v34 = vpop.f32.mrf.mxu0 }
 0xe47   : > { %v7160_v4 = vmul.f32 %v7150_v34, %v7150_v34  ;;  %8608 = vmatmul.msk.f32.gmra.mxu3 %vm2035_vm9, %v7150_v34 }
 0xe49   : > { %v7165_v62 = vsel %vm2035_vm9, %v7160_v4, 0.0 }
 0xe4a   : > { %v7166_v43 = vadd.f32 %v7165_v62, %v7164_v42 }
 0xe4b   : > { %v7222_v48 = vpop.f32.mrf.mxu1 }
 0xe4c   : > { %9133 = vrsqrt.f32 %v7166_v43  ;;  %vm7179_vm15 = vcmp.eq.f32.partialorder %v7166_v43, inf  ;;  %v7182_v63 = vand.u32 2147483648, %v7166_v43  ;;  %vm7181_vm13 = vcmp.eq.f32.partialorder %v7166_v43, 0.0 }
 0xe4e   : > { %v7153_v47 = vpop.f32.mrf.mxu0 }
 0xe4f   : > { %v7161_v29 = vmul.f32 %v7153_v47, %v7153_v47  ;;  %8609 = vmatmul.msk.f32.gmra.mxu3 %vm2035_vm9, %v7153_v47 }
 0xe51   : > { %v7170_v27 = vsel %vm2035_vm9, %v7161_v29, 0.0 }
 0xe52   : > { %v9134_v30 = vpop.eup %9133  ;;  %v7171_v12 = vadd.f32 %v7170_v27, %v7169_v5 }
 0xe53   : > { %v7173_v49 = vmul.f32 %v9134_v30, %v7166_v43 }
 0xe54   : > { %9135 = vrsqrt.f32 %v7171_v12  ;;  %vm7191_vm0 = vcmp.eq.f32.partialorder %v7171_v12, inf  ;;  %v7194_v3 = vand.u32 2147483648, %v7171_v12  ;;  %vm7193_vm1 = vcmp.eq.f32.partialorder %v7171_v12, 0.0 }
 0xe55   : > { %v7174_v7 = vmul.f32 %v9134_v30, %v7173_v49 }
 0xe57   : > { %v7175_v10 = vmul.f32 0.5, %v7174_v7 }
 0xe59   : > { %v7176_v33 = vsub.f32 1.5, %v7175_v10 }
 0xe5a   : > { %v9136_v40 = vpop.eup %9135 }
 0xe5b   : > { %v7177_v50 = vmul.f32 %v9134_v30, %v7176_v33  ;;  %v7185_v8 = vmul.f32 %v9136_v40, %v7171_v12 }
 0xe5d   : > { %v7178_v59 = vmul.f32 %v7177_v50, %v7166_v43  ;;  %v7186_v52 = vmul.f32 %v9136_v40, %v7185_v8 }
 0xe5f   : > { %v7180_v19 = vsel %vm7179_vm15, %v7166_v43, %v7178_v59  ;;  %v7187_v20 = vmul.f32 0.5, %v7186_v52 }
 0xe60   : > { %v7183_v46 = vsel %vm7181_vm13, %v7182_v63, %v7180_v19 }
 0xe61   : > { %8602 = vmatmul.msk.f32.vlgmr.msrb.gmra.mxu1 %vm2035_vm9, %v7183_v46  ;;  %v7188_v25 = vsub.f32 1.5, %v7187_v20 }
 0xe63   : > { %v7189_v21 = vmul.f32 %v9136_v40, %v7188_v25  ;;  %v7356_v25 = vpop.permute.xlu1 %7355 }
 0xe65   : > { %v7190_v15 = vmul.f32 %v7189_v21, %v7171_v12 }
 0xe67   : > { %v7192_v32 = vsel %vm7191_vm0, %v7171_v12, %v7190_v15 }
 0xe68   : > { %v7195_v53 = vsel %vm7193_vm1, %v7194_v3, %v7192_v32 }
 0xe69   : > { %8603 = vmatmul.msk.f32.gmra.mxu1 %vm2035_vm9, %v7195_v53 }
 0xe6b   : > { %v7362_v14 = vpop.permute.xlu1 %7361 }
 0xea2   : > { %v7354_v47 = vpop.permute.xlu0 %7353 }
 0xeaa   : > { %v7283_v17 = vpop.f32.mrf.mxu3  ;;  %v7360_v7 = vpop.permute.xlu0 %7359 }
 0xeb2   : > { %v7286_v56 = vpop.f32.mrf.mxu3 }
 0xeba   : > { %v7289_v6 = vpop.f32.mrf.mxu3 }
 0xec2   : > { %v7292_v37 = vpop.f32.mrf.mxu3 }
 0xeca   : > { %v7295_v12 = vpop.f32.mrf.mxu3 }
 0xed2   : > { %v7298_v53 = vpop.f32.mrf.mxu3 }
 0xede   : > { %v7242_v28 = vpop.f32.mrf.mxu1 }
 0xedf   : > { %v14489_v51 = vadd.f32 %v7242_v28, %v7219_v41 }
 0xee1   : > { %7318 = vmatmul.f32.vlgmr.msra.gmra.mxu2 %v14489_v51 }
 0xee6   : > { %v7245_v44 = vpop.f32.mrf.mxu1 }
 0xee7   : > { %v14492_v39 = vadd.f32 %v7245_v44, %v7222_v48 }
 0xee9   : > { %7321 = vmatmul.f32.gmra.mxu2 %v14492_v39 }
 0xf64   : > { %v7319_v38 = vpop.f32.mrf.mxu2 }
 0xf65   : > { %v7320_v13 = vadd.f32 %v9129_v23, %v7319_v38 }
 0xf67   : > { %v8610_v34 = vclamps-f32 %v7320_v13, 30.0 }
 0xf69   : > { %v7329_v4 = vsub.f32 0.0, %v8610_v34 }
 0xf6b   : > { %v7331_v42 = vmul.f32 1.442695, %v7329_v4 }
 0xf6c   : > { %v7322_v11 = vpop.f32.mrf.mxu2 }
 0xf6d   : > { %9137 = vpow2.f32 %v7331_v42  ;;  %v7323_v62 = vadd.f32 %v9129_v23, %v7322_v11 }
 0xf6f   : > { %v8611_v43 = vclamps-f32 %v7323_v62, 30.0 }
 0xf71   : > { %v7330_v54 = vsub.f32 0.0, %v8611_v43  ;;  %v7347_v43 = vld [vmem:[#allocation3 + $0x10] sm:$0xff] }
 0xf73   : > { %v9138_v9 = vpop.eup %9137  ;;  %v7333_v29 = vmul.f32 1.442695, %v7330_v54 }
 0xf74   : > { %v7335_v5 = vadd.f32 1.0, %v9138_v9  ;;  %v7345_v9 = vld [vmem:[#allocation3] sm:$0xff] }
 0xf75   : > { %9139 = vpow2.f32 %v7333_v29  ;;  %v7349_v29 = vadd.f32 %v7345_v9, %v14489_v51  ;;  %v7553_v51 = vld [vmem:[%s14872_s6 + $0x3f0] sm:$0xff] }
 0xf76   : > { %9141 = vrcp.f32 %v7335_v5  ;;  %v9224_v5 = vmov 128.0  }
 0xf7b   : > { %v9140_v27 = vpop.eup %9139 }
 0xf7c   : > { %v9142_v30 = vpop.eup %9141  ;;  %v7336_v49 = vadd.f32 1.0, %v9140_v27 }
 0xf7d   : > { %v7343_v10 = vmul.f32 %v9142_v30, %v7295_v12  ;;  %v7339_v33 = vmul.f32 %v9142_v30, %v7283_v17  ;;  %v7341_v8 = vmul.f32 %v9142_v30, %v7289_v6 }
 0xf7e   : > { %9143 = vrcp.f32 %v7336_v49  ;;  %v7555_v49 = vld [vmem:[%s14872_s6 + $0x400] sm:$0xff] }
 0xf7f   : > { %v7369_v40 = vadd.f32 %v7360_v7, %v7343_v10  ;;  %v7365_v50 = vadd.f32 %v7346_v31, %v7339_v33  ;;  %v7367_v19 = vadd.f32 %v7354_v47, %v7341_v8  ;;  %9145 = vrcp.f32 %v9224_v5  ;;  %7586 = vmatpush.msra.mxu1 %v7555_v49 }
 0xf81   : > { %v7438_v59 = vsel %vm2035_vm9, %v7369_v40, 0.0  ;;  %v7426_v52 = vsel %vm2035_vm9, %v7365_v50, 0.0  ;;  %v7432_v3 = vsel %vm2035_vm9, %v7367_v19, 0.0 }
 0xf82   : > { %7439 = vadd.xlane.f32.xlu0 %v7438_v59  ;;  %7427 = vadd.xlane.f32.xlu2 %v7426_v52 }
 0xf84   : > { %v9144_v63 = vpop.eup %9143 }
 0xf85   : > { %v7340_v20 = vmul.f32 %v9144_v63, %v7286_v56  ;;  %v7342_v21 = vmul.f32 %v9144_v63, %v7292_v37  ;;  %v7344_v18 = vmul.f32 %v9144_v63, %v7298_v53  ;;  %v7350_v37 = vadd.f32 %v7347_v43, %v14492_v39  ;;  %v9146_v30 = vpop.eup %9145  ;;  %v7554_v39 = vld [vmem:[%s14872_s6 + $0x3f8] sm:$0xff] }
 0xf86   : > { %v7376_v12 = vmul.f32 128.0, %v9146_v30  ;;  %7587 = vmatpush.msra.mxu1 %v7554_v39  ;;  %vm7380_vm2 = vweird.f32 %v9146_v30 }
 0xf87   : > { %v7366_v46 = vadd.f32 %v7348_v58, %v7340_v20  ;;  %v7368_v32 = vadd.f32 %v7356_v25, %v7342_v21  ;;  %v7370_v60 = vadd.f32 %v7362_v14, %v7344_v18 }
 0xf88   : > { %v7377_v10 = vsub.f32 1.0, %v7376_v12  ;;  %7588 = vmatpush.msra.mxu1 %v7553_v51 }
 0xf89   : > { %v7429_v15 = vsel %vm2035_vm9, %v7366_v46, 0.0  ;;  %v7435_v22 = vsel %vm2035_vm9, %v7368_v32, 0.0  ;;  %v7441_v36 = vsel %vm2035_vm9, %v7370_v60, 0.0 }
 0xf8a   : > { %7430 = vadd.xlane.f32.xlu1 %v7429_v15  ;;  %7433 = vadd.xlane.f32.xlu2 %v7432_v3  ;;  %v7378_v33 = vmul.f32 %v9146_v30, %v7377_v10 }
 0xf8c   : > { %v7379_v52 = vadd.f32 %v9146_v30, %v7378_v33 }
 0xf8e   : > { %v14548_v20 = vsel %vm7380_vm2, %v9146_v30, %v7379_v52 }
 0xf92   : > { %7436 = vadd.xlane.f32.xlu2 %v7435_v22 }
 0xf9a   : > { %7442 = vadd.xlane.f32.xlu2 %v7441_v36 }
 0xff5   : > { %v7428_v1 = vpop.xlane.xlu2 %7427  ;;  %v7440_v2 = vpop.xlane.xlu0 %7439 }
 0xffd   : > { %v7434_v35 = vpop.xlane.xlu2 %7433  ;;  %v7431_v31 = vpop.xlane.xlu1 %7430 }
 0xffe   : > { %v7444_v0 = vadd.f32 %v7434_v35, %v7428_v1 }
0x1000   : > { %v7445_v16 = vadd.f32 %v7444_v0, %v7440_v2 }
0x1002   : > { %v7448_v61 = vmul.f32 0.010416667, %v7445_v16 }
0x1004   : > { %v14504_v57 = vsub.f32 %v7365_v50, %v7448_v61  ;;  %v14509_v45 = vsub.f32 %v7367_v19, %v7448_v61  ;;  %v14514_v56 = vsub.f32 %v7369_v40, %v7448_v61  ;;  %v7552_v40 = vld [vmem:[%s14872_s6 + $0x3e8] sm:$0xff] }
0x1005   : > { %v7437_v24 = vpop.xlane.xlu2 %7436  ;;  %7589 = vmatpush.msra.mxu1 %v7552_v40 }
0x1006   : > { %v7456_v26 = vmul.f32 %v14504_v57, %v14504_v57  ;;  %v7446_v58 = vadd.f32 %v7437_v24, %v7431_v31  ;;  %v7458_v41 = vmul.f32 %v14509_v45, %v14509_v45  ;;  %v7460_v6 = vmul.f32 %v14514_v56, %v14514_v56 }
0x1008   : > { %v7462_v55 = vsel %vm2035_vm9, %v7456_v26, 0.0  ;;  %v7468_v17 = vsel %vm2035_vm9, %v7458_v41, 0.0  ;;  %v7474_v11 = vsel %vm2035_vm9, %v7460_v6, 0.0 }
0x1009   : > { %7463 = vadd.xlane.f32.xlu2 %v7462_v55  ;;  %v7514_v55 = vld [vmem:[%s14872_s6 + $0x4b8] sm:$0x7] }
0x100a   : > { %v7518_v41 = vperm.slane %v7514_v55, 0 }
0x100d   : > { %v7443_v48 = vpop.xlane.xlu2 %7442 }
0x100e   : > { %v7447_v28 = vadd.f32 %v7446_v58, %v7443_v48 }
0x1010   : > { %v7449_v44 = vmul.f32 0.010416667, %v7447_v28 }
0x1011   : > { %7469 = vadd.xlane.f32.xlu2 %v7468_v17 }
0x1012   : > { %v14516_v23 = vsub.f32 %v7370_v60, %v7449_v44  ;;  %v14518_v38 = vsub.f32 %v7368_v32, %v7449_v44  ;;  %v14529_v62 = vsub.f32 %v7366_v46, %v7449_v44  ;;  %v7530_v44 = vld [vmem:[%s14872_s6 + $0x4c0] sm:$0x7] }
0x1013   : > { %v7533_v33 = vrot.slane %v7530_v44, 2 }
0x1014   : > { %v7461_v13 = vmul.f32 %v14516_v23, %v14516_v23  ;;  %v7459_v34 = vmul.f32 %v14518_v38, %v14518_v38  ;;  %v7457_v54 = vmul.f32 %v14529_v62, %v14529_v62 }
0x1016   : > { %v7477_v4 = vsel %vm2035_vm9, %v7461_v13, 0.0  ;;  %v7471_v42 = vsel %vm2035_vm9, %v7459_v34, 0.0  ;;  %v7465_v47 = vsel %vm2035_vm9, %v7457_v54, 0.0  ;;  %v7534_v13 = vperm.slane %v7530_v44, 0 }
0x1017   : > { %7478 = vadd.xlane.f32.xlu1 %v7477_v4  ;;  %7472 = vadd.xlane.f32.xlu0 %v7471_v42 }
0x1019   : > { %7475 = vadd.xlane.f32.xlu2 %v7474_v11 }
0x101f   : > { %7373 = vadd.xlane.f32.xlu0 %v7350_v37 }
0x1021   : > { %7466 = vadd.xlane.f32.xlu2 %v7465_v47 }
0x1029   : > { %7371 = vadd.xlane.f32.xlu2 %v7349_v29 }
0x107c   : > { %v7464_v27 = vpop.xlane.xlu2 %7463 }
0x1084   : > { %v7470_v7 = vpop.xlane.xlu2 %7469 }
0x1085   : > { %v7480_v8 = vadd.f32 %v7470_v7, %v7464_v27  ;;  %v7532_v27 = vrot.slane %v7530_v44, 1 }
0x1087   : > { %v7535_v12 = vperm.slane %v7532_v27, 0  ;;  %v9131_v27 = vld [vmem:[%s14873_s7 + $0x288] ss:$0 sm:$0xff] }
0x108a   : > { %v7473_v50 = vpop.xlane.xlu0 %7472  ;;  %v7479_v53 = vpop.xlane.xlu1 %7478 }
0x108c   : > { %v7476_v59 = vpop.xlane.xlu2 %7475 }
0x108d   : > { %v7481_v63 = vadd.f32 %v7480_v8, %v7476_v59 }
0x108f   : > { %v7484_v19 = vmul.f32 0.010416667, %v7481_v63  ;;  %v7724_v63 = vld [vmem:[%s14873_s7 + $0x248] sm:$0xff] }
0x1091   : > { %v7486_v46 = vadd.f32 1e-05, %v7484_v19  ;;  %v7723_v19 = vld [vmem:[%s14873_s7 + $0x240] sm:$0xff] }
0x1092   : > { %v7374_v25 = vpop.xlane.xlu0 %7373 }
0x1093   : > { %9147 = vrsqrt.f32 %v7486_v46  ;;  %v7383_v21 = vmul.f32 %v14548_v20, %v7374_v25  ;;  %vm7494_vm4 = vweird.f32 %v7486_v46  ;;  %v7721_v25 = vld [vmem:[%s14873_s7 + $0x230] sm:$0xff] }
0x1094   : > { %v7467_v15 = vpop.xlane.xlu2 %7466 }
0x1095   : > { %v14551_v3 = vsub.f32 %v7350_v37, %v7383_v21  ;;  %v7482_v32 = vadd.f32 %v7473_v50, %v7467_v15  ;;  %v7516_v37 = vrot.slane %v7514_v55, 1  ;;  %v7536_v50 = vperm.slane %v7533_v33, 0  ;;  %v7720_v21 = vld [vmem:[%s14873_s7 + $0x228] sm:$0xff]  ;;  %v7719_v15 = vld [vmem:[%s14873_s7 + $0x220] sm:$0xff] }
0x1097   : > { %v7483_v18 = vadd.f32 %v7482_v32, %v7479_v53  ;;  %v7387_v22 = vmul.f32 %v14551_v3, %v14551_v3  ;;  %v7718_v32 = vld [vmem:[%s14873_s7 + $0x218] sm:$0xff]  ;;  %v7717_v53 = vld [vmem:[%s14873_s7 + $0x210] sm:$0xff] }
0x1099   : > { %v9148_v14 = vpop.eup %9147  ;;  %v7485_v60 = vmul.f32 0.010416667, %v7483_v18  ;;  %7390 = vadd.xlane.f32.xlu2 %v7387_v22  ;;  %v7716_v18 = vld [vmem:[%s14873_s7 + $0x208] sm:$0xff] }
0x109a   : > { %v7489_v36 = vmul.f32 %v9148_v14, %v7486_v46  ;;  %vm7495_vm3 = vweird.f32 %v9148_v14  ;;  %v7722_v46 = vld [vmem:[%s14873_s7 + $0x238] sm:$0xff] }
0x109b   : > { %v7487_v1 = vadd.f32 1e-05, %v7485_v60  ;;  %vm7496_vm5 = vmor %vm7494_vm4, %vm7495_vm3 }
0x109c   : > { %v7490_v35 = vmul.f32 %v9148_v14, %v7489_v36  ;;  %v7372_v0 = vpop.xlane.xlu2 %7371  ;;  %v7714_v36 = vld [vmem:[%s14873_s7 + $0x1f8] sm:$0xff] }
0x109d   : > { %9149 = vrsqrt.f32 %v7487_v1  ;;  %v7382_v2 = vmul.f32 %v14548_v20, %v7372_v0  ;;  %vm7504_vm8 = vweird.f32 %v7487_v1  ;;  %v7712_v0 = vld [vmem:[%s14873_s7 + $0x1e8] sm:$0xff] }
0x109e   : > { %v7491_v16 = vmul.f32 0.5, %v7490_v35 }
0x109f   : > { %v14556_v61 = vsub.f32 %v7349_v29, %v7382_v2  ;;  %v7711_v2 = vld [vmem:[%s14873_s7 + $0x1e0] sm:$0xff] }
0x10a0   : > { %v7492_v24 = vsub.f32 1.5, %v7491_v16 }
0x10a1   : > { %v7386_v26 = vmul.f32 %v14556_v61, %v14556_v61 }
0x10a2   : > { %v7493_v31 = vmul.f32 %v9148_v14, %v7492_v24  ;;  %v7706_v24 = vld [vmem:[%s14872_s6 + $0x318] sm:$0xff] }
0x10a3   : > { %v9150_v58 = vpop.eup %9149  ;;  %7388 = vadd.xlane.f32.xlu1 %v7386_v26  ;;  %7778 = vmatpush.msrb.mxu0 %v7706_v24 }
0x10a4   : > { %v7497_v48 = vsel %vm7496_vm5, %v9148_v14, %v7493_v31  ;;  %v7499_v28 = vmul.f32 %v9150_v58, %v7487_v1  ;;  %vm7505_vm6 = vweird.f32 %v9150_v58  ;;  %v7715_v14 = vld [vmem:[%s14873_s7 + $0x200] sm:$0xff]  ;;  %v7713_v1 = vld [vmem:[%s14873_s7 + $0x1f0] sm:$0xff] }
0x10a5   : > { %v7508_v17 = vmul.f32 %v7497_v48, %v14504_v57  ;;  %vm7506_vm10 = vmor %vm7504_vm8, %vm7505_vm6  ;;  %v7519_v57 = vperm.slane %v7516_v37, 0  ;;  %v7510_v29 = vmul.f32 %v7497_v48, %v14509_v45  ;;  %v7512_v45 = vmul.f32 %v7497_v48, %v14514_v56  ;;  %v7726_v56 = vld [vmem:[%s14873_s7 + $0x258] sm:$0xff] }
0x10a6   : > { %v7500_v34 = vmul.f32 %v9150_v58, %v7499_v28  ;;  %7847 = vmatpush.msrb.mxu3 %v7726_v56 }
0x10a7   : > { %v7524_v6 = vmul.f32 %v7518_v41, %v7508_v17  ;;  %v7526_v30 = vmul.f32 %v7519_v57, %v7510_v29 }
0x10a8   : > { %v7501_v4 = vmul.f32 0.5, %v7500_v34 }
0x10a9   : > { %v14567_v42 = vadd.f32 %v7534_v13, %v7524_v6  ;;  %v14578_v7 = vadd.f32 %v7535_v12, %v7526_v30 }
0x10aa   : > { %v7502_v11 = vsub.f32 1.5, %v7501_v4  ;;  %v7705_v4 = vld [vmem:[%s14872_s6 + $0x310] sm:$0xff] }
0x10ab   : > { %8612 = vmatmul.msk.f32.vlgmr.msra.gmra.mxu1 %vm2035_vm9, %v14567_v42  ;;  %7779 = vmatpush.msrb.mxu0 %v7705_v4 }
0x10ac   : > { %v7503_v43 = vmul.f32 %v9150_v58, %v7502_v11 }
0x10ae   : > { %v7507_v54 = vsel %vm7506_vm10, %v9150_v58, %v7503_v43 }
0x10af   : > { %v7509_v47 = vmul.f32 %v7507_v54, %v14529_v62  ;;  %v7511_v49 = vmul.f32 %v7507_v54, %v14518_v38  ;;  %v7517_v62 = vrot.slane %v7514_v55, 2  ;;  %v7513_v38 = vmul.f32 %v7507_v54, %v14516_v23  ;;  %v7725_v23 = vld [vmem:[%s14873_s7 + $0x250] sm:$0xff] }
0x10b0   : > { %7848 = vmatpush.msrb.mxu3 %v7725_v23 }
0x10b1   : > { %v7525_v9 = vmul.f32 %v7518_v41, %v7509_v47  ;;  %v7527_v10 = vmul.f32 %v7519_v57, %v7511_v49  ;;  %v7520_v39 = vperm.slane %v7517_v62, 0 }
0x10b2   : > { %7849 = vmatpush.msrb.mxu3 %v7724_v63 }
0x10b3   : > { %v14573_v5 = vadd.f32 %v7534_v13, %v7525_v9  ;;  %v14583_v51 = vadd.f32 %v7535_v12, %v7527_v10  ;;  %v7528_v40 = vmul.f32 %v7520_v39, %v7512_v45  ;;  %v7529_v59 = vmul.f32 %v7520_v39, %v7513_v38  ;;  %v9130_v9 = vld [vmem:[%s14873_s7 + $0x280] ss:$0 sm:$0xff] }
0x10b4   : > { %7850 = vmatpush.msrb.mxu3 %v7723_v19  ;;  %v7703_v38 = vld [vmem:[%s14872_s6 + $0x300] sm:$0xff] }
0x10b5   : > { %8613 = vmatmul.msk.f32.gmra.mxu1 %vm2035_vm9, %v14573_v5  ;;  %v14588_v8 = vadd.f32 %v7536_v50, %v7528_v40  ;;  %v14592_v52 = vadd.f32 %v7536_v50, %v7529_v59 }
0x10b6   : > { %7851 = vmatpush.msrb.mxu3 %v7722_v46 }
0x10b8   : > { %7852 = vmatpush.msrb.mxu3 %v7721_v25 }
0x10ba   : > { %7853 = vmatpush.msrb.mxu3 %v7720_v21 }
0x10bc   : > { %7854 = vmatpush.msrb.mxu3 %v7719_v15 }
0x10bd   : > { %8614 = vmatmul.msk.f32.gmra.mxu1 %vm2035_vm9, %v14578_v7 }
0x10be   : > { %7855 = vmatpush.msrb.mxu3 %v7718_v32 }
0x10c0   : > { %7856 = vmatpush.msrb.mxu3 %v7717_v53 }
0x10c2   : > { %7857 = vmatpush.msrb.mxu3 %v7716_v18 }
0x10c4   : > { %7858 = vmatpush.msrb.mxu3 %v7715_v14 }
0x10c5   : > { %8615 = vmatmul.msk.f32.gmra.mxu1 %vm2035_vm9, %v14583_v51 }
0x10c6   : > { %7859 = vmatpush.msrb.mxu3 %v7714_v36 }
0x10c8   : > { %7860 = vmatpush.msrb.mxu3 %v7713_v1 }
0x10ca   : > { %7861 = vmatpush.msrb.mxu3 %v7712_v0 }
0x10cc   : > { %7862 = vmatpush.msrb.mxu3 %v7711_v2 }
0x10cd   : > { %8616 = vmatmul.msk.f32.gmra.mxu1 %vm2035_vm9, %v14588_v8 }
0x10d5   : > { %8617 = vmatmul.msk.f32.gmra.mxu1 %vm2035_vm9, %v14592_v52 }
0x110c   : > { %v7391_v22 = vpop.xlane.xlu2 %7390 }
0x110d   : > { %v7393_v60 = vmul.f32 %v7391_v22, %v14548_v20 }
0x110f   : > { %v7395_v35 = vadd.f32 1e-05, %v7393_v60 }
0x1111   : > { %9151 = vrsqrt.f32 %v7395_v35  ;;  %vm7412_vm12 = vweird.f32 %v7395_v35 }
0x1116   : > { %v7389_v16 = vpop.xlane.xlu1 %7388 }
0x1117   : > { %v9152_v26 = vpop.eup %9151  ;;  %v7392_v55 = vmul.f32 %v7389_v16, %v14548_v20 }
0x1118   : > { %v7407_v31 = vmul.f32 %v9152_v26, %v7395_v35  ;;  %vm7413_vm11 = vweird.f32 %v9152_v26 }
0x1119   : > { %v7394_v58 = vadd.f32 1e-05, %v7392_v55  ;;  %vm7414_vm13 = vmor %vm7412_vm12, %vm7413_vm11 }
0x111a   : > { %v7408_v41 = vmul.f32 %v9152_v26, %v7407_v31 }
0x111b   : > { %9153 = vrsqrt.f32 %v7394_v58  ;;  %vm7402_vm0 = vweird.f32 %v7394_v58 }
0x111c   : > { %v7409_v48 = vmul.f32 0.5, %v7408_v41 }
0x111e   : > { %v7410_v44 = vsub.f32 1.5, %v7409_v48 }
0x1120   : > { %v7411_v34 = vmul.f32 %v9152_v26, %v7410_v44 }
0x1121   : > { %v9154_v28 = vpop.eup %9153 }
0x1122   : > { %v7397_v17 = vmul.f32 %v9154_v28, %v7394_v58  ;;  %vm7403_vm15 = vweird.f32 %v9154_v28  ;;  %v7415_v11 = vsel %vm7414_vm13, %v9152_v26, %v7411_v34 }
0x1123   : > { %vm7404_vm1 = vmor %vm7402_vm0, %vm7403_vm15  ;;  %v7417_v57 = vmul.f32 %v7415_v11, %v14551_v3  ;;  %v7704_v3 = vld [vmem:[%s14872_s6 + $0x308] sm:$0xff]  ;;  %v9225_v11 = vmov 0.0  }
0x1124   : > { %v7398_v13 = vmul.f32 %v9154_v28, %v7397_v17  ;;  %7780 = vmatpush.msrb.mxu0 %v7704_v3 }
0x1125   : > { %v7421_v12 = vmul.f32 %v9130_v9, %v7417_v57 }
0x1126   : > { %v7399_v6 = vmul.f32 0.5, %v7398_v13  ;;  %7781 = vmatpush.msrb.mxu0 %v7703_v38 }
0x1127   : > { %v7425_v39 = vadd.f32 %v9131_v27, %v7421_v12 }
0x1128   : > { %v7400_v20 = vsub.f32 1.5, %v7399_v6  ;;  %v14652_v54 = vpop.f32.mrf.mxu1 }
0x1129   : > { %vm7547_vm3 = vcmp.ge.f32.partialorder %v7425_v39, 0.0  ;;  %v7625_v59 = vmul.f32 %v14652_v54, %v14652_v54  ;;  %v7609_v25 = vmul.f32 %v14652_v54, %v14567_v42 }
0x112a   : > { %v7401_v43 = vmul.f32 %v9154_v28, %v7400_v20 }
0x112b   : > { %v7631_v19 = vsel %vm2035_vm9, %v7625_v59, 0.0  ;;  %v7615_v60 = vsel %vm2035_vm9, %v7609_v25, 0.0 }
0x112c   : > { %v7405_v37 = vsel %vm7404_vm1, %v9154_v28, %v7401_v43 }
0x112d   : > { %v7416_v47 = vmul.f32 %v7405_v37, %v14556_v61  ;;  %v7549_v61 = vmul.f32 0.01, %v7425_v39 }
0x112f   : > { %v7420_v29 = vmul.f32 %v9130_v9, %v7416_v47  ;;  %v7551_v33 = vsel %vm7547_vm3, %v7425_v39, %v7549_v61 }
0x1131   : > { %v7424_v30 = vadd.f32 %v9131_v27, %v7420_v29 }
0x1132   : > { %v14662_v49 = vpop.f32.mrf.mxu1 }
0x1133   : > { %vm7546_vm2 = vcmp.ge.f32.partialorder %v7424_v30, 0.0  ;;  %v7548_v62 = vmul.f32 0.01, %v7424_v30  ;;  %v7626_v14 = vmul.f32 %v14662_v49, %v14662_v49  ;;  %v7610_v31 = vmul.f32 %v14662_v49, %v14573_v5 }
0x1135   : > { %v7550_v10 = vsel %vm7546_vm2, %v7424_v30, %v7548_v62  ;;  %v7636_v24 = vsel %vm2035_vm9, %v7626_v14, 0.0  ;;  %v7620_v13 = vsel %vm2035_vm9, %v7610_v31, 0.0  ;;  %v7687_v14 = vmul.f32 0.01, %v14578_v7 }
0x1136   : > { %7863 = vmatmul.f32.vlgmr.msrb.gmra.mxu3 %v7550_v10 }
0x113a   : > { %v7597_v45 = vpop.f32.mrf.mxu1 }
0x113b   : > { %v7627_v50 = vmul.f32 %v7597_v45, %v7597_v45  ;;  %v7611_v23 = vmul.f32 %v7597_v45, %v14578_v7 }
0x113d   : > { %v7632_v56 = vsel %vm2035_vm9, %v7627_v50, 0.0  ;;  %v7616_v18 = vsel %vm2035_vm9, %v7611_v23, 0.0 }
0x113e   : > { %7866 = vmatmul.f32.gmra.mxu3 %v7551_v33  ;;  %v7633_v21 = vadd.f32 %v7632_v56, %v7631_v19  ;;  %v7617_v35 = vadd.f32 %v7616_v18, %v7615_v60  ;;  %v7685_v33 = vmul.f32 0.01, %v14567_v42 }
0x1142   : > { %v14667_v40 = vpop.f32.mrf.mxu1 }
0x1143   : > { %v7628_v32 = vmul.f32 %v14667_v40, %v14667_v40  ;;  %v7612_v2 = vmul.f32 %v14667_v40, %v14583_v51 }
0x1145   : > { %v7637_v0 = vsel %vm2035_vm9, %v7628_v32, 0.0  ;;  %v7621_v28 = vsel %vm2035_vm9, %v7612_v2, 0.0  ;;  %v7688_v2 = vmul.f32 0.01, %v14583_v51 }
0x1146   : > { %v7638_v58 = vadd.f32 %v7637_v0, %v7636_v24  ;;  %v7622_v4 = vadd.f32 %v7621_v28, %v7620_v13 }
0x114a   : > { %v14676_v63 = vpop.f32.mrf.mxu1 }
0x114b   : > { %v7629_v46 = vmul.f32 %v14676_v63, %v14676_v63  ;;  %v7613_v15 = vmul.f32 %v14676_v63, %v14588_v8 }
0x114d   : > { %v7634_v53 = vsel %vm2035_vm9, %v7629_v46, 0.0  ;;  %v7618_v36 = vsel %vm2035_vm9, %v7613_v15, 0.0 }
0x114e   : > { %v7635_v22 = vadd.f32 %v7634_v53, %v7633_v21  ;;  %v7619_v26 = vadd.f32 %v7618_v36, %v7617_v35 }
0x1150   : > { %v7647_v1 = vadd.f32 1e-06, %v7635_v22  ;;  %vm7641_vm4 = vcmp.ge.f32.partialorder %v7619_v26, 0.0 }
0x1151   : > { %v8618_v43 = vsel %vm7641_vm4, 1.0, %v9225_v11 }
0x1152   : > { %9155 = vrcp.f32 %v7647_v1  ;;  %v7606_v16 = vpop.f32.mrf.mxu1  ;;  %v7659_v9 = vsub.f32 1.0, %v8618_v43  ;;  %v7653_v29 = vmul.f32 %v8618_v43, %v14567_v42  ;;  %v7657_v24 = vmul.f32 %v8618_v43, %v14588_v8 }
0x1153   : > { %v7630_v55 = vmul.f32 %v7606_v16, %v7606_v16  ;;  %v7614_v41 = vmul.f32 %v7606_v16, %v14592_v52 }
0x1155   : > { %v7639_v48 = vsel %vm2035_vm9, %v7630_v55, 0.0  ;;  %v7623_v34 = vsel %vm2035_vm9, %v7614_v41, 0.0 }
0x1156   : > { %v7640_v44 = vadd.f32 %v7639_v48, %v7638_v58  ;;  %v7624_v47 = vadd.f32 %v7623_v34, %v7622_v4  ;;  %v7689_v58 = vmul.f32 0.01, %v14588_v8  ;;  %v7729_v34 = vld [vmem:[%s14873_s7 + $0x270] sm:$0xff]  ;;  %v7727_v4 = vld [vmem:[%s14873_s7 + $0x260] sm:$0xff] }
0x1158   : > { %v9156_v17 = vpop.eup %9155  ;;  %v7648_v6 = vadd.f32 1e-06, %v7640_v44  ;;  %vm7642_vm5 = vcmp.ge.f32.partialorder %v7624_v47, 0.0 }
0x1159   : > { %v7651_v20 = vmul.f32 %v9156_v17, %v7619_v26  ;;  %v8619_v39 = vsel %vm7642_vm5, 1.0, %v9225_v11 }
0x115a   : > { %9157 = vrcp.f32 %v7648_v6  ;;  %v7660_v50 = vsub.f32 1.0, %v8619_v39  ;;  %v7654_v56 = vmul.f32 %v8619_v39, %v14573_v5  ;;  %v7658_v41 = vmul.f32 %v8619_v39, %v14592_v52 }
0x115b   : > { %v7661_v37 = vmul.f32 %v7651_v20, %v14652_v54  ;;  %v7663_v10 = vmul.f32 %v7651_v20, %v7597_v45  ;;  %v7665_v53 = vmul.f32 %v7651_v20, %v14676_v63 }
0x115d   : > { %v7667_v57 = vsub.f32 %v14567_v42, %v7661_v37  ;;  %v7669_v59 = vsub.f32 %v14578_v7, %v7663_v10  ;;  %v7655_v42 = vmul.f32 %v8618_v43, %v14578_v7  ;;  %v7671_v60 = vsub.f32 %v14588_v8, %v7665_v53  ;;  %v7730_v8 = vld [vmem:[%s14873_s7 + $0x278] sm:$0xff] }
0x115e   : > { %7882 = vmatpush.msrb.mxu2 %v7730_v8 }
0x115f   : > { %v7673_v27 = vmul.f32 %v7667_v57, %v7659_v9  ;;  %v7675_v46 = vmul.f32 %v7669_v59, %v7659_v9  ;;  %v7677_v0 = vmul.f32 %v7671_v60, %v7659_v9 }
0x1160   : > { %v9158_v30 = vpop.eup %9157  ;;  %7883 = vmatpush.msrb.mxu2 %v7729_v34 }
0x1161   : > { %v7652_v12 = vmul.f32 %v9158_v30, %v7624_v47  ;;  %v7679_v62 = vadd.f32 %v7673_v27, %v7653_v29  ;;  %v7681_v15 = vadd.f32 %v7675_v46, %v7655_v42  ;;  %v7683_v55 = vadd.f32 %v7677_v0, %v7657_v24  ;;  %v7745_v24 = vld [vmem:[%s14872_s6 + $0x3b0] sm:$0xff] }
0x1163   : > { %v7662_v61 = vmul.f32 %v7652_v12, %v14662_v49  ;;  %v7691_v3 = vmul.f32 0.99, %v7679_v62  ;;  %v7664_v19 = vmul.f32 %v7652_v12, %v14667_v40  ;;  %v7686_v49 = vmul.f32 0.01, %v14573_v5  ;;  %v7709_v62 = vld [vmem:[%s14872_s6 + $0x330] sm:$0xff] }
0x1164   : > { %v7693_v18 = vmul.f32 0.99, %v7681_v15  ;;  %v7656_v40 = vmul.f32 %v8619_v39, %v14583_v51  ;;  %v7666_v1 = vmul.f32 %v7652_v12, %v7606_v16  ;;  %v7695_v31 = vmul.f32 0.99, %v7683_v55  ;;  %v7710_v12 = vld [vmem:[%s14872_s6 + $0x338] sm:$0xff] }
0x1165   : > { %v7697_v54 = vadd.f32 %v7691_v3, %v7685_v33  ;;  %v7668_v38 = vsub.f32 %v14573_v5, %v7662_v61  ;;  %v7670_v32 = vsub.f32 %v14583_v51, %v7664_v19  ;;  %v7690_v51 = vmul.f32 0.01, %v14592_v52  ;;  %v7708_v61 = vld [vmem:[%s14872_s6 + $0x328] sm:$0xff]  ;;  %v7707_v3 = vld [vmem:[%s14872_s6 + $0x320] sm:$0xff]  ;;  %v7742_v55 = vld [vmem:[%s14872_s6 + $0x398] sm:$0xff] }
0x1166   : > { %v7699_v5 = vadd.f32 %v7693_v18, %v7687_v14  ;;  %v7672_v63 = vsub.f32 %v14592_v52, %v7666_v1  ;;  %v7701_v48 = vadd.f32 %v7695_v31, %v7689_v58  ;;  %v7728_v52 = vld [vmem:[%s14873_s7 + $0x268] sm:$0xff]  ;;  %v7739_v58 = vld [vmem:[%s14872_s6 + $0x380] sm:$0xff] }
0x1167   : > { %8620 = vmatmul.msk.f32.vlgmr.msrb.gmra.mxu0 %vm2035_vm9, %v7697_v54  ;;  %v7674_v23 = vmul.f32 %v7668_v38, %v7660_v50  ;;  %v7676_v22 = vmul.f32 %v7670_v32, %v7660_v50  ;;  %7884 = vmatpush.msrb.mxu2 %v7728_v52  ;;  %v7740_v31 = vld [vmem:[%s14872_s6 + $0x388] sm:$0xff] }
0x1168   : > { %v7678_v7 = vmul.f32 %v7672_v63, %v7660_v50  ;;  %v7744_v63 = vld [vmem:[%s14872_s6 + $0x3a8] sm:$0xff] }
0x1169   : > { %v7680_v45 = vadd.f32 %v7674_v23, %v7654_v56  ;;  %v7682_v36 = vadd.f32 %v7676_v22, %v7656_v40  ;;  %7885 = vmatpush.msrb.mxu2 %v7727_v4 }
0x116a   : > { %v7684_v16 = vadd.f32 %v7678_v7, %v7658_v41  ;;  %v7741_v7 = vld [vmem:[%s14872_s6 + $0x390] sm:$0xff]  ;;  %v7738_v41 = vld [vmem:[%s14872_s6 + $0x378] sm:$0xff] }
0x116b   : > { %v7692_v25 = vmul.f32 0.99, %v7680_v45  ;;  %v7694_v35 = vmul.f32 0.99, %v7682_v36  ;;  %7923 = vmatpush.msra.mxu2 %v7710_v12 }
0x116c   : > { %v7696_v28 = vmul.f32 0.99, %v7684_v16  ;;  %v7736_v16 = vld [vmem:[%s14872_s6 + $0x368] sm:$0xff] }
0x116d   : > { %v7698_v21 = vadd.f32 %v7692_v25, %v7686_v49  ;;  %v7700_v26 = vadd.f32 %v7694_v35, %v7688_v2  ;;  %7924 = vmatpush.msra.mxu2 %v7709_v62  ;;  %v7746_v2 = vld [vmem:[%s14872_s6 + $0x3b8] sm:$0xff] }
0x116e   : > { %v7702_v44 = vadd.f32 %v7696_v28, %v7690_v51  ;;  %7947 = vmatpush.msra.mxu3 %v7746_v2  ;;  %v7735_v28 = vld [vmem:[%s14872_s6 + $0x360] sm:$0xff]  ;;  %v7734_v51 = vld [vmem:[%s14872_s6 + $0x358] sm:$0xff] }
0x116f   : > { %8621 = vmatmul.msk.f32.gmra.mxu0 %vm2035_vm9, %v7698_v21  ;;  %7925 = vmatpush.msra.mxu2 %v7708_v61 }
0x1170   : > { %7948 = vmatpush.msra.mxu3 %v7745_v24 }
0x1171   : > { %7926 = vmatpush.msra.mxu2 %v7707_v3 }
0x1172   : > { %7949 = vmatpush.msra.mxu3 %v7744_v63 }
0x1177   : > { %8622 = vmatmul.msk.f32.gmra.mxu0 %vm2035_vm9, %v7699_v5 }
0x117f   : > { %8623 = vmatmul.msk.f32.gmra.mxu0 %vm2035_vm9, %v7700_v26  ;;  %v7743_v26 = vld [vmem:[%s14872_s6 + $0x3a0] sm:$0xff] }
0x1180   : > { %7950 = vmatpush.msra.mxu3 %v7743_v26 }
0x1182   : > { %7951 = vmatpush.msra.mxu3 %v7742_v55 }
0x1184   : > { %7952 = vmatpush.msra.mxu3 %v7741_v7 }
0x1186   : > { %7953 = vmatpush.msra.mxu3 %v7740_v31 }
0x1187   : > { %8624 = vmatmul.msk.f32.gmra.mxu0 %vm2035_vm9, %v7701_v48  ;;  %v7737_v48 = vld [vmem:[%s14872_s6 + $0x370] sm:$0xff] }
0x1188   : > { %7954 = vmatpush.msra.mxu3 %v7739_v58 }
0x118a   : > { %7955 = vmatpush.msra.mxu3 %v7738_v41 }
0x118c   : > { %7956 = vmatpush.msra.mxu3 %v7737_v48 }
0x118e   : > { %7957 = vmatpush.msra.mxu3 %v7736_v16 }
0x118f   : > { %8625 = vmatmul.msk.f32.gmra.mxu0 %vm2035_vm9, %v7702_v44  ;;  %v7733_v44 = vld [vmem:[%s14872_s6 + $0x350] sm:$0xff] }
0x1190   : > { %7958 = vmatpush.msra.mxu3 %v7735_v28 }
0x1192   : > { %7959 = vmatpush.msra.mxu3 %v7734_v51 }
0x1194   : > { %7960 = vmatpush.msra.mxu3 %v7733_v44 }
0x11b9   : > { %v7864_v8 = vpop.f32.mrf.mxu3 }
0x11e4   : > { %v14732_v17 = vpop.f32.mrf.mxu0 }
0x11e5   : > { %v7801_v43 = vmul.f32 %v14732_v17, %v14732_v17 }
0x11e7   : > { %v7807_v9 = vsel %vm2035_vm9, %v7801_v43, 0.0 }
0x11ec   : > { %v14734_v13 = vpop.f32.mrf.mxu0 }
0x11ed   : > { %v7802_v39 = vmul.f32 %v14734_v13, %v14734_v13 }
0x11ef   : > { %v7812_v54 = vsel %vm2035_vm9, %v7802_v39, 0.0 }
0x11f4   : > { %v14745_v6 = vpop.f32.mrf.mxu0 }
0x11f5   : > { %v7803_v11 = vmul.f32 %v14745_v6, %v14745_v6 }
0x11f7   : > { %v7808_v37 = vsel %vm2035_vm9, %v7803_v11, 0.0 }
0x11f8   : > { %v7809_v29 = vadd.f32 %v7808_v37, %v7807_v9  ;;  %v9132_v37 = vld [vmem:[%s14872_s6 + $0x3c0] ss:$0 sm:$0xff] }
0x11fc   : > { %v14750_v20 = vpop.f32.mrf.mxu0 }
0x11fd   : > { %v7804_v27 = vmul.f32 %v14750_v20, %v14750_v20 }
0x11ff   : > { %v7813_v33 = vsel %vm2035_vm9, %v7804_v27, 0.0 }
0x1200   : > { %v7814_v59 = vadd.f32 %v7813_v33, %v7812_v54 }
0x1204   : > { %v14757_v47 = vpop.f32.mrf.mxu0 }
0x1205   : > { %v7805_v57 = vmul.f32 %v14757_v47, %v14757_v47 }
0x1207   : > { %v7810_v30 = vsel %vm2035_vm9, %v7805_v57, 0.0 }
0x1208   : > { %v7811_v10 = vadd.f32 %v7810_v30, %v7809_v29 }
0x120a   : > { %9159 = vrsqrt.f32 %v7811_v10  ;;  %vm7824_vm6 = vcmp.eq.f32.partialorder %v7811_v10, inf  ;;  %v7827_v18 = vand.u32 2147483648, %v7811_v10  ;;  %vm7826_vm8 = vcmp.eq.f32.partialorder %v7811_v10, 0.0 }
0x120c   : > { %v14780_v50 = vpop.f32.mrf.mxu0 }
0x120d   : > { %v7806_v38 = vmul.f32 %v14780_v50, %v14780_v50 }
0x120f   : > { %v7815_v56 = vsel %vm2035_vm9, %v7806_v38, 0.0 }
0x1210   : > { %v9160_v23 = vpop.eup %9159  ;;  %v7816_v19 = vadd.f32 %v7815_v56, %v7814_v59 }
0x1211   : > { %v7818_v45 = vmul.f32 %v9160_v23, %v7811_v10 }
0x1212   : > { %9161 = vrsqrt.f32 %v7816_v19  ;;  %vm7836_vm10 = vcmp.eq.f32.partialorder %v7816_v19, inf  ;;  %v7839_v1 = vand.u32 2147483648, %v7816_v19  ;;  %vm7838_vm11 = vcmp.eq.f32.partialorder %v7816_v19, 0.0 }
0x1213   : > { %v7819_v46 = vmul.f32 %v9160_v23, %v7818_v45 }
0x1215   : > { %v7820_v49 = vmul.f32 0.5, %v7819_v46 }
0x1217   : > { %v7821_v25 = vsub.f32 1.5, %v7820_v49 }
0x1218   : > { %v9162_v42 = vpop.eup %9161 }
0x1219   : > { %v7822_v21 = vmul.f32 %v9160_v23, %v7821_v25  ;;  %v7830_v15 = vmul.f32 %v9162_v42, %v7816_v19 }
0x121b   : > { %v7823_v32 = vmul.f32 %v7822_v21, %v7811_v10  ;;  %v7831_v53 = vmul.f32 %v9162_v42, %v7830_v15 }
0x121d   : > { %v7825_v22 = vsel %vm7824_vm6, %v7811_v10, %v7823_v32  ;;  %v7832_v14 = vmul.f32 0.5, %v7831_v53 }
0x121e   : > { %v7828_v40 = vsel %vm7826_vm8, %v7827_v18, %v7825_v22 }
0x121f   : > { %8626 = vmatmul.msk.f32.vlgmr.msrb.gmra.mxu2 %vm2035_vm9, %v7828_v40  ;;  %v7833_v60 = vsub.f32 1.5, %v7832_v14 }
0x1221   : > { %v7834_v5 = vmul.f32 %v9162_v42, %v7833_v60 }
0x1223   : > { %v7835_v36 = vmul.f32 %v7834_v5, %v7816_v19 }
0x1225   : > { %v7837_v35 = vsel %vm7836_vm10, %v7816_v19, %v7835_v36 }
0x1226   : > { %v7840_v0 = vsel %vm7838_vm11, %v7839_v1, %v7837_v35 }
0x1227   : > { %8627 = vmatmul.msk.f32.gmra.mxu2 %vm2035_vm9, %v7840_v0 }
0x122f   : > { %8628 = vmatmul.msk.f32.vlgmr.msra.gmra.mxu2 %vm2035_vm9, %v14732_v17  ;;  %v7732_v17 = vld [vmem:[%s14872_s6 + $0x348] sm:$0xff] }
0x1230   : > { %7961 = vmatpush.msra.mxu3 %v7732_v17 }
0x1237   : > { %8629 = vmatmul.msk.f32.gmra.mxu2 %vm2035_vm9, %v14734_v13  ;;  %v7731_v13 = vld [vmem:[%s14872_s6 + $0x340] sm:$0xff] }
0x1238   : > { %7962 = vmatpush.msra.mxu3 %v7731_v13 }
0x123f   : > { %8630 = vmatmul.msk.f32.gmra.mxu2 %vm2035_vm9, %v14745_v6  ;;  %v7867_v6 = vpop.f32.mrf.mxu3 }
0x1247   : > { %8631 = vmatmul.msk.f32.gmra.mxu2 %vm2035_vm9, %v14750_v20 }
0x124f   : > { %8632 = vmatmul.msk.f32.gmra.mxu2 %vm2035_vm9, %v14757_v47 }
0x1257   : > { %8633 = vmatmul.msk.f32.gmra.mxu2 %vm2035_vm9, %v14780_v50 }
0x12a2   : > { %v7887_v34 = vpop.f32.mrf.mxu2 }
0x12a3   : > { %v7888_v52 = vadd.f32 %v7887_v34, %v7864_v8 }
0x12a5   : > { %8010 = vst [vmem:[#allocation4] sm:$0xff] %v7888_v52  ;;  %7963 = vmatmul.f32.vlgmr.msra.gmra.mxu3 %v7888_v52 }
0x12aa   : > { %v7890_v4 = vpop.f32.mrf.mxu2 }
0x12ab   : > { %v7891_v20 = vadd.f32 %v7890_v4, %v7867_v6 }
0x12ad   : > { %8012 = vst [vmem:[#allocation4 + $0x10] sm:$0xff] %v7891_v20  ;;  %7966 = vmatmul.f32.gmra.mxu3 %v7891_v20 }
0x12b2   : > { %v7928_v11 = vpop.f32.mrf.mxu2 }
0x12ba   : > { %v7931_v43 = vpop.f32.mrf.mxu2 }
0x12c2   : > { %v7934_v57 = vpop.f32.mrf.mxu2 }
0x12ca   : > { %v7937_v39 = vpop.f32.mrf.mxu2 }
0x12d2   : > { %v7940_v54 = vpop.f32.mrf.mxu2 }
0x12da   : > { %v7943_v46 = vpop.f32.mrf.mxu2 }
0x1328   : > { %v7964_v47 = vpop.f32.mrf.mxu3 }
0x1329   : > { %v7965_v9 = vadd.f32 %v9132_v37, %v7964_v47 }
0x132b   : > { %v8634_v29 = vclamps-f32 %v7965_v9, 30.0 }
0x132d   : > { %v7974_v27 = vsub.f32 0.0, %v8634_v29 }
0x132f   : > { %v7976_v30 = vmul.f32 1.442695, %v7974_v27 }
0x1330   : > { %v7967_v12 = vpop.f32.mrf.mxu3 }
0x1331   : > { %9163 = vpow2.f32 %v7976_v30  ;;  %v7968_v62 = vadd.f32 %v9132_v37, %v7967_v12 }
0x1333   : > { %v8635_v10 = vclamps-f32 %v7968_v62, 30.0 }
0x1335   : > { %v7975_v61 = vsub.f32 0.0, %v8635_v10 }
0x1337   : > { %v9164_v33 = vpop.eup %9163  ;;  %v7978_v3 = vmul.f32 1.442695, %v7975_v61 }
0x1338   : > { %v7980_v50 = vadd.f32 1.0, %v9164_v33 }
0x1339   : > { %9165 = vpow2.f32 %v7978_v3 }
0x133a   : > { %9167 = vrcp.f32 %v7980_v50 }
0x133f   : > { %v9166_v38 = vpop.eup %9165 }
0x1340   : > { %v9168_v59 = vpop.eup %9167  ;;  %v7981_v56 = vadd.f32 1.0, %v9166_v38 }
0x1341   : > { %v7988_v23 = vmul.f32 %v9168_v59, %v7940_v54  ;;  %v7986_v19 = vmul.f32 %v9168_v59, %v7934_v57  ;;  %v7984_v42 = vmul.f32 %v9168_v59, %v7928_v11 }
0x1342   : > { %9169 = vrcp.f32 %v7981_v56 }
0x1343   : > { %8000 = vrot.lane.b32.xlu2 %v7988_v23, %s9223_s13  ;;  %7992 = vrot.lane.b32.xlu0 %v7986_v19, %s9226_s16 }
0x1348   : > { %v9170_v45 = vpop.eup %9169 }
0x1349   : > { %v7989_v49 = vmul.f32 %v9170_v45, %v7943_v46  ;;  %v7987_v25 = vmul.f32 %v9170_v45, %v7937_v39  ;;  %v7985_v18 = vmul.f32 %v9170_v45, %v7931_v43 }
0x134b   : > { %8002 = vrot.lane.b32.xlu0 %v7989_v49, %s9223_s13  ;;  %7994 = vrot.lane.b32.xlu1 %v7987_v25, %s9226_s16 }
0x139d   : > { %v8001_v15 = vpop.permute.xlu2 %8000 }
0x13b5   : > { %v7993_v21 = vpop.permute.xlu0 %7992 }
0x13b6   : > { %v8006_v32 = vsel %vm2035_vm9, %v7984_v42, %v7993_v21 }
0x13b7   : > { %v8008_v53 = vsel %vm2741_vm7, %v8006_v32, %v8001_v15 }
0x13b8   : > { %8011 = vst.msk [vmem:[#allocation4 + $0x8] sm:$0xff] %vm7042_vm14, %v8008_v53 }
0x13bd   : > { %v8003_v22 = vpop.permute.xlu0 %8002  ;;  %v7995_v14 = vpop.permute.xlu1 %7994 }
0x13be   : > { %v8007_v40 = vsel %vm2035_vm9, %v7985_v18, %v7995_v14 }
0x13bf   : > { %v8009_v60 = vsel %vm2741_vm7, %v8007_v40, %v8003_v22 }
0x13c0   : > { %8013 = vst.msk [vmem:[#allocation4 + $0x18] sm:$0xff] %vm7042_vm14, %v8009_v60 }
0x13c1 PF: > { %p8652_p7 = scmp.eq.s32.totalorder %s9286_s10, 1  ;;  %s9227_s13 = smov [#allocation4]  }
0x13c2   : > { %s8019_s17 = sshll.u32 %s9227_s13, 4  ;;  %s8021_s19 = sshll.u32 %s14875_s9, 4  ;;  %s8020_s17 = int_to_ptr.vmem [resolvable:$true] %s8019_s17  ;;  %s8022_s19 = int_to_ptr.hbm [resolvable:$true] %s8021_s19 }
0x13c3   : > { %s9228_s20 = smov 256   ;;  %s9229_s14 = smov 16  }
0x13c4   : > { %8649 = dma.vmem_to_hbm [thread:$0]  (%p8652_p7), %s8020_s17, 512, %s8022_s19, [#allocation5], %s9228_s20, %s9228_s20, %s9229_s14  }
0x13c5   : > { %9204 = dma.done.wait (%p8652_p7), [#allocation5], 512  }
0x13c6   : > { %9206 = vsyncadd (%p8652_p7), [#allocation5], 4294966784 }
0x13c7 PF: > { %s20_s30 = sadd.s32 1, %s9209_s30  }
0x13c8   : > { %p17_p8 = scmp.ge.s32.totalorder %s20_s30, 4  }
0x13ca   :  { %19 = sbr.rel (!%p17_p8) target bundleno = 1 (0x1), region = 101 }
0x13cf   :  { %8038 = vsyncpa [#allocation5], 1 }
0x13d0   :  { %8040 = vsyncpa [#allocation5 + $0x1], 1 }

</bundles_post_ra>
